<compile_context>
chip_gen: v5e
topology: v5e:2x2
jax: 0.10.0
libtpu: 0.0.40
codegen_flags: <defaults>
</compile_context>

<pallas_src>
import jax
import jax.numpy as jnp
from jax.experimental import pallas as pl
from jax.experimental.pallas import tpu as pltpu

BN_EPS = 1e-5
_KS = 5             # SPPF cascade: pool9 = pool5∘pool5, pool13 = pool5∘pool5∘pool5
_PAD = _KS // 2


def _silu_kernel(y):
    # exp and approximate reciprocal both issue on the EUP slot.
    return y * pl.reciprocal(1.0 + jnp.exp(-y), approx=True)


def _silu_ref(y):
    return y * (1.0 / (1.0 + jnp.exp(-y)))


# ----------------------------------------------------------------------------
# Fused kernel: conv1 -> SPPF cascade -> conv2, one batch element per grid step
# ----------------------------------------------------------------------------
def _spp_fused_kernel(x_ref, w1_ref, b1_ref, w2_ref, b2_ref, o_ref,
                      pad_ref, cat_ref):
    H, W, Cout = o_ref.shape[1], o_ref.shape[2], o_ref.shape[3]
    Cin = x_ref.shape[3]
    Ch = w1_ref.shape[1]
    M = H * W
    P = _PAD

    # ---- conv1: in-kernel bf16 cast, MXU matmul with f32 accumulation -------
    x = x_ref[...].reshape(M, Cin).astype(jnp.bfloat16)
    y1 = jnp.dot(x, w1_ref[...], preferred_element_type=jnp.float32) + b1_ref[...]
    h = _silu_kernel(y1).astype(jnp.bfloat16)                     # (M, Ch)

    # Branch 0 of the (VMEM-only) concat + input of the first pool stage.
    cat_ref[:, 0:Ch] = h
    pad_ref[...] = jnp.full(pad_ref.shape, -jnp.inf, pad_ref.dtype)
    pad_ref[P:P + H, P:P + W, :] = h.reshape(H, W, Ch)

    # ---- SPPF cascade: three ks=5, stride=1, "same" max pools ---------------
    # Separable max: 5 row maxes via per-offset ref reads (leading-dim slices,
    # no relayout, running max only), then 5 column maxes on the H-reduced
    # (H, W+4, Ch) value (unaligned sublane shifts only on the small extent).
    for stage in range(1, 4):                                     # p5, p9, p13
        r = pad_ref[0:H, :, :]
        for dy in range(1, _KS):
            r = jnp.maximum(r, pad_ref[dy:dy + H, :, :])
        out = r[:, 0:W, :]
        for dx in range(1, _KS):
            out = jnp.maximum(out, r[:, dx:dx + W, :])
        cat_ref[:, stage * Ch:(stage + 1) * Ch] = out.reshape(M, Ch)
        if stage < 3:                                             # feed next stage
            pad_ref[P:P + H, P:P + W, :] = out

    # ---- conv2 over the concat: one wide K = 4*Ch dot (fills the 256-deep MXU
    # on v6e/v7x; on v5e four K=128 dots would match the 128x128 MXU exactly).
    y2 = jnp.dot(cat_ref[...], w2_ref[...],
                 preferred_element_type=jnp.float32) + b2_ref[...]
    o_ref[...] = _silu_kernel(y2).reshape(1, H, W, Cout).astype(o_ref.dtype)


# ----------------------------------------------------------------------------
# Wrapper
# ----------------------------------------------------------------------------
def spp_bottleneck_forward(x_nchw, params):
    N, Cin, H, W = x_nchw.shape
    Ch = params["conv1"]["w"].shape[1]
    Cout = params["conv2"]["w"].shape[1]

    # NCHW -> NHWC so channels sit on the 128-wide lane dimension.
    # TODO(synk): keep activations NHWC end-to-end in the surrounding model to
    # drop these two transpose passes (each is a full HBM read+write).
    x = jnp.transpose(x_nchw, (0, 2, 3, 1))

    w1 = params["conv1"]["w"].astype(jnp.bfloat16)
    b1 = params["conv1"]["bias"].reshape(1, Ch).astype(jnp.float32)
    w2 = params["conv2"]["w"].astype(jnp.bfloat16)
    b2 = params["conv2"]["bias"].reshape(1, Cout).astype(jnp.float32)

    # TODO(synk): for production-size feature maps, add an H-band grid axis with
    # a (ks-1)-row halo so the per-step working set stays small on v7x (32 MiB
    # scoped VMEM) and both TensorCores get work even when N == 1.
    out = pl.pallas_call(
        _spp_fused_kernel,
        out_shape=jax.ShapeDtypeStruct((N, H, W, Cout), jnp.float32),
        grid=(N,),
        in_specs=[
            pl.BlockSpec((1, H, W, Cin), lambda n: (n, 0, 0, 0)),
            pl.BlockSpec((Cin, Ch), lambda n: (0, 0)),
            pl.BlockSpec((1, Ch), lambda n: (0, 0)),
            pl.BlockSpec((4 * Ch, Cout), lambda n: (0, 0)),
            pl.BlockSpec((1, Cout), lambda n: (0, 0)),
        ],
        out_specs=pl.BlockSpec((1, H, W, Cout), lambda n: (n, 0, 0, 0)),
        scratch_shapes=[
            pltpu.VMEM((H + 2 * _PAD, W + 2 * _PAD, Ch), jnp.bfloat16),  # padded pool buf
            pltpu.VMEM((H * W, 4 * Ch), jnp.bfloat16),                   # concat buf
        ],
        compiler_params=pltpu.CompilerParams(
            dimension_semantics=("parallel",)),
    )(x, w1, b1, w2, b2)

    return jnp.transpose(out, (0, 3, 1, 2))                       # back to NCHW


# ----------------------------------------------------------------------------
# Parameters (deterministic, synthetic; eval-mode BN folded into the weights)
# ----------------------------------------------------------------------------
def _init_conv_bn(key, cin, cout):
    """1x1 Conv2d(no bias) + BatchNorm folded: y = x @ w_folded + bias."""
    kw, kg, kb, km, kv = jax.random.split(key, 5)
    w = jax.random.normal(kw, (cin, cout), jnp.float32) * (cin ** -0.5)
    gamma = jax.random.uniform(kg, (cout,), jnp.float32, 0.5, 1.5)
    beta = jax.random.normal(kb, (cout,), jnp.float32) * 0.1
    mean = jax.random.normal(km, (cout,), jnp.float32) * 0.1
    var = jax.random.uniform(kv, (cout,), jnp.float32, 0.5, 1.5)
    scale = gamma / jnp.sqrt(var + BN_EPS)
    return {"w": w * scale[None, :],            # BN scale folded into the weights
            "bias": beta - mean * scale}


# ----------------------------------------------------------------------------
# Pure-JAX reference (independent 5/9/13 pools, explicit concat), with the same
# bf16 quantization points as the kernel path.
# ----------------------------------------------------------------------------
def _maxpool_ref(t, ks):
    N, H, W, C = t.shape
    p = ks // 2
    tp = jnp.pad(t, ((0, 0), (p, p), (p, p), (0, 0)), constant_values=-jnp.inf)
    out = None
    for dy in range(ks):
        for dx in range(ks):
            win = tp[:, dy:dy + H, dx:dx + W, :]
            out = win if out is None else jnp.maximum(out, win)
    return out


def spp_bottleneck_ref(x_nchw, params):
    N, Cin, H, W = x_nchw.shape
    Ch = params["conv1"]["w"].shape[1]
    x = jnp.transpose(x_nchw, (0, 2, 3, 1)).astype(jnp.bfloat16)

    y = jnp.dot(x.reshape(-1, Cin), params["conv1"]["w"].astype(jnp.bfloat16),
                preferred_element_type=jnp.float32) + params["conv1"]["bias"]
    h = _silu_ref(y).astype(jnp.bfloat16).reshape(N, H, W, Ch)

    cat = jnp.concatenate([h, _maxpool_ref(h, 5), _maxpool_ref(h, 9),
                           _maxpool_ref(h, 13)], axis=-1)
    y2 = jnp.dot(cat.reshape(N * H * W, 4 * Ch),
                 params["conv2"]["w"].astype(jnp.bfloat16),
                 preferred_element_type=jnp.float32) + params["conv2"]["bias"]
    out = _silu_ref(y2).astype(jnp.float32).reshape(N, H, W, -1)
    return jnp.transpose(out, (0, 3, 1, 2))


# ----------------------------------------------------------------------------
if __name__ == "__main__":
    key = jax.random.PRNGKey(0)
    k_x, k_c1, k_c2 = jax.random.split(key, 3)

    # Small config consistent with a YOLOX dark5 SPP: in=256, hidden=128, out=256.
    N, Cin, H, W = 2, 256, 16, 16
    Cout = 256
    Ch = Cin // 2

    params = {"conv1": _init_conv_bn(k_c1, Cin, Ch),
              "conv2": _init_conv_bn(k_c2, 4 * Ch, Cout)}
    x = jax.random.normal(k_x, (N, Cin, H, W), jnp.float32)

    out = jax.block_until_ready(spp_bottleneck_forward(x, params))
    ref = jax.block_until_ready(spp_bottleneck_ref(x, params))

    assert out.shape == (N, Cout, H, W), out.shape
    assert bool(jnp.all(jnp.isfinite(out)))
    err = float(jnp.max(jnp.abs(out - ref)))
    tol = 0.05 * float(jnp.max(jnp.abs(ref))) + 1e-3
    assert err < tol, (err, tol)
    print("KERNEL_OK")
</pallas_src>

<mosaic_0001>
module attributes {stable_mosaic.version = 11 : i64} {
  func.func @_spp_fused_kernel(%arg0: i32, %arg1: memref<1x16x16x256xf32, #tpu.memory_space<vmem>>, %arg2: memref<256x128xbf16, #tpu.memory_space<vmem>>, %arg3: memref<1x128xf32, #tpu.memory_space<vmem>>, %arg4: memref<512x256xbf16, #tpu.memory_space<vmem>>, %arg5: memref<1x256xf32, #tpu.memory_space<vmem>>, %arg6: memref<1x16x16x256xf32, #tpu.memory_space<vmem>>, %arg7: memref<20x20x128xbf16, #tpu.memory_space<vmem>>, %arg8: memref<256x512xbf16, #tpu.memory_space<vmem>>) attributes {dimension_semantics = [#tpu.dimension_semantics<parallel>], iteration_bounds = array<i64: 2>, scalar_prefetch = 0 : i64, scratch_operands = 2 : i64, tpu.core_type = #tpu.core_type<tc>, window_params = [{transform_indices = @transform_0, window_bounds = array<i64: 1, 16, 16, 256>}, {pipeline_mode = #tpu.pipeline_mode<synchronous>, transform_indices = @transform_1, window_bounds = array<i64: 256, 128>}, {pipeline_mode = #tpu.pipeline_mode<synchronous>, transform_indices = @transform_2, window_bounds = array<i64: 1, 128>}, {pipeline_mode = #tpu.pipeline_mode<synchronous>, transform_indices = @transform_3, window_bounds = array<i64: 512, 256>}, {pipeline_mode = #tpu.pipeline_mode<synchronous>, transform_indices = @transform_4, window_bounds = array<i64: 1, 256>}, {transform_indices = @transform_5, window_bounds = array<i64: 1, 16, 16, 256>}]} {
    %c0 = arith.constant 0 : index
    %c0_0 = arith.constant 0 : index
    %c0_1 = arith.constant 0 : index
    %c0_2 = arith.constant 0 : index
    %0 = vector.load %arg1[%c0, %c0_0, %c0_1, %c0_2] : memref<1x16x16x256xf32, #tpu.memory_space<vmem>>, vector<1x16x16x256xf32>
    %1 = vector.shape_cast %0 : vector<1x16x16x256xf32> to vector<256x256xf32>
    %2 = arith.truncf %1 : vector<256x256xf32> to vector<256x256xbf16>
    %c0_3 = arith.constant 0 : index
    %c0_4 = arith.constant 0 : index
    %3 = vector.load %arg2[%c0_3, %c0_4] : memref<256x128xbf16, #tpu.memory_space<vmem>>, vector<256x128xbf16>
    %cst = arith.constant dense<0.000000e+00> : vector<256x128xf32>
    %4 = tpu.matmul %2, %3, %cst {dimension_numbers = #tpu.dot_dimension_numbers<[1], [0], [0], [1], [0, 0, 1, 1], [], []>} : vector<256x256xbf16>, vector<256x128xbf16>, vector<256x128xf32> -> vector<256x128xf32>
    %c0_5 = arith.constant 0 : index
    %c0_6 = arith.constant 0 : index
    %5 = vector.load %arg3[%c0_5, %c0_6] : memref<1x128xf32, #tpu.memory_space<vmem>>, vector<1x128xf32>
    %6 = vector.broadcast %5 : vector<1x128xf32> to vector<256x128xf32>
    %7 = arith.addf %4, %6 : vector<256x128xf32>
    %cst_7 = arith.constant 0.000000e+00 : f32
    %8 = vector.broadcast %cst_7 : f32 to vector<256x128xf32>
    %9 = arith.subf %8, %7 : vector<256x128xf32>
    %10 = math.exp %9 : vector<256x128xf32>
    %cst_8 = arith.constant 1.000000e+00 : f32
    %11 = vector.broadcast %cst_8 : f32 to vector<256x128xf32>
    %12 = arith.addf %11, %10 : vector<256x128xf32>
    %13 = tpu.reciprocal %12 {approx = true} : vector<256x128xf32> -> vector<256x128xf32>
    %14 = arith.mulf %7, %13 : vector<256x128xf32>
    %15 = arith.truncf %14 : vector<256x128xf32> to vector<256x128xbf16>
    %c0_9 = arith.constant 0 : index
    %c0_10 = arith.constant 0 : index
    %16 = vector.load %arg8[%c0_9, %c0_10] : memref<256x512xbf16, #tpu.memory_space<vmem>>, vector<256x128xbf16>
    tpu.vector_store %arg8[%c0_9, %c0_10], %15 {strides = array<i32>} : memref<256x512xbf16, #tpu.memory_space<vmem>>, vector<256x128xbf16>,
    %cst_11 = arith.constant 0xFF80 : bf16
    %17 = vector.broadcast %cst_11 : bf16 to vector<20x20x128xbf16>
    %c0_12 = arith.constant 0 : index
    %c0_13 = arith.constant 0 : index
    %c0_14 = arith.constant 0 : index
    %18 = vector.load %arg7[%c0_12, %c0_13, %c0_14] : memref<20x20x128xbf16, #tpu.memory_space<vmem>>, vector<20x20x128xbf16>
    tpu.vector_store %arg7[%c0_12, %c0_13, %c0_14], %17 {strides = array<i32>} : memref<20x20x128xbf16, #tpu.memory_space<vmem>>, vector<20x20x128xbf16>,
    %19 = vector.shape_cast %15 : vector<256x128xbf16> to vector<16x16x128xbf16>
    %c2 = arith.constant 2 : index
    %c2_15 = arith.constant 2 : index
    %c0_16 = arith.constant 0 : index
    %20 = vector.load %arg7[%c2, %c2_15, %c0_16] : memref<20x20x128xbf16, #tpu.memory_space<vmem>>, vector<16x16x128xbf16>
    tpu.vector_store %arg7[%c2, %c2_15, %c0_16], %19 {strides = array<i32>} : memref<20x20x128xbf16, #tpu.memory_space<vmem>>, vector<16x16x128xbf16>,
    %c0_17 = arith.constant 0 : index
    %c0_18 = arith.constant 0 : index
    %c0_19 = arith.constant 0 : index
    %21 = vector.load %arg7[%c0_17, %c0_18, %c0_19] : memref<20x20x128xbf16, #tpu.memory_space<vmem>>, vector<16x20x128xbf16>
    %c1 = arith.constant 1 : index
    %c0_20 = arith.constant 0 : index
    %c0_21 = arith.constant 0 : index
    %22 = vector.load %arg7[%c1, %c0_20, %c0_21] : memref<20x20x128xbf16, #tpu.memory_space<vmem>>, vector<16x20x128xbf16>
    %23 = arith.maximumf %21, %22 : vector<16x20x128xbf16>
    %c2_22 = arith.constant 2 : index
    %c0_23 = arith.constant 0 : index
    %c0_24 = arith.constant 0 : index
    %24 = vector.load %arg7[%c2_22, %c0_23, %c0_24] : memref<20x20x128xbf16, #tpu.memory_space<vmem>>, vector<16x20x128xbf16>
    %25 = arith.maximumf %23, %24 : vector<16x20x128xbf16>
    %c3 = arith.constant 3 : index
    %c0_25 = arith.constant 0 : index
    %c0_26 = arith.constant 0 : index
    %26 = vector.load %arg7[%c3, %c0_25, %c0_26] : memref<20x20x128xbf16, #tpu.memory_space<vmem>>, vector<16x20x128xbf16>
    %27 = arith.maximumf %25, %26 : vector<16x20x128xbf16>
    %c4 = arith.constant 4 : index
    %c0_27 = arith.constant 0 : index
    %c0_28 = arith.constant 0 : index
    %28 = vector.load %arg7[%c4, %c0_27, %c0_28] : memref<20x20x128xbf16, #tpu.memory_space<vmem>>, vector<16x20x128xbf16>
    %29 = arith.maximumf %27, %28 : vector<16x20x128xbf16>
    %30 = vector.extract_strided_slice %29 {offsets = [0, 0, 0], sizes = [16, 16, 128], strides = [1, 1, 1]} : vector<16x20x128xbf16> to vector<16x16x128xbf16>
    %31 = vector.extract_strided_slice %29 {offsets = [0, 1, 0], sizes = [16, 16, 128], strides = [1, 1, 1]} : vector<16x20x128xbf16> to vector<16x16x128xbf16>
    %32 = arith.maximumf %30, %31 : vector<16x16x128xbf16>
    %33 = vector.extract_strided_slice %29 {offsets = [0, 2, 0], sizes = [16, 16, 128], strides = [1, 1, 1]} : vector<16x20x128xbf16> to vector<16x16x128xbf16>
    %34 = arith.maximumf %32, %33 : vector<16x16x128xbf16>
    %35 = vector.extract_strided_slice %29 {offsets = [0, 3, 0], sizes = [16, 16, 128], strides = [1, 1, 1]} : vector<16x20x128xbf16> to vector<16x16x128xbf16>
    %36 = arith.maximumf %34, %35 : vector<16x16x128xbf16>
    %37 = vector.extract_strided_slice %29 {offsets = [0, 4, 0], sizes = [16, 16, 128], strides = [1, 1, 1]} : vector<16x20x128xbf16> to vector<16x16x128xbf16>
    %38 = arith.maximumf %36, %37 : vector<16x16x128xbf16>
    %39 = vector.shape_cast %38 : vector<16x16x128xbf16> to vector<256x128xbf16>
    %c0_29 = arith.constant 0 : index
    %c128 = arith.constant 128 : index
    %40 = vector.load %arg8[%c0_29, %c128] : memref<256x512xbf16, #tpu.memory_space<vmem>>, vector<256x128xbf16>
    tpu.vector_store %arg8[%c0_29, %c128], %39 {strides = array<i32>} : memref<256x512xbf16, #tpu.memory_space<vmem>>, vector<256x128xbf16>,
    %c2_30 = arith.constant 2 : index
    %c2_31 = arith.constant 2 : index
    %c0_32 = arith.constant 0 : index
    %41 = vector.load %arg7[%c2_30, %c2_31, %c0_32] : memref<20x20x128xbf16, #tpu.memory_space<vmem>>, vector<16x16x128xbf16>
    tpu.vector_store %arg7[%c2_30, %c2_31, %c0_32], %38 {strides = array<i32>} : memref<20x20x128xbf16, #tpu.memory_space<vmem>>, vector<16x16x128xbf16>,
    %c0_33 = arith.constant 0 : index
    %c0_34 = arith.constant 0 : index
    %c0_35 = arith.constant 0 : index
    %42 = vector.load %arg7[%c0_33, %c0_34, %c0_35] : memref<20x20x128xbf16, #tpu.memory_space<vmem>>, vector<16x20x128xbf16>
    %c1_36 = arith.constant 1 : index
    %c0_37 = arith.constant 0 : index
    %c0_38 = arith.constant 0 : index
    %43 = vector.load %arg7[%c1_36, %c0_37, %c0_38] : memref<20x20x128xbf16, #tpu.memory_space<vmem>>, vector<16x20x128xbf16>
    %44 = arith.maximumf %42, %43 : vector<16x20x128xbf16>
    %c2_39 = arith.constant 2 : index
    %c0_40 = arith.constant 0 : index
    %c0_41 = arith.constant 0 : index
    %45 = vector.load %arg7[%c2_39, %c0_40, %c0_41] : memref<20x20x128xbf16, #tpu.memory_space<vmem>>, vector<16x20x128xbf16>
    %46 = arith.maximumf %44, %45 : vector<16x20x128xbf16>
    %c3_42 = arith.constant 3 : index
    %c0_43 = arith.constant 0 : index
    %c0_44 = arith.constant 0 : index
    %47 = vector.load %arg7[%c3_42, %c0_43, %c0_44] : memref<20x20x128xbf16, #tpu.memory_space<vmem>>, vector<16x20x128xbf16>
    %48 = arith.maximumf %46, %47 : vector<16x20x128xbf16>
    %c4_45 = arith.constant 4 : index
    %c0_46 = arith.constant 0 : index
    %c0_47 = arith.constant 0 : index
    %49 = vector.load %arg7[%c4_45, %c0_46, %c0_47] : memref<20x20x128xbf16, #tpu.memory_space<vmem>>, vector<16x20x128xbf16>
    %50 = arith.maximumf %48, %49 : vector<16x20x128xbf16>
    %51 = vector.extract_strided_slice %50 {offsets = [0, 0, 0], sizes = [16, 16, 128], strides = [1, 1, 1]} : vector<16x20x128xbf16> to vector<16x16x128xbf16>
    %52 = vector.extract_strided_slice %50 {offsets = [0, 1, 0], sizes = [16, 16, 128], strides = [1, 1, 1]} : vector<16x20x128xbf16> to vector<16x16x128xbf16>
    %53 = arith.maximumf %51, %52 : vector<16x16x128xbf16>
    %54 = vector.extract_strided_slice %50 {offsets = [0, 2, 0], sizes = [16, 16, 128], strides = [1, 1, 1]} : vector<16x20x128xbf16> to vector<16x16x128xbf16>
    %55 = arith.maximumf %53, %54 : vector<16x16x128xbf16>
    %56 = vector.extract_strided_slice %50 {offsets = [0, 3, 0], sizes = [16, 16, 128], strides = [1, 1, 1]} : vector<16x20x128xbf16> to vector<16x16x128xbf16>
    %57 = arith.maximumf %55, %56 : vector<16x16x128xbf16>
    %58 = vector.extract_strided_slice %50 {offsets = [0, 4, 0], sizes = [16, 16, 128], strides = [1, 1, 1]} : vector<16x20x128xbf16> to vector<16x16x128xbf16>
    %59 = arith.maximumf %57, %58 : vector<16x16x128xbf16>
    %60 = vector.shape_cast %59 : vector<16x16x128xbf16> to vector<256x128xbf16>
    %c0_48 = arith.constant 0 : index
    %c256 = arith.constant 256 : index
    %61 = vector.load %arg8[%c0_48, %c256] : memref<256x512xbf16, #tpu.memory_space<vmem>>, vector<256x128xbf16>
    tpu.vector_store %arg8[%c0_48, %c256], %60 {strides = array<i32>} : memref<256x512xbf16, #tpu.memory_space<vmem>>, vector<256x128xbf16>,
    %c2_49 = arith.constant 2 : index
    %c2_50 = arith.constant 2 : index
    %c0_51 = arith.constant 0 : index
    %62 = vector.load %arg7[%c2_49, %c2_50, %c0_51] : memref<20x20x128xbf16, #tpu.memory_space<vmem>>, vector<16x16x128xbf16>
    tpu.vector_store %arg7[%c2_49, %c2_50, %c0_51], %59 {strides = array<i32>} : memref<20x20x128xbf16, #tpu.memory_space<vmem>>, vector<16x16x128xbf16>,
    %c0_52 = arith.constant 0 : index
    %c0_53 = arith.constant 0 : index
    %c0_54 = arith.constant 0 : index
    %63 = vector.load %arg7[%c0_52, %c0_53, %c0_54] : memref<20x20x128xbf16, #tpu.memory_space<vmem>>, vector<16x20x128xbf16>
    %c1_55 = arith.constant 1 : index
    %c0_56 = arith.constant 0 : index
    %c0_57 = arith.constant 0 : index
    %64 = vector.load %arg7[%c1_55, %c0_56, %c0_57] : memref<20x20x128xbf16, #tpu.memory_space<vmem>>, vector<16x20x128xbf16>
    %65 = arith.maximumf %63, %64 : vector<16x20x128xbf16>
    %c2_58 = arith.constant 2 : index
    %c0_59 = arith.constant 0 : index
    %c0_60 = arith.constant 0 : index
    %66 = vector.load %arg7[%c2_58, %c0_59, %c0_60] : memref<20x20x128xbf16, #tpu.memory_space<vmem>>, vector<16x20x128xbf16>
    %67 = arith.maximumf %65, %66 : vector<16x20x128xbf16>
    %c3_61 = arith.constant 3 : index
    %c0_62 = arith.constant 0 : index
    %c0_63 = arith.constant 0 : index
    %68 = vector.load %arg7[%c3_61, %c0_62, %c0_63] : memref<20x20x128xbf16, #tpu.memory_space<vmem>>, vector<16x20x128xbf16>
    %69 = arith.maximumf %67, %68 : vector<16x20x128xbf16>
    %c4_64 = arith.constant 4 : index
    %c0_65 = arith.constant 0 : index
    %c0_66 = arith.constant 0 : index
    %70 = vector.load %arg7[%c4_64, %c0_65, %c0_66] : memref<20x20x128xbf16, #tpu.memory_space<vmem>>, vector<16x20x128xbf16>
    %71 = arith.maximumf %69, %70 : vector<16x20x128xbf16>
    %72 = vector.extract_strided_slice %71 {offsets = [0, 0, 0], sizes = [16, 16, 128], strides = [1, 1, 1]} : vector<16x20x128xbf16> to vector<16x16x128xbf16>
    %73 = vector.extract_strided_slice %71 {offsets = [0, 1, 0], sizes = [16, 16, 128], strides = [1, 1, 1]} : vector<16x20x128xbf16> to vector<16x16x128xbf16>
    %74 = arith.maximumf %72, %73 : vector<16x16x128xbf16>
    %75 = vector.extract_strided_slice %71 {offsets = [0, 2, 0], sizes = [16, 16, 128], strides = [1, 1, 1]} : vector<16x20x128xbf16> to vector<16x16x128xbf16>
    %76 = arith.maximumf %74, %75 : vector<16x16x128xbf16>
    %77 = vector.extract_strided_slice %71 {offsets = [0, 3, 0], sizes = [16, 16, 128], strides = [1, 1, 1]} : vector<16x20x128xbf16> to vector<16x16x128xbf16>
    %78 = arith.maximumf %76, %77 : vector<16x16x128xbf16>
    %79 = vector.extract_strided_slice %71 {offsets = [0, 4, 0], sizes = [16, 16, 128], strides = [1, 1, 1]} : vector<16x20x128xbf16> to vector<16x16x128xbf16>
    %80 = arith.maximumf %78, %79 : vector<16x16x128xbf16>
    %81 = vector.shape_cast %80 : vector<16x16x128xbf16> to vector<256x128xbf16>
    %c0_67 = arith.constant 0 : index
    %c384 = arith.constant 384 : index
    %82 = vector.load %arg8[%c0_67, %c384] : memref<256x512xbf16, #tpu.memory_space<vmem>>, vector<256x128xbf16>
    tpu.vector_store %arg8[%c0_67, %c384], %81 {strides = array<i32>} : memref<256x512xbf16, #tpu.memory_space<vmem>>, vector<256x128xbf16>,
    %c0_68 = arith.constant 0 : index
    %c0_69 = arith.constant 0 : index
    %83 = vector.load %arg8[%c0_68, %c0_69] : memref<256x512xbf16, #tpu.memory_space<vmem>>, vector<256x512xbf16>
    %c0_70 = arith.constant 0 : index
    %c0_71 = arith.constant 0 : index
    %84 = vector.load %arg4[%c0_70, %c0_71] : memref<512x256xbf16, #tpu.memory_space<vmem>>, vector<512x256xbf16>
    %cst_72 = arith.constant dense<0.000000e+00> : vector<256x256xf32>
    %85 = tpu.matmul %83, %84, %cst_72 {dimension_numbers = #tpu.dot_dimension_numbers<[1], [0], [0], [1], [0, 0, 1, 1], [], []>} : vector<256x512xbf16>, vector<512x256xbf16>, vector<256x256xf32> -> vector<256x256xf32>
    %c0_73 = arith.constant 0 : index
    %c0_74 = arith.constant 0 : index
    %86 = vector.load %arg5[%c0_73, %c0_74] : memref<1x256xf32, #tpu.memory_space<vmem>>, vector<1x256xf32>
    %87 = vector.broadcast %86 : vector<1x256xf32> to vector<256x256xf32>
    %88 = arith.addf %85, %87 : vector<256x256xf32>
    %cst_75 = arith.constant 0.000000e+00 : f32
    %89 = vector.broadcast %cst_75 : f32 to vector<256x256xf32>
    %90 = arith.subf %89, %88 : vector<256x256xf32>
    %91 = math.exp %90 : vector<256x256xf32>
    %cst_76 = arith.constant 1.000000e+00 : f32
    %92 = vector.broadcast %cst_76 : f32 to vector<256x256xf32>
    %93 = arith.addf %92, %91 : vector<256x256xf32>
    %94 = tpu.reciprocal %93 {approx = true} : vector<256x256xf32> -> vector<256x256xf32>
    %95 = arith.mulf %88, %94 : vector<256x256xf32>
    %96 = vector.shape_cast %95 : vector<256x256xf32> to vector<1x16x16x256xf32>
    %c0_77 = arith.constant 0 : index
    %c0_78 = arith.constant 0 : index
    %c0_79 = arith.constant 0 : index
    %c0_80 = arith.constant 0 : index
    %97 = vector.load %arg6[%c0_77, %c0_78, %c0_79, %c0_80] : memref<1x16x16x256xf32, #tpu.memory_space<vmem>>, vector<1x16x16x256xf32>
    tpu.vector_store %arg6[%c0_77, %c0_78, %c0_79, %c0_80], %96 {strides = array<i32>} : memref<1x16x16x256xf32, #tpu.memory_space<vmem>>, vector<1x16x16x256xf32>,
    return
  }
  func.func @transform_0(%arg0: i32) -> (i32, i32, i32, i32) {
    %c0_i32 = arith.constant 0 : i32
    %c0_i32_0 = arith.constant 0 : i32
    %c0_i32_1 = arith.constant 0 : i32
    %c0_i32_2 = arith.constant 0 : i32
    return %arg0, %c0_i32, %c0_i32_0, %c0_i32_1 : i32, i32, i32, i32
  }
  func.func @transform_1(%arg0: i32) -> (i32, i32) {
    %c0_i32 = arith.constant 0 : i32
    %c0_i32_0 = arith.constant 0 : i32
    %c0_i32_1 = arith.constant 0 : i32
    return %c0_i32, %c0_i32_0 : i32, i32
  }
  func.func @transform_2(%arg0: i32) -> (i32, i32) {
    %c0_i32 = arith.constant 0 : i32
    %c0_i32_0 = arith.constant 0 : i32
    %c0_i32_1 = arith.constant 0 : i32
    return %c0_i32, %c0_i32_0 : i32, i32
  }
  func.func @transform_3(%arg0: i32) -> (i32, i32) {
    %c0_i32 = arith.constant 0 : i32
    %c0_i32_0 = arith.constant 0 : i32
    %c0_i32_1 = arith.constant 0 : i32
    return %c0_i32, %c0_i32_0 : i32, i32
  }
  func.func @transform_4(%arg0: i32) -> (i32, i32) {
    %c0_i32 = arith.constant 0 : i32
    %c0_i32_0 = arith.constant 0 : i32
    %c0_i32_1 = arith.constant 0 : i32
    return %c0_i32, %c0_i32_0 : i32, i32
  }
  func.func @transform_5(%arg0: i32) -> (i32, i32, i32, i32) {
    %c0_i32 = arith.constant 0 : i32
    %c0_i32_0 = arith.constant 0 : i32
    %c0_i32_1 = arith.constant 0 : i32
    %c0_i32_2 = arith.constant 0 : i32
    return %arg0, %c0_i32, %c0_i32_0, %c0_i32_1 : i32, i32, i32, i32
  }
}

</mosaic_0001>

<bundles_post_ra>
// kernel: tpu_custom_call.1
= control target key start
LH: loop header
LB: loop body
LE: loop exit
PB: predicated region body
PF: predicated region fallthrough
CT: control target
= control target key end

     0   :  { %10 = vsyncpa [#allocation5], 0  ;;  %s15140_s0 = inlined_call_operand.hbm [shape: f32[2,16,16,256], index: 0, kind: input, shape index: {}]   ;;  %s15141_s1 = inlined_call_operand.hbm [shape: bf16[256,128], index: 1, kind: input, shape index: {}]   ;;  %s15142_s2 = inlined_call_operand.vmem [shape: f32[1,128], index: 2, kind: input, shape index: {}]   ;;  %s15143_s3 = inlined_call_operand.hbm [shape: bf16[512,256], index: 3, kind: input, shape index: {}]   ;;  %s15144_s4 = inlined_call_operand.vmem [shape: f32[1,256], index: 4, kind: input, shape index: {}]   ;;  %s15145_s5 = inlined_call_operand.hbm [shape: f32[2,16,16,256], index: 5, kind: output, shape index: {}]  }
   0x1   :  { %12 = vsyncpa [#allocation5 + $0x1], 0 }
   0x2   :  { %13 = vsyncpa [#allocation8], 0 }
   0x3   :  { %14 = vsyncpa [#allocation6], 0 }
   0x4   :  { %16 = vsyncpa [#allocation6 + $0x1], 0  ;;  %s11501_s18 = smov 0   ;;  %s11503_s19 = smov 0  }
   0x5   :  { %s11505_s20 = smov 0   ;;  %s11507_s21 = smov 0  }
   0x6 LB: > { %s11522_s22 = sadd.s32 4294967295, %s11458_s21   ;;  %s9486_s23 = sadd.s32 4294967294, %s11458_s21   ;;  %s11458_s21 = sphi %s11507_s21, %s15656_s21   ;;  %s11454_s20 = sphi %s11505_s20, %s15655_s20   ;;  %s11450_s19 = sphi %s11503_s19, %s15654_s19   ;;  %s11446_s18 = sphi %s11501_s18, %s15653_s18  }
   0x7   : > { %p42_p0 = scmp.ne.s32.totalorder %s11450_s19, %s11446_s18  ;;  %p43_p1 = scmp.eq.s32.totalorder %s11522_s22, 0 }
   0x8   : > { %p150_p2 = scmp.eq.s32.totalorder %s11522_s22, 1  ;;  %p156_p3 = scmp.eq.s32.totalorder %s9486_s23, 1 }
   0x9   : > { %p11531_p4 = por %p43_p1, %p42_p0  ;;  %p9487_p5 = scmp.ge.s32.totalorder %s11458_s21, 1 }
   0xa   : > { %p11536_p6 = por %p156_p3, %p42_p0  ;;  %p163_p7 = scmp.lt.s32.totalorder %s11458_s21, 3 }
   0xb   : > { %s174_s28 = sshll.u32 %s15141_s1, 4  ;;  %s11460_s30 = smov [#allocation7]   ;;  %s175_s28 = int_to_ptr.hbm [resolvable:$true] %s174_s28 }
   0xc   : > { %p11544_p8 = pnand %p9487_p5, %p163_p7  ;;  %s176_s6 = sshll.u32 %s11460_s30, 4  ;;  %s177_s6 = int_to_ptr.vmem [resolvable:$true] %s176_s6 }
   0xd   : > { %s191_s9 = sshll.u32 %s15143_s3, 4  ;;  %s11461_s10 = smov 64   ;;  %s192_s9 = int_to_ptr.hbm [resolvable:$true] %s191_s9 }
   0xe   : > { %p10845_p9 = pneg %p11544_p8  ;;  %s11462_s11 = smov 4  }
   0xf   : > { %s11463_s12 = smov [#allocation9]   ;;  %s11464_s14 = smov 128  }
  0x10   : > { %p10846_p10 = pnand %p10845_p9, %p43_p1  ;;  %s193_s13 = sshll.u32 %s11463_s12, 4  ;;  %s194_s13 = int_to_ptr.vmem [resolvable:$true] %s193_s13 }
  0x11   : > { %s11465_s15 = smov 8   ;;  %s11557_s16 = sadd.s32 1, %s11458_s21  }
  0x12   : > { %10848 = dma.hbm_to_vmem [thread:$0]  (!%p10846_p10), %s175_s28, 2048, %s177_s6, [#allocation8], %s11461_s10, %s11461_s10, %s11462_s11  }
  0x13   : > { %10851 = dma.hbm_to_vmem [thread:$0]  (!%p10846_p10), %s192_s9, 8192, %s194_s13, [#allocation8], %s11464_s14, %s11464_s14, %s11465_s15  }
  0x14   : > { %s26_s17 = ssub.s32 %s11458_s21, %s11557_s16  ;;  %s29_s23 = sadd.s32 1, %s11454_s20 }
  0x15   : > { %p27_p12 = scmp.eq.s32.totalorder %s26_s17, 0  ;;  %p36_p13 = scmp.ne.s32.totalorder %s11454_s20, %s11450_s19 }
  0x16   : > { %p37_p0 = scmp.eq.s32.totalorder %s11458_s21, 0  ;;  %p10862_p7 = scmp.lt.s32.totalorder %s11458_s21, 2 }
  0x17   : > { %s11566_s26 = scalar_select %p27_p12, %s11454_s20, %s29_s23  }
  0x18   : > { %p38_p3 = por %p37_p0, %p36_p13  ;;  %p11570_p5 = por %p150_p2, %p36_p13 }
  0x19   : > { %s210_s28 = sand.u32 1, %s11454_s20   ;;  %s10080_s6 = sshll.u32 %s11458_s21, 9 }
  0x1a   : > { %s9491_s30 = sshll.u32 %s210_s28, 9  ;;  %s219_s9 = scalar_lea.hbm %s15140_s0, %s10080_s6 }
  0x1b   : > { %s214_s10 = scalar_lea.vmem [#allocation4], %s9491_s30  ;;  %s220_s12 = sshll.u32 %s219_s9, 4  ;;  %s221_s12 = int_to_ptr.hbm [resolvable:$true] %s220_s12 }
  0x1c   : > { %s222_s11 = sshll.u32 %s214_s10, 4  ;;  %p11580_p9 = pnand %p10862_p7, %p38_p3  ;;  %s223_s11 = int_to_ptr.vmem [resolvable:$true] %s222_s11 }
  0x1d   : > { %s211_s14 = scalar_lea.sflag [#allocation5], %s210_s28  ;;  %s11358_s15 = sshra.s32 %s221_s12, 4  ;;  %s11359_s15 = int_to_ptr.hbm [resolvable:$true] %s11358_s15 }
  0x1e   : > { %s11360_s17 = scalar_lea.hbm %s11359_s15, 512  ;;  %p11362_p10 = pneg %p11580_p9 }
  0x1f   : > { %p11361_p2 = scmp.ne.s32.totalorder %s11359_s15, %s11360_s17  ;;  %s11365_s6 = scalar_lea.hbm %s15140_s0, 1024 }
  0x20   : > { %p11366_p0 = scmp.lt.s32.totalorder %s11359_s15, %s15140_s0  ;;  %p11367_p3 = scmp.lt.s32.totalorder %s11365_s6, %s11360_s17 }
  0x21   : > { %p11363_p12 = pnand %p11362_p10, %p11361_p2 }
  0x22   : > { %p11368_p7 = por %p11367_p3, %p11366_p0 }
  0x23   : > { %p11364_p13 = pneg %p11363_p12 }
  0x25   : > { %p11369_p11 = pnand %p11368_p7, %p11364_p13 }
  0x27   : > { %11372 = shalt.err (!%p11369_p11)
}
  0x28   : > { %s11466_s28 = smov 256   ;;  %s11467_s9 = smov 16  }
  0x29   : > { %10855 = dma.hbm_to_vmem [thread:$0]  (!%p11580_p9), %s221_s12, 8192, %s223_s11, %s211_s14, %s11466_s28, %s11466_s28, %s11467_s9  }
  0x2a   : > { %234 = sbr.rel (%p11544_p8) target bundleno = 1560 (0x618), region = 40 }
  0x2f   : > { %s11597_s10 = sand.u32 1, %s11450_s19  }
  0x30   : > { %s9495_s15 = sshll.u32 %s11597_s10, 9  ;;  %s237_s17 = scalar_lea.sflag [#allocation5], %s11597_s10 }
  0x31   : > { %s11603_s23 = scalar_lea.vmem [#allocation4], %s9495_s15 }
  0x32   : > { %11433 = dma.done.wait (%p11531_p4), %s237_s17, 8192  }
  0x33   : > { %11435 = vsyncadd (%p11531_p4), %s237_s17, 4294959104 }
  0x34   : > { %11437 = dma.done.wait (%p43_p1), [#allocation8], 10240  }
  0x35   : > { %11439 = vsyncadd (%p43_p1), [#allocation8], 4294957056  ;;  %v10088_v0 = vld [vmem:[#allocation7 + $0x38] sm:$0xff]  ;;  %v10087_v2 = vld [vmem:[#allocation7 + $0x30] sm:$0xff]  ;;  %vm1033_vm0 = vcmask 1040384   ;;  %vm1034_vm1 = vcmask 1044484  }
  0x36   : > { %v10096_v1 = vld [vmem:[#allocation7 + $0x78] sm:$0xff]  ;;  %507 = vmatpush.bf16.msra.mxu0 %v10088_v0  ;;  %10817 = vmatpush.bf16.msra.mxu2 %v10088_v0  ;;  %v10095_v3 = vld [vmem:[#allocation7 + $0x70] sm:$0xff]  ;;  %v10086_v4 = vld [vmem:[#allocation7 + $0x28] sm:$0xff]  ;;  %vm2320_vm3 = vcmask 1046528   ;;  %vm2529_vm4 = vcmask 1045504   ;;  %vm2738_vm5 = vcmask 1044480  }
  0x37   : > { %596 = vmatpush.bf16.msra.mxu1 %v10096_v1  ;;  %10825 = vmatpush.bf16.msra.mxu3 %v10096_v1  ;;  %v10094_v5 = vld [vmem:[#allocation7 + $0x68] sm:$0xff]  ;;  %v10085_v6 = vld [vmem:[#allocation7 + $0x20] sm:$0xff]  ;;  %v10084_v8 = vld [vmem:[#allocation7 + $0x18] sm:$0xff]  ;;  %vm2947_vm6 = vcmask 1043456   ;;  %s14180_s7 = scalar_lea.vmem [#allocation10], %s9495_s15  ;;  %s10225_s9 = sshll.u32 %s11522_s22, 9 }
  0x38   : > { %v10093_v7 = vld [vmem:[#allocation7 + $0x60] sm:$0xff]  ;;  %v10092_v9 = vld [vmem:[#allocation7 + $0x58] sm:$0xff]  ;;  %v10083_v10 = vld [vmem:[#allocation7 + $0x10] sm:$0xff]  ;;  %s9391_s24 = sshll.u32 %s14180_s7, 4  ;;  %s9379_s11 = scalar_lea.sflag [#allocation6], %s11597_s10  ;;  %s9392_s24 = int_to_ptr.vmem [resolvable:$true] %s9391_s24 }
  0x39   : > { %v10091_v11 = vld [vmem:[#allocation7 + $0x50] sm:$0xff]  ;;  %v10082_v12 = vld [vmem:[#allocation7 + $0x8] sm:$0xff]  ;;  %v10081_v14 = vld [vmem:[#allocation7] sm:$0xff]  ;;  %s11408_s30 = scalar_lea.hbm %s15145_s5, 1024 }
  0x3a   : > { %508 = vmatpush.bf16.msra.mxu0 %v10087_v2  ;;  %10818 = vmatpush.bf16.msra.mxu2 %v10087_v2  ;;  %v10090_v13 = vld [vmem:[#allocation7 + $0x48] sm:$0xff]  ;;  %v10089_v15 = vld [vmem:[#allocation7 + $0x40] sm:$0xff]  ;;  %v281_v17 = vld [vmem:[%s11603_s23 + $0x10] sm:$0xff] }
  0x3b   : > { %597 = vmatpush.bf16.msra.mxu1 %v10095_v3  ;;  %10826 = vmatpush.bf16.msra.mxu3 %v10095_v3  ;;  %v279_v16 = vld [vmem:[%s11603_s23] sm:$0xff]  ;;  %v313_v19 = vld [vmem:[%s11603_s23 + $0x110] sm:$0xff]  ;;  %v280_v20 = vld [vmem:[%s11603_s23 + $0x8] sm:$0xff] }
  0x3c   : > { %v311_v18 = vld [vmem:[%s11603_s23 + $0x100] sm:$0xff]  ;;  %v282_v21 = vld [vmem:[%s11603_s23 + $0x18] sm:$0xff]  ;;  %v312_v22 = vld [vmem:[%s11603_s23 + $0x108] sm:$0xff]  ;;  %v343_v24 = vpack.c.bf16 %v281_v17, %v279_v16 }
  0x3d   : > { %v314_v23 = vld [vmem:[%s11603_s23 + $0x118] sm:$0xff]  ;;  %v359_v25 = vpack.c.bf16 %v313_v19, %v311_v18  ;;  %v344_v26 = vpack.c.bf16 %v282_v21, %v280_v20  ;;  %v283_v28 = vld [vmem:[%s11603_s23 + $0x20] sm:$0xff]  ;;  %v285_v29 = vld [vmem:[%s11603_s23 + $0x30] sm:$0xff] }
  0x3e   : > { %509 = vmatpush.bf16.msra.mxu0 %v10086_v4  ;;  %10819 = vmatpush.bf16.msra.mxu2 %v10086_v4  ;;  %v360_v27 = vpack.c.bf16 %v314_v23, %v312_v22  ;;  %v315_v30 = vld [vmem:[%s11603_s23 + $0x120] sm:$0xff]  ;;  %v317_v31 = vld [vmem:[%s11603_s23 + $0x130] sm:$0xff]  ;;  %v284_v32 = vld [vmem:[%s11603_s23 + $0x28] sm:$0xff]  ;;  %v345_v36 = vpack.c.bf16 %v285_v29, %v283_v28 }
  0x3f   : > { %598 = vmatpush.bf16.msra.mxu1 %v10094_v5  ;;  %10827 = vmatpush.bf16.msra.mxu3 %v10094_v5  ;;  %v286_v33 = vld [vmem:[%s11603_s23 + $0x38] sm:$0xff]  ;;  %v316_v34 = vld [vmem:[%s11603_s23 + $0x128] sm:$0xff]  ;;  %v361_v37 = vpack.c.bf16 %v317_v31, %v315_v30  ;;  %v287_v40 = vld [vmem:[%s11603_s23 + $0x40] sm:$0xff] }
  0x40   : > { %v318_v35 = vld [vmem:[%s11603_s23 + $0x138] sm:$0xff]  ;;  %v346_v38 = vpack.c.bf16 %v286_v33, %v284_v32  ;;  %v289_v41 = vld [vmem:[%s11603_s23 + $0x50] sm:$0xff]  ;;  %v319_v42 = vld [vmem:[%s11603_s23 + $0x140] sm:$0xff] }
  0x41   : > { %v362_v39 = vpack.c.bf16 %v318_v35, %v316_v34  ;;  %v321_v43 = vld [vmem:[%s11603_s23 + $0x150] sm:$0xff]  ;;  %v288_v44 = vld [vmem:[%s11603_s23 + $0x48] sm:$0xff]  ;;  %v290_v45 = vld [vmem:[%s11603_s23 + $0x58] sm:$0xff]  ;;  %v347_v48 = vpack.c.bf16 %v289_v41, %v287_v40 }
  0x42   : > { %510 = vmatpush.bf16.msra.mxu0 %v10085_v6  ;;  %10820 = vmatpush.bf16.msra.mxu2 %v10085_v6  ;;  %v320_v46 = vld [vmem:[%s11603_s23 + $0x148] sm:$0xff]  ;;  %v322_v47 = vld [vmem:[%s11603_s23 + $0x158] sm:$0xff]  ;;  %v363_v49 = vpack.c.bf16 %v321_v43, %v319_v42  ;;  %v348_v50 = vpack.c.bf16 %v290_v45, %v288_v44  ;;  %v291_v52 = vld [vmem:[%s11603_s23 + $0x60] sm:$0xff] }
  0x43   : > { %599 = vmatpush.bf16.msra.mxu1 %v10093_v7  ;;  %10828 = vmatpush.bf16.msra.mxu3 %v10093_v7  ;;  %v364_v51 = vpack.c.bf16 %v322_v47, %v320_v46  ;;  %v293_v53 = vld [vmem:[%s11603_s23 + $0x70] sm:$0xff]  ;;  %v323_v54 = vld [vmem:[%s11603_s23 + $0x160] sm:$0xff]  ;;  %v292_v56 = vld [vmem:[%s11603_s23 + $0x68] sm:$0xff] }
  0x44   : > { %v325_v55 = vld [vmem:[%s11603_s23 + $0x170] sm:$0xff]  ;;  %v294_v57 = vld [vmem:[%s11603_s23 + $0x78] sm:$0xff]  ;;  %v324_v58 = vld [vmem:[%s11603_s23 + $0x168] sm:$0xff]  ;;  %v349_v60 = vpack.c.bf16 %v293_v53, %v291_v52 }
  0x45   : > { %v326_v59 = vld [vmem:[%s11603_s23 + $0x178] sm:$0xff]  ;;  %v365_v61 = vpack.c.bf16 %v325_v55, %v323_v54  ;;  %v350_v62 = vpack.c.bf16 %v294_v57, %v292_v56  ;;  %v295_v0 = vld [vmem:[%s11603_s23 + $0x80] sm:$0xff]  ;;  %v297_v1 = vld [vmem:[%s11603_s23 + $0x90] sm:$0xff] }
  0x46   : > { %511 = vmatpush.bf16.msra.mxu0 %v10084_v8  ;;  %10821 = vmatpush.bf16.msra.mxu2 %v10084_v8  ;;  %v366_v63 = vpack.c.bf16 %v326_v59, %v324_v58  ;;  %v327_v2 = vld [vmem:[%s11603_s23 + $0x180] sm:$0xff]  ;;  %v329_v3 = vld [vmem:[%s11603_s23 + $0x190] sm:$0xff]  ;;  %v296_v4 = vld [vmem:[%s11603_s23 + $0x88] sm:$0xff]  ;;  %v351_v8 = vpack.c.bf16 %v297_v1, %v295_v0 }
  0x47   : > { %600 = vmatpush.bf16.msra.mxu1 %v10092_v9  ;;  %10829 = vmatpush.bf16.msra.mxu3 %v10092_v9  ;;  %v298_v5 = vld [vmem:[%s11603_s23 + $0x98] sm:$0xff]  ;;  %v328_v6 = vld [vmem:[%s11603_s23 + $0x188] sm:$0xff]  ;;  %v367_v9 = vpack.c.bf16 %v329_v3, %v327_v2  ;;  %v9877_v54 = vld [vmem:[#allocation9 + $0x70] sm:$0xf] }
  0x48   : > { %v330_v7 = vld [vmem:[%s11603_s23 + $0x198] sm:$0xff]  ;;  %v300_v16 = vld [vmem:[%s11603_s23 + $0xa8] sm:$0xff]  ;;  %v9861_v3 = vld [vmem:[#allocation9 + $0x50] sm:$0xf] }
  0x49   : > { %v302_v17 = vld [vmem:[%s11603_s23 + $0xb8] sm:$0xff]  ;;  %v332_v18 = vld [vmem:[%s11603_s23 + $0x1a8] sm:$0xff]  ;;  %vm11801_vm2 = vmor %vm1033_vm0, %vm1034_vm1 }
  0x4a   : > { %512 = vmatpush.bf16.msra.mxu0 %v10083_v10  ;;  %10822 = vmatpush.bf16.msra.mxu2 %v10083_v10  ;;  %v352_v10 = vpack.c.bf16 %v298_v5, %v296_v4  ;;  %v334_v19 = vld [vmem:[%s11603_s23 + $0x1b8] sm:$0xff]  ;;  %v354_v22 = vpack.c.bf16 %v302_v17, %v300_v16  ;;  %v304_v28 = vld [vmem:[%s11603_s23 + $0xc8] sm:$0xff] }
  0x4b   : > { %601 = vmatpush.bf16.msra.mxu1 %v10091_v11  ;;  %10830 = vmatpush.bf16.msra.mxu3 %v10091_v11  ;;  %v368_v11 = vpack.c.bf16 %v330_v7, %v328_v6  ;;  %v370_v23 = vpack.c.bf16 %v334_v19, %v332_v18  ;;  %v306_v29 = vld [vmem:[%s11603_s23 + $0xd8] sm:$0xff]  ;;  %v336_v30 = vld [vmem:[%s11603_s23 + $0x1c8] sm:$0xff]  ;;  %v9845_v18 = vld [vmem:[#allocation9 + $0x30] sm:$0xf] }
  0x4c   : > { %v338_v31 = vld [vmem:[%s11603_s23 + $0x1d8] sm:$0xff]  ;;  %v356_v34 = vpack.c.bf16 %v306_v29, %v304_v28  ;;  %v308_v40 = vld [vmem:[%s11603_s23 + $0xe8] sm:$0xff] }
  0x4d   : > { %v372_v35 = vpack.c.bf16 %v338_v31, %v336_v30  ;;  %v310_v41 = vld [vmem:[%s11603_s23 + $0xf8] sm:$0xff]  ;;  %v340_v42 = vld [vmem:[%s11603_s23 + $0x1e8] sm:$0xff] }
  0x4e   : > { %513 = vmatpush.bf16.msra.mxu0 %v10082_v12  ;;  %10823 = vmatpush.bf16.msra.mxu2 %v10082_v12  ;;  %v299_v12 = vld [vmem:[%s11603_s23 + $0xa0] sm:$0xff]  ;;  %v342_v43 = vld [vmem:[%s11603_s23 + $0x1f8] sm:$0xff]  ;;  %v358_v46 = vpack.c.bf16 %v310_v41, %v308_v40  ;;  %v10166_v30 = vld [vmem:[#allocation9 + $0x24] sm:$0xf0] }
  0x4f   : > { %602 = vmatpush.bf16.msra.mxu1 %v10090_v13  ;;  %10831 = vmatpush.bf16.msra.mxu3 %v10090_v13  ;;  %v301_v13 = vld [vmem:[%s11603_s23 + $0xb0] sm:$0xff]  ;;  %v374_v47 = vpack.c.bf16 %v342_v43, %v340_v42  ;;  %v10176_v55 = vld [vmem:[#allocation9 + $0x74] sm:$0xf0] }
  0x50   : > { %v353_v20 = vpack.c.bf16 %v301_v13, %v299_v12  ;;  %v9878_v57 = vor.u32 %v10176_v55, %v9877_v54  ;;  %v10172_v4 = vld [vmem:[#allocation9 + $0x54] sm:$0xf0] }
  0x51   : > { %v9862_v5 = vor.u32 %v10172_v4, %v9861_v3  ;;  %v10168_v19 = vld [vmem:[#allocation9 + $0x34] sm:$0xf0] }
  0x52   : > { %514 = vmatpush.bf16.msra.mxu0 %v10081_v14  ;;  %10824 = vmatpush.bf16.msra.mxu2 %v10081_v14  ;;  %v331_v14 = vld [vmem:[%s11603_s23 + $0x1a0] sm:$0xff] }
  0x53   : > { %603 = vmatpush.bf16.msra.mxu1 %v10089_v15  ;;  %10832 = vmatpush.bf16.msra.mxu3 %v10089_v15  ;;  %v333_v15 = vld [vmem:[%s11603_s23 + $0x1b0] sm:$0xff] }
  0x54   : > { %v369_v21 = vpack.c.bf16 %v333_v15, %v331_v14  ;;  %v10170_v14 = vld [vmem:[#allocation9 + $0x44] sm:$0xf0] }
  0x55   : > { %515 = vmatmul.bf16.vlgmr.msra.gmra.mxu0 %v343_v24  ;;  %555 = vmatmul.bf16.vlgmr.msra.gmra.mxu2 %v359_v25  ;;  %v303_v24 = vld [vmem:[%s11603_s23 + $0xc0] sm:$0xff]  ;;  %v305_v25 = vld [vmem:[%s11603_s23 + $0xd0] sm:$0xff] }
  0x56   : > { %604 = vmatmul.bf16.vlgmr.msra.gmra.mxu1 %v344_v26  ;;  %644 = vmatmul.bf16.vlgmr.msra.gmra.mxu3 %v360_v27  ;;  %v335_v26 = vld [vmem:[%s11603_s23 + $0x1c0] sm:$0xff]  ;;  %v337_v27 = vld [vmem:[%s11603_s23 + $0x1d0] sm:$0xff]  ;;  %v355_v32 = vpack.c.bf16 %v305_v25, %v303_v24 }
  0x57   : > { %v371_v33 = vpack.c.bf16 %v337_v27, %v335_v26  ;;  %8218 = vmatpush.bf16.msrb.mxu2 %v9878_v57  ;;  %v9837_v26 = vld [vmem:[#allocation9 + $0x20] sm:$0xf] }
  0x65   : > { %520 = vmatmul.bf16.gmra.mxu0 %v345_v36  ;;  %560 = vmatmul.bf16.gmra.mxu2 %v361_v37  ;;  %v307_v36 = vld [vmem:[%s11603_s23 + $0xe0] sm:$0xff]  ;;  %v309_v37 = vld [vmem:[%s11603_s23 + $0xf0] sm:$0xff] }
  0x66   : > { %609 = vmatmul.bf16.gmra.mxu1 %v346_v38  ;;  %649 = vmatmul.bf16.gmra.mxu3 %v362_v39  ;;  %v339_v38 = vld [vmem:[%s11603_s23 + $0x1e0] sm:$0xff]  ;;  %v341_v39 = vld [vmem:[%s11603_s23 + $0x1f0] sm:$0xff]  ;;  %v357_v44 = vpack.c.bf16 %v309_v37, %v307_v36  ;;  %s9390_s23 = scalar_lea.hbm %s15145_s5, %s10225_s9 }
  0x67   : > { %v373_v45 = vpack.c.bf16 %v341_v39, %v339_v38  ;;  %v10164_v39 = vld [vmem:[#allocation9 + $0x14] sm:$0xf0]  ;;  %s9393_s29 = sshll.u32 %s9390_s23, 4  ;;  %s9394_s29 = int_to_ptr.hbm [resolvable:$true] %s9393_s29 }
  0x68   : > { %s11402_s12 = sshra.s32 %s9394_s29, 4  ;;  %s11403_s12 = int_to_ptr.hbm [resolvable:$true] %s11402_s12 }
  0x69   : > { %s11404_s22 = scalar_lea.hbm %s11403_s12, 512  ;;  %p11409_p11 = scmp.lt.s32.totalorder %s11403_s12, %s15145_s5 }
  0x6a   : > { %p11405_p1 = scmp.ne.s32.totalorder %s11403_s12, %s11404_s22  ;;  %p11410_p9 = scmp.lt.s32.totalorder %s11408_s30, %s11404_s22 }
  0x6c   : > { %p11406_p4 = pnand %p11405_p1, %p11570_p5  ;;  %p11411_p2 = por %p11410_p9, %p11409_p11 }
  0x6e   : > { %p11407_p8 = pneg %p11406_p4 }
  0x70   : > { %p11412_p10 = pnand %p11411_p2, %p11407_p8 }
  0x75   : > { %525 = vmatmul.bf16.gmra.mxu0 %v347_v48  ;;  %565 = vmatmul.bf16.gmra.mxu2 %v363_v49  ;;  %v11680_v48 = vld [vmem:[%s15142_s2] ss:$0 sm:$0xff]  ;;  %v11468_v49 = vmov 4286644096  }
  0x76   : > { %614 = vmatmul.bf16.gmra.mxu1 %v348_v50  ;;  %654 = vmatmul.bf16.gmra.mxu3 %v364_v51  ;;  %947 = vst [vmem:[#allocation2 + $0x18] sm:$0xf] %v11468_v49 }
  0x77   : > { %941 = vst [vmem:[#allocation2] sm:$0xf] %v11468_v49 }
  0x78   : > { %942 = vst [vmem:[#allocation2 + $0x4] sm:$0xf] %v11468_v49 }
  0x79   : > { %943 = vst [vmem:[#allocation2 + $0x8] sm:$0x3] %v11468_v49 }
  0x7a   : > { %944 = vst [vmem:[#allocation2 + $0xc] sm:$0xf] %v11468_v49 }
  0x7b   : > { %945 = vst [vmem:[#allocation2 + $0x10] sm:$0xf] %v11468_v49 }
  0x7c   : > { %946 = vst [vmem:[#allocation2 + $0x14] sm:$0x3] %v11468_v49 }
  0x7d   : > { %948 = vst [vmem:[#allocation2 + $0x1c] sm:$0xf] %v11468_v49 }
  0x7e   : > { %949 = vst [vmem:[#allocation2 + $0x20] sm:$0x3] %v11468_v49 }
  0x7f   : > { %950 = vst [vmem:[#allocation2 + $0x24] sm:$0xf] %v11468_v49 }
  0x80   : > { %951 = vst [vmem:[#allocation2 + $0x28] sm:$0xf] %v11468_v49 }
  0x81   : > { %952 = vst [vmem:[#allocation2 + $0x2c] sm:$0x3] %v11468_v49 }
  0x82   : > { %953 = vst [vmem:[#allocation2 + $0x30] sm:$0xf] %v11468_v49 }
  0x83   : > { %954 = vst [vmem:[#allocation2 + $0x34] sm:$0xf] %v11468_v49 }
  0x84   : > { %955 = vst [vmem:[#allocation2 + $0x38] sm:$0x3] %v11468_v49 }
  0x85   : > { %530 = vmatmul.bf16.gmra.mxu0 %v349_v60  ;;  %570 = vmatmul.bf16.gmra.mxu2 %v365_v61  ;;  %v9869_v60 = vld [vmem:[#allocation9 + $0x60] sm:$0xf]  ;;  %v10174_v61 = vld [vmem:[#allocation9 + $0x64] sm:$0xf0]  ;;  %956 = vst [vmem:[#allocation2 + $0x3c] sm:$0xf] %v11468_v49 }
  0x86   : > { %619 = vmatmul.bf16.gmra.mxu1 %v350_v62  ;;  %659 = vmatmul.bf16.gmra.mxu3 %v366_v63  ;;  %v9870_v0 = vor.u32 %v10174_v61, %v9869_v60  ;;  %957 = vst [vmem:[#allocation2 + $0x40] sm:$0xf] %v11468_v49 }
  0x87   : > { %958 = vst [vmem:[#allocation2 + $0x44] sm:$0x3] %v11468_v49 }
  0x88   : > { %8219 = vmatpush.bf16.msrb.mxu2 %v9870_v0  ;;  %959 = vst [vmem:[#allocation2 + $0x48] sm:$0xf] %v11468_v49 }
  0x89   : > { %960 = vst [vmem:[#allocation2 + $0x4c] sm:$0xf] %v11468_v49 }
  0x8a   : > { %961 = vst [vmem:[#allocation2 + $0x50] sm:$0x3] %v11468_v49 }
  0x8b   : > { %962 = vst [vmem:[#allocation2 + $0x54] sm:$0xf] %v11468_v49 }
  0x8c   : > { %8220 = vmatpush.bf16.msrb.mxu2 %v9862_v5  ;;  %963 = vst [vmem:[#allocation2 + $0x58] sm:$0xf] %v11468_v49 }
  0x8d   : > { %964 = vst [vmem:[#allocation2 + $0x5c] sm:$0x3] %v11468_v49 }
  0x8e   : > { %965 = vst [vmem:[#allocation2 + $0x60] sm:$0xf] %v11468_v49 }
  0x8f   : > { %966 = vst [vmem:[#allocation2 + $0x64] sm:$0xf] %v11468_v49 }
  0x90   : > { %967 = vst [vmem:[#allocation2 + $0x68] sm:$0x3] %v11468_v49 }
  0x91   : > { %968 = vst [vmem:[#allocation2 + $0x6c] sm:$0xf] %v11468_v49 }
  0x92   : > { %969 = vst [vmem:[#allocation2 + $0x70] sm:$0xf] %v11468_v49 }
  0x93   : > { %970 = vst [vmem:[#allocation2 + $0x74] sm:$0x3] %v11468_v49 }
  0x94   : > { %971 = vst [vmem:[#allocation2 + $0x78] sm:$0xf] %v11468_v49 }
  0x95   : > { %535 = vmatmul.bf16.gmra.mxu0 %v351_v8  ;;  %575 = vmatmul.bf16.gmra.mxu2 %v367_v9  ;;  %972 = vst [vmem:[#allocation2 + $0x7c] sm:$0xf] %v11468_v49 }
  0x96   : > { %624 = vmatmul.bf16.gmra.mxu1 %v352_v10  ;;  %664 = vmatmul.bf16.gmra.mxu3 %v368_v11  ;;  %v9853_v11 = vld [vmem:[#allocation9 + $0x40] sm:$0xf]  ;;  %973 = vst [vmem:[#allocation2 + $0x80] sm:$0x3] %v11468_v49 }
  0x97   : > { %v9854_v15 = vor.u32 %v10170_v14, %v9853_v11  ;;  %974 = vst [vmem:[#allocation2 + $0x84] sm:$0xf] %v11468_v49 }
  0x98   : > { %975 = vst [vmem:[#allocation2 + $0x88] sm:$0xf] %v11468_v49 }
  0x99   : > { %8221 = vmatpush.bf16.msrb.mxu2 %v9854_v15  ;;  %976 = vst [vmem:[#allocation2 + $0x8c] sm:$0x3] %v11468_v49 }
  0x9a   : > { %977 = vst [vmem:[#allocation2 + $0x90] sm:$0xf] %v11468_v49 }
  0x9b   : > { %978 = vst [vmem:[#allocation2 + $0x94] sm:$0xf] %v11468_v49 }
  0x9c   : > { %979 = vst [vmem:[#allocation2 + $0x98] sm:$0x3] %v11468_v49 }
  0x9d   : > { %980 = vst [vmem:[#allocation2 + $0x9c] sm:$0xf] %v11468_v49 }
  0x9e   : > { %981 = vst [vmem:[#allocation2 + $0xa0] sm:$0xf] %v11468_v49 }
  0x9f   : > { %982 = vst [vmem:[#allocation2 + $0xa4] sm:$0x3] %v11468_v49 }
  0xa0   : > { %983 = vst [vmem:[#allocation2 + $0xa8] sm:$0xf] %v11468_v49 }
  0xa1   : > { %984 = vst [vmem:[#allocation2 + $0xac] sm:$0xf] %v11468_v49 }
  0xa2   : > { %985 = vst [vmem:[#allocation2 + $0xb0] sm:$0x3] %v11468_v49 }
  0xa3   : > { %986 = vst [vmem:[#allocation2 + $0xb4] sm:$0xf] %v11468_v49 }
  0xa4   : > { %987 = vst [vmem:[#allocation2 + $0xb8] sm:$0xf] %v11468_v49 }
  0xa5   : > { %540 = vmatmul.bf16.gmra.mxu0 %v353_v20  ;;  %580 = vmatmul.bf16.gmra.mxu2 %v369_v21  ;;  %v9846_v21 = vor.u32 %v10168_v19, %v9845_v18  ;;  %988 = vst [vmem:[#allocation2 + $0xbc] sm:$0x3] %v11468_v49 }
  0xa6   : > { %629 = vmatmul.bf16.gmra.mxu1 %v354_v22  ;;  %669 = vmatmul.bf16.gmra.mxu3 %v370_v23  ;;  %989 = vst [vmem:[#allocation2 + $0xc0] sm:$0xf] %v11468_v49 }
  0xa7   : > { %8222 = vmatpush.bf16.msrb.mxu2 %v9846_v21  ;;  %990 = vst [vmem:[#allocation2 + $0xc4] sm:$0xf] %v11468_v49 }
  0xa8   : > { %991 = vst [vmem:[#allocation2 + $0xc8] sm:$0x3] %v11468_v49 }
  0xa9   : > { %992 = vst [vmem:[#allocation2 + $0xcc] sm:$0xf] %v11468_v49 }
  0xaa   : > { %993 = vst [vmem:[#allocation2 + $0xd0] sm:$0xf] %v11468_v49 }
  0xab   : > { %994 = vst [vmem:[#allocation2 + $0xd4] sm:$0x3] %v11468_v49 }
  0xac   : > { %995 = vst [vmem:[#allocation2 + $0xd8] sm:$0xf] %v11468_v49 }
  0xad   : > { %996 = vst [vmem:[#allocation2 + $0xdc] sm:$0xf] %v11468_v49 }
  0xae   : > { %997 = vst [vmem:[#allocation2 + $0xe0] sm:$0x3] %v11468_v49 }
  0xaf   : > { %998 = vst [vmem:[#allocation2 + $0xe4] sm:$0xf] %v11468_v49 }
  0xb0   : > { %999 = vst [vmem:[#allocation2 + $0xe8] sm:$0xf] %v11468_v49 }
  0xb1   : > { %1000 = vst [vmem:[#allocation2 + $0xec] sm:$0x3] %v11468_v49 }
  0xb5   : > { %545 = vmatmul.bf16.gmra.mxu0 %v355_v32  ;;  %585 = vmatmul.bf16.gmra.mxu2 %v371_v33  ;;  %v9838_v32 = vor.u32 %v10166_v30, %v9837_v26 }
  0xb6   : > { %634 = vmatmul.bf16.gmra.mxu1 %v356_v34  ;;  %674 = vmatmul.bf16.gmra.mxu3 %v372_v35  ;;  %v9829_v35 = vld [vmem:[#allocation9 + $0x10] sm:$0xf] }
  0xb7   : > { %8223 = vmatpush.bf16.msrb.mxu2 %v9838_v32  ;;  %v9830_v40 = vor.u32 %v10164_v39, %v9829_v35 }
  0xbb   : > { %8224 = vmatpush.bf16.msrb.mxu2 %v9830_v40 }
  0xc5   : > { %550 = vmatmul.bf16.gmra.mxu0 %v357_v44  ;;  %590 = vmatmul.bf16.gmra.mxu2 %v373_v45  ;;  %v9821_v45 = vld [vmem:[#allocation9] sm:$0xf] }
  0xc6   : > { %639 = vmatmul.bf16.gmra.mxu1 %v358_v46  ;;  %679 = vmatmul.bf16.gmra.mxu3 %v374_v47 }
  0xd2   : > { %v516_v50 = vpop.f32.mrf.mxu0 }
  0xd3   : > { %v517_v51 = vadd.f32 %v11680_v48, %v516_v50  ;;  %v605_v52 = vpop.f32.mrf.mxu1  ;;  %v10162_v50 = vld [vmem:[#allocation9 + $0x4] sm:$0xf0] }
  0xd5   : > { %v11688_v53 = vadd.f32 %v605_v52, %v517_v51  ;;  %v9822_v52 = vor.u32 %v10162_v50, %v9821_v45 }
  0xd7   : > { %v685_v56 = vsub.f32 0.0, %v11688_v53  ;;  %8225 = vmatpush.bf16.msrb.mxu2 %v9822_v52 }
  0xd8   : > { %v11704_v2 = vpop.f32.mrf.mxu2 }
  0xd9   : > { %v717_v58 = vmul.f32 1.442695, %v685_v56  ;;  %v11711_v9 = vpop.f32.mrf.mxu3 }
  0xda   : > { %v518_v59 = vpop.f32.mrf.mxu0 }
  0xdb   : > { %10910 = vpow2.f32 %v717_v58  ;;  %v519_v62 = vadd.f32 %v11680_v48, %v518_v59  ;;  %v607_v63 = vpop.f32.mrf.mxu1 }
  0xdd   : > { %v11701_v1 = vadd.f32 %v607_v63, %v519_v62 }
  0xdf   : > { %v686_v7 = vsub.f32 0.0, %v11701_v1 }
  0xe0   : > { %v558_v22 = vpop.f32.mrf.mxu2 }
  0xe1   : > { %v10911_v6 = vpop.eup %10910  ;;  %v719_v16 = vmul.f32 1.442695, %v686_v7  ;;  %v647_v31 = vpop.f32.mrf.mxu3  ;;  %v559_v59 = vadd.f32 %v11680_v48, %v558_v22 }
  0xe2   : > { %v781_v8 = vadd.f32 1.0, %v10911_v6  ;;  %v521_v10 = vpop.f32.mrf.mxu0 }
  0xe3   : > { %v522_v12 = vadd.f32 %v11680_v48, %v521_v10  ;;  %v610_v13 = vpop.f32.mrf.mxu1  ;;  %v11771_v5 = vadd.f32 %v647_v31, %v559_v59 }
  0xe4   : > { %10912 = vrcp.f32 %v781_v8 }
  0xe5   : > { %v11717_v17 = vadd.f32 %v610_v13, %v522_v12  ;;  %10914 = vpow2.f32 %v719_v16  ;;  %v702_v10 = vsub.f32 0.0, %v11771_v5 }
  0xe7   : > { %v687_v20 = vsub.f32 0.0, %v11717_v17  ;;  %v751_v14 = vmul.f32 1.442695, %v702_v10 }
  0xe8   : > { %v11742_v43 = vpop.f32.mrf.mxu2 }
  0xe9   : > { %v721_v24 = vmul.f32 1.442695, %v687_v20  ;;  %v11751_v54 = vpop.f32.mrf.mxu3 }
  0xea   : > { %v10913_v23 = vpop.eup %10912  ;;  %v523_v25 = vpop.f32.mrf.mxu0 }
  0xeb   : > { %v845_v27 = vmul.f32 %v10913_v23, %v11688_v53  ;;  %v524_v28 = vadd.f32 %v11680_v48, %v523_v25  ;;  %v612_v29 = vpop.f32.mrf.mxu1  ;;  %10916 = vpow2.f32 %v721_v24  ;;  %v10915_v36 = vpop.eup %10914  ;;  %v557_v53 = vadd.f32 %v11680_v48, %v11704_v2 }
  0xec   : > { %v782_v42 = vadd.f32 1.0, %v10915_v36  ;;  %v562_v25 = vadd.f32 %v11680_v48, %v11742_v43 }
  0xed   : > { %v11729_v33 = vpack.c.bf16 %v845_v27, %v845_v27  ;;  %v11732_v34 = vadd.f32 %v612_v29, %v524_v28  ;;  %v11760_v58 = vadd.f32 %v11711_v9, %v557_v53 }
  0xee   : > { %v11806_v35 = vadd.f32 %v11751_v54, %v562_v25  ;;  %v11841_v25 = vld [vmem:[#allocation2 + $0xc] sm:$0xff]  }
  0xef   : > { %909 = vst [vmem:[#allocation3] sm:$0xf] %v11729_v33  ;;  %v1036_v37 = vrot.slane %v11729_v33, 7  ;;  %v688_v38 = vsub.f32 0.0, %v11732_v34  ;;  %v701_v2 = vsub.f32 0.0, %v11760_v58 }
  0xf0   : > { %v11767_v3 = vpop.f32.mrf.mxu2 }
  0xf1   : > { %1165 = vst [vmem:[#allocation2 + $0x18] sm:$0xe] %v1036_v37  ;;  %v723_v41 = vmul.f32 1.442695, %v688_v38  ;;  %v10917_v51 = vpop.eup %10916  ;;  %v749_v7 = vmul.f32 1.442695, %v701_v2  ;;  %v11780_v11 = vpop.f32.mrf.mxu3  ;;  %v564_v53 = vadd.f32 %v11680_v48, %v11767_v3 }
  0xf2   : > { %v526_v44 = vpop.f32.mrf.mxu0  ;;  %v783_v55 = vadd.f32 1.0, %v10917_v51  ;;  %v1037_v36 = vrot.slane %v1036_v37, 4 }
  0xf3   : > { %10918 = vpow2.f32 %v723_v41  ;;  %v527_v46 = vadd.f32 %v11680_v48, %v526_v44  ;;  %v615_v47 = vpop.f32.mrf.mxu1 }
  0xf4   : > { %10920 = vrcp.f32 %v782_v42  ;;  %v703_v42 = vsub.f32 0.0, %v11806_v35 }
  0xf5   : > { %v11754_v56 = vadd.f32 %v615_v47, %v527_v46  ;;  %10922 = vrcp.f32 %v783_v55 }
  0xf6   : > { %v753_v46 = vmul.f32 1.442695, %v703_v42  ;;  %v1313_v42 = vunpack.c.l.bf16 %v11841_v25 }
  0xf7   : > { %v689_v62 = vsub.f32 0.0, %v11754_v56 }
  0xf8   : > { %v11796_v28 = vpop.f32.mrf.mxu2 }
  0xf9   : > { %v10919_v57 = vpop.eup %10918  ;;  %v725_v6 = vmul.f32 1.442695, %v689_v62  ;;  %v11813_v43 = vpop.f32.mrf.mxu3 }
  0xfa   : > { %v528_v60 = vpop.f32.mrf.mxu0  ;;  %v784_v61 = vadd.f32 1.0, %v10919_v57  ;;  %v10921_v0 = vpop.eup %10920 }
  0xfb   : > { %v617_v63 = vpop.f32.mrf.mxu1  ;;  %v529_v4 = vadd.f32 %v11680_v48, %v528_v60  ;;  %v846_v9 = vmul.f32 %v10921_v0, %v11701_v1  ;;  %v10923_v13 = vpop.eup %10922 }
  0xfc   : > { %10924 = vrcp.f32 %v784_v61  ;;  %v847_v20 = vmul.f32 %v10923_v13, %v11717_v17  ;;  %v11828_v61 = vadd.f32 %v11780_v11, %v564_v53 }
  0xfd   : > { %v11774_v8 = vadd.f32 %v617_v63, %v529_v4  ;;  %10926 = vpow2.f32 %v725_v6  ;;  %v878_v1 = vpack.c.bf16 %v846_v9, %v846_v9 }
  0xfe   : > { %10928 = vpow2.f32 %v749_v7  ;;  %v879_v32 = vpack.c.bf16 %v847_v20, %v847_v20  ;;  %v704_v11 = vsub.f32 0.0, %v11828_v61 }
  0xff   : > { %v690_v12 = vsub.f32 0.0, %v11774_v8  ;;  %10930 = vpow2.f32 %v751_v14  ;;  %v1038_v17 = vrot.slane %v878_v1, 7  ;;  %910 = vst [vmem:[#allocation3 + $0x10] sm:$0xf] %v878_v1  ;;  %v1264_v14 = vld [vmem:[#allocation2 + $0x14] sm:$0x3] }
 0x100   : > { %v1041_v45 = vrot.slane %v879_v32, 7  ;;  %v11825_v60 = vpop.f32.mrf.mxu2  ;;  %911 = vst [vmem:[#allocation3 + $0x20] sm:$0xf] %v879_v32  ;;  %v755_v32 = vmul.f32 1.442695, %v704_v11 }
 0x101   : > { %v727_v15 = vmul.f32 1.442695, %v690_v12  ;;  %v1039_v44 = vsel %vm11801_vm2, %v1037_v36, %v1038_v17  ;;  %v1040_v37 = vrot.slane %v1038_v17, 4  ;;  %v9565_v12 = vld [vmem:[#allocation3] sm:$0xf]  ;;  %v11836_v13 = vpop.f32.mrf.mxu3  ;;  %v1360_v36 = vunpack.c.l.bf16 %v1264_v14 }
 0x102   : > { %v531_v16 = vpop.f32.mrf.mxu0  ;;  %v10925_v18 = vpop.eup %10924  ;;  %1166 = vst [vmem:[#allocation2 + $0x1c] sm:$0xf] %v1039_v44  ;;  %v1042_v57 = vrot.slane %v1041_v45, 4 }
 0x103   : > { %v532_v19 = vadd.f32 %v11680_v48, %v531_v16  ;;  %10932 = vpow2.f32 %v727_v15  ;;  %v620_v21 = vpop.f32.mrf.mxu1  ;;  %v10927_v22 = vpop.eup %10926  ;;  %v848_v26 = vmul.f32 %v10925_v18, %v11732_v34  ;;  %1167 = vst [vmem:[#allocation2 + $0x20] sm:$0x1] %v1040_v37  ;;  %v10227_v15 = vld [vmem:[#allocation2] sm:$0xff]  }
 0x104   : > { %v10929_v24 = vpop.eup %10928  ;;  %v785_v27 = vadd.f32 1.0, %v10927_v22  ;;  %1168 = vst [vmem:[#allocation2 + $0x24] sm:$0xe] %v1041_v45  ;;  %v11839_v22 = vld [vmem:[#allocation2 + $0x14] sm:$0x3]  ;;  %v10228_v17 = vunpack.c.l.bf16 %v10227_v15 }
 0x105   : > { %v11790_v23 = vadd.f32 %v620_v21, %v532_v19  ;;  %v797_v29 = vadd.f32 1.0, %v10929_v24  ;;  %v10931_v34 = vpop.eup %10930  ;;  %v880_v41 = vpack.c.bf16 %v848_v26, %v848_v26 }
 0x106   : > { %10934 = vrcp.f32 %v785_v27  ;;  %v798_v40 = vadd.f32 1.0, %v10931_v34  ;;  %v10099_v21 = vld [vmem:[#allocation3 + $0xc] sm:$0xf0] }
 0x107   : > { %v691_v30 = vsub.f32 0.0, %v11790_v23  ;;  %10936 = vrcp.f32 %v797_v29  ;;  %v1043_v51 = vrot.slane %v880_v41, 7  ;;  %912 = vst [vmem:[#allocation3 + $0x30] sm:$0xf] %v880_v41  ;;  %v11843_v26 = vor.u32 %v10099_v21, %v9565_v12 }
 0x108   : > { %v1315_v41 = vunpack.c.l.bf16 %v11839_v22 }
 0x109   : > { %v729_v38 = vmul.f32 1.442695, %v691_v30  ;;  %v10933_v39 = vpop.eup %10932  ;;  %v1044_v0 = vsel %vm11801_vm2, %v1042_v57, %v1043_v51  ;;  %v1045_v19 = vrot.slane %v1043_v51, 4  ;;  %15287 = vst [vmem:[#allocation14_spill] sm:$0xff] %v11843_v26  ;;  %8226 = vmatmul.bf16.vlgmr.msrb.gmra.mxu2 %v11843_v26 }
 0x10a   : > { %v786_v33 = vadd.f32 1.0, %v10933_v39  ;;  %v533_v47 = vpop.f32.mrf.mxu0  ;;  %1169 = vst [vmem:[#allocation2 + $0x28] sm:$0xf] %v1044_v0  ;;  %v11854_v51 = vld [vmem:[#allocation2 + $0x20] sm:$0x3] }
 0x10b   : > { %10938 = vpow2.f32 %v729_v38  ;;  %v534_v54 = vadd.f32 %v11680_v48, %v533_v47  ;;  %v622_v3 = vpop.f32.mrf.mxu1  ;;  %1170 = vst [vmem:[#allocation2 + $0x2c] sm:$0x1] %v1045_v19  ;;  %v1267_v57 = vld [vmem:[#allocation2 + $0x20] sm:$0x3]  ;;  %v1318_v14 = vunpack.c.l.bf16 %v11854_v51 }
 0x10c   : > { %10940 = vrcp.f32 %v798_v40  ;;  %v10935_v50 = vpop.eup %10934  ;;  %v10706_v40 = vld [vmem:[#allocation2 + $0x18] sm:$0xff]  }
 0x10d   : > { %10942 = vrcp.f32 %v786_v33  ;;  %v10937_v52 = vpop.eup %10936  ;;  %v849_v59 = vmul.f32 %v10935_v50, %v11754_v56  ;;  %v11833_v56 = vadd.f32 %v622_v3, %v534_v54  ;;  %v11849_v33 = vpop.f32.mrf.mxu2  ;;  %v567_v54 = vadd.f32 %v11680_v48, %v11796_v28 }
 0x10e   : > { %10944 = vpow2.f32 %v753_v46  ;;  %v861_v55 = vmul.f32 %v10937_v52, %v11760_v58  ;;  %v1215_v58 = vld [vmem:[#allocation2 + $0x8] sm:$0x3]  ;;  %v1314_v52 = vunpack.c.h.bf16 %v11841_v25  ;;  %v11865_v3 = vunpack.c.h.bf16 %v10706_v40  ;;  %v10103_v19 = vld [vmem:[#allocation3 + $0x2c] sm:$0xf0] }
 0x10f   : > { %v881_v10 = vpack.c.bf16 %v849_v59, %v849_v59  ;;  %v1312_v1 = vunpack.c.l.bf16 %v1215_v58  ;;  %v692_v27 = vsub.f32 0.0, %v11833_v56  ;;  %v569_v28 = vadd.f32 %v11680_v48, %v11825_v60 }
 0x110   : > { %v893_v63 = vpack.c.bf16 %v861_v55, %v861_v55  ;;  %v1410_v25 = vmax.f32 %v1314_v52, %v11865_v3 }
 0x111   : > { %v10939_v49 = vpop.eup %10938  ;;  %v1046_v30 = vrot.slane %v881_v10, 7  ;;  %913 = vst [vmem:[#allocation3 + $0x40] sm:$0xf] %v881_v10  ;;  %v731_v46 = vmul.f32 1.442695, %v692_v27  ;;  %v1408_v59 = vmax.f32 %v1312_v1, %v1360_v36  ;;  %v11871_v10 = vadd.f32 %v11813_v43, %v567_v54 }
 0x112   : > { %v10941_v62 = vpop.eup %10940  ;;  %v787_v2 = vadd.f32 1.0, %v10939_v49  ;;  %925 = vst [vmem:[#allocation3 + $0x100] sm:$0xf] %v893_v63  ;;  %v1076_v9 = vrot.slane %v893_v63, 7  ;;  %v536_v34 = vpop.f32.mrf.mxu0  ;;  %v1504_v49 = vld [vmem:[#allocation2 + $0x20] sm:$0x3] }
 0x113   : > { %v10943_v4 = vpop.eup %10942  ;;  %v862_v6 = vmul.f32 %v10941_v62, %v11771_v5  ;;  %v1262_v5 = vld [vmem:[#allocation2 + $0xc] sm:$0xff]   ;;  %v537_v47 = vadd.f32 %v11680_v48, %v536_v34  ;;  %v1047_v53 = vrot.slane %v1046_v30, 4  ;;  %v11859_v62 = vunpack.c.l.bf16 %v10706_v40  ;;  %1171 = vst [vmem:[#allocation2 + $0x30] sm:$0xe] %v1046_v30  ;;  %v1506_v27 = vld [vmem:[#allocation2 + $0x28] sm:$0xf] }
 0x114   : > { %v10945_v7 = vpop.eup %10944  ;;  %1189 = vst [vmem:[#allocation2 + $0x78] sm:$0xe] %v1076_v9  ;;  %v850_v20 = vmul.f32 %v10943_v4, %v11774_v8  ;;  %10946 = vrcp.f32 %v787_v2  ;;  %v1077_v24 = vrot.slane %v1076_v9, 4  ;;  %v10229_v8 = vunpack.c.h.bf16 %v10227_v15  ;;  %v1268_v2 = vld [vmem:[#allocation2 + $0x24] sm:$0xf] }
 0x115   : > { %v894_v16 = vpack.c.bf16 %v862_v6, %v862_v6  ;;  %v799_v18 = vadd.f32 1.0, %v10945_v7  ;;  %v1358_v38 = vunpack.c.l.bf16 %v1262_v5  ;;  %v1359_v39 = vunpack.c.h.bf16 %v1262_v5  ;;  %v660_v6 = vpop.f32.mrf.mxu3  ;;  %v625_v7 = vpop.f32.mrf.mxu1  ;;  %v1505_v9 = vld [vmem:[#allocation2 + $0x24] sm:$0xf]  ;;  %v1744_v40 = vld [vmem:[#allocation2 + $0x28] sm:$0xf] }
 0x116   : > { %v882_v44 = vpack.c.bf16 %v850_v20, %v850_v20  ;;  %v11874_v12 = vadd.f32 %v625_v7, %v537_v47  ;;  %v1364_v1 = vunpack.c.l.bf16 %v1268_v2  ;;  %v1409_v43 = vmax.f32 %v1313_v42, %v11859_v62  ;;  %v1743_v5 = vld [vmem:[#allocation2 + $0x24] sm:$0xf]  ;;  %v11907_v22 = vld [vmem:[#allocation2 + $0x28] sm:$0xf] }
 0x117   : > { %10948 = vrcp.f32 %v799_v18  ;;  %926 = vst [vmem:[#allocation3 + $0x110] sm:$0xf] %v894_v16  ;;  %v1078_v29 = vrot.slane %v894_v16, 7  ;;  %v11861_v63 = vmax.f32 %v10228_v17, %v1358_v38  ;;  %v11863_v0 = vmax.f32 %v10229_v8, %v1359_v39  ;;  %v11881_v18 = vld [vmem:[#allocation2 + $0x24] sm:$0xf] }
 0x118   : > { %10950 = vpow2.f32 %v755_v32  ;;  %v1048_v58 = vrot.slane %v882_v44, 7  ;;  %914 = vst [vmem:[#allocation3 + $0x50] sm:$0xf] %v882_v44  ;;  %v1600_v16 = vunpack.c.l.bf16 %v1504_v49  ;;  %v1601_v21 = vunpack.c.l.bf16 %v1505_v9  ;;  %v9581_v44 = vld [vmem:[#allocation3 + $0x20] sm:$0xf] }
 0x119   : > { %v1079_v37 = vsel %vm11801_vm2, %v1077_v24, %v1078_v29  ;;  %v1080_v45 = vrot.slane %v1078_v29, 4  ;;  %10952 = vpow2.f32 %v731_v46  ;;  %v1269_v24 = vld [vmem:[#allocation2 + $0x28] sm:$0xf]  ;;  %v11891_v29 = vadd.f32 %v11836_v13, %v569_v28  ;;  %v573_v13 = vpop.f32.mrf.mxu2 }
 0x11a   : > { %v10947_v50 = vpop.eup %10946  ;;  %1190 = vst [vmem:[#allocation2 + $0x7c] sm:$0xf] %v1079_v37  ;;  %v1049_v60 = vsel %vm11801_vm2, %v1047_v53, %v1048_v58  ;;  %v1050_v34 = vrot.slane %v1048_v58, 4  ;;  %v705_v36 = vsub.f32 0.0, %v11871_v10  ;;  %v1839_v38 = vunpack.c.l.bf16 %v1743_v5  ;;  %v1507_v53 = vld [vmem:[#allocation2 + $0x2c] sm:$0x3] }
 0x11b   : > { %1191 = vst [vmem:[#allocation2 + $0x80] sm:$0x1] %v1080_v45  ;;  %v851_v11 = vmul.f32 %v10947_v50, %v11790_v23  ;;  %v1646_v23 = vmax.f32 %v11861_v63, %v11859_v62  ;;  %v1647_v39 = vmax.f32 %v11863_v0, %v11865_v3  ;;  %v572_v42 = vadd.f32 %v11680_v48, %v11849_v33  ;;  %v1270_v33 = vld [vmem:[#allocation2 + $0x2c] sm:$0x3]  ;;  %v10192_v7 = vld [vmem:[#allocation9 + $0xf4] sm:$0xf0] }
 0x11c   : > { %1172 = vst [vmem:[#allocation2 + $0x34] sm:$0xf] %v1049_v60  ;;  %v11901_v45 = vmax.f32 %v1408_v59, %v1600_v16  ;;  %v1319_v46 = vunpack.c.l.bf16 %v11881_v18  ;;  %v11905_v47 = vmax.f32 %v11859_v62, %v1364_v1  ;;  %v11913_v50 = vmax.f32 %v1409_v43, %v1601_v21  ;;  %v9941_v62 = vld [vmem:[#allocation9 + $0xf0] sm:$0xf]  ;;  %v11920_v0 = vld [vmem:[#allocation2 + $0x2c] sm:$0x3] }
 0x11d   : > { %v10949_v55 = vpop.eup %10948  ;;  %v11888_v17 = vpack.c.bf16 %v851_v11, %v851_v11  ;;  %v1365_v52 = vunpack.c.l.bf16 %v1269_v24  ;;  %v1602_v54 = vunpack.c.l.bf16 %v1506_v27  ;;  %1173 = vst [vmem:[#allocation2 + $0x38] sm:$0x1] %v1050_v34  ;;  %v706_v49 = vsub.f32 0.0, %v11891_v29  ;;  %v662_v28 = vpop.f32.mrf.mxu3 }
 0x11e   : > { %v863_v4 = vmul.f32 %v10949_v55, %v11806_v35  ;;  %v1363_v35 = vunpack.c.l.bf16 %v1267_v57  ;;  %v10951_v20 = vpop.eup %10950  ;;  %v1840_v55 = vunpack.c.l.bf16 %v1744_v40  ;;  %v757_v57 = vmul.f32 1.442695, %v705_v36  ;;  %v538_v34 = vpop.f32.mrf.mxu0 }
 0x11f   : > { %v800_v32 = vadd.f32 1.0, %v10951_v20  ;;  %v10953_v37 = vpop.eup %10952  ;;  %915 = vst [vmem:[#allocation3 + $0x60] sm:$0xf] %v11888_v17  ;;  %v1051_v59 = vrot.slane %v11888_v17, 7  ;;  %v11918_v63 = vmax.f32 %v1646_v23, %v1839_v38  ;;  %v693_v58 = vsub.f32 0.0, %v11874_v12 }
 0x120   : > { %v11877_v15 = vpack.c.bf16 %v863_v4, %v863_v4  ;;  %v1411_v8 = vmax.f32 %v1315_v41, %v1363_v35  ;;  %v11911_v41 = vor.u32 %v10103_v19, %v9581_v44  ;;  %v788_v2 = vadd.f32 1.0, %v10953_v37  ;;  %v1745_v35 = vld [vmem:[#allocation2 + $0x2c] sm:$0x3] }
 0x121   : > { %10954 = vrcp.f32 %v800_v32  ;;  %v11922_v4 = vadd.f32 %v660_v6, %v572_v42  ;;  %v1366_v9 = vunpack.c.l.bf16 %v1270_v33  ;;  %v1603_v11 = vunpack.c.l.bf16 %v1507_v53  ;;  %1174 = vst [vmem:[#allocation2 + $0x3c] sm:$0xe] %v1051_v59  ;;  %v11928_v16 = vld [vmem:[#allocation2 + $0x78] sm:$0xff]   ;;  %v9597_v33 = vld [vmem:[#allocation3 + $0x40] sm:$0xf] }
 0x122   : > { %927 = vst [vmem:[#allocation3 + $0x120] sm:$0xf] %v11877_v15  ;;  %v1081_v30 = vrot.slane %v11877_v15, 7  ;;  %10956 = vpow2.f32 %v757_v57  ;;  %v759_v60 = vmul.f32 1.442695, %v706_v49  ;;  %8231 = vmatmul.bf16.gmra.mxu2 %v11911_v41  ;;  %v11932_v6 = vmax.f32 %v11865_v3, %v1365_v52  ;;  %v576_v52 = vpop.f32.mrf.mxu2 }
 0x123   : > { %15288 = vst [vmem:[#allocation15_spill] sm:$0xff] %v11911_v41  ;;  %v11934_v43 = vmax.f32 %v1410_v25, %v1602_v54  ;;  %v733_v23 = vmul.f32 1.442695, %v693_v58  ;;  %v11936_v5 = vld [vmem:[#allocation2 + $0x80] sm:$0x3]  ;;  %v1321_v20 = vunpack.c.l.bf16 %v11920_v0  ;;  %v11941_v21 = vmax.f32 %v1647_v39, %v1840_v55  ;;  %v10707_v42 = vld [vmem:[#allocation2 + $0x30] sm:$0xff]  }
 0x124   : > { %1192 = vst [vmem:[#allocation2 + $0x84] sm:$0xe] %v1081_v30  ;;  %v11938_v19 = vld [vmem:[#allocation2 + $0x80] sm:$0x3]  ;;  %10958 = vrcp.f32 %v788_v2  ;;  %v574_v24 = vadd.f32 %v11680_v48, %v573_v13  ;;  %v1841_v32 = vunpack.c.l.bf16 %v1745_v35  ;;  %v707_v3 = vsub.f32 0.0, %v11922_v4 }
 0x125   : > { %15289 = vst [vmem:[#allocation16_spill] sm:$0xff] %v11938_v19  ;;  %10960 = vpow2.f32 %v759_v60  ;;  %v9942_v25 = vor.u32 %v10192_v7, %v9941_v62  ;;  %v11947_v36 = vmax.f32 %v1318_v14, %v1366_v9  ;;  %v11949_v38 = vmax.f32 %v1411_v8, %v1603_v11  ;;  %v11955_v37 = vld [vmem:[#allocation2 + $0x80] sm:$0x3] }
 0x126   : > { %v10248_v40 = vunpack.c.l.bf16 %v11928_v16  ;;  %15290 = vst [vmem:[#allocation17_spill] sm:$0xff] %v11955_v37  ;;  %10962 = vpow2.f32 %v733_v23  ;;  %v11958_v14 = vld [vmem:[#allocation2 + $0x80] sm:$0x3]  ;;  %v11964_v54 = vadd.f32 %v662_v28, %v574_v24  ;;  %v539_v55 = vadd.f32 %v11680_v48, %v538_v34  ;;  %v665_v34 = vpop.f32.mrf.mxu3 }
 0x127   : > { %v10955_v27 = vpop.eup %10954  ;;  %8307 = vmatpush.bf16.msrb.mxu3 %v9942_v25  ;;  %15291 = vst [vmem:[#allocation18_spill] sm:$0xff] %v11958_v14  ;;  %v11960_v8 = vld [vmem:[#allocation2 + $0x80] sm:$0x3]  ;;  %v11969_v49 = vunpack.c.l.bf16 %v10707_v42  ;;  %v761_v2 = vmul.f32 1.442695, %v707_v3  ;;  %v577_v58 = vadd.f32 %v11680_v48, %v576_v52  ;;  %v11974_v11 = vmax.f32 %v11901_v45, %v1841_v32  ;;  %v627_v32 = vpop.f32.mrf.mxu1 }
 0x128   : > { %v864_v39 = vmul.f32 %v10955_v27, %v11828_v61  ;;  %v10957_v51 = vpop.eup %10956  ;;  %15292 = vst [vmem:[#allocation19_spill] sm:$0xff] %v11960_v8  ;;  %v1082_v61 = vrot.slane %v1081_v30, 4  ;;  %v11978_v28 = vrot.slane %v1051_v59, 4  ;;  %v11988_v45 = vunpack.c.h.bf16 %v10707_v42  ;;  %v1273_v25 = vld [vmem:[#allocation2 + $0x38] sm:$0x3] }
 0x129   : > { %v801_v62 = vadd.f32 1.0, %v10957_v51  ;;  %v708_v52 = vsub.f32 0.0, %v11964_v54  ;;  %v11995_v51 = vadd.f32 %v627_v32, %v539_v55  ;;  %v1748_v42 = vld [vmem:[#allocation2 + $0x38] sm:$0x3]  ;;  %v12000_v60 = vadd.f32 %v665_v34, %v577_v58  ;;  %v9893_v19 = vld [vmem:[#allocation9 + $0x90] sm:$0xf] }
 0x12a   : > { %v896_v53 = vpack.c.bf16 %v864_v39, %v864_v39  ;;  %v10959_v7 = vpop.eup %10958  ;;  %v11992_v39 = vld [vmem:[#allocation2 + $0x38] sm:$0x3]  ;;  %v1369_v13 = vunpack.c.l.bf16 %v1273_v25  ;;  %v1844_v23 = vunpack.c.l.bf16 %v1748_v42  ;;  %v541_v42 = vpop.f32.mrf.mxu0 }
 0x12b   : > { %v11967_v57 = vld [vmem:[#allocation2 + $0x84] sm:$0xf]  ;;  %v10961_v35 = vpop.eup %10960  ;;  %10964 = vrcp.f32 %v801_v62  ;;  %v852_v55 = vmul.f32 %v10959_v7, %v11833_v56  ;;  %v694_v56 = vsub.f32 0.0, %v11995_v51  ;;  %v709_v7 = vsub.f32 0.0, %v12000_v60  ;;  %v12013_v25 = vld [vmem:[#allocation2 + $0x38] sm:$0x3] }
 0x12c   : > { %v1292_v15 = vld [vmem:[#allocation2 + $0x84] sm:$0xf]  ;;  %928 = vst [vmem:[#allocation3 + $0x130] sm:$0xf] %v896_v53  ;;  %v1083_v30 = vrot.slane %v896_v53, 7  ;;  %v10963_v53 = vpop.eup %10962  ;;  %v802_v44 = vadd.f32 1.0, %v10961_v35  ;;  %v15298_v26 = vunpack.c.l.bf16 %v12013_v25  ;;  %v15300_v25 = vmax.f32 %v11905_v47, %v11969_v49 }
 0x12d   : > { %v11982_v24 = vld [vmem:[#allocation2 + $0x84] sm:$0xf]  ;;  %v1388_v9 = vunpack.c.l.bf16 %v1292_v15  ;;  %v1606_v15 = vunpack.c.l.bf16 %v11992_v39  ;;  %v884_v58 = vpack.c.bf16 %v852_v55, %v852_v55  ;;  %v789_v34 = vadd.f32 1.0, %v10963_v53 }
 0x12e   : > { %15293 = vst [vmem:[#allocation20_spill] sm:$0xff] %v11982_v24  ;;  %v11984_v27 = vld [vmem:[#allocation2 + $0x84] sm:$0xf]  ;;  %v1084_v17 = vsel %vm11801_vm2, %v1082_v61, %v1083_v30  ;;  %v1085_v59 = vrot.slane %v1083_v30, 4  ;;  %10966 = vrcp.f32 %v802_v44  ;;  %v10107_v61 = vld [vmem:[#allocation3 + $0x4c] sm:$0xf0] }
 0x12f   : > { %15294 = vst [vmem:[#allocation21_spill] sm:$0xff] %v11984_v27  ;;  %v11986_v3 = vld [vmem:[#allocation2 + $0x84] sm:$0xf]  ;;  %v12009_v30 = vld [vmem:[#allocation2 + $0x38] sm:$0x3]  ;;  %10968 = vpow2.f32 %v761_v2  ;;  %v1053_v44 = vrot.slane %v884_v58, 7  ;;  %v12017_v2 = vor.u32 %v10107_v61, %v9597_v33  ;;  %v542_v33 = vadd.f32 %v11680_v48, %v541_v42 }
 0x130   : > { %15295 = vst [vmem:[#allocation22_spill] sm:$0xff] %v11986_v3  ;;  %v763_v35 = vmul.f32 1.442695, %v708_v52  ;;  %10970 = vrcp.f32 %v789_v34  ;;  %v735_v55 = vmul.f32 1.442695, %v694_v56  ;;  %v12021_v52 = vmax.f32 %v10248_v40, %v1388_v9 }
 0x131   : > { %1193 = vst [vmem:[#allocation2 + $0x88] sm:$0xf] %v1084_v17  ;;  %v10965_v1 = vpop.eup %10964  ;;  %v765_v32 = vmul.f32 1.442695, %v709_v7  ;;  %v12030_v34 = vld [vmem:[#allocation2 + $0x3c] sm:$0xf]  ;;  %v1054_v40 = vsel %vm11801_vm2, %v11978_v28, %v1053_v44  ;;  %v12042_v61 = vmax.f32 %v1321_v20, %v1369_v13  ;;  %v12046_v7 = vmax.f32 %v11941_v21, %v11988_v45 }
 0x132   : > { %1194 = vst [vmem:[#allocation2 + $0x8c] sm:$0x1] %v1085_v59  ;;  %v578_v59 = vpop.f32.mrf.mxu2  ;;  %v865_v39 = vmul.f32 %v10965_v1, %v11871_v10  ;;  %10972 = vpow2.f32 %v763_v35  ;;  %v12026_v10 = vmax.f32 %v11918_v63, %v11969_v49  ;;  %v12033_v56 = vld [vmem:[#allocation2 + $0x3c] sm:$0xf]  ;;  %8236 = vmatmul.bf16.gmra.mxu2 %v12017_v2  ;;  %v667_v63 = vpop.f32.mrf.mxu3  ;;  %v12051_v28 = vmax.f32 %v11947_v36, %v1606_v15  ;;  %v9933_v20 = vld [vmem:[#allocation9 + $0xe0] sm:$0xf] }
 0x133   : > { %916 = vst [vmem:[#allocation3 + $0x70] sm:$0xf] %v884_v58  ;;  %v579_v53 = vadd.f32 %v11680_v48, %v578_v59  ;;  %v12028_v58 = vld [vmem:[#allocation2 + $0x3c] sm:$0xf]  ;;  %10974 = vpow2.f32 %v735_v55  ;;  %v12054_v55 = vmax.f32 %v11949_v38, %v1844_v23  ;;  %v1370_v0 = vunpack.c.l.bf16 %v12030_v34  ;;  %v10190_v13 = vld [vmem:[#allocation9 + $0xe4] sm:$0xf0]  ;;  %v630_v38 = vpop.f32.mrf.mxu1  ;;  %v543_v47 = vpop.f32.mrf.mxu0 }
 0x134   : > { %15296 = vst [vmem:[#allocation23_spill] sm:$0xff] %v12017_v2  ;;  %v897_v1 = vpack.c.bf16 %v865_v39, %v865_v39  ;;  %v10967_v9 = vpop.eup %10966  ;;  %10976 = vpow2.f32 %v765_v32  ;;  %v1415_v32 = vmax.f32 %v1319_v46, %v11969_v49  ;;  %v9925_v23 = vld [vmem:[#allocation9 + $0xd0] sm:$0xf]  ;;  %v10188_v15 = vld [vmem:[#allocation9 + $0xd4] sm:$0xf0]  ;;  %v1055_v34 = vrot.slane %v1053_v44, 4 }
 0x135   : > { %v12048_v59 = vadd.f32 %v667_v63, %v579_v53  ;;  %v10969_v39 = vpop.eup %10968  ;;  %v1607_v53 = vunpack.c.l.bf16 %v12033_v56  ;;  %v866_v36 = vmul.f32 %v10967_v9, %v11891_v29  ;;  %1175 = vst [vmem:[#allocation2 + $0x40] sm:$0xf] %v1054_v40  ;;  %v1749_v48 = vld [vmem:[#allocation2 + $0x3c] sm:$0xf]  ;;  %v9934_v41 = vor.u32 %v10190_v13, %v9933_v20 }
 0x136   : > { %929 = vst [vmem:[#allocation3 + $0x140] sm:$0xf] %v897_v1  ;;  %v10971_v42 = vpop.eup %10970  ;;  %v1086_v21 = vrot.slane %v897_v1, 7  ;;  %v1987_v17 = vld [vmem:[#allocation2 + $0x3c] sm:$0xf]  ;;  %v803_v62 = vadd.f32 1.0, %v10969_v39  ;;  %v12064_v1 = vadd.f32 %v630_v38, %v542_v33  ;;  %v1845_v39 = vunpack.c.l.bf16 %v1749_v48 }
 0x137   : > { %v853_v35 = vmul.f32 %v10971_v42, %v11874_v12  ;;  %v898_v18 = vpack.c.bf16 %v866_v36, %v866_v36  ;;  %v710_v56 = vsub.f32 0.0, %v12048_v59  ;;  %1176 = vst [vmem:[#allocation2 + $0x44] sm:$0x1] %v1055_v34  ;;  %v12070_v42 = vld [vmem:[#allocation9 + $0xc0] sm:$0xf]  ;;  %8308 = vmatpush.bf16.msrb.mxu3 %v9934_v41  ;;  %v9926_v20 = vor.u32 %v10188_v15, %v9925_v23 }
 0x138   : > { %v10973_v63 = vpop.eup %10972  ;;  %v1087_v2 = vrot.slane %v1086_v21, 4  ;;  %1195 = vst [vmem:[#allocation2 + $0x90] sm:$0xe] %v1086_v21  ;;  %10978 = vrcp.f32 %v803_v62  ;;  %v695_v9 = vsub.f32 0.0, %v12064_v1  ;;  %v12072_v21 = vld [vmem:[#allocation9 + $0xc4] sm:$0xf0]  ;;  %v12088_v62 = vmax.f32 %v11969_v49, %v1370_v0 }
 0x139   : > { %v804_v46 = vadd.f32 1.0, %v10973_v63  ;;  %v10975_v29 = vpop.eup %10974  ;;  %v12067_v40 = vpack.c.bf16 %v853_v35, %v853_v35  ;;  %930 = vst [vmem:[#allocation3 + $0x150] sm:$0xf] %v898_v18  ;;  %v1088_v12 = vrot.slane %v898_v18, 7  ;;  %v12074_v36 = vld [vmem:[#allocation2 + $0x88] sm:$0xf]  ;;  %v2083_v63 = vunpack.c.l.bf16 %v1987_v17 }
 0x13a   : > { %v10977_v44 = vpop.eup %10976  ;;  %v790_v33 = vadd.f32 1.0, %v10975_v29  ;;  %v1293_v38 = vld [vmem:[#allocation2 + $0x88] sm:$0xf]  ;;  %v737_v18 = vmul.f32 1.442695, %v695_v9  ;;  %v12085_v17 = vmax.f32 %v11974_v11, %v15298_v26  ;;  %v1890_v41 = vmax.f32 %v11913_v50, %v11969_v49 }
 0x13b   : > { %10980 = vrcp.f32 %v804_v46  ;;  %917 = vst [vmem:[#allocation3 + $0x80] sm:$0xf] %v12067_v40  ;;  %v805_v35 = vadd.f32 1.0, %v10977_v44  ;;  %v12078_v48 = vld [vmem:[#allocation2 + $0x88] sm:$0xf]  ;;  %v1089_v13 = vsel %vm11801_vm2, %v1087_v2, %v1088_v12  ;;  %v1090_v34 = vrot.slane %v1088_v12, 4  ;;  %v581_v46 = vpop.f32.mrf.mxu2  ;;  %8309 = vmatpush.bf16.msrb.mxu3 %v9926_v20 }
 0x13c   : > { %15297 = vst [vmem:[#allocation24_spill] sm:$0xff] %v12078_v48  ;;  %10982 = vrcp.f32 %v790_v33  ;;  %v1294_v29 = vld [vmem:[#allocation2 + $0x8c] sm:$0x3]  ;;  %v767_v23 = vmul.f32 1.442695, %v710_v56  ;;  %v1389_v2 = vunpack.c.l.bf16 %v1293_v38  ;;  %v12096_v9 = vmax.f32 %v1415_v32, %v1607_v53 }
 0x13d   : > { %1196 = vst [vmem:[#allocation2 + $0x94] sm:$0xf] %v1089_v13  ;;  %v12092_v15 = vld [vmem:[#allocation2 + $0x8c] sm:$0x3]  ;;  %v12101_v26 = vmax.f32 %v15300_v25, %v1845_v39  ;;  %v15302_v11 = vunpack.c.l.bf16 %v11907_v22  ;;  %v12108_v56 = vld [vmem:[#allocation2 + $0x88] sm:$0xf]  ;;  %v12110_v12 = vmax.f32 %v1890_v41, %v2083_v63  ;;  %10984 = vrcp.f32 %v805_v35  ;;  %v670_v13 = vpop.f32.mrf.mxu3 }
 0x13e   : > { %v12094_v44 = vld [vmem:[#allocation2 + $0x8c] sm:$0x3]  ;;  %1197 = vst [vmem:[#allocation2 + $0x98] sm:$0x1] %v1090_v34  ;;  %v10979_v50 = vpop.eup %10978  ;;  %v15304_v53 = vrot.slane %v12067_v40, 7  ;;  %v9918_v49 = vor.u32 %v12072_v21, %v12070_v42  ;;  %v1390_v33 = vunpack.c.l.bf16 %v1294_v29  ;;  %10986 = vpow2.f32 %v737_v18 }
 0x13f   : > { %15299 = vst [vmem:[#allocation25_spill] sm:$0xff] %v12094_v44  ;;  %v12106_v0 = vmax.f32 %v15302_v11, %v11988_v45  ;;  %v1275_v38 = vld [vmem:[#allocation2 + $0x40] sm:$0xf]  ;;  %v867_v63 = vmul.f32 %v10979_v50, %v11922_v4  ;;  %v10184_v41 = vld [vmem:[#allocation9 + $0xb4] sm:$0xf0]  ;;  %10988 = vpow2.f32 %v767_v23  ;;  %v15307_v29 = vunpack.c.h.bf16 %v11928_v16  ;;  %v632_v44 = vpop.f32.mrf.mxu1 }
 0x140   : > { %15301 = vst [vmem:[#allocation26_spill] sm:$0xff] %v12101_v26  ;;  %v9909_v34 = vld [vmem:[#allocation9 + $0xb0] sm:$0xf]  ;;  %v12123_v11 = vld [vmem:[#allocation2 + $0x8c] sm:$0x3]  ;;  %v1371_v25 = vunpack.c.l.bf16 %v1275_v38  ;;  %8310 = vmatpush.bf16.msrb.mxu3 %v9918_v49  ;;  %v15309_v32 = vunpack.c.l.bf16 %v11936_v5 }
 0x141   : > { %15303 = vst [vmem:[#allocation27_spill] sm:$0xff] %v12108_v56  ;;  %v10981_v22 = vpop.eup %10980  ;;  %v12125_v42 = vld [vmem:[#allocation2 + $0x88] sm:$0xf]  ;;  %v12132_v18 = vld [vmem:[#allocation2 + $0x8c] sm:$0x3]  ;;  %v9910_v4 = vor.u32 %v10184_v41, %v9909_v34  ;;  %v15310_v34 = vrot.slane %v12067_v40, 7 }
 0x142   : > { %1177 = vst [vmem:[#allocation2 + $0x48] sm:$0xe] %v15304_v53  ;;  %v10983_v21 = vpop.eup %10982  ;;  %v12129_v53 = vmax.f32 %v15307_v29, %v1389_v2  ;;  %v12134_v50 = vld [vmem:[#allocation2 + $0x40] sm:$0xf]  ;;  %v899_v2 = vpack.c.bf16 %v867_v63, %v867_v63  ;;  %v868_v29 = vmul.f32 %v10981_v22, %v11964_v54  ;;  %v12146_v8 = vmax.f32 %v15309_v32, %v1390_v33  ;;  %v12154_v63 = vld [vmem:[#allocation2 + $0x44] sm:$0x3] }
 0x143   : > { %15305 = vst [vmem:[#allocation28_spill] sm:$0xff] %v12123_v11  ;;  %v1512_v39 = vld [vmem:[#allocation2 + $0x40] sm:$0xf]  ;;  %v12157_v49 = vld [vmem:[#allocation2 + $0x44] sm:$0x3]  ;;  %v1057_v41 = vrot.slane %v15310_v34, 4  ;;  %v12164_v11 = vmax.f32 %v11988_v45, %v1371_v25  ;;  %v1372_v40 = vunpack.c.l.bf16 %v12154_v63 }
 0x144   : > { %15306 = vst [vmem:[#allocation29_spill] sm:$0xff] %v12125_v42  ;;  %v12139_v20 = vld [vmem:[%s15142_s2] ss:$0 sm:$0xff]  ;;  %v1608_v5 = vunpack.c.l.bf16 %v1512_v39  ;;  %v900_v32 = vpack.c.bf16 %v868_v29, %v868_v29  ;;  %v12166_v54 = vld [vmem:[#allocation2 + $0x44] sm:$0x3]  ;;  %v1091_v29 = vrot.slane %v899_v2, 7  ;;  %8311 = vmatpush.bf16.msrb.mxu3 %v9910_v4 }
 0x145   : > { %15308 = vst [vmem:[#allocation30_spill] sm:$0xff] %v12132_v18  ;;  %v582_v35 = vadd.f32 %v12139_v20, %v581_v46  ;;  %v544_v23 = vadd.f32 %v12139_v20, %v543_v47  ;;  %v1750_v16 = vld [vmem:[#allocation2 + $0x40] sm:$0xf]  ;;  %v854_v46 = vmul.f32 %v10983_v21, %v11995_v51  ;;  %v10985_v47 = vpop.eup %10984  ;;  %v583_v21 = vpop.f32.mrf.mxu2  ;;  %v12174_v25 = vld [vmem:[#allocation2 + $0x44] sm:$0x3]  ;;  %v10711_v3 = vld [vmem:[#allocation2 + $0x90] sm:$0xff]  }
 0x146   : > { %v12150_v48 = vld [vmem:[#allocation2 + $0x40] sm:$0xf]  ;;  %v10987_v22 = vpop.eup %10986  ;;  %v1846_v33 = vunpack.c.l.bf16 %v1750_v16  ;;  %931 = vst [vmem:[#allocation3 + $0x160] sm:$0xf] %v899_v2  ;;  %v12177_v18 = vmax.f32 %v12106_v0, %v1608_v5  ;;  %v9613_v4 = vld [vmem:[#allocation3 + $0x60] sm:$0xf]  ;;  %v672_v14 = vpop.f32.mrf.mxu3  ;;  %v15311_v0 = vmax.f32 %v11932_v6, %v11988_v45 }
 0x147   : > { %v886_v56 = vpack.c.bf16 %v854_v46, %v854_v46  ;;  %v12161_v51 = vadd.f32 %v670_v13, %v582_v35  ;;  %v10989_v38 = vpop.eup %10988  ;;  %v2084_v39 = vunpack.c.l.bf16 %v12150_v48  ;;  %932 = vst [vmem:[#allocation3 + $0x170] sm:$0xf] %v900_v32  ;;  %v12169_v16 = vadd.f32 %v632_v44, %v544_v23  ;;  %v10111_v34 = vld [vmem:[#allocation3 + $0x6c] sm:$0xf0]  ;;  %v9901_v23 = vld [vmem:[#allocation9 + $0xa0] sm:$0xf] }
 0x148   : > { %v1609_v46 = vunpack.c.l.bf16 %v12157_v49  ;;  %v1093_v13 = vrot.slane %v900_v32, 7  ;;  %v869_v35 = vmul.f32 %v10985_v47, %v12000_v60  ;;  %v1092_v48 = vrot.slane %v1091_v29, 4  ;;  %1198 = vst [vmem:[#allocation2 + $0x9c] sm:$0xe] %v1091_v29  ;;  %v10182_v63 = vld [vmem:[#allocation9 + $0xa4] sm:$0xf0]  ;;  %v546_v47 = vpop.f32.mrf.mxu0 }
 0x149   : > { %918 = vst [vmem:[#allocation3 + $0x90] sm:$0xf] %v886_v56  ;;  %v1058_v2 = vrot.slane %v886_v56, 7  ;;  %v584_v44 = vadd.f32 %v12139_v20, %v583_v21  ;;  %v1847_v49 = vunpack.c.l.bf16 %v12166_v54  ;;  %v1989_v32 = vld [vmem:[#allocation2 + $0x44] sm:$0x3]  ;;  %v791_v37 = vadd.f32 1.0, %v10987_v22 }
 0x14a   : > { %v1095_v42 = vrot.slane %v1093_v13, 4  ;;  %v806_v60 = vadd.f32 1.0, %v10989_v38  ;;  %v12184_v5 = vmax.f32 %v15311_v0, %v1846_v33  ;;  %v1094_v56 = vsel %vm11801_vm2, %v1092_v48, %v1093_v13  ;;  %v10180_v54 = vld [vmem:[#allocation9 + $0x94] sm:$0xf0]  ;;  %v1297_v27 = vld [vmem:[#allocation2 + $0x98] sm:$0x3] }
 0x14b   : > { %v1059_v21 = vsel %vm11801_vm2, %v1057_v41, %v1058_v2  ;;  %v1060_v29 = vrot.slane %v1058_v2, 4  ;;  %1199 = vst [vmem:[#allocation2 + $0xa0] sm:$0xf] %v1094_v56  ;;  %v12190_v38 = vpack.c.bf16 %v869_v35, %v869_v35  ;;  %10990 = vrcp.f32 %v791_v37  ;;  %v1534_v33 = vld [vmem:[#allocation2 + $0x98] sm:$0x3] }
 0x14c   : > { %15312 = vst [vmem:[#allocation31_spill] sm:$0xff] %v12184_v5  ;;  %v696_v22 = vsub.f32 0.0, %v12169_v16  ;;  %v12193_v6 = vor.u32 %v10111_v34, %v9613_v4  ;;  %v2085_v0 = vunpack.c.l.bf16 %v1989_v32  ;;  %10992 = vrcp.f32 %v806_v60  ;;  %v12209_v34 = vld [vmem:[#allocation2 + $0x98] sm:$0x3] }
 0x14d   : > { %1200 = vst [vmem:[#allocation2 + $0xa4] sm:$0x1] %v1095_v42  ;;  %v711_v13 = vsub.f32 0.0, %v12161_v51  ;;  %v12196_v41 = vadd.f32 %v672_v14, %v584_v44  ;;  %v15314_v2 = vunpack.c.l.bf16 %v12009_v30  ;;  %v15315_v37 = vmax.f32 %v11934_v43, %v11988_v45 }
 0x14e   : > { %15313 = vst [vmem:[#allocation32_spill] sm:$0xff] %v12193_v6  ;;  %8241 = vmatmul.bf16.gmra.mxu2 %v12193_v6  ;;  %v9902_v42 = vor.u32 %v10182_v63, %v9901_v23  ;;  %v1393_v4 = vunpack.c.l.bf16 %v1297_v27  ;;  %v12212_v14 = vmax.f32 %v12042_v61, %v1609_v46  ;;  %v12214_v44 = vunpack.c.l.bf16 %v10711_v3  ;;  %v10178_v23 = vld [vmem:[#allocation9 + $0x84] sm:$0xf0] }
 0x14f   : > { %v12201_v56 = vmax.f32 %v15314_v2, %v1372_v40  ;;  %v12206_v35 = vmax.f32 %v15315_v37, %v2084_v39  ;;  %1178 = vst [vmem:[#allocation2 + $0x4c] sm:$0xf] %v1059_v21  ;;  %v712_v30 = vsub.f32 0.0, %v12196_v41  ;;  %v9885_v40 = vld [vmem:[#allocation9 + $0x80] sm:$0xf]  ;;  %v1630_v32 = vunpack.c.l.bf16 %v1534_v33  ;;  %v635_v39 = vpop.f32.mrf.mxu1 }
 0x150   : > { %15316 = vst [vmem:[#allocation33_spill] sm:$0xff] %v12214_v44  ;;  %v1096_v43 = vrot.slane %v12190_v38, 7  ;;  %v739_v45 = vmul.f32 1.442695, %v696_v22  ;;  %8312 = vmatpush.bf16.msrb.mxu3 %v9902_v42  ;;  %v9894_v60 = vor.u32 %v10180_v54, %v9893_v19  ;;  %v12218_v63 = vunpack.c.h.bf16 %v10711_v3  ;;  %v12220_v27 = vld [vmem:[#allocation2 + $0x98] sm:$0x3] }
 0x151   : > { %1179 = vst [vmem:[#allocation2 + $0x50] sm:$0x1] %v1060_v29  ;;  %v12223_v61 = vmax.f32 %v12051_v28, %v1847_v49  ;;  %v12226_v46 = vmax.f32 %v12054_v55, %v2085_v0  ;;  %v769_v21 = vmul.f32 1.442695, %v711_v13  ;;  %v10991_v29 = vpop.eup %10990  ;;  %v12231_v19 = vld [vmem:[#allocation2 + $0x98] sm:$0x3]  ;;  %v547_v3 = vadd.f32 %v12139_v20, %v546_v47 }
 0x152   : > { %15317 = vst [vmem:[#allocation34_spill] sm:$0xff] %v12218_v63  ;;  %v771_v54 = vmul.f32 1.442695, %v712_v30  ;;  %v10993_v2 = vpop.eup %10992  ;;  %v15321_v28 = vunpack.c.l.bf16 %v12092_v15  ;;  %v15322_v0 = vunpack.c.l.bf16 %v11967_v57  ;;  %v855_v37 = vmul.f32 %v10991_v29, %v12064_v1  ;;  %v1535_v33 = vld [vmem:[#allocation2 + $0x9c] sm:$0xf] }
 0x153   : > { %15318 = vst [vmem:[#allocation35_spill] sm:$0xff] %v12220_v27  ;;  %v12244_v42 = vmax.f32 %v12146_v8, %v1630_v32  ;;  %v1676_v47 = vmax.f32 %v12021_v52, %v12214_v44  ;;  %v1773_v30 = vld [vmem:[#allocation2 + $0x9c] sm:$0xf]  ;;  %v1299_v15 = vld [vmem:[#allocation2 + $0xa0] sm:$0xf]  ;;  %10994 = vpow2.f32 %v739_v45  ;;  %v9886_v55 = vor.u32 %v10178_v23, %v9885_v40 }
 0x154   : > { %15319 = vst [vmem:[#allocation36_spill] sm:$0xff] %v12226_v46  ;;  %v12236_v49 = vmax.f32 %v15321_v28, %v1393_v4  ;;  %v1439_v13 = vmax.f32 %v15322_v0, %v12214_v44  ;;  %8313 = vmatpush.bf16.msrb.mxu3 %v9894_v60  ;;  %v586_v4 = vpop.f32.mrf.mxu2  ;;  %v548_v28 = vpop.f32.mrf.mxu0  ;;  %v15323_v57 = vunpack.c.l.bf16 %v12074_v36  ;;  %v1536_v48 = vld [vmem:[#allocation2 + $0xa0] sm:$0xf]  ;;  %v12251_v1 = vpack.c.bf16 %v855_v37, %v855_v37  ;;  %v12254_v29 = vld [vmem:[#allocation2 + $0x9c] sm:$0xf] }
 0x155   : > { %933 = vst [vmem:[#allocation3 + $0x180] sm:$0xf] %v12190_v38  ;;  %v1298_v38 = vld [vmem:[#allocation2 + $0x9c] sm:$0xf]  ;;  %10996 = vpow2.f32 %v769_v21  ;;  %v587_v8 = vadd.f32 %v12139_v20, %v586_v4  ;;  %v1300_v52 = vld [vmem:[#allocation2 + $0xa4] sm:$0x3]  ;;  %v870_v45 = vmul.f32 %v10993_v2, %v12048_v59  ;;  %v12257_v60 = vadd.f32 %v635_v39, %v547_v3  ;;  %v675_v59 = vpop.f32.mrf.mxu3 }
 0x156   : > { %15320 = vst [vmem:[#allocation37_spill] sm:$0xff] %v12231_v19  ;;  %v1440_v0 = vmax.f32 %v15323_v57, %v12218_v63  ;;  %v1394_v32 = vunpack.c.l.bf16 %v1298_v38  ;;  %v1537_v22 = vld [vmem:[#allocation2 + $0xa4] sm:$0x3]  ;;  %10998 = vpow2.f32 %v771_v54  ;;  %v12259_v40 = vld [vmem:[#allocation2 + $0x9c] sm:$0xf]  ;;  %v1631_v36 = vunpack.c.l.bf16 %v1535_v33 }
 0x157   : > { %1201 = vst [vmem:[#allocation2 + $0xa8] sm:$0xe] %v1096_v43  ;;  %v1869_v23 = vunpack.c.l.bf16 %v1773_v30  ;;  %v1395_v57 = vunpack.c.l.bf16 %v1299_v15  ;;  %v549_v37 = vadd.f32 %v12139_v20, %v548_v28  ;;  %v1632_v4 = vunpack.c.l.bf16 %v1536_v48  ;;  %v1774_v33 = vld [vmem:[#allocation2 + $0xa0] sm:$0xf]  ;;  %v1775_v2 = vld [vmem:[#allocation2 + $0xa4] sm:$0x3]  ;;  %v637_v21 = vpop.f32.mrf.mxu1 }
 0x158   : > { %15324 = vst [vmem:[#allocation38_spill] sm:$0xff] %v12254_v29  ;;  %v1677_v38 = vmax.f32 %v12129_v53, %v12218_v63  ;;  %v1097_v6 = vrot.slane %v1096_v43, 4  ;;  %8314 = vmatpush.bf16.msrb.mxu3 %v9886_v55  ;;  %v1396_v3 = vunpack.c.l.bf16 %v1300_v52  ;;  %v1633_v54 = vunpack.c.l.bf16 %v1537_v22  ;;  %v1279_v52 = vld [vmem:[#allocation2 + $0x50] sm:$0x3] }
 0x159   : > { %919 = vst [vmem:[#allocation3 + $0xa0] sm:$0xf] %v12251_v1  ;;  %v12267_v30 = vadd.f32 %v675_v59, %v587_v8  ;;  %v10995_v15 = vpop.eup %10994  ;;  %v12270_v28 = vmax.f32 %v12214_v44, %v1394_v32  ;;  %v902_v53 = vpack.c.bf16 %v870_v45, %v870_v45  ;;  %v697_v43 = vsub.f32 0.0, %v12257_v60  ;;  %v12281_v8 = vld [vmem:[#allocation2 + $0xa0] sm:$0xf] }
 0x15a   : > { %v12274_v55 = vmax.f32 %v1439_v13, %v1631_v36  ;;  %v12276_v39 = vmax.f32 %v1676_v47, %v1869_v23  ;;  %v12279_v22 = vmax.f32 %v12218_v63, %v1395_v57  ;;  %15326 = vst [vmem:[#allocation40_spill] sm:$0xff] %v12281_v8  ;;  %v12283_v59 = vadd.f32 %v637_v21, %v549_v37  ;;  %v1516_v29 = vld [vmem:[#allocation2 + $0x50] sm:$0x3]  ;;  %v12296_v57 = vld [vmem:[#allocation2 + $0xa4] sm:$0x3] }
 0x15b   : > { %15325 = vst [vmem:[#allocation39_spill] sm:$0xff] %v12270_v28  ;;  %v10997_v19 = vpop.eup %10996  ;;  %v12285_v27 = vmax.f32 %v1440_v0, %v1632_v4  ;;  %v1870_v45 = vunpack.c.l.bf16 %v1774_v33  ;;  %v1871_v48 = vunpack.c.l.bf16 %v1775_v2  ;;  %v15327_v44 = vrot.slane %v12251_v1, 7  ;;  %v10708_v0 = vld [vmem:[#allocation2 + $0x48] sm:$0xff]   ;;  %v12299_v21 = vld [vmem:[#allocation2 + $0x50] sm:$0x3] }
 0x15c   : > { %v10999_v32 = vpop.eup %10998  ;;  %v1098_v13 = vrot.slane %v902_v53, 7  ;;  %v15328_v47 = vunpack.c.l.bf16 %v12209_v34  ;;  %v12294_v23 = vmax.f32 %v12236_v49, %v1633_v54  ;;  %15329 = vst [vmem:[#allocation41_spill] sm:$0xff] %v12296_v57  ;;  %v1754_v4 = vld [vmem:[#allocation2 + $0x50] sm:$0x3]  ;;  %v792_v33 = vadd.f32 1.0, %v10995_v15 }
 0x15d   : > { %1180 = vst [vmem:[#allocation2 + $0x54] sm:$0xe] %v15327_v44  ;;  %v1992_v2 = vld [vmem:[#allocation2 + $0x50] sm:$0x3]  ;;  %v808_v49 = vadd.f32 1.0, %v10999_v32  ;;  %v698_v54 = vsub.f32 0.0, %v12283_v59  ;;  %v1375_v63 = vunpack.c.l.bf16 %v1279_v52  ;;  %v1612_v24 = vunpack.c.l.bf16 %v1516_v29 }
 0x15e   : > { %v12291_v36 = vmax.f32 %v15328_v47, %v1396_v3  ;;  %934 = vst [vmem:[#allocation3 + $0x190] sm:$0xf] %v902_v53  ;;  %v1099_v44 = vsel %vm11801_vm2, %v1097_v6, %v1098_v13  ;;  %v1100_v34 = vrot.slane %v1098_v13, 4  ;;  %v807_v3 = vadd.f32 1.0, %v10997_v19 }
 0x15f   : > { %v741_v47 = vmul.f32 1.442695, %v697_v43  ;;  %1202 = vst [vmem:[#allocation2 + $0xac] sm:$0xf] %v1099_v44  ;;  %11000 = vrcp.f32 %v792_v33  ;;  %v713_v37 = vsub.f32 0.0, %v12267_v30  ;;  %v12306_v15 = vmax.f32 %v1677_v38, %v1870_v45 }
 0x160   : > { %1203 = vst [vmem:[#allocation2 + $0xb0] sm:$0x1] %v1100_v34  ;;  %11002 = vrcp.f32 %v807_v3  ;;  %v12309_v6 = vmax.f32 %v12244_v42, %v1871_v48  ;;  %v1850_v19 = vunpack.c.l.bf16 %v1754_v4  ;;  %v12311_v53 = vunpack.c.l.bf16 %v10708_v0  ;;  %v10005_v4 = vld [vmem:[#allocation9 + $0x170] sm:$0xf] }
 0x161   : > { %v2088_v32 = vunpack.c.l.bf16 %v1992_v2  ;;  %11004 = vpow2.f32 %v741_v47  ;;  %v743_v13 = vmul.f32 1.442695, %v698_v54  ;;  %v773_v33 = vmul.f32 1.442695, %v713_v37 }
 0x162   : > { %11006 = vrcp.f32 %v808_v49  ;;  %v2321_v52 = vrot.slane %v12026_v10, 1  ;;  %v2322_v29 = vrot.slane %v12046_v7, 1  ;;  %v15330_v38 = vunpack.c.l.bf16 %v12174_v25 }
 0x163   : > { %v12321_v42 = vmax.f32 %v12201_v56, %v1612_v24  ;;  %v12323_v48 = vunpack.c.h.bf16 %v10708_v0  ;;  %v12326_v44 = vmax.f32 %v12212_v14, %v1850_v19  ;;  %v15331_v37 = vunpack.c.l.bf16 %v12028_v58 }
 0x164   : > { %v12318_v45 = vmax.f32 %v15330_v38, %v1375_v63  ;;  %v10208_v63 = vld [vmem:[#allocation9 + $0x174] sm:$0xf0]  ;;  %v2324_v24 = vrot.slane %v12085_v17, 1  ;;  %v12337_v0 = vmax.f32 %v12223_v61, %v2088_v32  ;;  %11008 = vpow2.f32 %v743_v13  ;;  %v12342_v54 = vld [vmem:[#allocation2 + $0x54] sm:$0xf] }
 0x165   : > { %v11001_v2 = vpop.eup %11000  ;;  %v12331_v34 = vmax.f32 %v15331_v37, %v12311_v53  ;;  %v10006_v14 = vor.u32 %v10208_v63, %v10005_v4  ;;  %v15333_v49 = vrot.slane %v12251_v1, 7  ;;  %15334 = vst [vmem:[#allocation43_spill] sm:$0xff] %v12342_v54  ;;  %v1896_v19 = vmax.f32 %v12096_v9, %v12311_v53  ;;  %v1280_v61 = vld [vmem:[#allocation2 + $0x54] sm:$0xf] }
 0x166   : > { %v11003_v56 = vpop.eup %11002  ;;  %15332 = vst [vmem:[#allocation42_spill] sm:$0xff] %v12337_v0  ;;  %v10712_v3 = vld [vmem:[#allocation2 + $0xa8] sm:$0xff]   ;;  %v856_v47 = vmul.f32 %v11001_v2, %v12169_v16  ;;  %11010 = vpow2.f32 %v773_v33  ;;  %v12347_v38 = vsel %vm2320_vm3, %v2321_v52, %v2322_v29  ;;  %v1517_v32 = vld [vmem:[#allocation2 + $0x54] sm:$0xf]  ;;  %v15335_v16 = vunpack.c.l.bf16 %v12134_v50 }
 0x167   : > { %v1062_v58 = vrot.slane %v15333_v49, 4  ;;  %v11005_v37 = vpop.eup %11004  ;;  %v871_v1 = vmul.f32 %v11003_v56, %v12161_v51  ;;  %8396 = vmatpush.bf16.msrb.mxu0 %v10006_v14  ;;  %v1755_v9 = vld [vmem:[#allocation2 + $0x54] sm:$0xf]  ;;  %v12356_v63 = vunpack.c.l.bf16 %v10712_v3  ;;  %v10069_v49 = vld [vmem:[#allocation9 + $0x1f0] sm:$0xf]  ;;  %v12363_v50 = vsel %vm2320_vm3, %v2322_v29, %v2324_v24 }
 0x168   : > { %v888_v8 = vpack.c.bf16 %v856_v47, %v856_v47  ;;  %v12352_v13 = vmax.f32 %v15335_v16, %v12323_v48  ;;  %v11007_v2 = vpop.eup %11006  ;;  %v1993_v33 = vld [vmem:[#allocation2 + $0x54] sm:$0xf]  ;;  %v10224_v16 = vld [vmem:[#allocation9 + $0x1f4] sm:$0xf0]  ;;  %v1376_v4 = vunpack.c.l.bf16 %v1280_v61  ;;  %v1613_v25 = vunpack.c.l.bf16 %v1517_v32  ;;  %v1540_v52 = vld [vmem:[#allocation2 + $0xb0] sm:$0x3] }
 0x169   : > { %v903_v14 = vpack.c.bf16 %v871_v1, %v871_v1  ;;  %v1778_v57 = vld [vmem:[#allocation2 + $0xb0] sm:$0x3]  ;;  %v793_v0 = vadd.f32 1.0, %v11005_v37  ;;  %v872_v54 = vmul.f32 %v11007_v2, %v12196_v41  ;;  %v1851_v5 = vunpack.c.l.bf16 %v1755_v9 }
 0x16a   : > { %920 = vst [vmem:[#allocation3 + $0xb0] sm:$0xf] %v888_v8  ;;  %v1063_v56 = vrot.slane %v888_v8, 7  ;;  %v11009_v29 = vpop.eup %11008  ;;  %v2016_v24 = vld [vmem:[#allocation2 + $0xb0] sm:$0x3]  ;;  %v2089_v61 = vunpack.c.l.bf16 %v1993_v33  ;;  %v10070_v32 = vor.u32 %v10224_v16, %v10069_v49  ;;  %v12373_v26 = vunpack.c.h.bf16 %v10712_v3 }
 0x16b   : > { %935 = vst [vmem:[#allocation3 + $0x1a0] sm:$0xf] %v903_v14  ;;  %v1101_v1 = vrot.slane %v903_v14, 7  ;;  %11012 = vrcp.f32 %v793_v0  ;;  %v904_v47 = vpack.c.bf16 %v872_v54, %v872_v54  ;;  %v2434_v28 = vmax.f32 %v12046_v7, %v12363_v50 }
 0x16c   : > { %v1064_v51 = vsel %vm11801_vm2, %v1062_v58, %v1063_v56  ;;  %v1065_v8 = vrot.slane %v1063_v56, 4  ;;  %v11011_v43 = vpop.eup %11010  ;;  %v1636_v58 = vunpack.c.l.bf16 %v1540_v52  ;;  %v1874_v56 = vunpack.c.l.bf16 %v1778_v57  ;;  %8485 = vmatpush.bf16.msrb.mxu1 %v10070_v32 }
 0x16d   : > { %1181 = vst [vmem:[#allocation2 + $0x58] sm:$0xf] %v1064_v51  ;;  %v1102_v37 = vrot.slane %v1101_v1, 4  ;;  %v2112_v46 = vunpack.c.l.bf16 %v2016_v24  ;;  %v794_v41 = vadd.f32 1.0, %v11009_v29  ;;  %v12378_v2 = vmax.f32 %v12311_v53, %v1376_v4 }
 0x16e   : > { %1182 = vst [vmem:[#allocation2 + $0x5c] sm:$0x1] %v1065_v8  ;;  %v12381_v0 = vmax.f32 %v12331_v34, %v1613_v25  ;;  %v1103_v3 = vrot.slane %v904_v47, 7  ;;  %v809_v9 = vadd.f32 1.0, %v11011_v43  ;;  %v15336_v54 = vmax.f32 %v12088_v62, %v12311_v53 }
 0x16f   : > { %1204 = vst [vmem:[#allocation2 + $0xb4] sm:$0xe] %v1101_v1  ;;  %v12388_v52 = vmax.f32 %v1896_v19, %v2089_v61  ;;  %v2531_v57 = vrot.slane %v12046_v7, 2  ;;  %v2533_v49 = vrot.slane %v12085_v17, 2  ;;  %v12394_v4 = vmax.f32 %v12276_v39, %v12356_v63 }
 0x170   : > { %936 = vst [vmem:[#allocation3 + $0x1b0] sm:$0xf] %v904_v47  ;;  %v12386_v33 = vmax.f32 %v15336_v54, %v1851_v5  ;;  %v12398_v34 = vmax.f32 %v12306_v15, %v12373_v26  ;;  %v15339_v43 = vunpack.c.l.bf16 %v12259_v40  ;;  %v1104_v5 = vsel %vm11801_vm2, %v1102_v37, %v1103_v3  ;;  %v551_v54 = vpop.f32.mrf.mxu0 }
 0x171   : > { %15337 = vst [vmem:[#allocation44_spill] sm:$0xff] %v12394_v4  ;;  %v11013_v25 = vpop.eup %11012  ;;  %v12408_v19 = vmax.f32 %v12291_v36, %v1636_v58  ;;  %v12411_v47 = vmax.f32 %v12294_v23, %v1874_v56  ;;  %v12414_v39 = vmax.f32 %v12309_v6, %v2112_v46  ;;  %11014 = vrcp.f32 %v794_v41 }
 0x172   : > { %15338 = vst [vmem:[#allocation45_spill] sm:$0xff] %v12398_v34  ;;  %v12403_v62 = vmax.f32 %v15339_v43, %v12356_v63  ;;  %v857_v40 = vmul.f32 %v11013_v25, %v12257_v60  ;;  %11016 = vrcp.f32 %v809_v9  ;;  %v2739_v50 = vrot.slane %v12026_v10, 3  ;;  %v588_v9 = vpop.f32.mrf.mxu2 }
 0x173   : > { %15340 = vst [vmem:[#allocation46_spill] sm:$0xff] %v12414_v39  ;;  %v15341_v36 = vrot.slane %v12026_v10, 2  ;;  %v2534_v23 = vsel %vm2529_vm4, %v2531_v57, %v2533_v49  ;;  %v2740_v46 = vrot.slane %v12046_v7, 3  ;;  %v2742_v6 = vrot.slane %v12085_v17, 3 }
 0x174   : > { %1205 = vst [vmem:[#allocation2 + $0xb8] sm:$0xf] %v1104_v5  ;;  %v1281_v15 = vld [vmem:[#allocation2 + $0x58] sm:$0xf]  ;;  %v889_v24 = vpack.c.bf16 %v857_v40, %v857_v40  ;;  %v1105_v8 = vrot.slane %v1103_v3, 4  ;;  %v15342_v60 = vmax.f32 %v12026_v10, %v12347_v38  ;;  %v12427_v61 = vmax.f32 %v2434_v28, %v2534_v23  ;;  %v640_v38 = vpop.f32.mrf.mxu1 }
 0x175   : > { %v1282_v51 = vld [vmem:[#allocation2 + $0x5c] sm:$0x3]  ;;  %v1518_v14 = vld [vmem:[#allocation2 + $0x58] sm:$0xf]  ;;  %v2532_v16 = vsel %vm2529_vm4, %v15341_v36, %v2531_v57  ;;  %v1377_v32 = vunpack.c.l.bf16 %v1281_v15  ;;  %v1920_v58 = vmax.f32 %v12274_v55, %v12356_v63  ;;  %v2948_v56 = vrot.slane %v12026_v10, 4 }
 0x176   : > { %v1519_v29 = vld [vmem:[#allocation2 + $0x5c] sm:$0x3]  ;;  %v2642_v1 = vmax.f32 %v15342_v60, %v2532_v16  ;;  %v1756_v37 = vld [vmem:[#allocation2 + $0x58] sm:$0xf]  ;;  %v2949_v41 = vrot.slane %v12046_v7, 4  ;;  %v1378_v3 = vunpack.c.l.bf16 %v1282_v51  ;;  %v1614_v49 = vunpack.c.l.bf16 %v1518_v14 }
 0x177   : > { %v12433_v57 = vld [vmem:[#allocation2 + $0x58] sm:$0xf]  ;;  %v11015_v28 = vpop.eup %11014  ;;  %v1615_v43 = vunpack.c.l.bf16 %v1519_v29  ;;  %v1757_v5 = vld [vmem:[#allocation2 + $0x5c] sm:$0x3]  ;;  %921 = vst [vmem:[#allocation3 + $0xc0] sm:$0xf] %v889_v24  ;;  %v2741_v10 = vsel %vm2738_vm5, %v2739_v50, %v2740_v46  ;;  %v2743_v7 = vsel %vm2738_vm5, %v2740_v46, %v2742_v6  ;;  %v1852_v40 = vunpack.c.l.bf16 %v1756_v37 }
 0x178   : > { %v11017_v15 = vpop.eup %11016  ;;  %v1994_v36 = vld [vmem:[#allocation2 + $0x58] sm:$0xf]  ;;  %v1995_v51 = vld [vmem:[#allocation2 + $0x5c] sm:$0x3]  ;;  %1206 = vst [vmem:[#allocation2 + $0xbc] sm:$0x1] %v1105_v8  ;;  %v2851_v14 = vmax.f32 %v2642_v1, %v2741_v10  ;;  %v2852_v16 = vmax.f32 %v12427_v61, %v2743_v7  ;;  %v589_v23 = vadd.f32 %v12139_v20, %v588_v9  ;;  %v12445_v60 = vmax.f32 %v12323_v48, %v1377_v32 }
 0x179   : > { %v1066_v25 = vrot.slane %v889_v24, 7  ;;  %v2950_v50 = vsel %vm2947_vm6, %v2948_v56, %v2949_v41  ;;  %v15343_v46 = vunpack.c.l.bf16 %v12299_v21  ;;  %v12453_v8 = vmax.f32 %v12352_v13, %v1614_v49  ;;  %v10115_v37 = vld [vmem:[#allocation3 + $0x8c] sm:$0xf0]  ;;  %v677_v56 = vpop.f32.mrf.mxu3  ;;  %v12460_v7 = vld [vmem:[#allocation2 + $0x5c] sm:$0x3] }
 0x17a   : > { %v1853_v1 = vunpack.c.l.bf16 %v1757_v5  ;;  %v858_v61 = vmul.f32 %v11015_v28, %v12283_v59  ;;  %v12457_v9 = vmax.f32 %v12318_v45, %v1615_v43  ;;  %v2090_v32 = vunpack.c.l.bf16 %v1994_v36  ;;  %v9629_v28 = vld [vmem:[#allocation3 + $0x80] sm:$0xf]  ;;  %v12468_v45 = vld [vmem:[#allocation2 + $0xb4] sm:$0xf] }
 0x17b   : > { %v12450_v6 = vmax.f32 %v15343_v46, %v1378_v3  ;;  %v2091_v10 = vunpack.c.l.bf16 %v1995_v51  ;;  %1183 = vst [vmem:[#allocation2 + $0x60] sm:$0xe] %v1066_v25  ;;  %v873_v24 = vmul.f32 %v11017_v15, %v12267_v30  ;;  %v15344_v21 = vmax.f32 %v12164_v11, %v12323_v48  ;;  %v1304_v43 = vld [vmem:[#allocation2 + $0xb4] sm:$0xf] }
 0x17c   : > { %v890_v3 = vpack.c.bf16 %v858_v61, %v858_v61  ;;  %v2951_v59 = vrot.slane %v12085_v17, 4  ;;  %v3060_v49 = vmax.f32 %v2851_v14, %v2950_v50  ;;  %v1067_v5 = vrot.slane %v1066_v25, 4  ;;  %v1541_v50 = vld [vmem:[#allocation2 + $0xb4] sm:$0xf] }
 0x17d   : > { %v12465_v13 = vmax.f32 %v15344_v21, %v1852_v40  ;;  %v12470_v36 = vpack.c.bf16 %v873_v24, %v873_v24  ;;  %v12472_v30 = vor.u32 %v10115_v37, %v9629_v28  ;;  %v552_v15 = vadd.f32 %v12139_v20, %v551_v54  ;;  %v1779_v25 = vld [vmem:[#allocation2 + $0xb4] sm:$0xf]  ;;  %v553_v37 = vpop.f32.mrf.mxu0 }
 0x17e   : > { %922 = vst [vmem:[#allocation3 + $0xd0] sm:$0xf] %v890_v3  ;;  %v1068_v51 = vrot.slane %v890_v3, 7  ;;  %v2952_v11 = vsel %vm2947_vm6, %v2949_v41, %v2951_v59  ;;  %v3092_v40 = vpack.c.bf16 %v3060_v49, %v3060_v49  ;;  %v12476_v46 = vadd.f32 %v677_v56, %v589_v23  ;;  %v2017_v23 = vld [vmem:[#allocation2 + $0xb4] sm:$0xf] }
 0x17f   : > { %15345 = vst [vmem:[#allocation47_spill] sm:$0xff] %v12472_v30  ;;  %v12480_v14 = vmax.f32 %v12321_v42, %v1853_v1  ;;  %v3061_v61 = vmax.f32 %v2852_v16, %v2952_v11  ;;  %8246 = vmatmul.bf16.gmra.mxu2 %v12472_v30  ;;  %v12484_v54 = vadd.f32 %v640_v38, %v552_v15  ;;  %v1400_v24 = vunpack.c.l.bf16 %v1304_v43  ;;  %v1780_v42 = vld [vmem:[#allocation2 + $0xb8] sm:$0xf] }
 0x180   : > { %937 = vst [vmem:[#allocation3 + $0x1c0] sm:$0xf] %v12470_v36  ;;  %v1069_v56 = vsel %vm11801_vm2, %v1067_v5, %v1068_v51  ;;  %v1070_v21 = vrot.slane %v1068_v51, 4  ;;  %v15176_v1 = vrot.slane %v12470_v36, 7  ;;  %v3188_v16 = vrot.slane %v3092_v40, 7 }
 0x181   : > { %3124 = vst [vmem:[#allocation3 + $0x4] sm:$0xf] %v3092_v40  ;;  %v3093_v3 = vpack.c.bf16 %v3061_v61, %v3061_v61  ;;  %v699_v59 = vsub.f32 0.0, %v12484_v54  ;;  %v15346_v38 = vmax.f32 %v12177_v18, %v12323_v48  ;;  %v12497_v28 = vmax.f32 %v12326_v44, %v2091_v10  ;;  %v2018_v43 = vld [vmem:[#allocation2 + $0xb8] sm:$0xf]  ;;  %v591_v18 = vpop.f32.mrf.mxu2 }
 0x182   : > { %1184 = vst [vmem:[#allocation2 + $0x64] sm:$0xf] %v1069_v56  ;;  %v714_v5 = vsub.f32 0.0, %v12476_v46  ;;  %v554_v15 = vadd.f32 %v12139_v20, %v553_v37  ;;  %v1637_v51 = vunpack.c.l.bf16 %v1541_v50  ;;  %v1875_v11 = vunpack.c.l.bf16 %v1779_v25  ;;  %v1781_v61 = vld [vmem:[#allocation2 + $0xbc] sm:$0x3] }
 0x183   : > { %v12494_v49 = vmax.f32 %v15346_v38, %v2090_v32  ;;  %1185 = vst [vmem:[#allocation2 + $0x68] sm:$0x1] %v1070_v21  ;;  %v3189_v40 = vrot.slane %v3188_v16, 4  ;;  %v3190_v56 = vrot.slane %v3093_v3, 7  ;;  %v642_v32 = vpop.f32.mrf.mxu1  ;;  %v745_v38 = vmul.f32 1.442695, %v699_v59  ;;  %v680_v59 = vpop.f32.mrf.mxu3 }
 0x184   : > { %1207 = vst [vmem:[#allocation2 + $0xc0] sm:$0xe] %v15176_v1  ;;  %v775_v44 = vmul.f32 1.442695, %v714_v5  ;;  %v592_v10 = vadd.f32 %v12139_v20, %v591_v18  ;;  %v12504_v21 = vadd.f32 %v642_v32, %v554_v15  ;;  %v12507_v41 = vmax.f32 %v12356_v63, %v1400_v24  ;;  %v2019_v25 = vld [vmem:[#allocation2 + $0xbc] sm:$0x3] }
 0x185   : > { %3125 = vst [vmem:[#allocation3 + $0x14] sm:$0xf] %v3093_v3  ;;  %v2113_v50 = vunpack.c.l.bf16 %v2017_v23  ;;  %v3191_v37 = vsel %vm11801_vm2, %v3189_v40, %v3190_v56  ;;  %v3192_v29 = vrot.slane %v3190_v56, 4  ;;  %v1876_v17 = vunpack.c.l.bf16 %v1780_v42 }
 0x186   : > { %3316 = vst [vmem:[#allocation2 + $0x18] sm:$0xe] %v3188_v16  ;;  %11018 = vpow2.f32 %v745_v38  ;;  %v700_v3 = vsub.f32 0.0, %v12504_v21  ;;  %v2327_v20 = vrot.slane %v12206_v35, 1  ;;  %v2114_v5 = vunpack.c.l.bf16 %v2018_v43  ;;  %v15347_v16 = vld [vmem:[#allocation36_spill] sm:$0xff]  ;;  %v15348_v38 = vld [vmem:[#allocation39_spill] sm:$0xff] }
 0x187   : > { %3317 = vst [vmem:[#allocation2 + $0x1c] sm:$0xf] %v3191_v37  ;;  %11020 = vpow2.f32 %v775_v44  ;;  %v12513_v24 = vadd.f32 %v680_v59, %v592_v10  ;;  %v2326_v23 = vrot.slane %v12110_v12, 1  ;;  %v1877_v15 = vunpack.c.l.bf16 %v1781_v61  ;;  %v9997_v59 = vld [vmem:[#allocation9 + $0x160] sm:$0xf] }
 0x188   : > { %3318 = vst [vmem:[#allocation2 + $0x20] sm:$0x1] %v3192_v29  ;;  %v2115_v18 = vunpack.c.l.bf16 %v2019_v25  ;;  %v747_v56 = vmul.f32 1.442695, %v700_v3  ;;  %v2329_v42 = vrot.slane %v15347_v16, 1  ;;  %v12518_v32 = vmax.f32 %v12403_v62, %v1637_v51 }
 0x189   : > { %v10709_v40 = vld [vmem:[#allocation2 + $0x60] sm:$0xff]   ;;  %v15349_v37 = vmax.f32 %v15348_v38, %v12356_v63  ;;  %v10097_v44 = vld [vmem:[#allocation3 + $0x4] sm:$0xf]  ;;  %v12532_v61 = vmax.f32 %v1920_v58, %v2113_v50  ;;  %v15351_v10 = vmax.f32 %v12279_v22, %v12373_v26  ;;  %v2328_v51 = vsel %vm2320_vm3, %v2326_v23, %v2327_v20  ;;  %v10222_v38 = vld [vmem:[#allocation9 + $0x1e4] sm:$0xf0] }
 0x18a   : > { %v12525_v29 = vunpack.c.l.bf16 %v10709_v40  ;;  %v12527_v43 = vunpack.c.h.bf16 %v10709_v40  ;;  %11022 = vpow2.f32 %v747_v56  ;;  %v715_v22 = vsub.f32 0.0, %v12513_v24  ;;  %v1998_v56 = vld [vmem:[#allocation2 + $0x68] sm:$0x3] }
 0x18b   : > { %v12523_v1 = vmax.f32 %v15349_v37, %v1875_v11  ;;  %15350 = vst [vmem:[#allocation36_spill] sm:$0xff] %v12532_v61  ;;  %v12537_v62 = vmax.f32 %v15351_v10, %v1876_v17  ;;  %v15352_v11 = vmax.f32 %v12285_v27, %v12373_v26  ;;  %v12555_v17 = vmax.f32 %v12408_v19, %v1877_v15 }
 0x18c   : > { %v12547_v3 = vmax.f32 %v12386_v33, %v12525_v29  ;;  %v12551_v55 = vmax.f32 %v12465_v13, %v12527_v43  ;;  %v9567_v63 = vld [vmem:[#allocation3 + $0x10] sm:$0xf0]  ;;  %v11019_v58 = vpop.eup %11018  ;;  %v12558_v50 = vmax.f32 %v12411_v47, %v2115_v18  ;;  %v10061_v33 = vld [vmem:[#allocation9 + $0x1e0] sm:$0xf]  ;;  %v2330_v23 = vsel %vm2320_vm3, %v2327_v20, %v2329_v42 }
 0x18d   : > { %v12543_v25 = vmax.f32 %v15352_v11, %v2114_v5  ;;  %v12560_v27 = vor.u32 %v10097_v44, %v9567_v63  ;;  %v10206_v5 = vld [vmem:[#allocation9 + $0x164] sm:$0xf0]  ;;  %v11021_v40 = vpop.eup %11020  ;;  %v795_v13 = vadd.f32 1.0, %v11019_v58  ;;  %v2435_v37 = vmax.f32 %v12110_v12, %v2328_v51  ;;  %v15356_v47 = vld [vmem:[#allocation26_spill] sm:$0xff] }
 0x18e   : > { %15354 = vst [vmem:[#allocation48_spill] sm:$0xff] %v12558_v50  ;;  %v2535_v19 = vrot.slane %v12110_v12, 2  ;;  %v810_v15 = vadd.f32 1.0, %v11021_v40  ;;  %v9998_v18 = vor.u32 %v10206_v5, %v9997_v59  ;;  %v10062_v44 = vor.u32 %v10222_v38, %v10061_v33 }
 0x18f   : > { %15353 = vst [vmem:[#allocation39_spill] sm:$0xff] %v12543_v25  ;;  %8315 = vmatmul.bf16.vlgmr.msrb.gmra.mxu3 %v12560_v27  ;;  %11024 = vrcp.f32 %v795_v13  ;;  %v2436_v10 = vmax.f32 %v12206_v35, %v2330_v23  ;;  %v777_v11 = vmul.f32 1.442695, %v715_v22  ;;  %v2536_v63 = vrot.slane %v12206_v35, 2 }
 0x190   : > { %15355 = vst [vmem:[#allocation49_spill] sm:$0xff] %v12560_v27  ;;  %v11023_v51 = vpop.eup %11022  ;;  %11026 = vrcp.f32 %v810_v15  ;;  %8397 = vmatpush.bf16.msrb.mxu0 %v9998_v18  ;;  %8486 = vmatpush.bf16.msrb.mxu1 %v10062_v44  ;;  %v2538_v58 = vrot.slane %v15347_v16, 2  ;;  %v2744_v5 = vrot.slane %v12110_v12, 3  ;;  %v2745_v33 = vrot.slane %v12206_v35, 3 }
 0x191   : > { %v796_v59 = vadd.f32 1.0, %v11023_v51  ;;  %v2747_v40 = vrot.slane %v15347_v16, 3  ;;  %11028 = vpow2.f32 %v777_v11  ;;  %v2537_v13 = vsel %vm2529_vm4, %v2535_v19, %v2536_v63 }
 0x192   : > { %v2539_v23 = vsel %vm2529_vm4, %v2536_v63, %v2538_v58  ;;  %v2953_v38 = vrot.slane %v12110_v12, 4  ;;  %v2644_v22 = vmax.f32 %v2435_v37, %v2537_v13  ;;  %v2746_v18 = vsel %vm2738_vm5, %v2744_v5, %v2745_v33  ;;  %v15358_v37 = vld [vmem:[#allocation31_spill] sm:$0xff] }
 0x193   : > { %11030 = vrcp.f32 %v796_v59  ;;  %v2645_v15 = vmax.f32 %v2436_v10, %v2539_v23  ;;  %v2748_v44 = vsel %vm2738_vm5, %v2745_v33, %v2747_v40  ;;  %v2954_v51 = vrot.slane %v12206_v35, 4 }
 0x194   : > { %v2956_v42 = vrot.slane %v15347_v16, 4  ;;  %v12589_v11 = vmax.f32 %v15356_v47, %v12311_v53  ;;  %v15357_v63 = vrot.slane %v12470_v36, 7  ;;  %v2853_v12 = vmax.f32 %v2644_v22, %v2746_v18 }
 0x195   : > { %v11025_v19 = vpop.eup %11024  ;;  %v2854_v59 = vmax.f32 %v2645_v15, %v2748_v44  ;;  %v12595_v10 = vmax.f32 %v15358_v37, %v12323_v48  ;;  %v2955_v35 = vsel %vm2947_vm6, %v2953_v38, %v2954_v51  ;;  %v11295_v15 = vld [vmem:[#allocation2 + $0x78] sm:$0xff]   ;;  %v12607_v44 = vld [vmem:[#allocation2 + $0x68] sm:$0x3] }
 0x196   : > { %v1107_v58 = vrot.slane %v15357_v63, 4  ;;  %v11027_v5 = vpop.eup %11026  ;;  %v859_v33 = vmul.f32 %v11025_v19, %v12484_v54  ;;  %v2957_v16 = vsel %vm2947_vm6, %v2954_v51, %v2956_v42  ;;  %v2331_v53 = vrot.slane %v12589_v11, 1  ;;  %v1285_v38 = vld [vmem:[#allocation2 + $0x68] sm:$0x3] }
 0x197   : > { %v874_v47 = vmul.f32 %v11027_v5, %v12476_v46  ;;  %v3062_v40 = vmax.f32 %v2853_v12, %v2955_v35  ;;  %v3063_v36 = vmax.f32 %v2854_v59, %v2957_v16  ;;  %v15177_v13 = vrot.slane %v12595_v10, 1  ;;  %v11029_v23 = vpop.eup %11028  ;;  %v1522_v63 = vld [vmem:[#allocation2 + $0x68] sm:$0x3] }
 0x198   : > { %v891_v22 = vpack.c.bf16 %v859_v33, %v859_v33  ;;  %v12603_v48 = vunpack.c.l.bf16 %v11295_v15  ;;  %v12605_v18 = vunpack.c.h.bf16 %v11295_v15  ;;  %v811_v51 = vadd.f32 1.0, %v11029_v23  ;;  %v12619_v23 = vld [vmem:[#allocation2 + $0x68] sm:$0x3] }
 0x199   : > { %v11031_v54 = vpop.eup %11030  ;;  %v906_v42 = vpack.c.bf16 %v874_v47, %v874_v47  ;;  %v12609_v19 = vpack.c.bf16 %v3062_v40, %v3062_v40  ;;  %v2540_v46 = vrot.slane %v12589_v11, 2  ;;  %v2333_v37 = vsel %vm2320_vm3, %v2331_v53, %v15177_v13 }
 0x19a   : > { %923 = vst [vmem:[#allocation3 + $0xe0] sm:$0xf] %v891_v22  ;;  %v1071_v12 = vrot.slane %v891_v22, 7  ;;  %v860_v59 = vmul.f32 %v11031_v54, %v12504_v21  ;;  %v15178_v5 = vrot.slane %v12595_v10, 2  ;;  %11032 = vrcp.f32 %v811_v51  ;;  %v10119_v21 = vld [vmem:[#allocation3 + $0xac] sm:$0xf0] }
 0x19b   : > { %938 = vst [vmem:[#allocation3 + $0x1d0] sm:$0xf] %v906_v42  ;;  %v1108_v33 = vrot.slane %v906_v42, 7  ;;  %v3095_v35 = vpack.c.bf16 %v3063_v36, %v3063_v36  ;;  %v3193_v16 = vrot.slane %v12609_v19, 7  ;;  %v1381_v40 = vunpack.c.l.bf16 %v1285_v38  ;;  %v9645_v36 = vld [vmem:[#allocation3 + $0xa0] sm:$0xf] }
 0x19c   : > { %1186 = vst [vmem:[#allocation2 + $0x6c] sm:$0xe] %v1071_v12  ;;  %v892_v22 = vpack.c.bf16 %v860_v59, %v860_v59  ;;  %v2437_v15 = vmax.f32 %v12589_v11, %v2333_v37  ;;  %v1618_v54 = vunpack.c.l.bf16 %v1522_v63  ;;  %v15359_v42 = vld [vmem:[#allocation42_spill] sm:$0xff]  ;;  %v1072_v47 = vrot.slane %v1071_v12, 4 }
 0x19d   : > { %v1109_v53 = vsel %vm11801_vm2, %v1107_v58, %v1108_v33  ;;  %v1110_v20 = vrot.slane %v1108_v33, 4  ;;  %3126 = vst [vmem:[#allocation3 + $0x24] sm:$0xf] %v12609_v19  ;;  %v2334_v51 = vrot.slane %v15359_v42, 1  ;;  %v12626_v13 = vor.u32 %v10119_v21, %v9645_v36 }
 0x19e   : > { %1208 = vst [vmem:[#allocation2 + $0xc4] sm:$0xf] %v1109_v53  ;;  %v1073_v38 = vrot.slane %v892_v22, 7  ;;  %v2542_v59 = vsel %vm2529_vm4, %v2540_v46, %v15178_v5  ;;  %v1856_v63 = vunpack.c.l.bf16 %v12619_v23  ;;  %v3194_v58 = vrot.slane %v3193_v16, 4 }
 0x19f   : > { %15360 = vst [vmem:[#allocation26_spill] sm:$0xff] %v12626_v13  ;;  %v3195_v37 = vrot.slane %v3095_v35, 7  ;;  %v12632_v33 = vmax.f32 %v2437_v15, %v2542_v59  ;;  %8251 = vmatmul.bf16.gmra.mxu2 %v12626_v13  ;;  %v2749_v21 = vrot.slane %v12589_v11, 3  ;;  %v15179_v53 = vrot.slane %v12595_v10, 3 }
 0x1a0   : > { %1209 = vst [vmem:[#allocation2 + $0xc8] sm:$0x1] %v1110_v20  ;;  %v1074_v19 = vsel %vm11801_vm2, %v1072_v47, %v1073_v38  ;;  %v1075_v12 = vrot.slane %v1073_v38, 4  ;;  %v11033_v36 = vpop.eup %11032  ;;  %v15361_v46 = vunpack.c.l.bf16 %v12460_v7  ;;  %v2094_v20 = vunpack.c.l.bf16 %v1998_v56 }
 0x1a1   : > { %924 = vst [vmem:[#allocation3 + $0xf0] sm:$0xf] %v892_v22  ;;  %v2958_v15 = vrot.slane %v12589_v11, 4  ;;  %v15183_v22 = vrot.slane %v12595_v10, 4  ;;  %v12646_v47 = vmax.f32 %v12450_v6, %v1618_v54  ;;  %v875_v38 = vmul.f32 %v11033_v36, %v12513_v24  ;;  %v15363_v11 = vld [vmem:[#allocation43_spill] sm:$0xff]  ;;  %v593_v24 = vpop.f32.mrf.mxu2 }
 0x1a2   : > { %v12641_v23 = vmax.f32 %v15361_v46, %v1381_v40  ;;  %1187 = vst [vmem:[#allocation2 + $0x70] sm:$0xf] %v1074_v19  ;;  %v15362_v59 = vrot.slane %v12595_v10, 1  ;;  %v12655_v7 = vsel %vm2738_vm5, %v2749_v21, %v15179_v53  ;;  %v15364_v19 = vunpack.c.l.bf16 %v15363_v11 }
 0x1a3   : > { %1188 = vst [vmem:[#allocation2 + $0x74] sm:$0x1] %v1075_v12  ;;  %v1240_v56 = vld [vmem:[#allocation2 + $0x6c] sm:$0xf]  ;;  %v3196_v54 = vsel %vm11801_vm2, %v3194_v58, %v3195_v37  ;;  %v12669_v27 = vpack.c.bf16 %v875_v38, %v875_v38  ;;  %v3197_v13 = vrot.slane %v3195_v37, 4  ;;  %v2543_v12 = vrot.slane %v15359_v42, 2 }
 0x1a4   : > { %v2335_v5 = vsel %vm2320_vm3, %v15362_v59, %v2334_v51  ;;  %v1286_v40 = vld [vmem:[#allocation2 + $0x6c] sm:$0xf]  ;;  %v1427_v46 = vmax.f32 %v15364_v19, %v12525_v29  ;;  %v12667_v51 = vsel %vm2947_vm6, %v2958_v15, %v15183_v22  ;;  %v1337_v21 = vunpack.c.l.bf16 %v1240_v56  ;;  %3127 = vst [vmem:[#allocation3 + $0x34] sm:$0xf] %v3095_v35  ;;  %v11296_v35 = vld [vmem:[%s15142_s2] ss:$0 sm:$0xff]  ;;  %v682_v56 = vpop.f32.mrf.mxu3 }
 0x1a5   : > { %v1523_v6 = vld [vmem:[#allocation2 + $0x6c] sm:$0xf]  ;;  %v1382_v36 = vunpack.c.l.bf16 %v1286_v40  ;;  %v10720_v19 = vld [vmem:[#allocation2 + $0xc0] sm:$0xff]   ;;  %3319 = vst [vmem:[#allocation2 + $0x24] sm:$0xe] %v3193_v16  ;;  %v2438_v58 = vmax.f32 %v12595_v10, %v2335_v5  ;;  %v15365_v16 = vmax.f32 %v12378_v2, %v12525_v29  ;;  %v2752_v40 = vrot.slane %v15359_v42, 3 }
 0x1a6   : > { %v1619_v59 = vunpack.c.l.bf16 %v1523_v6  ;;  %v1761_v53 = vld [vmem:[#allocation2 + $0x6c] sm:$0xf]  ;;  %v1433_v15 = vmax.f32 %v1337_v21, %v12603_v48  ;;  %v12675_v22 = vunpack.c.l.bf16 %v10720_v19  ;;  %939 = vst [vmem:[#allocation3 + $0x1e0] sm:$0xf] %v12669_v27  ;;  %v12684_v37 = vunpack.c.h.bf16 %v10720_v19 }
 0x1a7   : > { %v1857_v11 = vunpack.c.l.bf16 %v1761_v53  ;;  %v1430_v30 = vmax.f32 %v12525_v29, %v1382_v36  ;;  %v594_v53 = vadd.f32 %v11296_v35, %v593_v24  ;;  %3320 = vst [vmem:[#allocation2 + $0x28] sm:$0xf] %v3196_v54  ;;  %v12688_v6 = vmax.f32 %v12457_v9, %v1856_v63  ;;  %v15371_v35 = vld [vmem:[#allocation20_spill] sm:$0xff]  ;;  %v2022_v50 = vld [vmem:[#allocation2 + $0xc8] sm:$0x3] }
 0x1a8   : > { %v1667_v38 = vmax.f32 %v1427_v46, %v1619_v59  ;;  %v12691_v21 = vmax.f32 %v12480_v14, %v2094_v20  ;;  %v12696_v46 = vmax.f32 %v12523_v1, %v12675_v22  ;;  %v12703_v9 = vmax.f32 %v12537_v62, %v12684_v37  ;;  %3321 = vst [vmem:[#allocation2 + $0x2c] sm:$0x1] %v3197_v13 }
 0x1a9   : > { %v1905_v5 = vmax.f32 %v15365_v16, %v1857_v11  ;;  %v1670_v36 = vmax.f32 %v1430_v30, %v12603_v48  ;;  %v1241_v2 = vld [vmem:[#allocation2 + $0x70] sm:$0xf]  ;;  %v1999_v11 = vld [vmem:[#allocation2 + $0x6c] sm:$0xf]  ;;  %v15369_v30 = vunpack.c.l.bf16 %v12433_v57  ;;  %v15370_v1 = vrot.slane %v12595_v10, 2 }
 0x1aa   : > { %15366 = vst [vmem:[#allocation31_spill] sm:$0xff] %v12696_v46  ;;  %v1287_v24 = vld [vmem:[#allocation2 + $0x70] sm:$0xf]  ;;  %v1242_v63 = vld [vmem:[#allocation2 + $0x74] sm:$0x3]  ;;  %v15372_v16 = vunpack.c.l.bf16 %v15371_v35  ;;  %v12713_v61 = vadd.f32 %v682_v56, %v594_v53  ;;  %v2095_v4 = vunpack.c.l.bf16 %v1999_v11  ;;  %v15374_v53 = vld [vmem:[#allocation21_spill] sm:$0xff] }
 0x1ab   : > { %v1524_v59 = vld [vmem:[#allocation2 + $0x70] sm:$0xf]  ;;  %v12699_v54 = vmax.f32 %v1905_v5, %v12603_v48  ;;  %15368 = vst [vmem:[#allocation43_spill] sm:$0xff] %v12703_v9  ;;  %v1288_v14 = vld [vmem:[#allocation2 + $0x74] sm:$0x3]  ;;  %v1428_v20 = vmax.f32 %v15369_v30, %v12527_v43  ;;  %v2544_v19 = vsel %vm2529_vm4, %v15370_v1, %v2543_v12  ;;  %v1338_v5 = vunpack.c.l.bf16 %v1241_v2 }
 0x1ac   : > { %v1673_v46 = vmax.f32 %v1433_v15, %v15372_v16  ;;  %v1525_v25 = vld [vmem:[#allocation2 + $0x74] sm:$0x3]  ;;  %v12715_v62 = vmax.f32 %v2438_v58, %v2544_v19  ;;  %v1908_v9 = vmax.f32 %v1667_v38, %v12603_v48  ;;  %v1383_v39 = vunpack.c.l.bf16 %v1287_v24  ;;  %v1762_v30 = vld [vmem:[#allocation2 + $0x70] sm:$0xf]  ;;  %v15377_v19 = vld [vmem:[#allocation33_spill] sm:$0xff] }
 0x1ad   : > { %15367 = vst [vmem:[#allocation42_spill] sm:$0xff] %v12699_v54  ;;  %v1384_v34 = vunpack.c.l.bf16 %v1288_v14  ;;  %v1620_v57 = vunpack.c.l.bf16 %v1524_v59  ;;  %v1339_v54 = vunpack.c.l.bf16 %v1242_v63  ;;  %v15373_v12 = vrot.slane %v12595_v10, 3  ;;  %v1763_v24 = vld [vmem:[#allocation2 + $0x74] sm:$0x3] }
 0x1ae   : > { %v15375_v56 = vunpack.c.l.bf16 %v15374_v53  ;;  %v2118_v1 = vunpack.c.l.bf16 %v2022_v50  ;;  %v1431_v48 = vmax.f32 %v12527_v43, %v1383_v39  ;;  %v1621_v38 = vunpack.c.l.bf16 %v1525_v25  ;;  %v15378_v35 = vld [vmem:[#allocation22_spill] sm:$0xff]  ;;  %v15380_v39 = vld [vmem:[#allocation16_spill] sm:$0xff] }
 0x1af   : > { %v12721_v15 = vsel %vm2738_vm5, %v15373_v12, %v2752_v40  ;;  %v15376_v59 = vunpack.c.l.bf16 %v12607_v44  ;;  %v1434_v11 = vmax.f32 %v1338_v5, %v12605_v18  ;;  %v1668_v63 = vmax.f32 %v1428_v20, %v1620_v57 }
 0x1b0   : > { %v1911_v58 = vmax.f32 %v1670_v36, %v15375_v56  ;;  %v1858_v14 = vunpack.c.l.bf16 %v1762_v30  ;;  %v1914_v40 = vmax.f32 %v1673_v46, %v15377_v19  ;;  %v15379_v16 = vunpack.c.l.bf16 %v15378_v35 }
 0x1b1   : > { %v1432_v13 = vmax.f32 %v15376_v59, %v1384_v34  ;;  %v1669_v36 = vmax.f32 %v12641_v23, %v1621_v38  ;;  %v1671_v50 = vmax.f32 %v1431_v48, %v12605_v18  ;;  %v15381_v25 = vunpack.c.l.bf16 %v15380_v39  ;;  %v15389_v59 = vld [vmem:[#allocation24_spill] sm:$0xff] }
 0x1b2   : > { %v12733_v12 = vmax.f32 %v1908_v9, %v15379_v16  ;;  %v1859_v56 = vunpack.c.l.bf16 %v1763_v24  ;;  %v15382_v34 = vmax.f32 %v12445_v60, %v12527_v43  ;;  %v1909_v20 = vmax.f32 %v1668_v63, %v12605_v18  ;;  %v15384_v9 = vld [vmem:[#allocation18_spill] sm:$0xff]  ;;  %v15387_v60 = vld [vmem:[#allocation17_spill] sm:$0xff] }
 0x1b3   : > { %v1435_v53 = vmax.f32 %v1339_v54, %v15381_v25  ;;  %v15383_v46 = vmax.f32 %v12381_v0, %v12525_v29  ;;  %v15385_v57 = vunpack.c.l.bf16 %v15384_v9  ;;  %v716_v30 = vsub.f32 0.0, %v12713_v61  ;;  %v15391_v29 = vld [vmem:[#allocation38_spill] sm:$0xff] }
 0x1b4   : > { %v1906_v44 = vmax.f32 %v15382_v34, %v1858_v14  ;;  %v12754_v48 = vmax.f32 %v12555_v17, %v2118_v1  ;;  %v15388_v38 = vunpack.c.l.bf16 %v15387_v60  ;;  %v15390_v63 = vunpack.c.l.bf16 %v15389_v59  ;;  %v15396_v1 = vld [vmem:[#allocation30_spill] sm:$0xff]  ;;  %v15400_v60 = vld [vmem:[#allocation27_spill] sm:$0xff] }
 0x1b5   : > { %v12746_v5 = vmax.f32 %v15383_v46, %v2095_v4  ;;  %v1910_v23 = vmax.f32 %v1669_v36, %v15385_v57  ;;  %v12764_v4 = vmax.f32 %v1911_v58, %v15377_v19  ;;  %v15392_v35 = vunpack.c.l.bf16 %v15391_v29  ;;  %v15394_v36 = vld [vmem:[#allocation29_spill] sm:$0xff] }
 0x1b6   : > { %15386 = vst [vmem:[#allocation20_spill] sm:$0xff] %v12754_v48  ;;  %v1672_v24 = vmax.f32 %v1432_v13, %v15388_v38  ;;  %v1674_v14 = vmax.f32 %v1434_v11, %v15390_v63  ;;  %v12761_v0 = vmax.f32 %v1906_v44, %v12605_v18  ;;  %v15395_v39 = vunpack.c.l.bf16 %v15394_v36  ;;  %v15398_v46 = vld [vmem:[#allocation25_spill] sm:$0xff] }
 0x1b7   : > { %v12768_v16 = vmax.f32 %v1914_v40, %v15392_v35  ;;  %v15397_v25 = vunpack.c.l.bf16 %v15396_v1  ;;  %v2356_v13 = vrot.slane %v12733_v12, 1  ;;  %v2565_v11 = vrot.slane %v12733_v12, 2  ;;  %v10101_v1 = vld [vmem:[#allocation3 + $0x24] sm:$0xf] }
 0x1b8   : > { %v2150_v17 = vmax.f32 %v1909_v20, %v15395_v39  ;;  %v15399_v18 = vunpack.c.l.bf16 %v15398_v46  ;;  %v1907_v58 = vmax.f32 %v12646_v47, %v1859_v56  ;;  %v15401_v38 = vunpack.c.l.bf16 %v15400_v60  ;;  %v15402_v20 = vld [vmem:[#allocation28_spill] sm:$0xff]  ;;  %v2000_v46 = vld [vmem:[#allocation2 + $0x70] sm:$0xf] }
 0x1b9   : > { %15393 = vst [vmem:[#allocation21_spill] sm:$0xff] %v12768_v16  ;;  %v2151_v34 = vmax.f32 %v1910_v23, %v15397_v25  ;;  %v15403_v63 = vunpack.c.l.bf16 %v15402_v20  ;;  %v15404_v23 = vld [vmem:[#allocation34_spill] sm:$0xff]  ;;  %v2774_v36 = vrot.slane %v12733_v12, 3  ;;  %v9583_v25 = vld [vmem:[#allocation3 + $0x30] sm:$0xf0]  ;;  %v15193_v20 = vrot.slane %v12669_v27, 7 }
 0x1ba   : > { %v1675_v44 = vmax.f32 %v1435_v53, %v15399_v18  ;;  %v2357_v19 = vrot.slane %v2150_v17, 1  ;;  %v2566_v57 = vrot.slane %v2150_v17, 2  ;;  %v1912_v59 = vmax.f32 %v1671_v50, %v15401_v38 }
 0x1bb   : > { %v2359_v9 = vrot.slane %v2151_v34, 1  ;;  %v2568_v40 = vrot.slane %v2151_v34, 2  ;;  %v12783_v29 = vmax.f32 %v1672_v24, %v15403_v63  ;;  %v1915_v35 = vmax.f32 %v1674_v14, %v15404_v23  ;;  %1210 = vst [vmem:[#allocation2 + $0xcc] sm:$0xe] %v15193_v20 }
 0x1bc   : > { %v2358_v39 = vsel %vm2320_vm3, %v2356_v13, %v2357_v19  ;;  %v2775_v47 = vrot.slane %v2150_v17, 3  ;;  %v2777_v56 = vrot.slane %v2151_v34, 3  ;;  %v2984_v60 = vrot.slane %v2150_v17, 4 }
 0x1bd   : > { %v2360_v53 = vsel %vm2320_vm3, %v2357_v19, %v2359_v9  ;;  %v2447_v18 = vmax.f32 %v12733_v12, %v2358_v39  ;;  %v2986_v38 = vrot.slane %v2151_v34, 4  ;;  %v2567_v24 = vsel %vm2529_vm4, %v2565_v11, %v2566_v57  ;;  %v12795_v19 = vld [vmem:[#allocation2 + $0x74] sm:$0x3] }
 0x1be   : > { %v2448_v50 = vmax.f32 %v2150_v17, %v2360_v53  ;;  %v2569_v14 = vsel %vm2529_vm4, %v2566_v57, %v2568_v40  ;;  %v12797_v54 = vor.u32 %v10101_v1, %v9583_v25  ;;  %v779_v2 = vmul.f32 1.442695, %v716_v30  ;;  %v15406_v57 = vld [vmem:[#allocation35_spill] sm:$0xff]  ;;  %v1253_v1 = vld [vmem:[#allocation2 + $0xa0] sm:$0xf] }
 0x1bf   : > { %v2656_v9 = vmax.f32 %v2447_v18, %v2567_v24  ;;  %v2096_v39 = vunpack.c.l.bf16 %v2000_v46  ;;  %v2776_v17 = vsel %vm2738_vm5, %v2774_v36, %v2775_v47  ;;  %v2778_v34 = vsel %vm2738_vm5, %v2775_v47, %v2777_v56  ;;  %v1305_v30 = vld [vmem:[#allocation2 + $0xb8] sm:$0xf]  ;;  %v1303_v25 = vld [vmem:[#allocation2 + $0xb0] sm:$0x3] }
 0x1c0   : > { %v2657_v63 = vmax.f32 %v2448_v50, %v2569_v14  ;;  %15405 = vst [vmem:[#allocation33_spill] sm:$0xff] %v12797_v54  ;;  %v2983_v11 = vrot.slane %v12733_v12, 4  ;;  %v15407_v40 = vunpack.c.l.bf16 %v15406_v57  ;;  %8320 = vmatmul.bf16.gmra.mxu3 %v12797_v54  ;;  %11034 = vpow2.f32 %v779_v2  ;;  %v15409_v47 = vld [vmem:[#allocation19_spill] sm:$0xff]  ;;  %v15412_v14 = vld [vmem:[#allocation40_spill] sm:$0xff] }
 0x1c1   : > { %v2865_v13 = vmax.f32 %v2656_v9, %v2776_v17  ;;  %v2097_v36 = vunpack.c.l.bf16 %v12795_v19  ;;  %v15410_v56 = vunpack.c.l.bf16 %v15409_v47  ;;  %v2987_v50 = vsel %vm2947_vm6, %v2984_v60, %v2986_v38  ;;  %v1260_v19 = vld [vmem:[#allocation2 + $0xbc] sm:$0x3] }
 0x1c2   : > { %v12806_v53 = vmax.f32 %v1675_v44, %v15407_v40  ;;  %v2866_v18 = vmax.f32 %v2657_v63, %v2778_v34  ;;  %v2985_v46 = vsel %vm2947_vm6, %v2983_v11, %v2984_v60  ;;  %v1257_v44 = vld [vmem:[#allocation2 + $0xb0] sm:$0x3]  ;;  %v12817_v24 = vmax.f32 %v1912_v59, %v15404_v23  ;;  %v1259_v34 = vld [vmem:[#allocation2 + $0xb8] sm:$0xf]  ;;  %v1306_v57 = vld [vmem:[#allocation2 + $0xbc] sm:$0x3] }
 0x1c3   : > { %v12812_v12 = vmax.f32 %v1907_v58, %v15410_v56  ;;  %v15413_v9 = vunpack.c.l.bf16 %v15412_v14  ;;  %v3074_v63 = vmax.f32 %v2865_v13, %v2985_v46  ;;  %v1254_v40 = vld [vmem:[#allocation2 + $0xa4] sm:$0x3]  ;;  %v15415_v58 = vmax.f32 %v12453_v8, %v12527_v43  ;;  %v1309_v23 = vld [vmem:[#allocation2 + $0xc8] sm:$0x3]  ;;  %v1542_v46 = vld [vmem:[#allocation2 + $0xb8] sm:$0xf] }
 0x1c4   : > { %15408 = vst [vmem:[#allocation22_spill] sm:$0xff] %v12806_v53  ;;  %v3075_v17 = vmax.f32 %v2866_v18, %v2987_v50  ;;  %v1350_v60 = vunpack.c.l.bf16 %v1253_v1  ;;  %v1401_v38 = vunpack.c.l.bf16 %v1305_v30  ;;  %v1351_v56 = vunpack.c.l.bf16 %v1254_v40  ;;  %v12828_v50 = vld [vmem:[#allocation2 + $0xd8] sm:$0xff]   ;;  %v1547_v8 = vld [vmem:[#allocation2 + $0xcc] sm:$0xf] }
 0x1c5   : > { %15411 = vst [vmem:[#allocation16_spill] sm:$0xff] %v12817_v24  ;;  %v12821_v2 = vmax.f32 %v1915_v35, %v15413_v9  ;;  %v12826_v11 = vmax.f32 %v15415_v58, %v2096_v39  ;;  %v3106_v47 = vpack.c.bf16 %v3074_v63, %v3074_v63  ;;  %v1354_v14 = vunpack.c.l.bf16 %v1257_v44  ;;  %v1785_v44 = vld [vmem:[#allocation2 + $0xcc] sm:$0xf]  ;;  %v9989_v58 = vld [vmem:[#allocation9 + $0x150] sm:$0xf] }
 0x1c6   : > { %v3107_v59 = vpack.c.bf16 %v3075_v17, %v3075_v17  ;;  %v1356_v35 = vunpack.c.l.bf16 %v1259_v34  ;;  %v1357_v9 = vunpack.c.l.bf16 %v1260_v19  ;;  %v1399_v13 = vunpack.c.l.bf16 %v1303_v25  ;;  %v11035_v20 = vpop.eup %11034 }
 0x1c7   : > { %15414 = vst [vmem:[#allocation18_spill] sm:$0xff] %v12821_v2  ;;  %v1402_v18 = vunpack.c.l.bf16 %v1306_v57  ;;  %v3223_v54 = vrot.slane %v3106_v47, 7  ;;  %v15416_v43 = vunpack.c.l.bf16 %v12468_v45  ;;  %v1688_v30 = vmax.f32 %v12507_v41, %v12675_v22 }
 0x1c8   : > { %v3225_v48 = vrot.slane %v3107_v59, 7  ;;  %3138 = vst [vmem:[#allocation3 + $0xe4] sm:$0xf] %v3106_v47  ;;  %v1643_v1 = vunpack.c.l.bf16 %v1547_v8  ;;  %v1405_v25 = vunpack.c.l.bf16 %v1309_v23  ;;  %v1446_v63 = vmax.f32 %v1350_v60, %v12373_v26  ;;  %v1543_v23 = vld [vmem:[#allocation2 + $0xbc] sm:$0x3] }
 0x1c9   : > { %v1451_v39 = vmax.f32 %v15416_v43, %v12675_v22  ;;  %3139 = vst [vmem:[#allocation3 + $0xf4] sm:$0xf] %v3107_v59  ;;  %v12837_v17 = vmax.f32 %v12373_v26, %v1401_v38  ;;  %v3224_v34 = vrot.slane %v3223_v54, 4  ;;  %v1881_v57 = vunpack.c.l.bf16 %v1785_v44  ;;  %v1546_v8 = vld [vmem:[#allocation2 + $0xc8] sm:$0x3] }
 0x1ca   : > { %v3227_v19 = vrot.slane %v3225_v48, 4  ;;  %3337 = vst [vmem:[#allocation2 + $0x6c] sm:$0xe] %v3223_v54  ;;  %v1638_v40 = vunpack.c.l.bf16 %v1542_v46  ;;  %v12840_v45 = vmax.f32 %v12688_v6, %v2097_v36  ;;  %v15417_v41 = vrot.slane %v12669_v27, 7  ;;  %v2023_v54 = vld [vmem:[#allocation2 + $0xcc] sm:$0xf] }
 0x1cb   : > { %v812_v59 = vadd.f32 1.0, %v11035_v20  ;;  %v10352_v60 = vunpack.c.l.bf16 %v12828_v50  ;;  %v3226_v26 = vsel %vm11801_vm2, %v3224_v34, %v3225_v48  ;;  %v1447_v38 = vmax.f32 %v1351_v56, %v1399_v13  ;;  %v10204_v44 = vld [vmem:[#allocation9 + $0x154] sm:$0xf0]  ;;  %v10123_v36 = vld [vmem:[#allocation3 + $0xcc] sm:$0xf0] }
 0x1cc   : > { %v12844_v47 = vrot.slane %v15417_v41, 4  ;;  %3339 = vst [vmem:[#allocation2 + $0x74] sm:$0x1] %v3227_v19  ;;  %v1450_v46 = vmax.f32 %v1354_v14, %v1402_v18  ;;  %v1691_v43 = vmax.f32 %v1451_v39, %v1643_v1  ;;  %v12850_v27 = vmax.f32 %v1356_v35, %v12684_v37  ;;  %v12858_v56 = vld [vmem:[#allocation2 + $0xe4] sm:$0xff]   ;;  %v9981_v14 = vld [vmem:[#allocation9 + $0x140] sm:$0xf] }
 0x1cd   : > { %3338 = vst [vmem:[#allocation2 + $0x70] sm:$0xf] %v3226_v26  ;;  %11036 = vrcp.f32 %v812_v59  ;;  %v12852_v6 = vmax.f32 %v1357_v9, %v1405_v25  ;;  %v1929_v20 = vmax.f32 %v1688_v30, %v1881_v57  ;;  %v1639_v41 = vunpack.c.l.bf16 %v1543_v23  ;;  %v10202_v13 = vld [vmem:[#allocation9 + $0x144] sm:$0xf0]  ;;  %v9661_v25 = vld [vmem:[#allocation3 + $0xc0] sm:$0xf] }
 0x1ce   : > { %v1642_v2 = vunpack.c.l.bf16 %v1546_v8  ;;  %v12854_v16 = vmax.f32 %v1446_v63, %v1638_v40  ;;  %v1689_v48 = vmax.f32 %v12837_v17, %v12684_v37  ;;  %v2119_v18 = vunpack.c.l.bf16 %v2023_v54  ;;  %v10200_v26 = vld [vmem:[#allocation9 + $0x134] sm:$0xf0] }
 0x1cf   : > { %v12860_v39 = vmax.f32 %v1929_v20, %v10352_v60  ;;  %v9990_v35 = vor.u32 %v10204_v44, %v9989_v58  ;;  %v15419_v9 = vrot.slane %v15359_v42, 4  ;;  %v15420_v30 = vrot.slane %v12595_v10, 4  ;;  %v12876_v58 = vld [vmem:[#allocation2 + $0xc8] sm:$0x3]  ;;  %v12878_v42 = vld [vmem:[#allocation2 + $0xe0] sm:$0x3] }
 0x1d0   : > { %v1932_v63 = vmax.f32 %v1691_v43, %v10352_v60  ;;  %v15421_v34 = vmax.f32 %v12632_v33, %v12655_v7  ;;  %v15422_v57 = vmax.f32 %v12715_v62, %v12721_v15  ;;  %v12874_v59 = vor.u32 %v10123_v36, %v9661_v25  ;;  %v9973_v15 = vld [vmem:[#allocation9 + $0x130] sm:$0xf] }
 0x1d1   : > { %15418 = vst [vmem:[#allocation17_spill] sm:$0xff] %v12860_v39  ;;  %v2962_v1 = vsel %vm2947_vm6, %v15420_v30, %v15419_v9  ;;  %v2125_v10 = vunpack.c.l.bf16 %v12858_v56  ;;  %8398 = vmatpush.bf16.msrb.mxu0 %v9990_v35  ;;  %v9982_v23 = vor.u32 %v10202_v13, %v9981_v14  ;;  %v2336_v8 = vrot.slane %v12388_v52, 1 }
 0x1d2   : > { %v3064_v19 = vmax.f32 %v15421_v34, %v12667_v51  ;;  %v3065_v40 = vmax.f32 %v15422_v57, %v2962_v1  ;;  %15423 = vst [vmem:[#allocation24_spill] sm:$0xff] %v12874_v59  ;;  %v2337_v60 = vrot.slane %v12494_v49, 1  ;;  %v1687_v33 = vmax.f32 %v1447_v38, %v1639_v41  ;;  %8256 = vmatmul.bf16.gmra.mxu2 %v12874_v59  ;;  %v10216_v59 = vld [vmem:[#allocation9 + $0x1b4] sm:$0xf0] }
 0x1d3   : > { %v12883_v7 = vmax.f32 %v1450_v46, %v1642_v2  ;;  %v10353_v51 = vunpack.c.h.bf16 %v12828_v50  ;;  %v11037_v54 = vpop.eup %11036  ;;  %v15424_v43 = vmax.f32 %v12518_v32, %v12675_v22  ;;  %v2339_v38 = vrot.slane %v12497_v28, 1 }
 0x1d4   : > { %v3096_v62 = vpack.c.bf16 %v3064_v19, %v3064_v19  ;;  %v3097_v20 = vpack.c.bf16 %v3065_v40, %v3065_v40  ;;  %v2338_v36 = vsel %vm2320_vm3, %v2336_v8, %v2337_v60  ;;  %v876_v2 = vmul.f32 %v11037_v54, %v12713_v61 }
 0x1d5   : > { %v12890_v44 = vmax.f32 %v15424_v43, %v2119_v18  ;;  %v1880_v46 = vunpack.c.l.bf16 %v12876_v58  ;;  %v1886_v41 = vunpack.c.l.bf16 %v12878_v42  ;;  %v2439_v14 = vmax.f32 %v12388_v52, %v2338_v36  ;;  %8399 = vmatpush.bf16.msrb.mxu0 %v9982_v23  ;;  %v12921_v36 = vld [vmem:[#allocation2 + $0xc] sm:$0xff]  }
 0x1d6   : > { %v12900_v35 = vmax.f32 %v1932_v63, %v2125_v10  ;;  %3128 = vst [vmem:[#allocation3 + $0x44] sm:$0xf] %v3096_v62  ;;  %v3198_v32 = vrot.slane %v3096_v62, 7  ;;  %v9974_v22 = vor.u32 %v10200_v26, %v9973_v15  ;;  %v908_v18 = vpack.c.bf16 %v876_v2, %v876_v2  ;;  %v12917_v26 = vld [vmem:[#allocation2 + $0xe0] sm:$0x3] }
 0x1d7   : > { %15425 = vst [vmem:[#allocation38_spill] sm:$0xff] %v12890_v44  ;;  %v3200_v9 = vrot.slane %v3097_v20, 7  ;;  %v2340_v61 = vsel %vm2320_vm3, %v2337_v60, %v2339_v38  ;;  %v2545_v30 = vrot.slane %v12388_v52, 2  ;;  %v2546_v34 = vrot.slane %v12494_v49, 2 }
 0x1d8   : > { %3129 = vst [vmem:[#allocation3 + $0x54] sm:$0xf] %v3097_v20  ;;  %v3199_v1 = vrot.slane %v3198_v32, 4  ;;  %v2440_v25 = vmax.f32 %v12494_v49, %v2340_v61  ;;  %v2548_v63 = vrot.slane %v12497_v28, 2  ;;  %v1113_v19 = vrot.slane %v908_v18, 7  ;;  %v12919_v20 = vld [vmem:[#allocation2] sm:$0xff]  }
 0x1d9   : > { %3322 = vst [vmem:[#allocation2 + $0x30] sm:$0xe] %v3198_v32  ;;  %v3202_v57 = vrot.slane %v3200_v9, 4  ;;  %v2754_v40 = vrot.slane %v12388_v52, 3  ;;  %v2755_v58 = vrot.slane %v12494_v49, 3  ;;  %8400 = vmatpush.bf16.msrb.mxu0 %v9974_v22  ;;  %v2547_v23 = vsel %vm2529_vm4, %v2545_v30, %v2546_v34 }
 0x1da   : > { %940 = vst [vmem:[#allocation3 + $0x1f0] sm:$0xf] %v908_v18  ;;  %v3201_v10 = vsel %vm11801_vm2, %v3199_v1, %v3200_v9  ;;  %v2549_v8 = vsel %vm2529_vm4, %v2546_v34, %v2548_v63  ;;  %v2757_v60 = vrot.slane %v12497_v28, 3  ;;  %v1114_v62 = vsel %vm11801_vm2, %v12844_v47, %v1113_v19  ;;  %v9965_v47 = vld [vmem:[#allocation9 + $0x120] sm:$0xf] }
 0x1db   : > { %v1115_v15 = vrot.slane %v1113_v19, 4  ;;  %3323 = vst [vmem:[#allocation2 + $0x34] sm:$0xf] %v3201_v10  ;;  %v2648_v54 = vmax.f32 %v2439_v14, %v2547_v23  ;;  %v2649_v43 = vmax.f32 %v2440_v25, %v2549_v8  ;;  %v2756_v38 = vsel %vm2738_vm5, %v2754_v40, %v2755_v58  ;;  %v3366_v19 = vld [vmem:[#allocation2 + $0x8] sm:$0x3] }
 0x1dc   : > { %1211 = vst [vmem:[#allocation2 + $0xd0] sm:$0xf] %v1114_v62  ;;  %v2758_v2 = vsel %vm2738_vm5, %v2755_v58, %v2757_v60  ;;  %v2963_v32 = vrot.slane %v12388_v52, 4  ;;  %v2964_v22 = vrot.slane %v12494_v49, 4  ;;  %v2966_v30 = vrot.slane %v12497_v28, 4 }
 0x1dd   : > { %1212 = vst [vmem:[#allocation2 + $0xd4] sm:$0x1] %v1115_v15  ;;  %v10105_v9 = vld [vmem:[#allocation3 + $0x44] sm:$0xf]  ;;  %v2857_v14 = vmax.f32 %v2648_v54, %v2756_v38  ;;  %v2858_v61 = vmax.f32 %v2649_v43, %v2758_v2  ;;  %v12929_v1 = vmax.f32 %v1687_v33, %v1880_v46  ;;  %v10198_v49 = vld [vmem:[#allocation9 + $0x124] sm:$0xf0]  ;;  %v10388_v43 = vunpack.c.l.bf16 %v12919_v20 }
 0x1de   : > { %3324 = vst [vmem:[#allocation2 + $0x38] sm:$0x1] %v3202_v57  ;;  %v2965_v52 = vsel %vm2947_vm6, %v2963_v32, %v2964_v22  ;;  %v3414_v40 = vld [vmem:[#allocation2 + $0x14] sm:$0x3]  ;;  %v12934_v58 = vld [vmem:[#allocation2 + $0xec] sm:$0x3]  ;;  %v2967_v23 = vsel %vm2947_vm6, %v2964_v22, %v2966_v30  ;;  %v9966_v33 = vor.u32 %v10198_v49, %v9965_v47  ;;  %v3508_v38 = vunpack.c.l.bf16 %v12921_v36 }
 0x1df   : > { %v9599_v63 = vld [vmem:[#allocation3 + $0x50] sm:$0xf0]  ;;  %v3066_v28 = vmax.f32 %v2857_v14, %v2965_v52  ;;  %v9677_v46 = vld [vmem:[#allocation3 + $0xe0] sm:$0xf]  ;;  %v10127_v8 = vld [vmem:[#allocation3 + $0xec] sm:$0xf0]  ;;  %v3067_v62 = vmax.f32 %v2858_v61, %v2967_v23  ;;  %v10389_v22 = vunpack.c.h.bf16 %v12919_v20  ;;  %v2127_v20 = vunpack.c.l.bf16 %v12934_v58 }
 0x1e0   : > { %v12936_v10 = vor.u32 %v10105_v9, %v9599_v63  ;;  %v12939_v60 = vld [vmem:[#allocation2 + $0x70] sm:$0xf]  ;;  %v12941_v57 = vor.u32 %v10127_v8, %v9677_v46  ;;  %v9957_v15 = vld [vmem:[#allocation9 + $0x110] sm:$0xf]  ;;  %v10196_v54 = vld [vmem:[#allocation9 + $0x114] sm:$0xf0]  ;;  %8401 = vmatpush.bf16.msrb.mxu0 %v9966_v33  ;;  %v3509_v9 = vunpack.c.h.bf16 %v12921_v36  ;;  %v3462_v36 = vunpack.c.l.bf16 %v3366_v19 }
 0x1e1   : > { %15427 = vst [vmem:[#allocation30_spill] sm:$0xff] %v12939_v60  ;;  %v12946_v2 = vpack.c.bf16 %v3066_v28, %v3066_v28  ;;  %v9958_v32 = vor.u32 %v10196_v54, %v9957_v15  ;;  %v10743_v47 = vld [vmem:[#allocation2 + $0x18] sm:$0xff]   ;;  %v12950_v14 = vld [vmem:[#allocation2 + $0x70] sm:$0xf]  ;;  %v12955_v52 = vpack.c.bf16 %v3067_v62, %v3067_v62  ;;  %v3510_v46 = vunpack.c.l.bf16 %v3414_v40  ;;  %v3654_v62 = vld [vmem:[#allocation2 + $0x20] sm:$0x3] }
 0x1e2   : > { %15426 = vst [vmem:[#allocation29_spill] sm:$0xff] %v12936_v10  ;;  %8325 = vmatmul.bf16.gmra.mxu3 %v12936_v10  ;;  %8261 = vmatmul.bf16.gmra.mxu2 %v12941_v57  ;;  %v12960_v30 = vmax.f32 %v10388_v43, %v3508_v38  ;;  %v12962_v63 = vunpack.c.l.bf16 %v10743_v47  ;;  %v12967_v18 = vmax.f32 %v10389_v22, %v3509_v9  ;;  %v12969_v19 = vld [vmem:[#allocation2 + $0x24] sm:$0xff]   ;;  %v9693_v40 = vld [vmem:[#allocation3 + $0x100] sm:$0xf]  ;;  %v10131_v49 = vld [vmem:[#allocation3 + $0x10c] sm:$0xf0]  ;;  %v3750_v13 = vunpack.c.l.bf16 %v3654_v62 }
 0x1e3   : > { %15428 = vst [vmem:[#allocation25_spill] sm:$0xff] %v12941_v57  ;;  %v1548_v23 = vld [vmem:[#allocation2 + $0xd0] sm:$0xf]  ;;  %v15198_v58 = vrot.slane %v12946_v2, 7  ;;  %v3558_v34 = vmax.f32 %v3462_v36, %v3510_v46  ;;  %v3205_v62 = vrot.slane %v12955_v52, 7  ;;  %v15436_v53 = vrot.slane %v12946_v2, 7 }
 0x1e4   : > { %15429 = vst [vmem:[#allocation27_spill] sm:$0xff] %v12950_v14  ;;  %v1786_v28 = vld [vmem:[#allocation2 + $0xd0] sm:$0xf]  ;;  %v1549_v8 = vld [vmem:[#allocation2 + $0xd4] sm:$0x3]  ;;  %v1644_v15 = vunpack.c.l.bf16 %v1548_v23  ;;  %8402 = vmatpush.bf16.msrb.mxu0 %v9958_v32 }
 0x1e5   : > { %v2024_v33 = vld [vmem:[#allocation2 + $0xd0] sm:$0xf]  ;;  %v1882_v54 = vunpack.c.l.bf16 %v1786_v28  ;;  %v2025_v25 = vld [vmem:[#allocation2 + $0xd4] sm:$0x3]  ;;  %v1645_v61 = vunpack.c.l.bf16 %v1549_v8  ;;  %3130 = vst [vmem:[#allocation3 + $0x64] sm:$0xf] %v12946_v2  ;;  %v12976_v28 = vunpack.c.h.bf16 %v10743_v47  ;;  %v3989_v47 = vunpack.c.h.bf16 %v12969_v19 }
 0x1e6   : > { %v1692_v23 = vmax.f32 %v12850_v27, %v1644_v15  ;;  %v2120_v38 = vunpack.c.l.bf16 %v2024_v33  ;;  %3131 = vst [vmem:[#allocation3 + $0x74] sm:$0xf] %v12955_v52  ;;  %v12978_v8 = vld [vmem:[#allocation2 + $0x2c] sm:$0x3]  ;;  %v12981_v22 = vld [vmem:[#allocation2 + $0xd4] sm:$0x3]  ;;  %v2121_v9 = vunpack.c.l.bf16 %v2025_v25  ;;  %v12998_v33 = vor.u32 %v10131_v49, %v9693_v40 }
 0x1e7   : > { %v1930_v43 = vmax.f32 %v1689_v48, %v1882_v54  ;;  %v1693_v32 = vmax.f32 %v12852_v6, %v1645_v61  ;;  %3325 = vst [vmem:[#allocation2 + $0x3c] sm:$0xe] %v15198_v58  ;;  %v3796_v48 = vmax.f32 %v12960_v30, %v12962_v63  ;;  %v3988_v6 = vunpack.c.l.bf16 %v12969_v19  ;;  %v10053_v54 = vld [vmem:[#allocation9 + $0x1d0] sm:$0xf]  ;;  %v10220_v49 = vld [vmem:[#allocation9 + $0x1d4] sm:$0xf0] }
 0x1e8   : > { %v1933_v27 = vmax.f32 %v1692_v23, %v10353_v51  ;;  %v3990_v61 = vunpack.c.l.bf16 %v12978_v8  ;;  %v15431_v30 = vunpack.c.h.bf16 %v12858_v56  ;;  %v3797_v42 = vmax.f32 %v12967_v18, %v12976_v28  ;;  %v10037_v57 = vld [vmem:[#allocation9 + $0x1b0] sm:$0xf]  ;;  %v10744_v60 = vld [vmem:[#allocation2 + $0x30] sm:$0xff]  }
 0x1e9   : > { %v12987_v17 = vmax.f32 %v1930_v43, %v10353_v51  ;;  %v1934_v25 = vmax.f32 %v1693_v32, %v1886_v41  ;;  %v15430_v51 = vmax.f32 %v12854_v16, %v12684_v37  ;;  %v13011_v41 = vmax.f32 %v12929_v1, %v2121_v9  ;;  %v10045_v43 = vld [vmem:[#allocation9 + $0x1c0] sm:$0xf] }
 0x1ea   : > { %v2174_v46 = vmax.f32 %v1933_v27, %v15431_v30  ;;  %v3798_v19 = vmax.f32 %v3558_v34, %v3750_v13  ;;  %v10218_v27 = vld [vmem:[#allocation9 + $0x1c4] sm:$0xf0]  ;;  %v15432_v18 = vrot.slane %v12900_v35, 1  ;;  %v15434_v13 = vrot.slane %v12900_v35, 3 }
 0x1eb   : > { %v13004_v36 = vmax.f32 %v15430_v51, %v2120_v38  ;;  %v2175_v15 = vmax.f32 %v1934_v25, %v2127_v20  ;;  %v15433_v20 = vrot.slane %v12900_v35, 2  ;;  %v15435_v52 = vrot.slane %v12900_v35, 4 }
 0x1ec   : > { %v2397_v40 = vrot.slane %v2174_v46, 1  ;;  %v2606_v23 = vrot.slane %v2174_v46, 2  ;;  %v2815_v37 = vrot.slane %v2174_v46, 3  ;;  %v3024_v16 = vrot.slane %v2174_v46, 4  ;;  %v10109_v51 = vld [vmem:[#allocation3 + $0x64] sm:$0xf] }
 0x1ed   : > { %v2399_v38 = vrot.slane %v2175_v15, 1  ;;  %v2608_v56 = vrot.slane %v2175_v15, 2  ;;  %v2817_v8 = vrot.slane %v2175_v15, 3  ;;  %v3026_v32 = vrot.slane %v2175_v15, 4  ;;  %v9615_v30 = vld [vmem:[#allocation3 + $0x70] sm:$0xf0] }
 0x1ee   : > { %v2398_v1 = vsel %vm2320_vm3, %v15432_v18, %v2397_v40  ;;  %v2607_v9 = vsel %vm2529_vm4, %v15433_v20, %v2606_v23  ;;  %v2816_v34 = vsel %vm2738_vm5, %v15434_v13, %v2815_v37  ;;  %v3025_v25 = vsel %vm2947_vm6, %v15435_v52, %v3024_v16  ;;  %v9949_v15 = vld [vmem:[#allocation9 + $0x100] sm:$0xf]  ;;  %v10194_v20 = vld [vmem:[#allocation9 + $0x104] sm:$0xf0] }
 0x1ef   : > { %v2400_v50 = vsel %vm2320_vm3, %v2397_v40, %v2399_v38  ;;  %v2463_v58 = vmax.f32 %v12900_v35, %v2398_v1  ;;  %v2609_v18 = vsel %vm2529_vm4, %v2606_v23, %v2608_v56  ;;  %v2818_v10 = vsel %vm2738_vm5, %v2815_v37, %v2817_v8  ;;  %v4134_v35 = vld [vmem:[#allocation2 + $0x38] sm:$0x3] }
 0x1f0   : > { %v2464_v39 = vmax.f32 %v2174_v46, %v2400_v50  ;;  %v3027_v13 = vsel %vm2947_vm6, %v3024_v16, %v3026_v32  ;;  %v10054_v44 = vor.u32 %v10220_v49, %v10053_v54  ;;  %v10046_v52 = vor.u32 %v10218_v27, %v10045_v43 }
 0x1f1   : > { %v2672_v14 = vmax.f32 %v2463_v58, %v2607_v9  ;;  %v3204_v24 = vrot.slane %v15436_v53, 4  ;;  %v3207_v40 = vrot.slane %v3205_v62, 4  ;;  %v13033_v38 = vor.u32 %v10109_v51, %v9615_v30 }
 0x1f2   : > { %v2673_v23 = vmax.f32 %v2464_v39, %v2609_v18  ;;  %8487 = vmatpush.bf16.msrb.mxu1 %v10054_v44  ;;  %v9950_v37 = vor.u32 %v10194_v20, %v9949_v15  ;;  %v10038_v56 = vor.u32 %v10216_v59, %v10037_v57  ;;  %v4036_v8 = vmax.f32 %v3796_v48, %v3988_v6 }
 0x1f3   : > { %15437 = vst [vmem:[#allocation28_spill] sm:$0xff] %v13033_v38  ;;  %v2881_v1 = vmax.f32 %v2672_v14, %v2816_v34  ;;  %v3206_v50 = vsel %vm11801_vm2, %v3204_v24, %v3205_v62  ;;  %8330 = vmatmul.bf16.gmra.mxu3 %v13033_v38  ;;  %v4037_v58 = vmax.f32 %v3797_v42, %v3989_v47  ;;  %v13038_v46 = vunpack.c.l.bf16 %v10744_v60 }
 0x1f4   : > { %3327 = vst [vmem:[#allocation2 + $0x44] sm:$0x1] %v3207_v40  ;;  %v2882_v53 = vmax.f32 %v2673_v23, %v2818_v10  ;;  %8403 = vmatpush.bf16.msrb.mxu0 %v9950_v37  ;;  %v4038_v2 = vmax.f32 %v3798_v19, %v3990_v61  ;;  %v13040_v54 = vunpack.c.h.bf16 %v10744_v60  ;;  %v4230_v39 = vunpack.c.l.bf16 %v4134_v35  ;;  %8266 = vmatmul.bf16.gmra.mxu2 %v12998_v33 }
 0x1f5   : > { %3326 = vst [vmem:[#allocation2 + $0x40] sm:$0xf] %v3206_v50  ;;  %v3090_v59 = vmax.f32 %v2881_v1, %v3025_v25  ;;  %v4276_v44 = vmax.f32 %v4036_v8, %v13038_v46  ;;  %v2341_v24 = vrot.slane %v12547_v3, 1  ;;  %v2342_v57 = vrot.slane %v12551_v55, 1 }
 0x1f6   : > { %v3091_v14 = vmax.f32 %v2882_v53, %v3027_v13  ;;  %8488 = vmatpush.bf16.msrb.mxu1 %v10046_v52  ;;  %v4277_v48 = vmax.f32 %v4037_v58, %v13040_v54  ;;  %v4278_v10 = vmax.f32 %v4038_v2, %v4230_v39  ;;  %v2344_v6 = vrot.slane %v12691_v21, 1 }
 0x1f7   : > { %v3122_v47 = vpack.c.bf16 %v3090_v59, %v3090_v59  ;;  %v4468_v60 = vrot.slane %v4276_v44, 1  ;;  %v4676_v61 = vrot.slane %v4276_v44, 2  ;;  %v4884_v42 = vrot.slane %v4276_v44, 3 }
 0x1f8   : > { %v3123_v49 = vpack.c.bf16 %v3091_v14, %v3091_v14  ;;  %v4469_v62 = vrot.slane %v4277_v48, 1  ;;  %v4471_v19 = vrot.slane %v4278_v10, 1  ;;  %v4677_v16 = vrot.slane %v4277_v48, 2 }
 0x1f9   : > { %v3263_v43 = vrot.slane %v3122_v47, 7  ;;  %3154 = vst [vmem:[#allocation3 + $0x1e4] sm:$0xf] %v3122_v47  ;;  %v4679_v32 = vrot.slane %v4278_v10, 2  ;;  %v4885_v27 = vrot.slane %v4277_v48, 3  ;;  %v4887_v9 = vrot.slane %v4278_v10, 3 }
 0x1fa   : > { %v3265_v34 = vrot.slane %v3123_v49, 7  ;;  %3155 = vst [vmem:[#allocation3 + $0x1f4] sm:$0xf] %v3123_v49  ;;  %8489 = vmatpush.bf16.msrb.mxu1 %v10038_v56  ;;  %v4470_v25 = vsel %vm2320_vm3, %v4468_v60, %v4469_v62  ;;  %v4472_v51 = vsel %vm2320_vm3, %v4469_v62, %v4471_v19  ;;  %v4678_v30 = vsel %vm2529_vm4, %v4676_v61, %v4677_v16 }
 0x1fb   : > { %v3264_v15 = vrot.slane %v3263_v43, 4  ;;  %3361 = vst [vmem:[#allocation2 + $0xcc] sm:$0xe] %v3263_v43  ;;  %v4580_v18 = vmax.f32 %v4276_v44, %v4470_v25  ;;  %v4581_v20 = vmax.f32 %v4277_v48, %v4472_v51  ;;  %v4680_v13 = vsel %vm2529_vm4, %v4677_v16, %v4679_v32  ;;  %v10029_v16 = vld [vmem:[#allocation9 + $0x1a0] sm:$0xf] }
 0x1fc   : > { %v3267_v52 = vrot.slane %v3265_v34, 4  ;;  %v4886_v40 = vsel %vm2738_vm5, %v4884_v42, %v4885_v27  ;;  %v4888_v35 = vsel %vm2738_vm5, %v4885_v27, %v4887_v9  ;;  %v5092_v23 = vrot.slane %v4276_v44, 4  ;;  %v10214_v43 = vld [vmem:[#allocation9 + $0x1a4] sm:$0xf0] }
 0x1fd   : > { %v3266_v37 = vsel %vm11801_vm2, %v3264_v15, %v3265_v34  ;;  %v4788_v56 = vmax.f32 %v4580_v18, %v4678_v30  ;;  %v4789_v8 = vmax.f32 %v4581_v20, %v4680_v13  ;;  %v5093_v1 = vrot.slane %v4277_v48, 4  ;;  %v3367_v18 = vld [vmem:[#allocation2 + $0xc] sm:$0xff]  }
 0x1fe   : > { %3362 = vst [vmem:[#allocation2 + $0xd0] sm:$0xf] %v3266_v37  ;;  %v5095_v50 = vrot.slane %v4278_v10, 4  ;;  %v2343_v58 = vsel %vm2320_vm3, %v2341_v24, %v2342_v57  ;;  %v2345_v53 = vsel %vm2320_vm3, %v2342_v57, %v2344_v6  ;;  %v2550_v2 = vrot.slane %v12547_v3, 2 }
 0x1ff   : > { %3363 = vst [vmem:[#allocation2 + $0xd4] sm:$0x1] %v3267_v52  ;;  %v4996_v39 = vmax.f32 %v4788_v56, %v4886_v40  ;;  %v4997_v59 = vmax.f32 %v4789_v8, %v4888_v35  ;;  %v5094_v14 = vsel %vm2947_vm6, %v5092_v23, %v5093_v1  ;;  %v2441_v44 = vmax.f32 %v12547_v3, %v2343_v58  ;;  %v3369_v35 = vld [vmem:[#allocation2 + $0x14] sm:$0x3] }
 0x200   : > { %v5096_v47 = vsel %vm2947_vm6, %v5093_v1, %v5095_v50  ;;  %v2442_v60 = vmax.f32 %v12551_v55, %v2345_v53  ;;  %v2551_v48 = vrot.slane %v12551_v55, 2  ;;  %v2553_v10 = vrot.slane %v12691_v21, 2 }
 0x201   : > { %v5204_v24 = vmax.f32 %v4996_v39, %v5094_v14  ;;  %v5205_v61 = vmax.f32 %v4997_v59, %v5096_v47  ;;  %v2759_v57 = vrot.slane %v12547_v3, 3  ;;  %v2760_v6 = vrot.slane %v12551_v55, 3  ;;  %v3655_v47 = vld [vmem:[#allocation2 + $0x24] sm:$0xff]  }
 0x202   : > { %v2552_v42 = vsel %vm2529_vm4, %v2550_v2, %v2551_v48  ;;  %v2554_v49 = vsel %vm2529_vm4, %v2551_v48, %v2553_v10  ;;  %v2762_v62 = vrot.slane %v12691_v21, 3  ;;  %v2968_v19 = vrot.slane %v12547_v3, 4 }
 0x203   : > { %v5236_v32 = vpack.c.bf16 %v5204_v24, %v5204_v24  ;;  %v5237_v27 = vpack.c.bf16 %v5205_v61, %v5205_v61  ;;  %v2650_v9 = vmax.f32 %v2441_v44, %v2552_v42  ;;  %v2651_v34 = vmax.f32 %v2442_v60, %v2554_v49  ;;  %v4135_v42 = vld [vmem:[#allocation2 + $0x3c] sm:$0xff]  }
 0x204   : > { %v2761_v25 = vsel %vm2738_vm5, %v2759_v57, %v2760_v6  ;;  %v2763_v51 = vsel %vm2738_vm5, %v2760_v6, %v2762_v62  ;;  %v2969_v30 = vrot.slane %v12551_v55, 4  ;;  %v2971_v15 = vrot.slane %v12691_v21, 4  ;;  %v3417_v55 = vld [vmem:[#allocation2 + $0x20] sm:$0x3]  ;;  %v3657_v57 = vld [vmem:[#allocation2 + $0x2c] sm:$0x3] }
 0x205   : > { %v15438_v20 = vunpack.c.l.bf16 %v12981_v22  ;;  %v2859_v3 = vmax.f32 %v2650_v9, %v2761_v25  ;;  %v2860_v52 = vmax.f32 %v2651_v34, %v2763_v51  ;;  %v10030_v40 = vor.u32 %v10214_v43, %v10029_v16  ;;  %5268 = vst [vmem:[#allocation3 + $0x8] sm:$0xf] %v5236_v32  ;;  %v3897_v6 = vld [vmem:[#allocation2 + $0x38] sm:$0x3]  ;;  %v4137_v9 = vld [vmem:[#allocation2 + $0x44] sm:$0x3] }
 0x206   : > { %v2970_v8 = vsel %vm2947_vm6, %v2968_v19, %v2969_v30  ;;  %v5332_v22 = vrot.slane %v5236_v32, 7  ;;  %5269 = vst [vmem:[#allocation3 + $0x18] sm:$0xf] %v5237_v27  ;;  %v5334_v58 = vrot.slane %v5237_v27, 7  ;;  %v2972_v53 = vsel %vm2947_vm6, %v2969_v30, %v2971_v15  ;;  %v13094_v15 = vld [vmem:[#allocation2 + $0x20] sm:$0x3] }
 0x207   : > { %v1931_v13 = vmax.f32 %v12883_v7, %v15438_v20  ;;  %8490 = vmatpush.bf16.msrb.mxu1 %v10030_v40  ;;  %v3463_v7 = vunpack.c.l.bf16 %v3367_v18  ;;  %v3068_v2 = vmax.f32 %v2859_v3, %v2970_v8  ;;  %v3069_v59 = vmax.f32 %v2860_v52, %v2972_v53 }
 0x208   : > { %v5333_v39 = vrot.slane %v5332_v22, 4  ;;  %5460 = vst [vmem:[#allocation2 + $0x18] sm:$0xe] %v5332_v22  ;;  %v3464_v14 = vunpack.c.h.bf16 %v3367_v18  ;;  %v3465_v44 = vunpack.c.l.bf16 %v3369_v35  ;;  %v15439_v60 = vunpack.c.l.bf16 %v12917_v26 }
 0x209   : > { %v5336_v10 = vrot.slane %v5334_v58, 4  ;;  %v3100_v24 = vpack.c.bf16 %v3068_v2, %v3068_v2  ;;  %v3513_v61 = vunpack.c.l.bf16 %v3417_v55  ;;  %v3101_v62 = vpack.c.bf16 %v3069_v59, %v3069_v59 }
 0x20a   : > { %v13088_v48 = vmax.f32 %v1931_v13, %v15439_v60  ;;  %v5335_v49 = vsel %vm11801_vm2, %v5333_v39, %v5334_v58  ;;  %v3559_v19 = vmax.f32 %v3463_v7, %v12962_v63  ;;  %v3560_v16 = vmax.f32 %v3464_v14, %v12976_v28 }
 0x20b   : > { %5461 = vst [vmem:[#allocation2 + $0x1c] sm:$0xf] %v5335_v49  ;;  %v3208_v43 = vrot.slane %v3100_v24, 7  ;;  %v3561_v32 = vmax.f32 %v3465_v44, %v3513_v61  ;;  %v3751_v26 = vunpack.c.l.bf16 %v3655_v47  ;;  %v3752_v27 = vunpack.c.h.bf16 %v3655_v47 }
 0x20c   : > { %3132 = vst [vmem:[#allocation3 + $0x84] sm:$0xf] %v3100_v24  ;;  %v3210_v34 = vrot.slane %v3101_v62, 7  ;;  %v3753_v25 = vunpack.c.l.bf16 %v3657_v57  ;;  %v3993_v51 = vunpack.c.l.bf16 %v3897_v6  ;;  %v4231_v30 = vunpack.c.l.bf16 %v4135_v42  ;;  %v9573_v18 = vld [vmem:[#allocation3 + $0x8] sm:$0xf] }
 0x20d   : > { %3133 = vst [vmem:[#allocation3 + $0x94] sm:$0xf] %v3101_v62  ;;  %v3209_v20 = vrot.slane %v3208_v43, 4  ;;  %v3799_v13 = vmax.f32 %v3559_v19, %v3751_v26  ;;  %v3800_v3 = vmax.f32 %v3560_v16, %v3752_v27  ;;  %v4232_v52 = vunpack.c.h.bf16 %v4135_v42  ;;  %v10100_v35 = vld [vmem:[#allocation3 + $0x14] sm:$0xf0] }
 0x20e   : > { %v3212_v8 = vrot.slane %v3210_v34, 4  ;;  %3328 = vst [vmem:[#allocation2 + $0x48] sm:$0xe] %v3208_v43  ;;  %v3801_v55 = vmax.f32 %v3561_v32, %v3753_v25  ;;  %v4233_v22 = vunpack.c.l.bf16 %v4137_v9  ;;  %v13097_v7 = vor.u32 %v10100_v35, %v9573_v18 }
 0x20f   : > { %v3211_v58 = vsel %vm11801_vm2, %v3209_v20, %v3210_v34  ;;  %v4039_v53 = vmax.f32 %v3799_v13, %v13038_v46  ;;  %v4040_v2 = vmax.f32 %v3800_v3, %v13040_v54  ;;  %5462 = vst [vmem:[#allocation2 + $0x20] sm:$0x1] %v5336_v10  ;;  %v2346_v59 = vrot.slane %v12746_v5, 1 }
 0x210   : > { %15440 = vst [vmem:[#allocation34_spill] sm:$0xff] %v13097_v7  ;;  %v4041_v39 = vmax.f32 %v3801_v55, %v3993_v51  ;;  %v2347_v14 = vrot.slane %v12826_v11, 1  ;;  %v2349_v44 = vrot.slane %v12840_v45, 1  ;;  %8404 = vmatmul.bf16.vlgmr.msrb.gmra.mxu0 %v13097_v7  ;;  %v2555_v24 = vrot.slane %v12746_v5, 2 }
 0x211   : > { %3329 = vst [vmem:[#allocation2 + $0x4c] sm:$0xf] %v3211_v58  ;;  %v4279_v47 = vmax.f32 %v4039_v53, %v4231_v30  ;;  %v4280_v60 = vmax.f32 %v4040_v2, %v4232_v52  ;;  %v2556_v61 = vrot.slane %v12826_v11, 2  ;;  %v2558_v42 = vrot.slane %v12840_v45, 2 }
 0x212   : > { %3330 = vst [vmem:[#allocation2 + $0x50] sm:$0x1] %v3212_v8  ;;  %v4281_v57 = vmax.f32 %v4041_v39, %v4233_v22  ;;  %v2348_v10 = vsel %vm2320_vm3, %v2346_v59, %v2347_v14  ;;  %v2350_v6 = vsel %vm2320_vm3, %v2347_v14, %v2349_v44 }
 0x213   : > { %v10113_v49 = vld [vmem:[#allocation3 + $0x84] sm:$0xf]  ;;  %v4473_v62 = vrot.slane %v4279_v47, 1  ;;  %v4474_v19 = vrot.slane %v4280_v60, 1  ;;  %v4681_v16 = vrot.slane %v4279_v47, 2  ;;  %v4682_v43 = vrot.slane %v4280_v60, 2 }
 0x214   : > { %v9631_v32 = vld [vmem:[#allocation3 + $0x90] sm:$0xf0]  ;;  %v4476_v26 = vrot.slane %v4281_v57, 1  ;;  %v4684_v27 = vrot.slane %v4281_v57, 2  ;;  %v4889_v9 = vrot.slane %v4279_v47, 3  ;;  %v4890_v34 = vrot.slane %v4280_v60, 3 }
 0x215   : > { %v13112_v25 = vor.u32 %v10113_v49, %v9631_v32  ;;  %v4475_v51 = vsel %vm2320_vm3, %v4473_v62, %v4474_v19  ;;  %v4683_v30 = vsel %vm2529_vm4, %v4681_v16, %v4682_v43  ;;  %v4892_v18 = vrot.slane %v4281_v57, 3 }
 0x216   : > { %v4477_v20 = vsel %vm2320_vm3, %v4474_v19, %v4476_v26  ;;  %v4582_v13 = vmax.f32 %v4279_v47, %v4475_v51  ;;  %v4685_v3 = vsel %vm2529_vm4, %v4682_v43, %v4684_v27  ;;  %v4891_v52 = vsel %vm2738_vm5, %v4889_v9, %v4890_v34  ;;  %v10021_v26 = vld [vmem:[#allocation9 + $0x190] sm:$0xf]  ;;  %v10212_v9 = vld [vmem:[#allocation9 + $0x194] sm:$0xf0] }
 0x217   : > { %15441 = vst [vmem:[#allocation35_spill] sm:$0xff] %v13112_v25  ;;  %8335 = vmatmul.bf16.gmra.mxu3 %v13112_v25  ;;  %v4583_v35 = vmax.f32 %v4280_v60, %v4477_v20  ;;  %v4893_v8 = vsel %vm2738_vm5, %v4890_v34, %v4892_v18  ;;  %v5097_v55 = vrot.slane %v4279_v47, 4  ;;  %v5098_v22 = vrot.slane %v4280_v60, 4  ;;  %v9709_v47 = vld [vmem:[#allocation3 + $0x120] sm:$0xf] }
 0x218   : > { %v4790_v58 = vmax.f32 %v4582_v13, %v4683_v30  ;;  %v5100_v53 = vrot.slane %v4281_v57, 4  ;;  %v2443_v2 = vmax.f32 %v12746_v5, %v2348_v10  ;;  %v2444_v39 = vmax.f32 %v12826_v11, %v2350_v6  ;;  %v10135_v60 = vld [vmem:[#allocation3 + $0x12c] sm:$0xf0] }
 0x219   : > { %v4791_v59 = vmax.f32 %v4583_v35, %v4685_v3  ;;  %v5099_v14 = vsel %vm2947_vm6, %v5097_v55, %v5098_v22  ;;  %v2557_v44 = vsel %vm2529_vm4, %v2555_v24, %v2556_v61  ;;  %v2559_v49 = vsel %vm2529_vm4, %v2556_v61, %v2558_v42  ;;  %v3418_v35 = vld [vmem:[#allocation2 + $0x24] sm:$0xff]  }
 0x21a   : > { %v4998_v62 = vmax.f32 %v4790_v58, %v4891_v52  ;;  %v5101_v19 = vsel %vm2947_vm6, %v5098_v22, %v5100_v53  ;;  %v2652_v16 = vmax.f32 %v2443_v2, %v2557_v44  ;;  %v2653_v43 = vmax.f32 %v2444_v39, %v2559_v49  ;;  %v3660_v22 = vld [vmem:[#allocation2 + $0x38] sm:$0x3] }
 0x21b   : > { %v4999_v32 = vmax.f32 %v4791_v59, %v4893_v8  ;;  %v2764_v57 = vrot.slane %v12746_v5, 3  ;;  %v2765_v10 = vrot.slane %v12826_v11, 3  ;;  %v2767_v6 = vrot.slane %v12840_v45, 3  ;;  %v3420_v8 = vld [vmem:[#allocation2 + $0x2c] sm:$0x3] }
 0x21c   : > { %v5206_v27 = vmax.f32 %v4998_v62, %v5099_v14  ;;  %v2973_v24 = vrot.slane %v12746_v5, 4  ;;  %v2974_v61 = vrot.slane %v12826_v11, 4  ;;  %v2976_v42 = vrot.slane %v12840_v45, 4  ;;  %v3898_v62 = vld [vmem:[#allocation2 + $0x3c] sm:$0xff]   ;;  %v5558_v5 = vld [vmem:[#allocation2 + $0x14] sm:$0x3] }
 0x21d   : > { %v5207_v34 = vmax.f32 %v4999_v32, %v5101_v19  ;;  %v2766_v51 = vsel %vm2738_vm5, %v2764_v57, %v2765_v10  ;;  %v2768_v30 = vsel %vm2738_vm5, %v2765_v10, %v2767_v6  ;;  %v13135_v18 = vor.u32 %v10135_v60, %v9709_v47  ;;  %v13142_v19 = vld [vmem:[#allocation2 + $0x24] sm:$0xff]  }
 0x21e   : > { %v5238_v20 = vpack.c.bf16 %v5206_v27, %v5206_v27  ;;  %v2861_v13 = vmax.f32 %v2652_v16, %v2766_v51  ;;  %v2862_v3 = vmax.f32 %v2653_v43, %v2768_v30  ;;  %v2975_v52 = vsel %vm2947_vm6, %v2973_v24, %v2974_v61  ;;  %v10745_v57 = vld [vmem:[#allocation2 + $0x48] sm:$0xff]  }
 0x21f   : > { %15442 = vst [vmem:[#allocation19_spill] sm:$0xff] %v13135_v18  ;;  %v5239_v11 = vpack.c.bf16 %v5207_v34, %v5207_v34  ;;  %v2977_v45 = vsel %vm2947_vm6, %v2974_v61, %v2976_v42  ;;  %8271 = vmatmul.bf16.gmra.mxu2 %v13135_v18  ;;  %v10022_v55 = vor.u32 %v10212_v9, %v10021_v26  ;;  %v3468_v39 = vunpack.c.l.bf16 %v13094_v15  ;;  %v3900_v26 = vld [vmem:[#allocation2 + $0x44] sm:$0x3]  ;;  %v4140_v9 = vld [vmem:[#allocation2 + $0x50] sm:$0x3] }
 0x220   : > { %5270 = vst [vmem:[#allocation3 + $0x28] sm:$0xf] %v5238_v20  ;;  %v5337_v58 = vrot.slane %v5238_v20, 7  ;;  %v3070_v53 = vmax.f32 %v2861_v13, %v2975_v52  ;;  %v3071_v2 = vmax.f32 %v2862_v3, %v2977_v45  ;;  %v3514_v14 = vunpack.c.l.bf16 %v3418_v35  ;;  %v5510_v32 = vld [vmem:[#allocation2 + $0x8] sm:$0x3] }
 0x221   : > { %5271 = vst [vmem:[#allocation3 + $0x38] sm:$0xf] %v5239_v11  ;;  %v5339_v59 = vrot.slane %v5239_v11, 7  ;;  %8491 = vmatpush.bf16.msrb.mxu1 %v10022_v55  ;;  %v3515_v44 = vunpack.c.h.bf16 %v3418_v35  ;;  %v3516_v49 = vunpack.c.l.bf16 %v3420_v8  ;;  %v3756_v60 = vunpack.c.l.bf16 %v3660_v22 }
 0x222   : > { %v5338_v16 = vrot.slane %v5337_v58, 4  ;;  %v3102_v43 = vpack.c.bf16 %v3070_v53, %v3070_v53  ;;  %v3103_v47 = vpack.c.bf16 %v3071_v2, %v3071_v2  ;;  %5463 = vst [vmem:[#allocation2 + $0x24] sm:$0xe] %v5337_v58  ;;  %v3562_v10 = vmax.f32 %v12962_v63, %v3514_v14  ;;  %v15443_v2 = vld [vmem:[#allocation42_spill] sm:$0xff] }
 0x223   : > { %v3563_v15 = vmax.f32 %v12976_v28, %v3515_v44  ;;  %v3564_v6 = vmax.f32 %v3468_v39, %v3516_v49  ;;  %v3994_v42 = vunpack.c.l.bf16 %v3898_v62  ;;  %v3995_v20 = vunpack.c.h.bf16 %v3898_v62 }
 0x224   : > { %v5340_v27 = vsel %vm11801_vm2, %v5338_v16, %v5339_v59  ;;  %3134 = vst [vmem:[#allocation3 + $0xa4] sm:$0xf] %v3102_v43  ;;  %v3213_v24 = vrot.slane %v3102_v43, 7  ;;  %v3215_v61 = vrot.slane %v3103_v47, 7  ;;  %v3802_v34 = vmax.f32 %v3562_v10, %v13038_v46 }
 0x225   : > { %3135 = vst [vmem:[#allocation3 + $0xb4] sm:$0xf] %v3103_v47  ;;  %v3803_v51 = vmax.f32 %v3563_v15, %v13040_v54  ;;  %v3804_v30 = vmax.f32 %v3564_v6, %v3756_v60  ;;  %v3996_v28 = vunpack.c.l.bf16 %v3900_v26  ;;  %v13151_v3 = vunpack.c.l.bf16 %v10745_v57 }
 0x226   : > { %v3214_v63 = vrot.slane %v3213_v24, 4  ;;  %v3217_v13 = vrot.slane %v3215_v61, 4  ;;  %3331 = vst [vmem:[#allocation2 + $0x54] sm:$0xe] %v3213_v24  ;;  %v4042_v35 = vmax.f32 %v3802_v34, %v3994_v42  ;;  %v13153_v11 = vunpack.c.h.bf16 %v10745_v57 }
 0x227   : > { %v9589_v52 = vld [vmem:[#allocation3 + $0x28] sm:$0xf]  ;;  %v4043_v8 = vmax.f32 %v3803_v51, %v3995_v20  ;;  %v4236_v45 = vunpack.c.l.bf16 %v4140_v9  ;;  %5464 = vst [vmem:[#allocation2 + $0x28] sm:$0xf] %v5340_v27  ;;  %v5341_v55 = vrot.slane %v5339_v59, 4  ;;  %v4044_v53 = vmax.f32 %v3804_v30, %v3996_v28 }
 0x228   : > { %v10104_v22 = vld [vmem:[#allocation3 + $0x34] sm:$0xf0]  ;;  %v3216_v58 = vsel %vm11801_vm2, %v3214_v63, %v3215_v61  ;;  %3333 = vst [vmem:[#allocation2 + $0x5c] sm:$0x1] %v3217_v13  ;;  %v2351_v39 = vrot.slane %v15443_v2, 1  ;;  %v4282_v44 = vmax.f32 %v4042_v35, %v13151_v3  ;;  %v2352_v62 = vrot.slane %v12761_v0, 1 }
 0x229   : > { %v13158_v14 = vor.u32 %v10104_v22, %v9589_v52  ;;  %3332 = vst [vmem:[#allocation2 + $0x58] sm:$0xf] %v3216_v58  ;;  %v4283_v49 = vmax.f32 %v4043_v8, %v13153_v11  ;;  %v4284_v16 = vmax.f32 %v4044_v53, %v4236_v45  ;;  %v2354_v59 = vrot.slane %v12812_v12, 1  ;;  %v13171_v20 = vld [vmem:[#allocation2 + $0x2c] sm:$0x3] }
 0x22a   : > { %v2560_v43 = vrot.slane %v15443_v2, 2  ;;  %v2561_v47 = vrot.slane %v12761_v0, 2  ;;  %v4478_v57 = vrot.slane %v4282_v44, 1  ;;  %v4686_v15 = vrot.slane %v4282_v44, 2  ;;  %5465 = vst [vmem:[#allocation2 + $0x2c] sm:$0x1] %v5341_v55 }
 0x22b   : > { %15444 = vst [vmem:[#allocation40_spill] sm:$0xff] %v13158_v14  ;;  %8409 = vmatmul.bf16.gmra.mxu0 %v13158_v14  ;;  %v10117_v60 = vld [vmem:[#allocation3 + $0xa4] sm:$0xf]  ;;  %v4479_v10 = vrot.slane %v4283_v49, 1  ;;  %v4687_v6 = vrot.slane %v4283_v49, 2  ;;  %v4481_v27 = vrot.slane %v4284_v16, 1 }
 0x22c   : > { %v9647_v26 = vld [vmem:[#allocation3 + $0xb0] sm:$0xf0]  ;;  %v4689_v24 = vrot.slane %v4284_v16, 2  ;;  %v4894_v61 = vrot.slane %v4282_v44, 3  ;;  %v4895_v42 = vrot.slane %v4283_v49, 3  ;;  %v4897_v30 = vrot.slane %v4284_v16, 3 }
 0x22d   : > { %v13167_v9 = vor.u32 %v10117_v60, %v9647_v26  ;;  %v4480_v34 = vsel %vm2320_vm3, %v4478_v57, %v4479_v10  ;;  %v4688_v51 = vsel %vm2529_vm4, %v4686_v15, %v4687_v6  ;;  %v4482_v63 = vsel %vm2320_vm3, %v4479_v10, %v4481_v27 }
 0x22e   : > { %v4584_v13 = vmax.f32 %v4282_v44, %v4480_v34  ;;  %v4690_v28 = vsel %vm2529_vm4, %v4687_v6, %v4689_v24  ;;  %v4896_v52 = vsel %vm2738_vm5, %v4894_v61, %v4895_v42  ;;  %v4585_v35 = vmax.f32 %v4283_v49, %v4482_v63 }
 0x22f   : > { %15445 = vst [vmem:[#allocation42_spill] sm:$0xff] %v13167_v9  ;;  %8340 = vmatmul.bf16.gmra.mxu3 %v13167_v9  ;;  %v4898_v8 = vsel %vm2738_vm5, %v4895_v42, %v4897_v30  ;;  %v5102_v45 = vrot.slane %v4282_v44, 4  ;;  %v5103_v22 = vrot.slane %v4283_v49, 4  ;;  %v5105_v53 = vrot.slane %v4284_v16, 4  ;;  %v10139_v30 = vld [vmem:[#allocation3 + $0x14c] sm:$0xf0] }
 0x230   : > { %v4792_v58 = vmax.f32 %v4584_v13, %v4688_v51  ;;  %v2353_v60 = vsel %vm2320_vm3, %v2351_v39, %v2352_v62  ;;  %v2355_v57 = vsel %vm2320_vm3, %v2352_v62, %v2354_v59  ;;  %v4793_v10 = vmax.f32 %v4585_v35, %v4690_v28  ;;  %v9725_v51 = vld [vmem:[#allocation3 + $0x140] sm:$0xf]  ;;  %v3904_v37 = vld [vmem:[#allocation2 + $0x54] sm:$0xff]  }
 0x231   : > { %v5104_v15 = vsel %vm2947_vm6, %v5102_v45, %v5103_v22  ;;  %v2445_v6 = vmax.f32 %v15443_v2, %v2353_v60  ;;  %v2446_v55 = vmax.f32 %v12761_v0, %v2355_v57  ;;  %v5106_v27 = vsel %vm2947_vm6, %v5103_v22, %v5105_v53  ;;  %v10013_v22 = vld [vmem:[#allocation9 + $0x180] sm:$0xf] }
 0x232   : > { %v5000_v26 = vmax.f32 %v4792_v58, %v4896_v52  ;;  %v2562_v24 = vsel %vm2529_vm4, %v2560_v43, %v2561_v47  ;;  %v2563_v44 = vrot.slane %v12812_v12, 2  ;;  %v5001_v49 = vmax.f32 %v4793_v10, %v4898_v8 }
 0x233   : > { %v2654_v16 = vmax.f32 %v2445_v6, %v2562_v24  ;;  %v2769_v39 = vrot.slane %v15443_v2, 3  ;;  %v2770_v62 = vrot.slane %v12761_v0, 3  ;;  %v2772_v42 = vrot.slane %v12812_v12, 3  ;;  %v3423_v6 = vld [vmem:[#allocation2 + $0x38] sm:$0x3]  ;;  %v3661_v24 = vld [vmem:[#allocation2 + $0x3c] sm:$0xff]  }
 0x234   : > { %v5208_v59 = vmax.f32 %v5000_v26, %v5104_v15  ;;  %v2564_v61 = vsel %vm2529_vm4, %v2561_v47, %v2563_v44  ;;  %v2978_v34 = vrot.slane %v15443_v2, 4  ;;  %v5209_v63 = vmax.f32 %v5001_v49, %v5106_v27  ;;  %v10210_v47 = vld [vmem:[#allocation9 + $0x184] sm:$0xf0] }
 0x235   : > { %v2655_v13 = vmax.f32 %v2446_v55, %v2564_v61  ;;  %v2771_v43 = vsel %vm2738_vm5, %v2769_v39, %v2770_v62  ;;  %v2979_v28 = vrot.slane %v12761_v0, 4  ;;  %v2773_v35 = vsel %vm2738_vm5, %v2770_v62, %v2772_v42  ;;  %v3663_v62 = vld [vmem:[#allocation2 + $0x44] sm:$0x3] }
 0x236   : > { %v5240_v52 = vpack.c.bf16 %v5208_v59, %v5208_v59  ;;  %v2863_v8 = vmax.f32 %v2654_v16, %v2771_v43  ;;  %v2981_v45 = vrot.slane %v12812_v12, 4  ;;  %v5241_v58 = vpack.c.bf16 %v5209_v63, %v5209_v63  ;;  %v13204_v59 = vld [vmem:[#allocation2 + $0x70] sm:$0xf]  ;;  %v4141_v63 = vld [vmem:[#allocation2 + $0x54] sm:$0xff]  }
 0x237   : > { %v2864_v53 = vmax.f32 %v2655_v13, %v2773_v35  ;;  %v2980_v2 = vsel %vm2947_vm6, %v2978_v34, %v2979_v28  ;;  %v13196_v60 = vor.u32 %v10139_v30, %v9725_v51  ;;  %v10014_v12 = vor.u32 %v10210_v47, %v10013_v22  ;;  %v3903_v30 = vld [vmem:[#allocation2 + $0x50] sm:$0x3]  ;;  %v7572_v35 = vld [vmem:[%s15144_s4] sm:$0x3] }
 0x238   : > { %5272 = vst [vmem:[#allocation3 + $0x48] sm:$0xf] %v5240_v52  ;;  %v5342_v10 = vrot.slane %v5240_v52, 7  ;;  %v2982_v0 = vsel %vm2947_vm6, %v2979_v28, %v2981_v45  ;;  %v3072_v15 = vmax.f32 %v2863_v8, %v2980_v2  ;;  %v5344_v55 = vrot.slane %v5241_v58, 7  ;;  %v4143_v28 = vld [vmem:[#allocation2 + $0x5c] sm:$0x3] }
 0x239   : > { %15446 = vst [vmem:[#allocation50_spill] sm:$0xff] %v13196_v60  ;;  %v3073_v26 = vmax.f32 %v2864_v53, %v2982_v0  ;;  %8276 = vmatmul.bf16.gmra.mxu2 %v13196_v60  ;;  %v3469_v27 = vunpack.c.l.bf16 %v13142_v19  ;;  %v3470_v16 = vunpack.c.h.bf16 %v13142_v19  ;;  %v3471_v39 = vunpack.c.l.bf16 %v13171_v20  ;;  %8492 = vmatpush.bf16.msrb.mxu1 %v10014_v12  ;;  %v13210_v52 = vld [vmem:[#allocation2 + $0x38] sm:$0x3] }
 0x23a   : > { %5273 = vst [vmem:[#allocation3 + $0x58] sm:$0xf] %v5241_v58  ;;  %v5343_v44 = vrot.slane %v5342_v10, 4  ;;  %v3104_v49 = vpack.c.bf16 %v3072_v15, %v3072_v15  ;;  %v5346_v61 = vrot.slane %v5344_v55, 4  ;;  %v3519_v34 = vunpack.c.l.bf16 %v3423_v6  ;;  %v10175_v58 = vld [vmem:[#allocation9 + $0x74] sm:$0xf] }
 0x23b   : > { %5466 = vst [vmem:[#allocation2 + $0x30] sm:$0xe] %v5342_v10  ;;  %v3105_v42 = vpack.c.bf16 %v3073_v26, %v3073_v26  ;;  %v3565_v51 = vmax.f32 %v3469_v27, %v13038_v46  ;;  %v3566_v19 = vmax.f32 %v3470_v16, %v13040_v54  ;;  %v3757_v20 = vunpack.c.l.bf16 %v3661_v24  ;;  %v9879_v15 = vld [vmem:[#allocation9 + $0x78] sm:$0xf0] }
 0x23c   : > { %v5345_v13 = vsel %vm11801_vm2, %v5343_v44, %v5344_v55  ;;  %3136 = vst [vmem:[#allocation3 + $0xc4] sm:$0xf] %v3104_v49  ;;  %v3218_v43 = vrot.slane %v3104_v49, 7  ;;  %v3567_v45 = vmax.f32 %v3471_v39, %v3519_v34  ;;  %v3758_v22 = vunpack.c.h.bf16 %v3661_v24  ;;  %v13215_v44 = vld [vmem:[#allocation2] sm:$0xff]  }
 0x23d   : > { %3137 = vst [vmem:[#allocation3 + $0xd4] sm:$0xf] %v3105_v42  ;;  %v3220_v8 = vrot.slane %v3105_v42, 7  ;;  %v3759_v47 = vunpack.c.l.bf16 %v3663_v62  ;;  %v3805_v2 = vmax.f32 %v3565_v51, %v3757_v20  ;;  %v3999_v10 = vunpack.c.l.bf16 %v3903_v30  ;;  %v10125_v42 = vld [vmem:[#allocation3 + $0xe4] sm:$0xf] }
 0x23e   : > { %v3219_v53 = vrot.slane %v3218_v43, 4  ;;  %3334 = vst [vmem:[#allocation2 + $0x60] sm:$0xe] %v3218_v43  ;;  %v4237_v0 = vunpack.c.l.bf16 %v4141_v63  ;;  %v3806_v26 = vmax.f32 %v3566_v19, %v3758_v22  ;;  %v4238_v27 = vunpack.c.h.bf16 %v4141_v63  ;;  %v10191_v43 = vld [vmem:[#allocation9 + $0xf4] sm:$0xf] }
 0x23f   : > { %v9605_v6 = vld [vmem:[#allocation3 + $0x48] sm:$0xf]  ;;  %v3222_v55 = vrot.slane %v3220_v8, 4  ;;  %v3807_v12 = vmax.f32 %v3567_v45, %v3759_v47  ;;  %5467 = vst [vmem:[#allocation2 + $0x34] sm:$0xf] %v5345_v13  ;;  %v4045_v39 = vmax.f32 %v3805_v2, %v13151_v3  ;;  %v4239_v62 = vunpack.c.l.bf16 %v4143_v28  ;;  %v5556_v2 = vld [vmem:[#allocation2 + $0xc] sm:$0xff]  }
 0x240   : > { %v3221_v24 = vsel %vm11801_vm2, %v3219_v53, %v3220_v8  ;;  %5468 = vst [vmem:[#allocation2 + $0x38] sm:$0x1] %v5346_v61  ;;  %v4046_v51 = vmax.f32 %v3806_v26, %v13153_v11  ;;  %v9882_v63 = vor.u32 %v10175_v58, %v9879_v15  ;;  %v9679_v13 = vld [vmem:[#allocation3 + $0xf0] sm:$0xf0]  ;;  %v13224_v19 = vperm.slane %v7572_v35, 0 }
 0x241   : > { %v10108_v16 = vld [vmem:[#allocation3 + $0x54] sm:$0xf0]  ;;  %3335 = vst [vmem:[#allocation2 + $0x64] sm:$0xf] %v3221_v24  ;;  %v4047_v30 = vmax.f32 %v3807_v12, %v3999_v10  ;;  %v4285_v20 = vmax.f32 %v4045_v39, %v4237_v0  ;;  %v13226_v45 = vor.u32 %v10125_v42, %v9679_v13  ;;  %v9943_v8 = vld [vmem:[#allocation9 + $0xf8] sm:$0xf0]  ;;  %v10548_v28 = vunpack.c.l.bf16 %v13215_v44 }
 0x242   : > { %v13221_v34 = vor.u32 %v10108_v16, %v9605_v6  ;;  %3336 = vst [vmem:[#allocation2 + $0x68] sm:$0x1] %v3222_v55  ;;  %v4286_v22 = vmax.f32 %v4046_v51, %v4238_v27  ;;  %8574 = vmatpush.bf16.msra.mxu2 %v9882_v63  ;;  %v9946_v53 = vor.u32 %v10191_v43, %v9943_v8  ;;  %v10549_v58 = vunpack.c.h.bf16 %v13215_v44  ;;  %v9741_v24 = vld [vmem:[#allocation3 + $0x160] sm:$0xf]  ;;  %v10143_v51 = vld [vmem:[#allocation3 + $0x16c] sm:$0xf0] }
 0x243   : > { %15448 = vst [vmem:[#allocation52_spill] sm:$0xff] %v13226_v45  ;;  %v10121_v61 = vld [vmem:[#allocation3 + $0xc4] sm:$0xf]  ;;  %v4287_v47 = vmax.f32 %v4047_v30, %v4239_v62  ;;  %v4483_v35 = vrot.slane %v4285_v20, 1  ;;  %v4691_v15 = vrot.slane %v4285_v20, 2  ;;  %v4899_v6 = vrot.slane %v4285_v20, 3 }
 0x244   : > { %15447 = vst [vmem:[#allocation51_spill] sm:$0xff] %v13221_v34  ;;  %8414 = vmatmul.bf16.gmra.mxu0 %v13221_v34  ;;  %v9663_v10 = vld [vmem:[#allocation3 + $0xd0] sm:$0xf0]  ;;  %v5107_v0 = vrot.slane %v4285_v20, 4  ;;  %v4484_v26 = vrot.slane %v4286_v22, 1  ;;  %v4692_v16 = vrot.slane %v4286_v22, 2  ;;  %8663 = vmatpush.bf16.msra.mxu3 %v9946_v53  ;;  %v5652_v8 = vunpack.c.l.bf16 %v5556_v2 }
 0x245   : > { %v13231_v55 = vor.u32 %v10121_v61, %v9663_v10  ;;  %v4486_v12 = vrot.slane %v4287_v47, 1  ;;  %v4694_v39 = vrot.slane %v4287_v47, 2  ;;  %v4900_v27 = vrot.slane %v4286_v22, 3  ;;  %v10207_v13 = vld [vmem:[#allocation9 + $0x174] sm:$0xf] }
 0x246   : > { %v4902_v62 = vrot.slane %v4287_v47, 3  ;;  %v5108_v42 = vrot.slane %v4286_v22, 4  ;;  %v4485_v44 = vsel %vm2320_vm3, %v4483_v35, %v4484_v26  ;;  %v5110_v63 = vrot.slane %v4287_v47, 4  ;;  %v10007_v43 = vld [vmem:[#allocation9 + $0x178] sm:$0xf0]  ;;  %v10611_v47 = vld [vmem:[#allocation2 + $0x18] sm:$0xff]  }
 0x247   : > { %15449 = vst [vmem:[#allocation53_spill] sm:$0xff] %v13231_v55  ;;  %8345 = vmatmul.bf16.gmra.mxu3 %v13231_v55  ;;  %v4487_v30 = vsel %vm2320_vm3, %v4484_v26, %v4486_v12  ;;  %v4586_v61 = vmax.f32 %v4285_v20, %v4485_v44  ;;  %v4693_v53 = vsel %vm2529_vm4, %v4691_v15, %v4692_v16  ;;  %v5798_v44 = vld [vmem:[#allocation2 + $0x20] sm:$0x3]  ;;  %v6036_v15 = vld [vmem:[#allocation2 + $0x24] sm:$0xff]  }
 0x248   : > { %v4587_v10 = vmax.f32 %v4286_v22, %v4487_v30  ;;  %v4695_v57 = vsel %vm2529_vm4, %v4692_v16, %v4694_v39  ;;  %v4901_v21 = vsel %vm2738_vm5, %v4899_v6, %v4900_v27  ;;  %v4903_v40 = vsel %vm2738_vm5, %v4900_v27, %v4902_v62  ;;  %v6038_v62 = vld [vmem:[#allocation2 + $0x2c] sm:$0x3] }
 0x249   : > { %v5109_v35 = vsel %vm2947_vm6, %v5107_v0, %v5108_v42  ;;  %v13241_v50 = vor.u32 %v10143_v51, %v9741_v24  ;;  %v4794_v26 = vmax.f32 %v4586_v61, %v4693_v53  ;;  %v5111_v20 = vsel %vm2947_vm6, %v5108_v42, %v5110_v63  ;;  %v3909_v14 = vld [vmem:[#allocation2 + $0x68] sm:$0x3] }
 0x24a   : > { %v4795_v12 = vmax.f32 %v4587_v10, %v4695_v57  ;;  %v10010_v22 = vor.u32 %v10207_v13, %v10007_v43  ;;  %v5606_v16 = vunpack.c.l.bf16 %v5510_v32  ;;  %v5653_v39 = vunpack.c.h.bf16 %v5556_v2  ;;  %v10675_v57 = vld [vmem:[#allocation2 + $0x30] sm:$0xff]   ;;  %v3435_v9 = vld [vmem:[#allocation2 + $0x68] sm:$0x3] }
 0x24b   : > { %15450 = vst [vmem:[#allocation54_spill] sm:$0xff] %v13241_v50  ;;  %8281 = vmatmul.bf16.gmra.mxu2 %v13241_v50  ;;  %v5654_v30 = vunpack.c.l.bf16 %v5558_v5  ;;  %v5700_v6 = vmax.f32 %v10548_v28, %v5652_v8  ;;  %v5002_v1 = vmax.f32 %v4794_v26, %v4901_v21  ;;  %v13245_v0 = vunpack.c.l.bf16 %v10611_v47  ;;  %v6278_v5 = vld [vmem:[#allocation2 + $0x38] sm:$0x3]  ;;  %v10223_v28 = vld [vmem:[#allocation9 + $0x1f4] sm:$0xf] }
 0x24c   : > { %v5003_v27 = vmax.f32 %v4795_v12, %v4903_v40  ;;  %8752 = vmatpush.bf16.msra.mxu0 %v10010_v22  ;;  %v13247_v24 = vunpack.c.h.bf16 %v10611_v47  ;;  %v5701_v51 = vmax.f32 %v10549_v58, %v5653_v39  ;;  %v5894_v63 = vunpack.c.l.bf16 %v5798_v44  ;;  %v10071_v21 = vld [vmem:[#allocation9 + $0x1f8] sm:$0xf0]  ;;  %v13256_v39 = vld [vmem:[#allocation2 + $0x3c] sm:$0xff]  }
 0x24d   : > { %v5702_v42 = vmax.f32 %v5606_v16, %v5654_v30  ;;  %v6132_v13 = vunpack.c.l.bf16 %v6036_v15  ;;  %v5210_v43 = vmax.f32 %v5002_v1, %v5109_v35  ;;  %v5940_v32 = vmax.f32 %v5700_v6, %v13245_v0  ;;  %v13258_v30 = vld [vmem:[#allocation2 + $0x44] sm:$0x3]  ;;  %v9871_v50 = vld [vmem:[#allocation9 + $0x68] sm:$0xf0] }
 0x24e   : > { %v5211_v61 = vmax.f32 %v5003_v27, %v5111_v20  ;;  %v6133_v2 = vunpack.c.h.bf16 %v6036_v15  ;;  %v5941_v40 = vmax.f32 %v5701_v51, %v13247_v24  ;;  %v6134_v10 = vunpack.c.l.bf16 %v6038_v62  ;;  %v3424_v62 = vld [vmem:[#allocation2 + $0x3c] sm:$0xff]  }
 0x24f   : > { %v5942_v8 = vmax.f32 %v5702_v42, %v5894_v63  ;;  %v13251_v53 = vunpack.c.l.bf16 %v10675_v57  ;;  %v5242_v47 = vpack.c.bf16 %v5210_v43, %v5210_v43  ;;  %v6180_v58 = vmax.f32 %v5940_v32, %v6132_v13 }
 0x250   : > { %v5243_v26 = vpack.c.bf16 %v5211_v61, %v5211_v61  ;;  %v13253_v12 = vunpack.c.h.bf16 %v10675_v57  ;;  %v6181_v22 = vmax.f32 %v5941_v40, %v6133_v2  ;;  %v6374_v35 = vunpack.c.l.bf16 %v6278_v5  ;;  %v3426_v5 = vld [vmem:[#allocation2 + $0x44] sm:$0x3] }
 0x251   : > { %v6182_v1 = vmax.f32 %v5942_v8, %v6134_v10  ;;  %v10074_v20 = vor.u32 %v10223_v28, %v10071_v21  ;;  %5274 = vst [vmem:[#allocation3 + $0x68] sm:$0xf] %v5242_v47  ;;  %v5347_v44 = vrot.slane %v5242_v47, 7  ;;  %v6420_v16 = vmax.f32 %v6180_v58, %v13251_v53 }
 0x252   : > { %v5349_v15 = vrot.slane %v5243_v26, 7  ;;  %5275 = vst [vmem:[#allocation3 + $0x78] sm:$0xf] %v5243_v26  ;;  %v6421_v6 = vmax.f32 %v6181_v22, %v13253_v12  ;;  %v3474_v57 = vunpack.c.l.bf16 %v13210_v52 }
 0x253   : > { %v6422_v27 = vmax.f32 %v6182_v1, %v6374_v35  ;;  %8841 = vmatpush.bf16.msra.mxu1 %v10074_v20  ;;  %v5348_v51 = vrot.slane %v5347_v44, 4  ;;  %v6612_v63 = vrot.slane %v6420_v16, 1  ;;  %v6820_v13 = vrot.slane %v6420_v16, 2  ;;  %5469 = vst [vmem:[#allocation2 + $0x3c] sm:$0xe] %v5347_v44 }
 0x254   : > { %v5351_v42 = vrot.slane %v5349_v15, 4  ;;  %v6613_v43 = vrot.slane %v6421_v6, 1  ;;  %v6821_v32 = vrot.slane %v6421_v6, 2  ;;  %v7028_v21 = vrot.slane %v6420_v16, 3 }
 0x255   : > { %v6615_v61 = vrot.slane %v6422_v27, 1  ;;  %v6823_v2 = vrot.slane %v6422_v27, 2  ;;  %v5350_v28 = vsel %vm11801_vm2, %v5348_v51, %v5349_v15  ;;  %v7029_v40 = vrot.slane %v6421_v6, 3 }
 0x256   : > { %v7031_v8 = vrot.slane %v6422_v27, 3  ;;  %5471 = vst [vmem:[#allocation2 + $0x44] sm:$0x1] %v5351_v42  ;;  %v6614_v52 = vsel %vm2320_vm3, %v6612_v63, %v6613_v43  ;;  %v6822_v47 = vsel %vm2529_vm4, %v6820_v13, %v6821_v32  ;;  %v7236_v44 = vrot.slane %v6420_v16, 4  ;;  %v3666_v13 = vld [vmem:[#allocation2 + $0x50] sm:$0x3] }
 0x257   : > { %8350 = vmatmul.bf16.gmra.mxu3 %v13226_v45  ;;  %v6616_v10 = vsel %vm2320_vm3, %v6613_v43, %v6615_v61  ;;  %v6824_v26 = vsel %vm2529_vm4, %v6821_v32, %v6823_v2  ;;  %v6724_v58 = vmax.f32 %v6420_v16, %v6614_v52  ;;  %v7030_v1 = vsel %vm2738_vm5, %v7028_v21, %v7029_v40  ;;  %v10746_v16 = vld [vmem:[#allocation2 + $0x60] sm:$0xff]   ;;  %v4147_v45 = vld [vmem:[#allocation2 + $0x6c] sm:$0xff]  }
 0x258   : > { %v6725_v22 = vmax.f32 %v6421_v6, %v6616_v10  ;;  %v7032_v35 = vsel %vm2738_vm5, %v7029_v40, %v7031_v8  ;;  %5470 = vst [vmem:[#allocation2 + $0x40] sm:$0xf] %v5350_v28  ;;  %v9621_v20 = vld [vmem:[#allocation3 + $0x68] sm:$0xf]  ;;  %v7237_v15 = vrot.slane %v6421_v6, 4  ;;  %v7239_v51 = vrot.slane %v6422_v27, 4 }
 0x259   : > { %v3520_v42 = vunpack.c.l.bf16 %v3424_v62  ;;  %v10112_v56 = vld [vmem:[#allocation3 + $0x74] sm:$0xf0]  ;;  %v6932_v63 = vmax.f32 %v6724_v58, %v6822_v47  ;;  %v3521_v43 = vunpack.c.h.bf16 %v3424_v62  ;;  %v3522_v61 = vunpack.c.l.bf16 %v3426_v5  ;;  %v3906_v40 = vld [vmem:[#allocation2 + $0x5c] sm:$0x3] }
 0x25a   : > { %v6933_v23 = vmax.f32 %v6725_v22, %v6824_v26  ;;  %v13271_v32 = vor.u32 %v10112_v56, %v9621_v20  ;;  %v7238_v2 = vsel %vm2947_vm6, %v7236_v44, %v7237_v15  ;;  %v7240_v21 = vsel %vm2947_vm6, %v7237_v15, %v7239_v51  ;;  %v4146_v47 = vld [vmem:[#allocation2 + $0x68] sm:$0x3]  ;;  %v8227_v26 = vpop.f32.mrf.mxu2 }
 0x25b   : > { %v3568_v28 = vmax.f32 %v13038_v46, %v3520_v42  ;;  %v7140_v6 = vmax.f32 %v6932_v63, %v7030_v1  ;;  %v3569_v8 = vmax.f32 %v13040_v54, %v3521_v43  ;;  %v3570_v52 = vmax.f32 %v3474_v57, %v3522_v61  ;;  %v15452_v43 = vld [vmem:[#allocation37_spill] sm:$0xff] }
 0x25c   : > { %15451 = vst [vmem:[#allocation55_spill] sm:$0xff] %v13271_v32  ;;  %v7141_v27 = vmax.f32 %v6933_v23, %v7032_v35  ;;  %8419 = vmatmul.bf16.gmra.mxu0 %v13271_v32  ;;  %v3762_v62 = vunpack.c.l.bf16 %v3666_v13  ;;  %v4000_v56 = vunpack.c.l.bf16 %v3904_v37  ;;  %v4001_v10 = vunpack.c.h.bf16 %v3904_v37 }
 0x25d   : > { %v3808_v5 = vmax.f32 %v3568_v28, %v13151_v3  ;;  %v7348_v58 = vmax.f32 %v7140_v6, %v7238_v2  ;;  %v3809_v46 = vmax.f32 %v3569_v8, %v13153_v11  ;;  %v4002_v20 = vunpack.c.l.bf16 %v3906_v40  ;;  %v15454_v28 = vld [vmem:[#allocation16_spill] sm:$0xff] }
 0x25e   : > { %v7349_v22 = vmax.f32 %v7141_v27, %v7240_v21  ;;  %v3810_v44 = vmax.f32 %v3570_v52, %v3762_v62  ;;  %v13280_v23 = vunpack.c.l.bf16 %v10746_v16  ;;  %v13282_v54 = vunpack.c.h.bf16 %v10746_v16 }
 0x25f   : > { %v4048_v1 = vmax.f32 %v3808_v5, %v4000_v56  ;;  %v7380_v57 = vpack.c.bf16 %v7348_v58, %v7348_v58  ;;  %v4049_v15 = vmax.f32 %v3809_v46, %v4001_v10  ;;  %v4242_v51 = vunpack.c.l.bf16 %v4146_v47 }
 0x260   : > { %v7381_v35 = vpack.c.bf16 %v7349_v22, %v7349_v22  ;;  %v13285_v42 = vadd.f32 %v8227_v26, %v13224_v19  ;;  %v4050_v37 = vmax.f32 %v3810_v44, %v4002_v20  ;;  %v15453_v61 = vunpack.c.l.bf16 %v15452_v43 }
 0x261   : > { %v4288_v63 = vmax.f32 %v4048_v1, %v13280_v23  ;;  %7412 = vst [vmem:[#allocation3 + $0xc] sm:$0xf] %v7380_v57  ;;  %v4289_v2 = vmax.f32 %v4049_v15, %v13282_v54  ;;  %v2361_v21 = vrot.slane %v12764_v4, 1  ;;  %v2362_v40 = vrot.slane %v15454_v28, 1 }
 0x262   : > { %v13291_v13 = vmax.f32 %v12783_v29, %v15453_v61  ;;  %v2570_v16 = vrot.slane %v12764_v4, 2  ;;  %7413 = vst [vmem:[#allocation3 + $0x1c] sm:$0xf] %v7381_v35  ;;  %v4290_v6 = vmax.f32 %v4050_v37, %v4242_v51  ;;  %v4244_v55 = vunpack.c.h.bf16 %v4147_v45 }
 0x263   : > { %v4488_v27 = vrot.slane %v4288_v63, 1  ;;  %v4696_v8 = vrot.slane %v4288_v63, 2  ;;  %v4904_v52 = vrot.slane %v4288_v63, 3  ;;  %v4489_v62 = vrot.slane %v4289_v2, 1 }
 0x264   : > { %v4697_v5 = vrot.slane %v4289_v2, 2  ;;  %v4905_v56 = vrot.slane %v4289_v2, 3  ;;  %v5112_v10 = vrot.slane %v4288_v63, 4  ;;  %v4491_v29 = vrot.slane %v4290_v6, 1 }
 0x265   : > { %v4699_v47 = vrot.slane %v4290_v6, 2  ;;  %v4907_v26 = vrot.slane %v4290_v6, 3  ;;  %v5113_v58 = vrot.slane %v4289_v2, 4  ;;  %v4490_v22 = vsel %vm2320_vm3, %v4488_v27, %v4489_v62 }
 0x266   : > { %v4698_v46 = vsel %vm2529_vm4, %v4696_v8, %v4697_v5  ;;  %v4906_v20 = vsel %vm2738_vm5, %v4904_v52, %v4905_v56  ;;  %v5115_v44 = vrot.slane %v4290_v6, 4  ;;  %v4492_v1 = vsel %vm2320_vm3, %v4489_v62, %v4491_v29 }
 0x267   : > { %v4588_v57 = vmax.f32 %v4288_v63, %v4490_v22  ;;  %v4700_v35 = vsel %vm2529_vm4, %v4697_v5, %v4699_v47  ;;  %v4908_v15 = vsel %vm2738_vm5, %v4905_v56, %v4907_v26  ;;  %v4589_v51 = vmax.f32 %v4289_v2, %v4492_v1  ;;  %v10147_v1 = vld [vmem:[#allocation3 + $0x18c] sm:$0xf0] }
 0x268   : > { %v5114_v37 = vsel %vm2947_vm6, %v5112_v10, %v5113_v58  ;;  %v5116_v43 = vsel %vm2947_vm6, %v5113_v58, %v5115_v44  ;;  %v2363_v61 = vsel %vm2320_vm3, %v2361_v21, %v2362_v40  ;;  %v10098_v27 = vld [vmem:[#allocation3 + $0xc] sm:$0xf]  ;;  %v2364_v8 = vrot.slane %v13291_v13, 1  ;;  %v9757_v44 = vld [vmem:[#allocation3 + $0x180] sm:$0xf] }
 0x269   : > { %v4796_v49 = vmax.f32 %v4588_v57, %v4698_v46  ;;  %v2449_v6 = vmax.f32 %v12764_v4, %v2363_v61  ;;  %v2571_v52 = vrot.slane %v15454_v28, 2  ;;  %v9575_v63 = vld [vmem:[#allocation3 + $0x18] sm:$0xf0]  ;;  %v4797_v62 = vmax.f32 %v4589_v51, %v4700_v35 }
 0x26a   : > { %v2573_v5 = vrot.slane %v13291_v13, 2  ;;  %v2779_v2 = vrot.slane %v12764_v4, 3  ;;  %v2780_v56 = vrot.slane %v15454_v28, 3  ;;  %v13312_v10 = vor.u32 %v10098_v27, %v9575_v63 }
 0x26b   : > { %v5004_v29 = vmax.f32 %v4796_v49, %v4906_v20  ;;  %v2365_v21 = vsel %vm2320_vm3, %v2362_v40, %v2364_v8  ;;  %v2572_v47 = vsel %vm2529_vm4, %v2570_v16, %v2571_v52  ;;  %v5005_v26 = vmax.f32 %v4797_v62, %v4908_v15  ;;  %v8316_v40 = vpop.f32.mrf.mxu3  ;;  %v13322_v20 = vld [vmem:[#allocation2 + $0xd0] sm:$0xf] }
 0x26c   : > { %15455 = vst [vmem:[#allocation37_spill] sm:$0xff] %v13312_v10  ;;  %v2450_v58 = vmax.f32 %v15454_v28, %v2365_v21  ;;  %v2574_v22 = vsel %vm2529_vm4, %v2571_v52, %v2573_v5  ;;  %v2658_v46 = vmax.f32 %v2449_v6, %v2572_v47  ;;  %8493 = vmatmul.bf16.vlgmr.msrb.gmra.mxu1 %v13312_v10  ;;  %v2782_v51 = vrot.slane %v13291_v13, 3  ;;  %v13325_v8 = vld [vmem:[#allocation2 + $0xd0] sm:$0xf]  ;;  %v13336_v21 = vpop.f32.mrf.mxu2 }
 0x26d   : > { %v5212_v57 = vmax.f32 %v5004_v29, %v5114_v37  ;;  %v2781_v35 = vsel %vm2738_vm5, %v2779_v2, %v2780_v56  ;;  %v2988_v49 = vrot.slane %v12764_v4, 4  ;;  %15456 = vst [vmem:[#allocation16_spill] sm:$0xff] %v13322_v20  ;;  %v5213_v16 = vmax.f32 %v5005_v26, %v5116_v43  ;;  %v5511_v62 = vld [vmem:[#allocation2 + $0xc] sm:$0xff]   ;;  %v5513_v29 = vld [vmem:[#allocation2 + $0x14] sm:$0x3] }
 0x26e   : > { %v2659_v15 = vmax.f32 %v2450_v58, %v2574_v22  ;;  %v2867_v61 = vmax.f32 %v2658_v46, %v2781_v35  ;;  %v2989_v27 = vrot.slane %v15454_v28, 4  ;;  %15457 = vst [vmem:[#allocation56_spill] sm:$0xff] %v13325_v8  ;;  %v2783_v52 = vsel %vm2738_vm5, %v2780_v56, %v2782_v51  ;;  %v5561_v26 = vld [vmem:[#allocation2 + $0x20] sm:$0x3] }
 0x26f   : > { %v5244_v6 = vpack.c.bf16 %v5212_v57, %v5212_v57  ;;  %v2991_v37 = vrot.slane %v13291_v13, 4  ;;  %v13329_v63 = vor.u32 %v10147_v1, %v9757_v44  ;;  %v5245_v5 = vpack.c.bf16 %v5213_v16, %v5213_v16  ;;  %v5799_v44 = vld [vmem:[#allocation2 + $0x24] sm:$0xff]  }
 0x270   : > { %v2868_v4 = vmax.f32 %v2659_v15, %v2783_v52  ;;  %v2990_v2 = vsel %vm2947_vm6, %v2988_v49, %v2989_v27  ;;  %v13333_v43 = vadd.f32 %v8316_v40, %v13285_v42  ;;  %v5607_v42 = vunpack.c.l.bf16 %v5511_v62  ;;  %v13341_v1 = vld [vmem:[#allocation2 + $0x48] sm:$0xff]   ;;  %v6279_v52 = vld [vmem:[#allocation2 + $0x3c] sm:$0xff]  }
 0x271   : > { %15458 = vst [vmem:[#allocation57_spill] sm:$0xff] %v13329_v63  ;;  %v5352_v47 = vrot.slane %v5244_v6, 7  ;;  %v2992_v56 = vsel %vm2947_vm6, %v2989_v27, %v2991_v37  ;;  %v3076_v13 = vmax.f32 %v2867_v61, %v2990_v2  ;;  %8286 = vmatmul.bf16.gmra.mxu2 %v13329_v63  ;;  %v5354_v22 = vrot.slane %v5245_v5, 7  ;;  %v5801_v40 = vld [vmem:[#allocation2 + $0x2c] sm:$0x3] }
 0x272   : > { %5276 = vst [vmem:[#allocation3 + $0x88] sm:$0xf] %v5244_v6  ;;  %v3077_v46 = vmax.f32 %v2868_v4, %v2992_v56  ;;  %v5608_v51 = vunpack.c.h.bf16 %v5511_v62  ;;  %v5609_v49 = vunpack.c.l.bf16 %v5513_v29  ;;  %v5657_v61 = vunpack.c.l.bf16 %v5561_v26  ;;  %v6041_v6 = vld [vmem:[#allocation2 + $0x38] sm:$0x3] }
 0x273   : > { %5277 = vst [vmem:[#allocation3 + $0x98] sm:$0xf] %v5245_v5  ;;  %v5353_v57 = vrot.slane %v5352_v47, 4  ;;  %v3108_v35 = vpack.c.bf16 %v3076_v13, %v3076_v13  ;;  %v5356_v16 = vrot.slane %v5354_v22, 4  ;;  %v5703_v27 = vmax.f32 %v5607_v42, %v13245_v0  ;;  %v6281_v13 = vld [vmem:[#allocation2 + $0x44] sm:$0x3] }
 0x274   : > { %5472 = vst [vmem:[#allocation2 + $0x48] sm:$0xe] %v5352_v47  ;;  %v3109_v15 = vpack.c.bf16 %v3077_v46, %v3077_v46  ;;  %v5704_v4 = vmax.f32 %v5608_v51, %v13247_v24  ;;  %v5895_v2 = vunpack.c.l.bf16 %v5799_v44  ;;  %v5705_v29 = vmax.f32 %v5609_v49, %v5657_v61 }
 0x275   : > { %v5355_v37 = vsel %vm11801_vm2, %v5353_v57, %v5354_v22  ;;  %3140 = vst [vmem:[#allocation3 + $0x104] sm:$0xf] %v3108_v35  ;;  %v3228_v5 = vrot.slane %v3108_v35, 7  ;;  %v5896_v56 = vunpack.c.h.bf16 %v5799_v44  ;;  %v5897_v47 = vunpack.c.l.bf16 %v5801_v40  ;;  %v3429_v35 = vld [vmem:[#allocation2 + $0x50] sm:$0x3] }
 0x276   : > { %3141 = vst [vmem:[#allocation3 + $0x114] sm:$0xf] %v3109_v15  ;;  %v3230_v62 = vrot.slane %v3109_v15, 7  ;;  %v5943_v26 = vmax.f32 %v5703_v27, %v5895_v2  ;;  %v6137_v42 = vunpack.c.l.bf16 %v6041_v6  ;;  %v6375_v28 = vunpack.c.l.bf16 %v6279_v52  ;;  %v13351_v15 = vld [vmem:[#allocation2 + $0x54] sm:$0xff]  }
 0x277   : > { %v3229_v46 = vrot.slane %v3228_v5, 4  ;;  %3340 = vst [vmem:[#allocation2 + $0x78] sm:$0xe] %v3228_v5  ;;  %v5944_v32 = vmax.f32 %v5704_v4, %v5896_v56  ;;  %v5945_v22 = vmax.f32 %v5705_v29, %v5897_v47  ;;  %v6376_v57 = vunpack.c.h.bf16 %v6279_v52  ;;  %v13357_v5 = vld [vmem:[#allocation2 + $0x50] sm:$0x3] }
 0x278   : > { %v3232_v10 = vrot.slane %v3230_v62, 4  ;;  %v6183_v49 = vmax.f32 %v5943_v26, %v13251_v53  ;;  %v6377_v44 = vunpack.c.l.bf16 %v6281_v13  ;;  %v10428_v40 = vunpack.c.l.bf16 %v13341_v1  ;;  %5473 = vst [vmem:[#allocation2 + $0x4c] sm:$0xf] %v5355_v37 }
 0x279   : > { %v9637_v58 = vld [vmem:[#allocation3 + $0x88] sm:$0xf]  ;;  %v3231_v51 = vsel %vm11801_vm2, %v3229_v46, %v3230_v62  ;;  %v6184_v27 = vmax.f32 %v5944_v32, %v13253_v12  ;;  %v6185_v6 = vmax.f32 %v5945_v22, %v6137_v42  ;;  %v10429_v52 = vunpack.c.h.bf16 %v13341_v1  ;;  %5474 = vst [vmem:[#allocation2 + $0x50] sm:$0x1] %v5356_v16 }
 0x27a   : > { %v10116_v34 = vld [vmem:[#allocation3 + $0x94] sm:$0xf0]  ;;  %3341 = vst [vmem:[#allocation2 + $0x7c] sm:$0xf] %v3231_v51  ;;  %v6423_v4 = vmax.f32 %v6183_v49, %v6375_v28  ;;  %v3475_v2 = vunpack.c.l.bf16 %v13256_v39  ;;  %v3476_v62 = vunpack.c.h.bf16 %v13256_v39  ;;  %v3477_v29 = vunpack.c.l.bf16 %v13258_v30 }
 0x27b   : > { %v13353_v61 = vor.u32 %v10116_v34, %v9637_v58  ;;  %3342 = vst [vmem:[#allocation2 + $0x80] sm:$0x1] %v3232_v10  ;;  %v6424_v58 = vmax.f32 %v6184_v27, %v6376_v57  ;;  %v6425_v37 = vmax.f32 %v6185_v6, %v6377_v44  ;;  %v3525_v56 = vunpack.c.l.bf16 %v3429_v35 }
 0x27c   : > { %v10129_v34 = vld [vmem:[#allocation3 + $0x104] sm:$0xf]  ;;  %v3763_v32 = vunpack.c.l.bf16 %v13351_v15  ;;  %v6617_v47 = vrot.slane %v6423_v4, 1  ;;  %v6825_v13 = vrot.slane %v6423_v4, 2  ;;  %v7033_v10 = vrot.slane %v6423_v4, 3 }
 0x27d   : > { %15459 = vst [vmem:[#allocation58_spill] sm:$0xff] %v13353_v61  ;;  %8424 = vmatmul.bf16.gmra.mxu0 %v13353_v61  ;;  %v9695_v1 = vld [vmem:[#allocation3 + $0x110] sm:$0xf0]  ;;  %v7241_v28 = vrot.slane %v6423_v4, 4  ;;  %v6618_v26 = vrot.slane %v6424_v58, 1  ;;  %v6620_v39 = vrot.slane %v6425_v37, 1 }
 0x27e   : > { %v13364_v46 = vor.u32 %v10129_v34, %v9695_v1  ;;  %v6826_v42 = vrot.slane %v6424_v58, 2  ;;  %v6828_v30 = vrot.slane %v6425_v37, 2  ;;  %v7034_v22 = vrot.slane %v6424_v58, 3  ;;  %v3669_v61 = vld [vmem:[#allocation2 + $0x5c] sm:$0x3] }
 0x27f   : > { %v7036_v51 = vrot.slane %v6425_v37, 3  ;;  %v7242_v49 = vrot.slane %v6424_v58, 4  ;;  %v6619_v57 = vsel %vm2320_vm3, %v6617_v47, %v6618_v26  ;;  %v6621_v16 = vsel %vm2320_vm3, %v6618_v26, %v6620_v39 }
 0x280   : > { %15460 = vst [vmem:[#allocation59_spill] sm:$0xff] %v13364_v46  ;;  %8355 = vmatmul.bf16.gmra.mxu3 %v13364_v46  ;;  %v6827_v35 = vsel %vm2529_vm4, %v6825_v13, %v6826_v42  ;;  %v7244_v44 = vrot.slane %v6425_v37, 4  ;;  %v6726_v27 = vmax.f32 %v6423_v4, %v6619_v57  ;;  %v6727_v6 = vmax.f32 %v6424_v58, %v6621_v16  ;;  %v4149_v4 = vld [vmem:[#allocation2 + $0x74] sm:$0x3]  ;;  %v8232_v58 = vpop.f32.mrf.mxu2 }
 0x281   : > { %v6829_v34 = vsel %vm2529_vm4, %v6826_v42, %v6828_v30  ;;  %v7035_v1 = vsel %vm2738_vm5, %v7033_v10, %v7034_v22  ;;  %v7037_v7 = vsel %vm2738_vm5, %v7034_v22, %v7036_v51  ;;  %v7243_v63 = vsel %vm2947_vm6, %v7241_v28, %v7242_v49  ;;  %v10173_v16 = vld [vmem:[#allocation9 + $0x64] sm:$0xf] }
 0x282   : > { %v7245_v46 = vsel %vm2947_vm6, %v7242_v49, %v7244_v44  ;;  %v3571_v47 = vmax.f32 %v3475_v2, %v10428_v40  ;;  %v6934_v26 = vmax.f32 %v6726_v27, %v6827_v35  ;;  %v6935_v39 = vmax.f32 %v6727_v6, %v6829_v34  ;;  %v15464_v34 = vld [vmem:[#allocation21_spill] sm:$0xff] }
 0x283   : > { %v3572_v13 = vmax.f32 %v3476_v62, %v10429_v52  ;;  %v3573_v37 = vmax.f32 %v3477_v29, %v3525_v56  ;;  %v3764_v42 = vunpack.c.h.bf16 %v13351_v15  ;;  %v3765_v30 = vunpack.c.l.bf16 %v3669_v61 }
 0x284   : > { %v3811_v10 = vmax.f32 %v3571_v47, %v3763_v32  ;;  %v4005_v57 = vunpack.c.l.bf16 %v3909_v14  ;;  %v7142_v22 = vmax.f32 %v6934_v26, %v7035_v1  ;;  %v7143_v51 = vmax.f32 %v6935_v39, %v7037_v7  ;;  %v15461_v32 = vld [vmem:[#allocation41_spill] sm:$0xff]  ;;  %v15463_v7 = vld [vmem:[#allocation22_spill] sm:$0xff] }
 0x285   : > { %v4243_v28 = vunpack.c.l.bf16 %v4147_v45  ;;  %v3812_v49 = vmax.f32 %v3572_v13, %v3764_v42  ;;  %v3813_v40 = vmax.f32 %v3573_v37, %v3765_v30  ;;  %v4245_v35 = vunpack.c.l.bf16 %v4149_v4  ;;  %v15465_v47 = vld [vmem:[#allocation18_spill] sm:$0xff]  ;;  %v13388_v13 = vpop.f32.mrf.mxu3 }
 0x286   : > { %v4051_v2 = vmax.f32 %v3811_v10, %v13280_v23  ;;  %v13378_v52 = vadd.f32 %v8232_v58, %v13224_v19  ;;  %v7350_v62 = vmax.f32 %v7142_v22, %v7243_v63  ;;  %v7351_v29 = vmax.f32 %v7143_v51, %v7245_v46 }
 0x287   : > { %v9874_v15 = vor.u32 %v10173_v16, %v9871_v50  ;;  %v4052_v61 = vmax.f32 %v3812_v49, %v13282_v54  ;;  %v4053_v14 = vmax.f32 %v3813_v40, %v4005_v57  ;;  %v15462_v44 = vunpack.c.l.bf16 %v15461_v32 }
 0x288   : > { %v4291_v56 = vmax.f32 %v4051_v2, %v4243_v28  ;;  %v7382_v45 = vpack.c.bf16 %v7350_v62, %v7350_v62  ;;  %v7383_v6 = vpack.c.bf16 %v7351_v29, %v7351_v29  ;;  %v2366_v1 = vrot.slane %v15464_v34, 1 }
 0x289   : > { %v13384_v27 = vmax.f32 %v15463_v7, %v15462_v44  ;;  %8575 = vmatpush.bf16.msra.mxu2 %v9874_v15  ;;  %v2367_v26 = vrot.slane %v15465_v47, 1  ;;  %v4292_v39 = vmax.f32 %v4052_v61, %v4244_v55  ;;  %v4293_v63 = vmax.f32 %v4053_v14, %v4245_v35 }
 0x28a   : > { %v4493_v46 = vrot.slane %v4291_v56, 1  ;;  %v4701_v50 = vrot.slane %v4291_v56, 2  ;;  %7414 = vst [vmem:[#allocation3 + $0x2c] sm:$0xf] %v7382_v45  ;;  %v4909_v37 = vrot.slane %v4291_v56, 3  ;;  %v5117_v4 = vrot.slane %v4291_v56, 4 }
 0x28b   : > { %v2368_v58 = vsel %vm2320_vm3, %v2366_v1, %v2367_v26  ;;  %v2369_v42 = vrot.slane %v13384_v27, 1  ;;  %7415 = vst [vmem:[#allocation3 + $0x3c] sm:$0xf] %v7383_v6  ;;  %v4494_v30 = vrot.slane %v4292_v39, 1  ;;  %v4496_v10 = vrot.slane %v4293_v63, 1 }
 0x28c   : > { %v4702_v57 = vrot.slane %v4292_v39, 2  ;;  %v4704_v16 = vrot.slane %v4293_v63, 2  ;;  %v4910_v22 = vrot.slane %v4292_v39, 3  ;;  %v4912_v51 = vrot.slane %v4293_v63, 3 }
 0x28d   : > { %v5118_v55 = vrot.slane %v4292_v39, 4  ;;  %v5120_v28 = vrot.slane %v4293_v63, 4  ;;  %v4495_v49 = vsel %vm2320_vm3, %v4493_v46, %v4494_v30  ;;  %v4497_v40 = vsel %vm2320_vm3, %v4494_v30, %v4496_v10 }
 0x28e   : > { %v4703_v2 = vsel %vm2529_vm4, %v4701_v50, %v4702_v57  ;;  %v4705_v35 = vsel %vm2529_vm4, %v4702_v57, %v4704_v16  ;;  %v4590_v62 = vmax.f32 %v4291_v56, %v4495_v49  ;;  %v4591_v29 = vmax.f32 %v4292_v39, %v4497_v40  ;;  %v10189_v56 = vld [vmem:[#allocation9 + $0xe4] sm:$0xf]  ;;  %v9935_v57 = vld [vmem:[#allocation9 + $0xe8] sm:$0xf0] }
 0x28f   : > { %v4911_v15 = vsel %vm2738_vm5, %v4909_v37, %v4910_v22  ;;  %v4913_v61 = vsel %vm2738_vm5, %v4910_v22, %v4912_v51  ;;  %v5119_v14 = vsel %vm2947_vm6, %v5117_v4, %v5118_v55  ;;  %v5121_v32 = vsel %vm2947_vm6, %v5118_v55, %v5120_v28 }
 0x290   : > { %v2370_v44 = vsel %vm2320_vm3, %v2367_v26, %v2369_v42  ;;  %v2451_v7 = vmax.f32 %v15464_v34, %v2368_v58  ;;  %v4798_v45 = vmax.f32 %v4590_v62, %v4703_v2  ;;  %v4799_v6 = vmax.f32 %v4591_v29, %v4705_v35  ;;  %v9773_v35 = vld [vmem:[#allocation3 + $0x1a0] sm:$0xf]  ;;  %v10151_v62 = vld [vmem:[#allocation3 + $0x1ac] sm:$0xf0]  ;;  %v8321_v29 = vpop.f32.mrf.mxu3 }
 0x291   : > { %v2452_v1 = vmax.f32 %v15465_v47, %v2370_v44  ;;  %v2575_v63 = vrot.slane %v15464_v34, 2  ;;  %v10102_v39 = vld [vmem:[#allocation3 + $0x2c] sm:$0xf]  ;;  %v2576_v46 = vrot.slane %v15465_v47, 2  ;;  %v2578_v50 = vrot.slane %v13384_v27, 2 }
 0x292   : > { %v2784_v37 = vrot.slane %v15464_v34, 3  ;;  %v2785_v4 = vrot.slane %v15465_v47, 3  ;;  %v9591_v30 = vld [vmem:[#allocation3 + $0x38] sm:$0xf0]  ;;  %v5006_v26 = vmax.f32 %v4798_v45, %v4911_v15  ;;  %v5007_v42 = vmax.f32 %v4799_v6, %v4913_v61  ;;  %v13415_v15 = vld [vmem:[#allocation2 + $0xd4] sm:$0x3] }
 0x293   : > { %v2787_v58 = vrot.slane %v13384_v27, 3  ;;  %v2993_v10 = vrot.slane %v15464_v34, 4  ;;  %v13410_v16 = vor.u32 %v10102_v39, %v9591_v30  ;;  %v2577_v22 = vsel %vm2529_vm4, %v2575_v63, %v2576_v46  ;;  %15467 = vst [vmem:[#allocation22_spill] sm:$0xff] %v13415_v15  ;;  %v13417_v61 = vld [vmem:[#allocation2 + $0xd0] sm:$0xf] }
 0x294   : > { %v2579_v51 = vsel %vm2529_vm4, %v2576_v46, %v2578_v50  ;;  %v2786_v55 = vsel %vm2738_vm5, %v2784_v37, %v2785_v4  ;;  %v5214_v28 = vmax.f32 %v5006_v26, %v5119_v14  ;;  %v5215_v49 = vmax.f32 %v5007_v42, %v5121_v32  ;;  %15468 = vst [vmem:[#allocation21_spill] sm:$0xff] %v13417_v61  ;;  %v10205_v63 = vld [vmem:[#allocation9 + $0x164] sm:$0xf]  ;;  %v9999_v39 = vld [vmem:[#allocation9 + $0x168] sm:$0xf0] }
 0x295   : > { %15466 = vst [vmem:[#allocation41_spill] sm:$0xff] %v13410_v16  ;;  %v2660_v40 = vmax.f32 %v2451_v7, %v2577_v22  ;;  %v2661_v2 = vmax.f32 %v2452_v1, %v2579_v51  ;;  %8498 = vmatmul.bf16.gmra.mxu1 %v13410_v16  ;;  %v2788_v34 = vsel %vm2738_vm5, %v2785_v4, %v2787_v58  ;;  %v2994_v44 = vrot.slane %v15465_v47, 4  ;;  %v5516_v46 = vld [vmem:[#allocation2 + $0x20] sm:$0x3]  ;;  %v5562_v47 = vld [vmem:[#allocation2 + $0x24] sm:$0xff]   ;;  %v13432_v51 = vld [vmem:[#allocation2 + $0x54] sm:$0xff]  }
 0x296   : > { %v2996_v45 = vrot.slane %v13384_v27, 4  ;;  %v9938_v6 = vor.u32 %v10189_v56, %v9935_v57  ;;  %v5246_v14 = vpack.c.bf16 %v5214_v28, %v5214_v28  ;;  %v5247_v32 = vpack.c.bf16 %v5215_v49, %v5215_v49  ;;  %v5564_v27 = vld [vmem:[#allocation2 + $0x2c] sm:$0x3]  ;;  %v5804_v57 = vld [vmem:[#allocation2 + $0x38] sm:$0x3]  ;;  %v6042_v49 = vld [vmem:[#allocation2 + $0x3c] sm:$0xff]  }
 0x297   : > { %v2869_v7 = vmax.f32 %v2660_v40, %v2786_v55  ;;  %v2870_v1 = vmax.f32 %v2661_v2, %v2788_v34  ;;  %v2995_v50 = vsel %vm2947_vm6, %v2993_v10, %v2994_v44  ;;  %v13425_v30 = vor.u32 %v10151_v62, %v9773_v35  ;;  %v13434_v55 = vpop.f32.mrf.mxu2  ;;  %v13437_v40 = vld [vmem:[#allocation2 + $0x54] sm:$0xff]  }
 0x298   : > { %v2997_v37 = vsel %vm2947_vm6, %v2994_v44, %v2996_v45  ;;  %8664 = vmatpush.bf16.msra.mxu3 %v9938_v6  ;;  %v13428_v4 = vadd.f32 %v8321_v29, %v13378_v52  ;;  %5278 = vst [vmem:[#allocation3 + $0xa8] sm:$0xf] %v5246_v14  ;;  %v5357_v56 = vrot.slane %v5246_v14, 7  ;;  %v5359_v26 = vrot.slane %v5247_v32, 7  ;;  %v6044_v14 = vld [vmem:[#allocation2 + $0x44] sm:$0x3] }
 0x299   : > { %15469 = vst [vmem:[#allocation18_spill] sm:$0xff] %v13425_v30  ;;  %v3078_v42 = vmax.f32 %v2869_v7, %v2995_v50  ;;  %v3079_v58 = vmax.f32 %v2870_v1, %v2997_v37  ;;  %8291 = vmatmul.bf16.gmra.mxu2 %v13425_v30  ;;  %v10002_v52 = vor.u32 %v10205_v63, %v9999_v39  ;;  %v5612_v28 = vunpack.c.l.bf16 %v5516_v46  ;;  %v10810_v7 = vld [vmem:[#allocation2 + $0x48] sm:$0xff]   ;;  %v6284_v46 = vld [vmem:[#allocation2 + $0x50] sm:$0x3] }
 0x29a   : > { %5279 = vst [vmem:[#allocation3 + $0xb8] sm:$0xf] %v5247_v32  ;;  %v5358_v2 = vrot.slane %v5357_v56, 4  ;;  %v5361_v35 = vrot.slane %v5359_v26, 4  ;;  %v5658_v34 = vunpack.c.l.bf16 %v5562_v47  ;;  %v5659_v44 = vunpack.c.h.bf16 %v5562_v47  ;;  %v10221_v47 = vld [vmem:[#allocation9 + $0x1e4] sm:$0xf] }
 0x29b   : > { %v3110_v62 = vpack.c.bf16 %v3078_v42, %v3078_v42  ;;  %v3111_v29 = vpack.c.bf16 %v3079_v58, %v3079_v58  ;;  %5475 = vst [vmem:[#allocation2 + $0x54] sm:$0xe] %v5357_v56  ;;  %8753 = vmatpush.bf16.msra.mxu0 %v10002_v52  ;;  %v5660_v45 = vunpack.c.l.bf16 %v5564_v27  ;;  %v5900_v6 = vunpack.c.l.bf16 %v5804_v57  ;;  %v10063_v27 = vld [vmem:[#allocation9 + $0x1e8] sm:$0xf0] }
 0x29c   : > { %v5360_v32 = vsel %vm11801_vm2, %v5358_v2, %v5359_v26  ;;  %v6138_v39 = vunpack.c.l.bf16 %v6042_v49  ;;  %v5706_v50 = vmax.f32 %v13245_v0, %v5658_v34  ;;  %v5707_v37 = vmax.f32 %v13247_v24, %v5659_v44  ;;  %v3432_v34 = vld [vmem:[#allocation2 + $0x5c] sm:$0x3] }
 0x29d   : > { %3142 = vst [vmem:[#allocation3 + $0x124] sm:$0xf] %v3110_v62  ;;  %v3233_v1 = vrot.slane %v3110_v62, 7  ;;  %v3235_v63 = vrot.slane %v3111_v29, 7  ;;  %v5708_v56 = vmax.f32 %v5612_v28, %v5660_v45  ;;  %v6139_v42 = vunpack.c.h.bf16 %v6042_v49  ;;  %v13451_v44 = vld [vmem:[#allocation2 + $0x5c] sm:$0x3] }
 0x29e   : > { %3143 = vst [vmem:[#allocation3 + $0x134] sm:$0xf] %v3111_v29  ;;  %v6140_v52 = vunpack.c.l.bf16 %v6044_v14  ;;  %v13443_v22 = vunpack.c.l.bf16 %v10810_v7  ;;  %v5946_v2 = vmax.f32 %v5706_v50, %v13251_v53  ;;  %v5947_v62 = vmax.f32 %v5707_v37, %v13253_v12 }
 0x29f   : > { %v3234_v58 = vrot.slane %v3233_v1, 4  ;;  %v3237_v57 = vrot.slane %v3235_v63, 4  ;;  %3343 = vst [vmem:[#allocation2 + $0x84] sm:$0xe] %v3233_v1  ;;  %v9653_v26 = vld [vmem:[#allocation3 + $0xa8] sm:$0xf]  ;;  %v5948_v29 = vmax.f32 %v5708_v56, %v5900_v6  ;;  %v13447_v10 = vunpack.c.h.bf16 %v10810_v7 }
 0x2a0   : > { %5476 = vst [vmem:[#allocation2 + $0x58] sm:$0xf] %v5360_v32  ;;  %v6380_v28 = vunpack.c.l.bf16 %v6284_v46  ;;  %v10066_v49 = vor.u32 %v10221_v47, %v10063_v27  ;;  %v6186_v53 = vmax.f32 %v5946_v2, %v6138_v39  ;;  %v6187_v14 = vmax.f32 %v5947_v62, %v6139_v42  ;;  %v13455_v6 = vld [vmem:[#allocation2 + $0x60] sm:$0xff]  }
 0x2a1   : > { %v10120_v0 = vld [vmem:[#allocation3 + $0xb4] sm:$0xf0]  ;;  %v3236_v24 = vsel %vm11801_vm2, %v3234_v58, %v3235_v63  ;;  %3345 = vst [vmem:[#allocation2 + $0x8c] sm:$0x1] %v3237_v57  ;;  %v6188_v12 = vmax.f32 %v5948_v29, %v6140_v52  ;;  %v3480_v7 = vunpack.c.l.bf16 %v13357_v5  ;;  %v3526_v32 = vunpack.c.l.bf16 %v13437_v40 }
 0x2a2   : > { %v13453_v45 = vor.u32 %v10120_v0, %v9653_v26  ;;  %3344 = vst [vmem:[#allocation2 + $0x88] sm:$0xf] %v3236_v24  ;;  %8842 = vmatpush.bf16.msra.mxu1 %v10066_v49  ;;  %v3527_v1 = vunpack.c.h.bf16 %v13437_v40  ;;  %v6426_v46 = vmax.f32 %v6186_v53, %v13443_v22  ;;  %v6427_v50 = vmax.f32 %v6187_v14, %v13447_v10  ;;  %v3672_v53 = vld [vmem:[#allocation2 + $0x68] sm:$0x3] }
 0x2a3   : > { %5477 = vst [vmem:[#allocation2 + $0x5c] sm:$0x1] %v5361_v35  ;;  %v6428_v39 = vmax.f32 %v6188_v12, %v6380_v28  ;;  %v3528_v37 = vunpack.c.l.bf16 %v3432_v34  ;;  %v3574_v42 = vmax.f32 %v13151_v3, %v3526_v32  ;;  %v3768_v5 = vunpack.c.l.bf16 %v3672_v53 }
 0x2a4   : > { %15470 = vst [vmem:[#allocation60_spill] sm:$0xff] %v13453_v45  ;;  %8429 = vmatmul.bf16.gmra.mxu0 %v13453_v45  ;;  %v10133_v63 = vld [vmem:[#allocation3 + $0x124] sm:$0xf]  ;;  %v3575_v47 = vmax.f32 %v13153_v11, %v3527_v1  ;;  %v6622_v35 = vrot.slane %v6426_v46, 1  ;;  %v6623_v58 = vrot.slane %v6427_v50, 1  ;;  %v6830_v52 = vrot.slane %v6426_v46, 2 }
 0x2a5   : > { %v9711_v56 = vld [vmem:[#allocation3 + $0x130] sm:$0xf0]  ;;  %v6625_v57 = vrot.slane %v6428_v39, 1  ;;  %v6831_v26 = vrot.slane %v6427_v50, 2  ;;  %v6833_v2 = vrot.slane %v6428_v39, 2  ;;  %v7038_v62 = vrot.slane %v6426_v46, 3 }
 0x2a6   : > { %v13467_v40 = vor.u32 %v10133_v63, %v9711_v56  ;;  %v6624_v29 = vsel %vm2320_vm3, %v6622_v35, %v6623_v58  ;;  %v7039_v11 = vrot.slane %v6427_v50, 3  ;;  %v7041_v0 = vrot.slane %v6428_v39, 3  ;;  %v3910_v63 = vld [vmem:[#allocation2 + $0x6c] sm:$0xf]  ;;  %v3911_v56 = vld [vmem:[#allocation2 + $0x70] sm:$0xf] }
 0x2a7   : > { %v6626_v3 = vsel %vm2320_vm3, %v6623_v58, %v6625_v57  ;;  %v6728_v24 = vmax.f32 %v6426_v46, %v6624_v29  ;;  %v6832_v49 = vsel %vm2529_vm4, %v6830_v52, %v6831_v26  ;;  %v6834_v34 = vsel %vm2529_vm4, %v6831_v26, %v6833_v2  ;;  %v13476_v35 = vld [vmem:[#allocation2 + $0x78] sm:$0xff]  }
 0x2a8   : > { %15471 = vst [vmem:[#allocation61_spill] sm:$0xff] %v13467_v40  ;;  %8360 = vmatmul.bf16.gmra.mxu3 %v13467_v40  ;;  %v6729_v28 = vmax.f32 %v6427_v50, %v6626_v3  ;;  %v7040_v14 = vsel %vm2738_vm5, %v7038_v62, %v7039_v11  ;;  %v7042_v12 = vsel %vm2738_vm5, %v7039_v11, %v7041_v0  ;;  %v7246_v32 = vrot.slane %v6426_v46, 4  ;;  %v3912_v3 = vld [vmem:[#allocation2 + $0x74] sm:$0x3]  ;;  %v8237_v46 = vpop.f32.mrf.mxu2 }
 0x2a9   : > { %v7247_v1 = vrot.slane %v6427_v50, 4  ;;  %v6936_v58 = vmax.f32 %v6728_v24, %v6832_v49  ;;  %v7249_v27 = vrot.slane %v6428_v39, 4  ;;  %v3576_v29 = vmax.f32 %v3480_v7, %v3528_v37  ;;  %v4152_v24 = vld [vmem:[#allocation2 + $0x80] sm:$0x3] }
 0x2aa   : > { %v6937_v57 = vmax.f32 %v6729_v28, %v6834_v34  ;;  %v15472_v26 = vunpack.c.l.bf16 %v13455_v6  ;;  %v15473_v62 = vunpack.c.h.bf16 %v13455_v6  ;;  %v4006_v45 = vunpack.c.l.bf16 %v3910_v63 }
 0x2ab   : > { %v7248_v52 = vsel %vm2947_vm6, %v7246_v32, %v7247_v1  ;;  %v7144_v50 = vmax.f32 %v6936_v58, %v7040_v14  ;;  %v7250_v16 = vsel %vm2947_vm6, %v7247_v1, %v7249_v27  ;;  %v3816_v28 = vmax.f32 %v3576_v29, %v3768_v5  ;;  %v15474_v1 = vld [vmem:[#allocation44_spill] sm:$0xff]  ;;  %v15476_v29 = vld [vmem:[#allocation46_spill] sm:$0xff] }
 0x2ac   : > { %v3814_v2 = vmax.f32 %v3574_v42, %v15472_v26  ;;  %v3815_v11 = vmax.f32 %v3575_v47, %v15473_v62  ;;  %v7145_v0 = vmax.f32 %v6937_v57, %v7042_v12  ;;  %v4007_v39 = vunpack.c.l.bf16 %v3911_v56 }
 0x2ad   : > { %v4008_v7 = vunpack.c.l.bf16 %v3912_v3  ;;  %v15221_v37 = vunpack.c.l.bf16 %v13476_v35  ;;  %v7352_v49 = vmax.f32 %v7144_v50, %v7248_v52  ;;  %v15220_v42 = vunpack.c.h.bf16 %v13476_v35  ;;  %v13496_v52 = vpop.f32.mrf.mxu3 }
 0x2ae   : > { %v7353_v34 = vmax.f32 %v7145_v0, %v7250_v16  ;;  %v4054_v53 = vmax.f32 %v3814_v2, %v4006_v45  ;;  %v13487_v32 = vadd.f32 %v8237_v46, %v13224_v19  ;;  %v4055_v47 = vmax.f32 %v3815_v11, %v4007_v39  ;;  %v15475_v45 = vld [vmem:[#allocation45_spill] sm:$0xff] }
 0x2af   : > { %v4056_v14 = vmax.f32 %v3816_v28, %v4008_v7  ;;  %v4248_v12 = vunpack.c.l.bf16 %v4152_v24  ;;  %v7384_v58 = vpack.c.bf16 %v7352_v49, %v7352_v49  ;;  %v2371_v63 = vrot.slane %v15474_v1, 1 }
 0x2b0   : > { %v7385_v27 = vpack.c.bf16 %v7353_v34, %v7353_v34  ;;  %v4294_v5 = vmax.f32 %v4054_v53, %v15221_v37  ;;  %v4295_v56 = vmax.f32 %v4055_v47, %v15220_v42  ;;  %v2372_v57 = vrot.slane %v15475_v45, 1 }
 0x2b1   : > { %v4296_v16 = vmax.f32 %v4056_v14, %v4248_v12  ;;  %v2374_v3 = vrot.slane %v15476_v29, 1  ;;  %7416 = vst [vmem:[#allocation3 + $0x4c] sm:$0xf] %v7384_v58 }
 0x2b2   : > { %v4498_v26 = vrot.slane %v4294_v5, 1  ;;  %v4706_v2 = vrot.slane %v4294_v5, 2  ;;  %v4914_v62 = vrot.slane %v4294_v5, 3  ;;  %v5122_v11 = vrot.slane %v4294_v5, 4  ;;  %7417 = vst [vmem:[#allocation3 + $0x5c] sm:$0xf] %v7385_v27 }
 0x2b3   : > { %v4499_v46 = vrot.slane %v4295_v56, 1  ;;  %v4501_v50 = vrot.slane %v4296_v16, 1  ;;  %v4707_v0 = vrot.slane %v4295_v56, 2  ;;  %v4709_v24 = vrot.slane %v4296_v16, 2 }
 0x2b4   : > { %v4915_v28 = vrot.slane %v4295_v56, 3  ;;  %v4917_v39 = vrot.slane %v4296_v16, 3  ;;  %v5123_v7 = vrot.slane %v4295_v56, 4  ;;  %v5125_v49 = vrot.slane %v4296_v16, 4 }
 0x2b5   : > { %v4500_v34 = vsel %vm2320_vm3, %v4498_v26, %v4499_v46  ;;  %v4502_v53 = vsel %vm2320_vm3, %v4499_v46, %v4501_v50  ;;  %v4708_v47 = vsel %vm2529_vm4, %v4706_v2, %v4707_v0  ;;  %v4710_v14 = vsel %vm2529_vm4, %v4707_v0, %v4709_v24 }
 0x2b6   : > { %v4592_v12 = vmax.f32 %v4294_v5, %v4500_v34  ;;  %v4593_v58 = vmax.f32 %v4295_v56, %v4502_v53  ;;  %v4916_v27 = vsel %vm2738_vm5, %v4914_v62, %v4915_v28  ;;  %v4918_v42 = vsel %vm2738_vm5, %v4915_v28, %v4917_v39 }
 0x2b7   : > { %v5124_v37 = vsel %vm2947_vm6, %v5122_v11, %v5123_v7  ;;  %v5126_v30 = vsel %vm2947_vm6, %v5123_v7, %v5125_v49  ;;  %v2373_v16 = vsel %vm2320_vm3, %v2371_v63, %v2372_v57  ;;  %v2375_v26 = vsel %vm2320_vm3, %v2372_v57, %v2374_v3 }
 0x2b8   : > { %v4800_v40 = vmax.f32 %v4592_v12, %v4708_v47  ;;  %v4801_v46 = vmax.f32 %v4593_v58, %v4710_v14  ;;  %v2453_v2 = vmax.f32 %v15474_v1, %v2373_v16  ;;  %v2454_v50 = vmax.f32 %v15475_v45, %v2375_v26  ;;  %v10106_v5 = vld [vmem:[#allocation3 + $0x4c] sm:$0xf]  ;;  %v9789_v58 = vld [vmem:[#allocation3 + $0x1c0] sm:$0xf]  ;;  %v10155_v16 = vld [vmem:[#allocation3 + $0x1cc] sm:$0xf0] }
 0x2b9   : > { %v2580_v56 = vrot.slane %v15474_v1, 2  ;;  %v2581_v62 = vrot.slane %v15475_v45, 2  ;;  %v2583_v0 = vrot.slane %v15476_v29, 2  ;;  %v2789_v11 = vrot.slane %v15474_v1, 3  ;;  %v9607_v24 = vld [vmem:[#allocation3 + $0x58] sm:$0xf0] }
 0x2ba   : > { %v5008_v28 = vmax.f32 %v4800_v40, %v4916_v27  ;;  %v5009_v63 = vmax.f32 %v4801_v46, %v4918_v42  ;;  %v2790_v57 = vrot.slane %v15475_v45, 3  ;;  %v2792_v3 = vrot.slane %v15476_v29, 3  ;;  %v8326_v40 = vpop.f32.mrf.mxu3 }
 0x2bb   : > { %v13516_v39 = vor.u32 %v10106_v5, %v9607_v24  ;;  %v2582_v7 = vsel %vm2529_vm4, %v2580_v56, %v2581_v62  ;;  %v2584_v49 = vsel %vm2529_vm4, %v2581_v62, %v2583_v0  ;;  %v2998_v34 = vrot.slane %v15474_v1, 4  ;;  %v13526_v5 = vld [vmem:[#allocation2 + $0xd4] sm:$0x3]  ;;  %v5519_v24 = vld [vmem:[#allocation2 + $0x2c] sm:$0x3] }
 0x2bc   : > { %v5216_v53 = vmax.f32 %v5008_v28, %v5124_v37  ;;  %v5217_v47 = vmax.f32 %v5009_v63, %v5126_v30  ;;  %v2662_v14 = vmax.f32 %v2453_v2, %v2582_v7  ;;  %v2663_v12 = vmax.f32 %v2454_v50, %v2584_v49  ;;  %15478 = vst [vmem:[#allocation45_spill] sm:$0xff] %v13526_v5  ;;  %v13528_v1 = vld [vmem:[#allocation2 + $0xd4] sm:$0x3]  ;;  %v5567_v7 = vld [vmem:[#allocation2 + $0x38] sm:$0x3] }
 0x2bd   : > { %15477 = vst [vmem:[#allocation44_spill] sm:$0xff] %v13516_v39  ;;  %8503 = vmatmul.bf16.gmra.mxu1 %v13516_v39  ;;  %v2791_v42 = vsel %vm2738_vm5, %v2789_v11, %v2790_v57  ;;  %v2793_v27 = vsel %vm2738_vm5, %v2790_v57, %v2792_v3  ;;  %v2999_v26 = vrot.slane %v15475_v45, 4  ;;  %v3001_v46 = vrot.slane %v15476_v29, 4  ;;  %v13530_v56 = vld [vmem:[#allocation2 + $0x30] sm:$0xff]   ;;  %v5517_v29 = vld [vmem:[#allocation2 + $0x24] sm:$0xff]  }
 0x2be   : > { %15479 = vst [vmem:[#allocation46_spill] sm:$0xff] %v13528_v1  ;;  %v5248_v30 = vpack.c.bf16 %v5216_v53, %v5216_v53  ;;  %v5249_v37 = vpack.c.bf16 %v5217_v47, %v5217_v47  ;;  %v2871_v2 = vmax.f32 %v2662_v14, %v2791_v42  ;;  %v2872_v50 = vmax.f32 %v2663_v12, %v2793_v27  ;;  %v5805_v14 = vld [vmem:[#allocation2 + $0x3c] sm:$0xff]  }
 0x2bf   : > { %v3000_v62 = vsel %vm2947_vm6, %v2998_v34, %v2999_v26  ;;  %v3002_v0 = vsel %vm2947_vm6, %v2999_v26, %v3001_v46  ;;  %v13534_v11 = vor.u32 %v10155_v16, %v9789_v58  ;;  %v13537_v45 = vadd.f32 %v8326_v40, %v13487_v32  ;;  %v13541_v34 = vpop.f32.mrf.mxu2  ;;  %v6287_v53 = vld [vmem:[#allocation2 + $0x5c] sm:$0x3] }
 0x2c0   : > { %5280 = vst [vmem:[#allocation3 + $0xc8] sm:$0xf] %v5248_v30  ;;  %v5362_v28 = vrot.slane %v5248_v30, 7  ;;  %v5364_v63 = vrot.slane %v5249_v37, 7  ;;  %v3080_v57 = vmax.f32 %v2871_v2, %v3000_v62  ;;  %v3081_v3 = vmax.f32 %v2872_v50, %v3002_v0  ;;  %v5807_v30 = vld [vmem:[#allocation2 + $0x44] sm:$0x3] }
 0x2c1   : > { %15480 = vst [vmem:[#allocation62_spill] sm:$0xff] %v13534_v11  ;;  %8296 = vmatmul.bf16.gmra.mxu2 %v13534_v11  ;;  %v15232_v32 = vunpack.c.l.bf16 %v13530_v56  ;;  %v15231_v47 = vunpack.c.h.bf16 %v13530_v56  ;;  %v5613_v42 = vunpack.c.l.bf16 %v5517_v29  ;;  %v5614_v27 = vunpack.c.h.bf16 %v5517_v29  ;;  %v6047_v2 = vld [vmem:[#allocation2 + $0x50] sm:$0x3]  ;;  %v6285_v50 = vld [vmem:[#allocation2 + $0x54] sm:$0xff]  }
 0x2c2   : > { %5281 = vst [vmem:[#allocation3 + $0xd8] sm:$0xf] %v5249_v37  ;;  %v5363_v12 = vrot.slane %v5362_v28, 4  ;;  %v5366_v58 = vrot.slane %v5364_v63, 4  ;;  %v3112_v16 = vpack.c.bf16 %v3080_v57, %v3080_v57  ;;  %v3113_v40 = vpack.c.bf16 %v3081_v3, %v3081_v3  ;;  %v10171_v3 = vld [vmem:[#allocation9 + $0x54] sm:$0xf] }
 0x2c3   : > { %5478 = vst [vmem:[#allocation2 + $0x60] sm:$0xe] %v5362_v28  ;;  %v5615_v26 = vunpack.c.l.bf16 %v5519_v24  ;;  %v5663_v46 = vunpack.c.l.bf16 %v5567_v7  ;;  %v5901_v49 = vunpack.c.l.bf16 %v5805_v14  ;;  %v5709_v57 = vmax.f32 %v5613_v42, %v15232_v32  ;;  %v9863_v7 = vld [vmem:[#allocation9 + $0x58] sm:$0xf0] }
 0x2c4   : > { %v5365_v37 = vsel %vm11801_vm2, %v5363_v12, %v5364_v63  ;;  %3144 = vst [vmem:[#allocation3 + $0x144] sm:$0xf] %v3112_v16  ;;  %v3238_v62 = vrot.slane %v3112_v16, 7  ;;  %v3240_v0 = vrot.slane %v3113_v40, 7  ;;  %v5710_v29 = vmax.f32 %v5614_v27, %v15231_v47 }
 0x2c5   : > { %3145 = vst [vmem:[#allocation3 + $0x154] sm:$0xf] %v3113_v40  ;;  %v5711_v24 = vmax.f32 %v5615_v26, %v5663_v46  ;;  %v5902_v28 = vunpack.c.h.bf16 %v5805_v14  ;;  %v5903_v63 = vunpack.c.l.bf16 %v5807_v30  ;;  %v6143_v12 = vunpack.c.l.bf16 %v6047_v2  ;;  %v3673_v46 = vld [vmem:[#allocation2 + $0x6c] sm:$0xf] }
 0x2c6   : > { %v3239_v39 = vrot.slane %v3238_v62, 4  ;;  %v3242_v11 = vrot.slane %v3240_v0, 4  ;;  %3346 = vst [vmem:[#allocation2 + $0x90] sm:$0xe] %v3238_v62  ;;  %v5949_v15 = vmax.f32 %v5709_v57, %v5901_v49  ;;  %v6381_v60 = vunpack.c.l.bf16 %v6285_v50  ;;  %v13559_v62 = vld [vmem:[#allocation2 + $0x68] sm:$0x3] }
 0x2c7   : > { %v9669_v16 = vld [vmem:[#allocation3 + $0xc8] sm:$0xf]  ;;  %v5950_v20 = vmax.f32 %v5710_v29, %v5902_v28  ;;  %v6382_v40 = vunpack.c.h.bf16 %v6285_v50  ;;  %v5951_v27 = vmax.f32 %v5711_v24, %v5903_v63  ;;  %v6383_v14 = vunpack.c.l.bf16 %v6287_v53  ;;  %v3675_v50 = vld [vmem:[#allocation2 + $0x74] sm:$0x3]  ;;  %5479 = vst [vmem:[#allocation2 + $0x64] sm:$0xf] %v5365_v37 }
 0x2c8   : > { %v3241_v42 = vsel %vm11801_vm2, %v3239_v39, %v3240_v0  ;;  %3348 = vst [vmem:[#allocation2 + $0x98] sm:$0x1] %v3242_v11  ;;  %v9866_v26 = vor.u32 %v10171_v3, %v9863_v7  ;;  %v6189_v30 = vmax.f32 %v5949_v15, %v13443_v22  ;;  %v3481_v2 = vunpack.c.l.bf16 %v13432_v51 }
 0x2c9   : > { %v10124_v25 = vld [vmem:[#allocation3 + $0xd4] sm:$0xf0]  ;;  %3347 = vst [vmem:[#allocation2 + $0x94] sm:$0xf] %v3241_v42  ;;  %v6190_v49 = vmax.f32 %v5950_v20, %v13447_v10  ;;  %v6191_v57 = vmax.f32 %v5951_v27, %v6143_v12  ;;  %v3482_v39 = vunpack.c.h.bf16 %v13432_v51  ;;  %v3483_v11 = vunpack.c.l.bf16 %v13451_v44 }
 0x2ca   : > { %v13554_v47 = vor.u32 %v10124_v25, %v9669_v16  ;;  %8576 = vmatpush.bf16.msra.mxu2 %v9866_v26  ;;  %v3531_v53 = vunpack.c.l.bf16 %v3435_v9  ;;  %v6429_v0 = vmax.f32 %v6189_v30, %v6381_v60  ;;  %v15482_v20 = vunpack.c.l.bf16 %v13455_v6  ;;  %5480 = vst [vmem:[#allocation2 + $0x68] sm:$0x1] %v5366_v58 }
 0x2cb   : > { %v10137_v25 = vld [vmem:[#allocation3 + $0x144] sm:$0xf]  ;;  %v6430_v15 = vmax.f32 %v6190_v49, %v6382_v40  ;;  %v3769_v24 = vunpack.c.l.bf16 %v3673_v46  ;;  %v6431_v3 = vmax.f32 %v6191_v57, %v6383_v14  ;;  %v15483_v7 = vunpack.c.h.bf16 %v13455_v6 }
 0x2cc   : > { %15481 = vst [vmem:[#allocation63_spill] sm:$0xff] %v13554_v47  ;;  %8434 = vmatmul.bf16.gmra.mxu0 %v13554_v47  ;;  %v3577_v29 = vmax.f32 %v3481_v2, %v15482_v20  ;;  %v9727_v28 = vld [vmem:[#allocation3 + $0x150] sm:$0xf0]  ;;  %v3579_v51 = vmax.f32 %v3483_v11, %v3531_v53  ;;  %v3771_v12 = vunpack.c.l.bf16 %v3675_v50  ;;  %v6627_v9 = vrot.slane %v6429_v0, 1  ;;  %v10768_v50 = vld [vmem:[#allocation2 + $0x78] sm:$0xff]  }
 0x2cd   : > { %v3578_v63 = vmax.f32 %v3482_v39, %v15483_v7  ;;  %v13568_v44 = vor.u32 %v10137_v25, %v9727_v28  ;;  %v6628_v37 = vrot.slane %v6430_v15, 1  ;;  %v6835_v16 = vrot.slane %v6429_v0, 2  ;;  %v3915_v25 = vld [vmem:[#allocation2 + $0x80] sm:$0x3] }
 0x2ce   : > { %v6630_v42 = vrot.slane %v6431_v3, 1  ;;  %v6836_v60 = vrot.slane %v6430_v15, 2  ;;  %v6838_v40 = vrot.slane %v6431_v3, 2  ;;  %v7043_v27 = vrot.slane %v6429_v0, 3 }
 0x2cf   : > { %15484 = vst [vmem:[#allocation64_spill] sm:$0xff] %v13568_v44  ;;  %8365 = vmatmul.bf16.gmra.mxu3 %v13568_v44  ;;  %v6629_v58 = vsel %vm2320_vm3, %v6627_v9, %v6628_v37  ;;  %v7044_v26 = vrot.slane %v6430_v15, 3  ;;  %v7046_v14 = vrot.slane %v6431_v3, 3  ;;  %v7251_v46 = vrot.slane %v6429_v0, 4 }
 0x2d0   : > { %v6631_v6 = vsel %vm2320_vm3, %v6628_v37, %v6630_v42  ;;  %v6730_v30 = vmax.f32 %v6429_v0, %v6629_v58  ;;  %v6837_v49 = vsel %vm2529_vm4, %v6835_v16, %v6836_v60  ;;  %v6839_v2 = vsel %vm2529_vm4, %v6836_v60, %v6838_v40  ;;  %v4153_v37 = vld [vmem:[#allocation2 + $0x84] sm:$0xff]   ;;  %v4155_v40 = vld [vmem:[#allocation2 + $0x8c] sm:$0x3]  ;;  %v8242_v58 = vpop.f32.mrf.mxu2 }
 0x2d1   : > { %v6731_v57 = vmax.f32 %v6430_v15, %v6631_v6  ;;  %v7045_v39 = vsel %vm2738_vm5, %v7043_v27, %v7044_v26  ;;  %v7047_v11 = vsel %vm2738_vm5, %v7044_v26, %v7046_v14  ;;  %v7252_v53 = vrot.slane %v6430_v15, 4 }
 0x2d2   : > { %v6938_v20 = vmax.f32 %v6730_v30, %v6837_v49  ;;  %v7254_v28 = vrot.slane %v6431_v3, 4  ;;  %v3817_v7 = vmax.f32 %v3577_v29, %v3769_v24  ;;  %v15485_v9 = vunpack.c.l.bf16 %v13204_v59 }
 0x2d3   : > { %v6939_v0 = vmax.f32 %v6731_v57, %v6839_v2  ;;  %v7253_v16 = vsel %vm2947_vm6, %v7251_v46, %v7252_v53  ;;  %v3819_v42 = vmax.f32 %v3579_v51, %v3771_v12  ;;  %v13580_v60 = vunpack.c.l.bf16 %v10768_v50  ;;  %v15486_v2 = vld [vmem:[#allocation36_spill] sm:$0xff] }
 0x2d4   : > { %v3818_v32 = vmax.f32 %v3578_v63, %v15485_v9  ;;  %v7146_v27 = vmax.f32 %v6938_v20, %v7045_v39  ;;  %v7255_v26 = vsel %vm2947_vm6, %v7252_v53, %v7254_v28  ;;  %v13583_v15 = vunpack.c.h.bf16 %v10768_v50 }
 0x2d5   : > { %v4011_v14 = vunpack.c.l.bf16 %v3915_v25  ;;  %v7147_v3 = vmax.f32 %v6939_v0, %v7047_v11  ;;  %v4057_v29 = vmax.f32 %v3817_v7, %v13580_v60  ;;  %v4249_v59 = vunpack.c.l.bf16 %v4153_v37  ;;  %v15487_v11 = vld [vmem:[#allocation39_spill] sm:$0xff] }
 0x2d6   : > { %v4250_v24 = vunpack.c.h.bf16 %v4153_v37  ;;  %v7354_v63 = vmax.f32 %v7146_v27, %v7253_v16  ;;  %v4058_v6 = vmax.f32 %v3818_v32, %v13583_v15  ;;  %v4251_v51 = vunpack.c.l.bf16 %v4155_v40 }
 0x2d7   : > { %v4059_v46 = vmax.f32 %v3819_v42, %v4011_v14  ;;  %v13588_v12 = vadd.f32 %v8242_v58, %v13224_v19  ;;  %v7355_v30 = vmax.f32 %v7147_v3, %v7255_v26  ;;  %v4297_v49 = vmax.f32 %v4057_v29, %v4249_v59  ;;  %v13592_v42 = vpop.f32.mrf.mxu3 }
 0x2d8   : > { %v2376_v57 = vrot.slane %v15486_v2, 1  ;;  %v7386_v50 = vpack.c.bf16 %v7354_v63, %v7354_v63  ;;  %v4298_v39 = vmax.f32 %v4058_v6, %v4250_v24  ;;  %v2377_v25 = vrot.slane %v15487_v11, 1 }
 0x2d9   : > { %v4299_v53 = vmax.f32 %v4059_v46, %v4251_v51  ;;  %v7387_v20 = vpack.c.bf16 %v7355_v30, %v7355_v30  ;;  %v4503_v28 = vrot.slane %v4297_v49, 1  ;;  %v4711_v7 = vrot.slane %v4297_v49, 2 }
 0x2da   : > { %v4919_v9 = vrot.slane %v4297_v49, 3  ;;  %7418 = vst [vmem:[#allocation3 + $0x6c] sm:$0xf] %v7386_v50  ;;  %v4504_v32 = vrot.slane %v4298_v39, 1  ;;  %v4712_v0 = vrot.slane %v4298_v39, 2  ;;  %v4920_v40 = vrot.slane %v4298_v39, 3 }
 0x2db   : > { %v4506_v37 = vrot.slane %v4299_v53, 1  ;;  %v4714_v16 = vrot.slane %v4299_v53, 2  ;;  %7419 = vst [vmem:[#allocation3 + $0x7c] sm:$0xf] %v7387_v20  ;;  %v4922_v58 = vrot.slane %v4299_v53, 3  ;;  %v5127_v27 = vrot.slane %v4297_v49, 4 }
 0x2dc   : > { %v5128_v26 = vrot.slane %v4298_v39, 4  ;;  %v4505_v14 = vsel %vm2320_vm3, %v4503_v28, %v4504_v32  ;;  %v4713_v29 = vsel %vm2529_vm4, %v4711_v7, %v4712_v0  ;;  %v4921_v6 = vsel %vm2738_vm5, %v4919_v9, %v4920_v40  ;;  %v15488_v20 = vld [vmem:[#allocation48_spill] sm:$0xff] }
 0x2dd   : > { %v4507_v3 = vsel %vm2320_vm3, %v4504_v32, %v4506_v37  ;;  %v4715_v59 = vsel %vm2529_vm4, %v4712_v0, %v4714_v16  ;;  %v4594_v24 = vmax.f32 %v4297_v49, %v4505_v14  ;;  %v4923_v46 = vsel %vm2738_vm5, %v4920_v40, %v4922_v58 }
 0x2de   : > { %v4595_v63 = vmax.f32 %v4298_v39, %v4507_v3  ;;  %v5129_v51 = vsel %vm2947_vm6, %v5127_v27, %v5128_v26  ;;  %v5130_v30 = vrot.slane %v4299_v53, 4  ;;  %v2378_v50 = vsel %vm2320_vm3, %v2376_v57, %v2377_v25 }
 0x2df   : > { %v2379_v47 = vrot.slane %v15488_v20, 1  ;;  %v4802_v28 = vmax.f32 %v4594_v24, %v4713_v29  ;;  %v2455_v32 = vmax.f32 %v15486_v2, %v2378_v50  ;;  %v2585_v7 = vrot.slane %v15486_v2, 2 }
 0x2e0   : > { %v4803_v44 = vmax.f32 %v4595_v63, %v4715_v59  ;;  %v5131_v49 = vsel %vm2947_vm6, %v5128_v26, %v5130_v30  ;;  %v2586_v9 = vrot.slane %v15487_v11, 2  ;;  %v2588_v37 = vrot.slane %v15488_v20, 2  ;;  %v10187_v63 = vld [vmem:[#allocation9 + $0xd4] sm:$0xf] }
 0x2e1   : > { %v2380_v39 = vsel %vm2320_vm3, %v2377_v25, %v2379_v47  ;;  %v10110_v0 = vld [vmem:[#allocation3 + $0x6c] sm:$0xf]  ;;  %v5010_v53 = vmax.f32 %v4802_v28, %v4921_v6  ;;  %v2794_v40 = vrot.slane %v15486_v2, 3  ;;  %v2795_v26 = vrot.slane %v15487_v11, 3  ;;  %v10169_v25 = vld [vmem:[#allocation9 + $0x44] sm:$0xf] }
 0x2e2   : > { %v5011_v16 = vmax.f32 %v4803_v44, %v4923_v46  ;;  %v2456_v57 = vmax.f32 %v15487_v11, %v2380_v39  ;;  %v9623_v58 = vld [vmem:[#allocation3 + $0x78] sm:$0xf0]  ;;  %v2587_v27 = vsel %vm2529_vm4, %v2585_v7, %v2586_v9  ;;  %v2589_v14 = vsel %vm2529_vm4, %v2586_v9, %v2588_v37  ;;  %v9855_v44 = vld [vmem:[#allocation9 + $0x48] sm:$0xf0]  ;;  %v9805_v7 = vld [vmem:[#allocation3 + $0x1e0] sm:$0xf] }
 0x2e3   : > { %v2797_v47 = vrot.slane %v15488_v20, 3  ;;  %v13615_v3 = vor.u32 %v10110_v0, %v9623_v58  ;;  %v5218_v29 = vmax.f32 %v5010_v53, %v5129_v51  ;;  %v2664_v24 = vmax.f32 %v2455_v32, %v2587_v27  ;;  %v9927_v6 = vld [vmem:[#allocation9 + $0xd8] sm:$0xf0]  ;;  %v10159_v39 = vld [vmem:[#allocation3 + $0x1ec] sm:$0xf0] }
 0x2e4   : > { %v5219_v59 = vmax.f32 %v5011_v16, %v5131_v49  ;;  %v2665_v46 = vmax.f32 %v2456_v57, %v2589_v14  ;;  %v2796_v30 = vsel %vm2738_vm5, %v2794_v40, %v2795_v26  ;;  %v3003_v28 = vrot.slane %v15486_v2, 4  ;;  %v8331_v49 = vpop.f32.mrf.mxu3  ;;  %v10167_v0 = vld [vmem:[#allocation9 + $0x34] sm:$0xf]  ;;  %v9847_v58 = vld [vmem:[#allocation9 + $0x38] sm:$0xf0] }
 0x2e5   : > { %15489 = vst [vmem:[#allocation36_spill] sm:$0xff] %v13615_v3  ;;  %v2798_v50 = vsel %vm2738_vm5, %v2795_v26, %v2797_v47  ;;  %8508 = vmatmul.bf16.gmra.mxu1 %v13615_v3  ;;  %v13621_v9 = vpack.c.bf16 %v5218_v29, %v5218_v29  ;;  %v2873_v51 = vmax.f32 %v2664_v24, %v2796_v30  ;;  %v3004_v32 = vrot.slane %v15487_v11, 4  ;;  %v10203_v27 = vld [vmem:[#allocation9 + $0x154] sm:$0xf]  ;;  %v9991_v29 = vld [vmem:[#allocation9 + $0x158] sm:$0xf0]  ;;  %v13634_v24 = vpop.f32.mrf.mxu2 }
 0x2e6   : > { %v5251_v37 = vpack.c.bf16 %v5219_v59, %v5219_v59  ;;  %v2874_v53 = vmax.f32 %v2665_v46, %v2798_v50  ;;  %v3006_v16 = vrot.slane %v15488_v20, 4  ;;  %v9858_v57 = vor.u32 %v10169_v25, %v9855_v44  ;;  %v13630_v11 = vld [vmem:[#allocation2 + $0x74] sm:$0x3] }
 0x2e7   : > { %v9930_v40 = vor.u32 %v10187_v63, %v9927_v6  ;;  %5282 = vst [vmem:[#allocation3 + $0xe8] sm:$0xf] %v13621_v9  ;;  %v15235_v2 = vrot.slane %v13621_v9, 7  ;;  %v3005_v26 = vsel %vm2947_vm6, %v3003_v28, %v3004_v32  ;;  %v13628_v47 = vor.u32 %v10159_v39, %v9805_v7  ;;  %v13632_v59 = vld [vmem:[#allocation2 + $0x74] sm:$0x3]  ;;  %v5568_v39 = vld [vmem:[#allocation2 + $0x3c] sm:$0xff]  }
 0x2e8   : > { %v5369_v14 = vrot.slane %v5251_v37, 7  ;;  %5283 = vst [vmem:[#allocation3 + $0xf8] sm:$0xf] %v5251_v37  ;;  %v3007_v20 = vsel %vm2947_vm6, %v3004_v32, %v3006_v16  ;;  %v3082_v25 = vmax.f32 %v2873_v51, %v3005_v26  ;;  %8577 = vmatpush.bf16.msra.mxu2 %v9858_v57  ;;  %v13638_v44 = vadd.f32 %v8331_v49, %v13588_v12  ;;  %v10165_v63 = vld [vmem:[#allocation9 + $0x24] sm:$0xf] }
 0x2e9   : > { %15490 = vst [vmem:[#allocation39_spill] sm:$0xff] %v13628_v47  ;;  %8665 = vmatpush.bf16.msra.mxu3 %v9930_v40  ;;  %v9839_v6 = vld [vmem:[#allocation9 + $0x28] sm:$0xf0]  ;;  %v5368_v46 = vrot.slane %v15235_v2, 4  ;;  %v3083_v50 = vmax.f32 %v2874_v53, %v3007_v20  ;;  %8301 = vmatmul.bf16.gmra.mxu2 %v13628_v47  ;;  %v9850_v28 = vor.u32 %v10167_v0, %v9847_v58  ;;  %v5522_v7 = vld [vmem:[#allocation2 + $0x38] sm:$0x3]  ;;  %v5664_v26 = vunpack.c.l.bf16 %v5568_v39 }
 0x2ea   : > { %15491 = vst [vmem:[#allocation48_spill] sm:$0xff] %v13638_v44  ;;  %v5371_v30 = vrot.slane %v5369_v14, 4  ;;  %v13645_v37 = vadd.f32 %v13336_v21, %v13224_v19  ;;  %v13649_v12 = vadd.f32 %v13434_v55, %v13224_v19  ;;  %v3114_v51 = vpack.c.bf16 %v3082_v25, %v3082_v25  ;;  %v5570_v49 = vld [vmem:[#allocation2 + $0x44] sm:$0x3]  ;;  %v5810_v16 = vld [vmem:[#allocation2 + $0x50] sm:$0x3] }
 0x2eb   : > { %v9994_v32 = vor.u32 %v10203_v27, %v9991_v29  ;;  %v6048_v57 = vld [vmem:[#allocation2 + $0x54] sm:$0xff]   ;;  %v13653_v53 = vadd.f32 %v13541_v34, %v13224_v19  ;;  %v5370_v0 = vsel %vm11801_vm2, %v5368_v46, %v5369_v14  ;;  %v3115_v40 = vpack.c.bf16 %v3083_v50, %v3083_v50  ;;  %v6050_v29 = vld [vmem:[#allocation2 + $0x5c] sm:$0x3]  ;;  %v10811_v20 = vld [vmem:[#allocation2 + $0x60] sm:$0xff]  }
 0x2ec   : > { %5483 = vst [vmem:[#allocation2 + $0x74] sm:$0x1] %v5371_v30  ;;  %v9842_v21 = vor.u32 %v10165_v63, %v9839_v6  ;;  %v3243_v58 = vrot.slane %v3114_v51, 7  ;;  %8578 = vmatpush.bf16.msra.mxu2 %v9850_v28  ;;  %v5618_v55 = vunpack.c.l.bf16 %v5522_v7  ;;  %v5665_v27 = vunpack.c.h.bf16 %v5568_v39  ;;  %v6290_v47 = vld [vmem:[#allocation2 + $0x68] sm:$0x3] }
 0x2ed   : > { %5482 = vst [vmem:[#allocation2 + $0x70] sm:$0xf] %v5370_v0  ;;  %8754 = vmatpush.bf16.msra.mxu0 %v9994_v32  ;;  %v3245_v25 = vrot.slane %v3115_v40, 7  ;;  %v5666_v2 = vunpack.c.l.bf16 %v5570_v49  ;;  %v5906_v34 = vunpack.c.l.bf16 %v5810_v16  ;;  %v6144_v3 = vunpack.c.l.bf16 %v6048_v57 }
 0x2ee   : > { %3146 = vst [vmem:[#allocation3 + $0x164] sm:$0xf] %v3114_v51  ;;  %v9685_v5 = vld [vmem:[#allocation3 + $0xe8] sm:$0xf]  ;;  %v3244_v14 = vrot.slane %v3243_v58, 4  ;;  %v15492_v63 = vunpack.c.l.bf16 %v13530_v56  ;;  %v15493_v46 = vunpack.c.h.bf16 %v13530_v56  ;;  %v6145_v50 = vunpack.c.h.bf16 %v6048_v57 }
 0x2ef   : > { %3147 = vst [vmem:[#allocation3 + $0x174] sm:$0xf] %v3115_v40  ;;  %v10128_v28 = vld [vmem:[#allocation3 + $0xf4] sm:$0xf0]  ;;  %v3247_v7 = vrot.slane %v3245_v25, 4  ;;  %v5714_v39 = vmax.f32 %v5618_v55, %v5666_v2  ;;  %v6146_v51 = vunpack.c.l.bf16 %v6050_v29  ;;  %v13661_v32 = vunpack.c.l.bf16 %v10811_v20 }
 0x2f0   : > { %v5712_v6 = vmax.f32 %v15492_v63, %v5664_v26  ;;  %v5713_v30 = vmax.f32 %v15493_v46, %v5665_v27  ;;  %3349 = vst [vmem:[#allocation2 + $0x9c] sm:$0xe] %v3243_v58  ;;  %v13663_v49 = vor.u32 %v10128_v28, %v9685_v5  ;;  %v3246_v16 = vsel %vm11801_vm2, %v3244_v14, %v3245_v25  ;;  %v10219_v56 = vld [vmem:[#allocation9 + $0x1d4] sm:$0xf]  ;;  %v10055_v26 = vld [vmem:[#allocation9 + $0x1d8] sm:$0xf0]  ;;  %v13671_v63 = vpop.f32.mrf.mxu2 }
 0x2f1   : > { %8579 = vmatpush.bf16.msra.mxu2 %v9842_v21  ;;  %v10163_v57 = vld [vmem:[#allocation9 + $0x14] sm:$0xf]  ;;  %3350 = vst [vmem:[#allocation2 + $0xa0] sm:$0xf] %v3246_v16  ;;  %v5954_v27 = vmax.f32 %v5714_v39, %v5906_v34  ;;  %v13669_v58 = vunpack.c.h.bf16 %v10811_v20  ;;  %v6386_v2 = vunpack.c.l.bf16 %v6290_v47  ;;  %v10058_v55 = vor.u32 %v10219_v56, %v10055_v26  ;;  %v9831_v29 = vld [vmem:[#allocation9 + $0x18] sm:$0xf0] }
 0x2f2   : > { %15494 = vst [vmem:[#allocation65_spill] sm:$0xff] %v13663_v49  ;;  %v5952_v0 = vmax.f32 %v5712_v6, %v13443_v22  ;;  %v5953_v40 = vmax.f32 %v5713_v30, %v13447_v10  ;;  %v3678_v5 = vld [vmem:[#allocation2 + $0x80] sm:$0x3]  ;;  %8439 = vmatmul.bf16.gmra.mxu0 %v13663_v49  ;;  %v9834_v25 = vor.u32 %v10163_v57, %v9831_v29  ;;  %v3916_v10 = vld [vmem:[#allocation2 + $0x84] sm:$0xff]   ;;  %v13674_v14 = vld [vmem:[#allocation2 + $0x6c] sm:$0xf]  ;;  %v3486_v47 = vunpack.c.l.bf16 %v13559_v62 }
 0x2f3   : > { %3351 = vst [vmem:[#allocation2 + $0xa4] sm:$0x1] %v3247_v7  ;;  %v6194_v6 = vmax.f32 %v5954_v27, %v6146_v51  ;;  %8843 = vmatpush.bf16.msra.mxu1 %v10058_v55  ;;  %v3534_v20 = vunpack.c.l.bf16 %v13632_v59  ;;  %v15495_v7 = vrot.slane %v13621_v9, 7  ;;  %v15496_v16 = vld [vmem:[#allocation27_spill] sm:$0xff]  ;;  %v4012_v59 = vunpack.c.l.bf16 %v3916_v10  ;;  %v13697_v49 = vld [vmem:[#allocation2 + $0x90] sm:$0xff]  }
 0x2f4   : > { %v6192_v21 = vmax.f32 %v5952_v0, %v6144_v3  ;;  %v6193_v22 = vmax.f32 %v5953_v40, %v6145_v50  ;;  %v13676_v34 = vld [vmem:[#allocation2 + $0x6c] sm:$0xff]   ;;  %v3774_v50 = vunpack.c.l.bf16 %v3678_v5  ;;  %v15497_v0 = vunpack.c.l.bf16 %v15496_v16 }
 0x2f5   : > { %v10141_v46 = vld [vmem:[#allocation3 + $0x164] sm:$0xf]  ;;  %8580 = vmatpush.bf16.msra.mxu2 %v9834_v25  ;;  %v3532_v3 = vunpack.c.l.bf16 %v13676_v34  ;;  %5481 = vst [vmem:[#allocation2 + $0x6c] sm:$0xe] %v15495_v7  ;;  %v6434_v51 = vmax.f32 %v6194_v6, %v6386_v2  ;;  %v3582_v40 = vmax.f32 %v3486_v47, %v3534_v20 }
 0x2f6   : > { %v6432_v30 = vmax.f32 %v6192_v21, %v13661_v32  ;;  %v6433_v28 = vmax.f32 %v6193_v22, %v13669_v58  ;;  %v9743_v39 = vld [vmem:[#allocation3 + $0x170] sm:$0xf0]  ;;  %v3581_v62 = vmax.f32 %v13282_v54, %v15497_v0  ;;  %v3918_v0 = vld [vmem:[#allocation2 + $0x8c] sm:$0x3] }
 0x2f7   : > { %v13688_v56 = vor.u32 %v10141_v46, %v9743_v39  ;;  %v6635_v55 = vrot.slane %v6434_v51, 1  ;;  %v6843_v21 = vrot.slane %v6434_v51, 2  ;;  %v7051_v22 = vrot.slane %v6434_v51, 3 }
 0x2f8   : > { %v6632_v26 = vrot.slane %v6432_v30, 1  ;;  %v6633_v57 = vrot.slane %v6433_v28, 1  ;;  %v6840_v27 = vrot.slane %v6432_v30, 2  ;;  %v6841_v29 = vrot.slane %v6433_v28, 2 }
 0x2f9   : > { %15498 = vst [vmem:[#allocation27_spill] sm:$0xff] %v13688_v56  ;;  %v7048_v5 = vrot.slane %v6432_v30, 3  ;;  %8370 = vmatmul.bf16.gmra.mxu3 %v13688_v56  ;;  %v7049_v2 = vrot.slane %v6433_v28, 3  ;;  %v7256_v25 = vrot.slane %v6432_v30, 4  ;;  %v7257_v16 = vrot.slane %v6433_v28, 4 }
 0x2fa   : > { %v6634_v9 = vsel %vm2320_vm3, %v6632_v26, %v6633_v57  ;;  %v6636_v54 = vsel %vm2320_vm3, %v6633_v57, %v6635_v55  ;;  %v6842_v47 = vsel %vm2529_vm4, %v6840_v27, %v6841_v29  ;;  %v6844_v20 = vsel %vm2529_vm4, %v6841_v29, %v6843_v21 }
 0x2fb   : > { %v6732_v6 = vmax.f32 %v6432_v30, %v6634_v9  ;;  %v6733_v46 = vmax.f32 %v6433_v28, %v6636_v54  ;;  %v7050_v7 = vsel %vm2738_vm5, %v7048_v5, %v7049_v2  ;;  %v7052_v39 = vsel %vm2738_vm5, %v7049_v2, %v7051_v22  ;;  %v13701_v30 = vpop.f32.mrf.mxu2  ;;  %v4158_v5 = vld [vmem:[#allocation2 + $0x98] sm:$0x3] }
 0x2fc   : > { %v7259_v56 = vrot.slane %v6434_v51, 4  ;;  %v3580_v8 = vmax.f32 %v13280_v23, %v3532_v3  ;;  %v3821_v57 = vmax.f32 %v3581_v62, %v13583_v15  ;;  %v7258_v55 = vsel %vm2947_vm6, %v7256_v25, %v7257_v16 }
 0x2fd   : > { %v6940_v26 = vmax.f32 %v6732_v6, %v6842_v47  ;;  %v6941_v27 = vmax.f32 %v6733_v46, %v6844_v20  ;;  %v3822_v29 = vmax.f32 %v3582_v40, %v3774_v50  ;;  %v4013_v21 = vunpack.c.h.bf16 %v3916_v10 }
 0x2fe   : > { %v7260_v28 = vsel %vm2947_vm6, %v7257_v16, %v7259_v56  ;;  %v3820_v2 = vmax.f32 %v3580_v8, %v13580_v60  ;;  %v4014_v22 = vunpack.c.l.bf16 %v3918_v0  ;;  %v15243_v23 = vunpack.c.l.bf16 %v13697_v49  ;;  %v15499_v8 = vld [vmem:[#allocation31_spill] sm:$0xff] }
 0x2ff   : > { %v7148_v9 = vmax.f32 %v6940_v26, %v7050_v7  ;;  %v7149_v54 = vmax.f32 %v6941_v27, %v7052_v39  ;;  %v4061_v51 = vmax.f32 %v3821_v57, %v4013_v21  ;;  %v15242_v3 = vunpack.c.h.bf16 %v13697_v49  ;;  %v15500_v39 = vld [vmem:[#allocation43_spill] sm:$0xff]  ;;  %v13718_v27 = vpop.f32.mrf.mxu3 }
 0x300   : > { %v4060_v6 = vmax.f32 %v3820_v2, %v4012_v59  ;;  %v4062_v47 = vmax.f32 %v3822_v29, %v4014_v22  ;;  %v4254_v20 = vunpack.c.l.bf16 %v4158_v5  ;;  %v13710_v10 = vadd.f32 %v13671_v63, %v13224_v19 }
 0x301   : > { %v7356_v62 = vmax.f32 %v7148_v9, %v7258_v55  ;;  %v7357_v50 = vmax.f32 %v7149_v54, %v7260_v28  ;;  %v4301_v40 = vmax.f32 %v4061_v51, %v15242_v3  ;;  %v2381_v56 = vrot.slane %v15499_v8, 1 }
 0x302   : > { %v4300_v46 = vmax.f32 %v4060_v6, %v15243_v23  ;;  %v4302_v7 = vmax.f32 %v4062_v47, %v4254_v20  ;;  %v2382_v16 = vrot.slane %v15500_v39, 1 }
 0x303   : > { %v7388_v25 = vpack.c.bf16 %v7356_v62, %v7356_v62  ;;  %v7389_v59 = vpack.c.bf16 %v7357_v50, %v7357_v50  ;;  %v4509_v0 = vrot.slane %v4301_v40, 1  ;;  %v4717_v26 = vrot.slane %v4301_v40, 2  ;;  %v13724_v6 = vpop.f32.mrf.mxu2 }
 0x304   : > { %v4925_v57 = vrot.slane %v4301_v40, 3  ;;  %v4508_v63 = vrot.slane %v4300_v46, 1  ;;  %v4511_v55 = vrot.slane %v4302_v7, 1  ;;  %v4716_v29 = vrot.slane %v4300_v46, 2 }
 0x305   : > { %7420 = vst [vmem:[#allocation3 + $0x8c] sm:$0xf] %v7388_v25  ;;  %v4719_v21 = vrot.slane %v4302_v7, 2  ;;  %v4924_v5 = vrot.slane %v4300_v46, 3  ;;  %v4927_v9 = vrot.slane %v4302_v7, 3  ;;  %v5132_v28 = vrot.slane %v4300_v46, 4 }
 0x306   : > { %7421 = vst [vmem:[#allocation3 + $0x9c] sm:$0xf] %v7389_v59  ;;  %v5133_v2 = vrot.slane %v4301_v40, 4  ;;  %v4510_v22 = vsel %vm2320_vm3, %v4508_v63, %v4509_v0  ;;  %v4512_v54 = vsel %vm2320_vm3, %v4509_v0, %v4511_v55  ;;  %v4718_v51 = vsel %vm2529_vm4, %v4716_v29, %v4717_v26  ;;  %v15501_v63 = vld [vmem:[#allocation20_spill] sm:$0xff] }
 0x307   : > { %v4720_v62 = vsel %vm2529_vm4, %v4717_v26, %v4719_v21  ;;  %v4596_v47 = vmax.f32 %v4300_v46, %v4510_v22  ;;  %v4597_v20 = vmax.f32 %v4301_v40, %v4512_v54  ;;  %v4926_v50 = vsel %vm2738_vm5, %v4924_v5, %v4925_v57 }
 0x308   : > { %v4928_v25 = vsel %vm2738_vm5, %v4925_v57, %v4927_v9  ;;  %v5134_v59 = vsel %vm2947_vm6, %v5132_v28, %v5133_v2  ;;  %v5135_v3 = vrot.slane %v4302_v7, 4  ;;  %v2383_v23 = vsel %vm2320_vm3, %v2381_v56, %v2382_v16 }
 0x309   : > { %v2384_v18 = vrot.slane %v15501_v63, 1  ;;  %v4804_v0 = vmax.f32 %v4596_v47, %v4718_v51  ;;  %v4805_v55 = vmax.f32 %v4597_v20, %v4720_v62  ;;  %v2457_v29 = vmax.f32 %v15499_v8, %v2383_v23  ;;  %v10161_v47 = vld [vmem:[#allocation9 + $0x4] sm:$0xf]  ;;  %v9823_v20 = vld [vmem:[#allocation9 + $0x8] sm:$0xf0] }
 0x30a   : > { %v2590_v26 = vrot.slane %v15499_v8, 2  ;;  %v5136_v46 = vsel %vm2947_vm6, %v5133_v2, %v5135_v3  ;;  %v2591_v21 = vrot.slane %v15500_v39, 2  ;;  %v2593_v57 = vrot.slane %v15501_v63, 2 }
 0x30b   : > { %v2385_v40 = vsel %vm2320_vm3, %v2382_v16, %v2384_v18  ;;  %v5012_v7 = vmax.f32 %v4804_v0, %v4926_v50  ;;  %v5013_v9 = vmax.f32 %v4805_v55, %v4928_v25  ;;  %v2799_v28 = vrot.slane %v15499_v8, 3 }
 0x30c   : > { %v10114_v5 = vld [vmem:[#allocation3 + $0x8c] sm:$0xf]  ;;  %v2458_v56 = vmax.f32 %v15500_v39, %v2385_v40  ;;  %v2592_v23 = vsel %vm2529_vm4, %v2590_v26, %v2591_v21  ;;  %v2594_v54 = vsel %vm2529_vm4, %v2591_v21, %v2593_v57  ;;  %v2800_v3 = vrot.slane %v15500_v39, 3  ;;  %v8336_v26 = vpop.f32.mrf.mxu3 }
 0x30d   : > { %v9639_v22 = vld [vmem:[#allocation3 + $0x98] sm:$0xf0]  ;;  %v2802_v18 = vrot.slane %v15501_v63, 3  ;;  %v5220_v2 = vmax.f32 %v5012_v7, %v5134_v59  ;;  %v5221_v51 = vmax.f32 %v5013_v9, %v5136_v46  ;;  %v2666_v62 = vmax.f32 %v2457_v29, %v2592_v23 }
 0x30e   : > { %v13743_v16 = vor.u32 %v10114_v5, %v9639_v22  ;;  %v2667_v50 = vmax.f32 %v2458_v56, %v2594_v54  ;;  %v2801_v25 = vsel %vm2738_vm5, %v2799_v28, %v2800_v3  ;;  %v3008_v55 = vrot.slane %v15499_v8, 4  ;;  %v13750_v59 = vld [vmem:[#allocation2 + $0x48] sm:$0xff]   ;;  %v13757_v56 = vpop.f32.mrf.mxu2  ;;  %v13763_v54 = vld [vmem:[#allocation2 + $0x80] sm:$0x3] }
 0x30f   : > { %v2803_v0 = vsel %vm2738_vm5, %v2800_v3, %v2802_v18  ;;  %v5252_v40 = vpack.c.bf16 %v5220_v2, %v5220_v2  ;;  %v5253_v21 = vpack.c.bf16 %v5221_v51, %v5221_v51  ;;  %v2875_v57 = vmax.f32 %v2666_v62, %v2801_v25  ;;  %v5525_v18 = vld [vmem:[#allocation2 + $0x44] sm:$0x3] }
 0x310   : > { %15502 = vst [vmem:[#allocation31_spill] sm:$0xff] %v13743_v16  ;;  %8513 = vmatmul.bf16.gmra.mxu1 %v13743_v16  ;;  %v3009_v5 = vrot.slane %v15500_v39, 4  ;;  %v13754_v29 = vadd.f32 %v13634_v24, %v13224_v19  ;;  %v2876_v46 = vmax.f32 %v2667_v50, %v2803_v0  ;;  %v3011_v7 = vrot.slane %v15501_v63, 4  ;;  %v5523_v39 = vld [vmem:[#allocation2 + $0x3c] sm:$0xff]   ;;  %v5811_v50 = vld [vmem:[#allocation2 + $0x54] sm:$0xff]  }
 0x311   : > { %v9826_v9 = vor.u32 %v10161_v47, %v9823_v20  ;;  %5284 = vst [vmem:[#allocation3 + $0x108] sm:$0xf] %v5252_v40  ;;  %v5372_v8 = vrot.slane %v5252_v40, 7  ;;  %v5374_v28 = vrot.slane %v5253_v21, 7  ;;  %v13761_v23 = vadd.f32 %v8336_v26, %v13710_v10  ;;  %v5573_v20 = vld [vmem:[#allocation2 + $0x50] sm:$0x3] }
 0x312   : > { %v3010_v22 = vsel %vm2947_vm6, %v3008_v55, %v3009_v5  ;;  %v13767_v24 = vadd.f32 %v13388_v13, %v13645_v37  ;;  %5285 = vst [vmem:[#allocation3 + $0x118] sm:$0xf] %v5253_v21  ;;  %v3012_v63 = vsel %vm2947_vm6, %v3009_v5, %v3011_v7  ;;  %v15246_v2 = vunpack.c.l.bf16 %v13750_v59  ;;  %v5813_v55 = vld [vmem:[#allocation2 + $0x5c] sm:$0x3]  ;;  %v13780_v26 = vld [vmem:[#allocation2 + $0x80] sm:$0x3] }
 0x313   : > { %15503 = vst [vmem:[#allocation43_spill] sm:$0xff] %v13761_v23  ;;  %v3084_v3 = vmax.f32 %v2875_v57, %v3010_v22  ;;  %8581 = vmatpush.bf16.msra.mxu2 %v9826_v9  ;;  %v13773_v51 = vadd.f32 %v13701_v30, %v13224_v19  ;;  %v5373_v10 = vrot.slane %v5372_v8, 4  ;;  %v5376_v62 = vrot.slane %v5374_v28, 4  ;;  %v15504_v21 = vld [vmem:[#allocation14_spill] sm:$0xff] }
 0x314   : > { %v3085_v47 = vmax.f32 %v2876_v46, %v3012_v63  ;;  %v13777_v13 = vadd.f32 %v13724_v6, %v13224_v19  ;;  %v15247_v25 = vunpack.c.h.bf16 %v13750_v59  ;;  %v5619_v0 = vunpack.c.l.bf16 %v5523_v39  ;;  %5484 = vst [vmem:[#allocation2 + $0x78] sm:$0xe] %v5372_v8  ;;  %v6053_v46 = vld [vmem:[#allocation2 + $0x68] sm:$0x3]  ;;  %v13787_v63 = vld [vmem:[#allocation2 + $0x6c] sm:$0xff]  }
 0x315   : > { %v3116_v37 = vpack.c.bf16 %v3084_v3, %v3084_v3  ;;  %v5375_v30 = vsel %vm11801_vm2, %v5373_v10, %v5374_v28  ;;  %v5620_v57 = vunpack.c.h.bf16 %v5523_v39  ;;  %v5621_v5 = vunpack.c.l.bf16 %v5525_v18  ;;  %5486 = vst [vmem:[#allocation2 + $0x80] sm:$0x1] %v5376_v62  ;;  %v6293_v39 = vld [vmem:[#allocation2 + $0x74] sm:$0x3] }
 0x316   : > { %v3117_v40 = vpack.c.bf16 %v3085_v47, %v3085_v47  ;;  %8582 = vmatmul.bf16.vlgmr.msra.gmra.mxu2 %v15504_v21  ;;  %v5669_v7 = vunpack.c.l.bf16 %v5573_v20  ;;  %v5715_v9 = vmax.f32 %v5619_v0, %v15246_v2  ;;  %v5907_v22 = vunpack.c.l.bf16 %v5811_v50  ;;  %5485 = vst [vmem:[#allocation2 + $0x7c] sm:$0xf] %v5375_v30 }
 0x317   : > { %3148 = vst [vmem:[#allocation3 + $0x184] sm:$0xf] %v3116_v37  ;;  %v3248_v6 = vrot.slane %v3116_v37, 7  ;;  %v5716_v28 = vmax.f32 %v5620_v57, %v15247_v25  ;;  %v5908_v3 = vunpack.c.h.bf16 %v5811_v50  ;;  %v5909_v10 = vunpack.c.l.bf16 %v5813_v55 }
 0x318   : > { %3149 = vst [vmem:[#allocation3 + $0x194] sm:$0xf] %v3117_v40  ;;  %v3250_v8 = vrot.slane %v3117_v40, 7  ;;  %v9701_v18 = vld [vmem:[#allocation3 + $0x108] sm:$0xf]  ;;  %v5717_v62 = vmax.f32 %v5621_v5, %v5669_v7  ;;  %v5955_v37 = vmax.f32 %v5715_v9, %v5907_v22  ;;  %v6149_v20 = vunpack.c.l.bf16 %v6053_v46  ;;  %v13802_v46 = vpop.f32.mrf.mxu2 }
 0x319   : > { %v3249_v47 = vrot.slane %v3248_v6, 4  ;;  %3352 = vst [vmem:[#allocation2 + $0xa8] sm:$0xe] %v3248_v6  ;;  %v10132_v21 = vld [vmem:[#allocation3 + $0x114] sm:$0xf0]  ;;  %v5956_v0 = vmax.f32 %v5716_v28, %v5908_v3  ;;  %v6387_v2 = vunpack.c.l.bf16 %v13787_v63  ;;  %v6388_v23 = vunpack.c.h.bf16 %v13676_v34 }
 0x31a   : > { %v3252_v16 = vrot.slane %v3250_v8, 4  ;;  %v13793_v40 = vor.u32 %v10132_v21, %v9701_v18  ;;  %v5957_v55 = vmax.f32 %v5717_v62, %v5909_v10  ;;  %v6195_v57 = vmax.f32 %v5955_v37, %v13661_v32  ;;  %v3679_v6 = vld [vmem:[#allocation2 + $0x84] sm:$0xff]   ;;  %v15506_v10 = vld [vmem:[#allocation30_spill] sm:$0xff] }
 0x31b   : > { %v3251_v50 = vsel %vm11801_vm2, %v3249_v47, %v3250_v8  ;;  %v13800_v5 = vadd.f32 %v13496_v52, %v13649_v12  ;;  %v6196_v7 = vmax.f32 %v5956_v0, %v13669_v58  ;;  %v6389_v34 = vunpack.c.l.bf16 %v6293_v39 }
 0x31c   : > { %15505 = vst [vmem:[#allocation20_spill] sm:$0xff] %v13793_v40  ;;  %v3487_v30 = vunpack.c.l.bf16 %v13674_v14  ;;  %8444 = vmatmul.bf16.gmra.mxu0 %v13793_v40  ;;  %v6197_v9 = vmax.f32 %v5957_v55, %v6149_v20  ;;  %v6435_v22 = vmax.f32 %v6195_v57, %v6387_v2  ;;  %v3489_v8 = vunpack.c.l.bf16 %v13630_v11 }
 0x31d   : > { %3353 = vst [vmem:[#allocation2 + $0xac] sm:$0xf] %v3251_v50  ;;  %v3537_v28 = vunpack.c.l.bf16 %v13780_v26  ;;  %v6436_v52 = vmax.f32 %v6196_v7, %v6388_v23  ;;  %v15507_v18 = vunpack.c.l.bf16 %v15506_v10  ;;  %v3775_v39 = vunpack.c.l.bf16 %v3679_v6 }
 0x31e   : > { %3354 = vst [vmem:[#allocation2 + $0xb0] sm:$0x1] %v3252_v16  ;;  %v10145_v3 = vld [vmem:[#allocation3 + $0x184] sm:$0xf]  ;;  %v3583_v12 = vmax.f32 %v3487_v30, %v13580_v60  ;;  %v6437_v14 = vmax.f32 %v6197_v9, %v6389_v34  ;;  %v6637_v37 = vrot.slane %v6435_v22, 1  ;;  %v6845_v21 = vrot.slane %v6435_v22, 2 }
 0x31f   : > { %v3584_v47 = vmax.f32 %v15507_v18, %v13583_v15  ;;  %v9759_v62 = vld [vmem:[#allocation3 + $0x190] sm:$0xf0]  ;;  %v7053_v16 = vrot.slane %v6435_v22, 3  ;;  %v6638_v2 = vrot.slane %v6436_v52, 1  ;;  %v6846_v11 = vrot.slane %v6436_v52, 2  ;;  %v10769_v18 = vld [vmem:[#allocation2 + $0x90] sm:$0xff]  }
 0x320   : > { %v13813_v20 = vor.u32 %v10145_v3, %v9759_v62  ;;  %v7054_v0 = vrot.slane %v6436_v52, 3  ;;  %v6640_v26 = vrot.slane %v6437_v14, 1  ;;  %v6848_v50 = vrot.slane %v6437_v14, 2  ;;  %v3681_v34 = vld [vmem:[#allocation2 + $0x8c] sm:$0x3]  ;;  %v13822_v61 = vpop.f32.mrf.mxu2 }
 0x321   : > { %v7056_v23 = vrot.slane %v6437_v14, 3  ;;  %v3776_v55 = vunpack.c.h.bf16 %v3679_v6  ;;  %v6639_v60 = vsel %vm2320_vm3, %v6637_v37, %v6638_v2  ;;  %v6847_v15 = vsel %vm2529_vm4, %v6845_v21, %v6846_v11  ;;  %v4159_v37 = vld [vmem:[#allocation2 + $0x9c] sm:$0xff]  }
 0x322   : > { %15508 = vst [vmem:[#allocation14_spill] sm:$0xff] %v13813_v20  ;;  %8375 = vmatmul.bf16.gmra.mxu3 %v13813_v20  ;;  %v7055_v57 = vsel %vm2738_vm5, %v7053_v16, %v7054_v0  ;;  %v7261_v7 = vrot.slane %v6435_v22, 4  ;;  %v6641_v30 = vsel %vm2320_vm3, %v6638_v2, %v6640_v26  ;;  %v6734_v9 = vmax.f32 %v6435_v22, %v6639_v60  ;;  %v3921_v20 = vld [vmem:[#allocation2 + $0x98] sm:$0x3] }
 0x323   : > { %v6849_v3 = vsel %vm2529_vm4, %v6846_v11, %v6848_v50  ;;  %v7262_v10 = vrot.slane %v6436_v52, 4  ;;  %v6735_v62 = vmax.f32 %v6436_v52, %v6641_v30  ;;  %v7057_v6 = vsel %vm2738_vm5, %v7054_v0, %v7056_v23  ;;  %v4161_v52 = vld [vmem:[#allocation2 + $0xa4] sm:$0x3]  ;;  %v15509_v26 = vld [vmem:[#allocation15_spill] sm:$0xff] }
 0x324   : > { %v7264_v25 = vrot.slane %v6437_v14, 4  ;;  %v3585_v40 = vmax.f32 %v3489_v8, %v3537_v28  ;;  %v6942_v38 = vmax.f32 %v6734_v9, %v6847_v15  ;;  %v3777_v21 = vunpack.c.l.bf16 %v3681_v34  ;;  %v15510_v9 = vld [vmem:[#allocation38_spill] sm:$0xff] }
 0x325   : > { %v3823_v1 = vmax.f32 %v3583_v12, %v3775_v39  ;;  %v3824_v16 = vmax.f32 %v3584_v47, %v3776_v55  ;;  %v6943_v44 = vmax.f32 %v6735_v62, %v6849_v3  ;;  %v7263_v22 = vsel %vm2947_vm6, %v7261_v7, %v7262_v10 }
 0x326   : > { %v13825_v2 = vunpack.c.l.bf16 %v10769_v18  ;;  %v13827_v11 = vunpack.c.h.bf16 %v10769_v18  ;;  %8587 = vmatmul.bf16.gmra.mxu2 %v15509_v26  ;;  %v7150_v14 = vmax.f32 %v6942_v38, %v7055_v57  ;;  %v3825_v8 = vmax.f32 %v3585_v40, %v3777_v21  ;;  %v13834_v38 = vpop.f32.mrf.mxu3 }
 0x327   : > { %v4017_v28 = vunpack.c.l.bf16 %v3921_v20  ;;  %v4255_v0 = vunpack.c.l.bf16 %v4159_v37  ;;  %v7151_v50 = vmax.f32 %v6943_v44, %v7057_v6  ;;  %v4256_v39 = vunpack.c.h.bf16 %v4159_v37 }
 0x328   : > { %v4063_v12 = vmax.f32 %v3823_v1, %v13825_v2  ;;  %v4064_v47 = vmax.f32 %v3824_v16, %v13827_v11  ;;  %v7265_v23 = vsel %vm2947_vm6, %v7262_v10, %v7264_v25  ;;  %v7358_v55 = vmax.f32 %v7150_v14, %v7263_v22 }
 0x329   : > { %v4065_v60 = vmax.f32 %v3825_v8, %v4017_v28  ;;  %v4257_v15 = vunpack.c.l.bf16 %v4161_v52  ;;  %v7359_v7 = vmax.f32 %v7151_v50, %v7265_v23  ;;  %v2386_v3 = vrot.slane %v15510_v9, 1 }
 0x32a   : > { %v4303_v34 = vmax.f32 %v4063_v12, %v4255_v0  ;;  %v4304_v30 = vmax.f32 %v4064_v47, %v4256_v39  ;;  %v7390_v40 = vpack.c.bf16 %v7358_v55, %v7358_v55  ;;  %v15511_v44 = vrot.slane %v13011_v41, 1  ;;  %v13846_v47 = vpop.f32.mrf.mxu2 }
 0x32b   : > { %v4305_v20 = vmax.f32 %v4065_v60, %v4257_v15  ;;  %v15512_v1 = vrot.slane %v13004_v36, 1  ;;  %v2595_v25 = vrot.slane %v15510_v9, 2  ;;  %v7391_v10 = vpack.c.bf16 %v7359_v7, %v7359_v7 }
 0x32c   : > { %v4513_v18 = vrot.slane %v4303_v34, 1  ;;  %v4514_v62 = vrot.slane %v4304_v30, 1  ;;  %v4721_v6 = vrot.slane %v4303_v34, 2  ;;  %7422 = vst [vmem:[#allocation3 + $0xac] sm:$0xf] %v7390_v40  ;;  %v4722_v21 = vrot.slane %v4304_v30, 2 }
 0x32d   : > { %v2390_v57 = vsel %vm2320_vm3, %v15512_v1, %v15511_v44  ;;  %v4516_v37 = vrot.slane %v4305_v20, 1  ;;  %v4724_v16 = vrot.slane %v4305_v20, 2  ;;  %v4929_v22 = vrot.slane %v4303_v34, 3  ;;  %7423 = vst [vmem:[#allocation3 + $0xbc] sm:$0xf] %v7391_v10 }
 0x32e   : > { %v4515_v52 = vsel %vm2320_vm3, %v4513_v18, %v4514_v62  ;;  %v4930_v26 = vrot.slane %v4304_v30, 3  ;;  %v4932_v14 = vrot.slane %v4305_v20, 3  ;;  %v5137_v8 = vrot.slane %v4303_v34, 4 }
 0x32f   : > { %v4517_v28 = vsel %vm2320_vm3, %v4514_v62, %v4516_v37  ;;  %v4598_v0 = vmax.f32 %v4303_v34, %v4515_v52  ;;  %v4723_v50 = vsel %vm2529_vm4, %v4721_v6, %v4722_v21  ;;  %v4725_v12 = vsel %vm2529_vm4, %v4722_v21, %v4724_v16  ;;  %v10185_v37 = vld [vmem:[#allocation9 + $0xc4] sm:$0xf]  ;;  %v9919_v21 = vld [vmem:[#allocation9 + $0xc8] sm:$0xf0] }
 0x330   : > { %v4599_v39 = vmax.f32 %v4304_v30, %v4517_v28  ;;  %v4931_v23 = vsel %vm2738_vm5, %v4929_v22, %v4930_v26  ;;  %v4933_v55 = vsel %vm2738_vm5, %v4930_v26, %v4932_v14  ;;  %v5138_v60 = vrot.slane %v4304_v30, 4 }
 0x331   : > { %v4806_v15 = vmax.f32 %v4598_v0, %v4723_v50  ;;  %v5140_v7 = vrot.slane %v4305_v20, 4  ;;  %v15513_v40 = vmov %v15512_v1  ;;  %v2460_v34 = vmax.f32 %v13004_v36, %v2390_v57 }
 0x332   : > { %v2388_v44 = vsel %vm2320_vm3, %v2386_v3, %v15513_v40  ;;  %v4807_v1 = vmax.f32 %v4599_v39, %v4725_v12  ;;  %v5139_v10 = vsel %vm2947_vm6, %v5137_v8, %v5138_v60  ;;  %v15514_v62 = vrot.slane %v13004_v36, 2 }
 0x333   : > { %v2459_v18 = vmax.f32 %v15510_v9, %v2388_v44  ;;  %v5014_v30 = vmax.f32 %v4806_v15, %v4931_v23  ;;  %v5141_v20 = vsel %vm2947_vm6, %v5138_v60, %v5140_v7  ;;  %v15515_v16 = vrot.slane %v13011_v41, 2  ;;  %v10118_v52 = vld [vmem:[#allocation3 + $0xac] sm:$0xf]  ;;  %v8341_v23 = vpop.f32.mrf.mxu3 }
 0x334   : > { %v2597_v6 = vsel %vm2529_vm4, %v2595_v25, %v15514_v62  ;;  %v15516_v3 = vmov %v15514_v62  ;;  %v2804_v22 = vrot.slane %v15510_v9, 3  ;;  %v5015_v26 = vmax.f32 %v4807_v1, %v4933_v55  ;;  %v9655_v25 = vld [vmem:[#allocation3 + $0xb8] sm:$0xf0]  ;;  %v15519_v44 = vld [vmem:[#allocation23_spill] sm:$0xff]  ;;  %v13877_v62 = vld [vmem:[#allocation2 + $0x84] sm:$0xff]  }
 0x335   : > { %v2599_v57 = vsel %vm2529_vm4, %v15516_v3, %v15515_v16  ;;  %v2668_v14 = vmax.f32 %v2459_v18, %v2597_v6  ;;  %v2805_v28 = vrot.slane %v13004_v36, 3  ;;  %v5222_v0 = vmax.f32 %v5014_v30, %v5139_v10  ;;  %v9983_v18 = vld [vmem:[#allocation9 + $0x148] sm:$0xf0]  ;;  %v5528_v16 = vld [vmem:[#allocation2 + $0x50] sm:$0x3] }
 0x336   : > { %v2669_v8 = vmax.f32 %v2460_v34, %v2599_v57  ;;  %v3013_v50 = vrot.slane %v15510_v9, 4  ;;  %v3014_v12 = vrot.slane %v13004_v36, 4  ;;  %v9922_v39 = vor.u32 %v10185_v37, %v9919_v21  ;;  %8592 = vmatmul.bf16.gmra.mxu2 %v15519_v44  ;;  %v10201_v36 = vld [vmem:[#allocation9 + $0x144] sm:$0xf] }
 0x337   : > { %v13869_v60 = vor.u32 %v10118_v52, %v9655_v25  ;;  %v5223_v15 = vmax.f32 %v5015_v26, %v5141_v20  ;;  %v2806_v7 = vsel %vm2738_vm5, %v2804_v22, %v2805_v28  ;;  %v15518_v40 = vrot.slane %v13011_v41, 3  ;;  %v5574_v52 = vld [vmem:[#allocation2 + $0x54] sm:$0xff]   ;;  %v5576_v26 = vld [vmem:[#allocation2 + $0x5c] sm:$0x3]  ;;  %v13904_v25 = vld [vmem:[#allocation2 + $0x84] sm:$0xff]  }
 0x338   : > { %v5254_v34 = vpack.c.bf16 %v5222_v0, %v5222_v0  ;;  %v2877_v1 = vmax.f32 %v2668_v14, %v2806_v7  ;;  %v3015_v9 = vsel %vm2947_vm6, %v3013_v50, %v3014_v12  ;;  %8666 = vmatpush.bf16.msra.mxu3 %v9922_v39  ;;  %v13881_v6 = vadd.f32 %v13757_v56, %v13224_v19  ;;  %v6056_v7 = vld [vmem:[#allocation2 + $0x74] sm:$0x3] }
 0x339   : > { %15517 = vst [vmem:[#allocation30_spill] sm:$0xff] %v13869_v60  ;;  %v2808_v55 = vsel %vm2738_vm5, %v2805_v28, %v15518_v40  ;;  %8518 = vmatmul.bf16.gmra.mxu1 %v13869_v60  ;;  %v5255_v37 = vpack.c.bf16 %v5223_v15, %v5223_v15  ;;  %v15520_v21 = vrot.slane %v13011_v41, 4  ;;  %v13888_v20 = vadd.f32 %v8341_v23, %v13777_v13  ;;  %v13902_v13 = vpop.f32.mrf.mxu2  ;;  %v5816_v28 = vld [vmem:[#allocation2 + $0x68] sm:$0x3]  ;;  %v13906_v23 = vld [vmem:[#allocation2 + $0x6c] sm:$0xff]   ;;  %v10812_v40 = vld [vmem:[#allocation2 + $0x78] sm:$0xff]  }
 0x33a   : > { %v2878_v10 = vmax.f32 %v2669_v8, %v2808_v55  ;;  %v13892_v3 = vadd.f32 %v13802_v46, %v13224_v19  ;;  %5286 = vst [vmem:[#allocation3 + $0x128] sm:$0xf] %v5254_v34  ;;  %v5377_v57 = vrot.slane %v5254_v34, 7  ;;  %v3086_v22 = vmax.f32 %v2877_v1, %v3015_v9 }
 0x33b   : > { %v3017_v30 = vsel %vm2947_vm6, %v3014_v12, %v15520_v21  ;;  %15521 = vst [vmem:[#allocation15_spill] sm:$0xff] %v13888_v20  ;;  %v13896_v14 = vadd.f32 %v13592_v42, %v13653_v53  ;;  %v13900_v41 = vadd.f32 %v13822_v61, %v13224_v19  ;;  %v5379_v8 = vrot.slane %v5255_v37, 7 }
 0x33c   : > { %v3087_v56 = vmax.f32 %v2878_v10, %v3017_v30  ;;  %5287 = vst [vmem:[#allocation3 + $0x138] sm:$0xf] %v5255_v37  ;;  %v9986_v46 = vor.u32 %v10201_v36, %v9983_v18  ;;  %v5378_v0 = vrot.slane %v5377_v57, 4  ;;  %v3118_v50 = vpack.c.bf16 %v3086_v22, %v3086_v22  ;;  %v6296_v10 = vld [vmem:[#allocation2 + $0x80] sm:$0x3] }
 0x33d   : > { %v5624_v39 = vunpack.c.l.bf16 %v5528_v16  ;;  %5487 = vst [vmem:[#allocation2 + $0x84] sm:$0xe] %v5377_v57  ;;  %v5381_v42 = vrot.slane %v5379_v8, 4  ;;  %v5670_v53 = vunpack.c.l.bf16 %v5574_v52  ;;  %v5671_v61 = vunpack.c.h.bf16 %v5574_v52  ;;  %v10217_v16 = vld [vmem:[#allocation9 + $0x1c4] sm:$0xf] }
 0x33e   : > { %v3119_v12 = vpack.c.bf16 %v3087_v56, %v3087_v56  ;;  %8755 = vmatpush.bf16.msra.mxu0 %v9986_v46  ;;  %v5672_v15 = vunpack.c.l.bf16 %v5576_v26  ;;  %v5380_v55 = vsel %vm11801_vm2, %v5378_v0, %v5379_v8  ;;  %3150 = vst [vmem:[#allocation3 + $0x1a4] sm:$0xf] %v3118_v50  ;;  %v3253_v44 = vrot.slane %v3118_v50, 7  ;;  %v10047_v57 = vld [vmem:[#allocation9 + $0x1c8] sm:$0xf0] }
 0x33f   : > { %v5912_v1 = vunpack.c.l.bf16 %v5816_v28  ;;  %v15522_v9 = vunpack.c.l.bf16 %v13750_v59  ;;  %v15523_v18 = vunpack.c.h.bf16 %v13750_v59  ;;  %v6150_v30 = vunpack.c.l.bf16 %v13906_v23  ;;  %v13916_v8 = vld [vmem:[#allocation2 + $0x8c] sm:$0x3]  ;;  %5488 = vst [vmem:[#allocation2 + $0x88] sm:$0xf] %v5380_v55 }
 0x340   : > { %v3255_v34 = vrot.slane %v3119_v12, 7  ;;  %3151 = vst [vmem:[#allocation3 + $0x1b4] sm:$0xf] %v3119_v12  ;;  %v5720_v21 = vmax.f32 %v5624_v39, %v5672_v15  ;;  %v3254_v22 = vrot.slane %v3253_v44, 4  ;;  %v6151_v52 = vunpack.c.h.bf16 %v13787_v63  ;;  %v13926_v15 = vld [vmem:[#allocation2 + $0x98] sm:$0x3] }
 0x341   : > { %v5718_v36 = vmax.f32 %v15522_v9, %v5670_v53  ;;  %v5719_v37 = vmax.f32 %v15523_v18, %v5671_v61  ;;  %3355 = vst [vmem:[#allocation2 + $0xb4] sm:$0xe] %v3253_v44  ;;  %v6152_v26 = vunpack.c.l.bf16 %v6056_v7  ;;  %v9717_v46 = vld [vmem:[#allocation3 + $0x128] sm:$0xf]  ;;  %v13920_v50 = vunpack.c.l.bf16 %v10812_v40  ;;  %v3922_v9 = vld [vmem:[#allocation2 + $0x9c] sm:$0xff]  }
 0x342   : > { %v3257_v56 = vrot.slane %v3255_v34, 4  ;;  %v5960_v59 = vmax.f32 %v5720_v21, %v5912_v1  ;;  %v3256_v39 = vsel %vm11801_vm2, %v3254_v22, %v3255_v34  ;;  %v13924_v53 = vunpack.c.h.bf16 %v10812_v40  ;;  %v3444_v1 = vld [vmem:[#allocation2 + $0x8c] sm:$0x3]  ;;  %v13932_v40 = vpop.f32.mrf.mxu2 }
 0x343   : > { %v5958_v28 = vmax.f32 %v5718_v36, %v13661_v32  ;;  %v5959_v0 = vmax.f32 %v5719_v37, %v13669_v58  ;;  %v10136_v12 = vld [vmem:[#allocation3 + $0x134] sm:$0xf0]  ;;  %v6392_v63 = vunpack.c.l.bf16 %v6296_v10  ;;  %v10050_v61 = vor.u32 %v10217_v16, %v10047_v57  ;;  %3356 = vst [vmem:[#allocation2 + $0xb8] sm:$0xf] %v3256_v39 }
 0x344   : > { %3357 = vst [vmem:[#allocation2 + $0xbc] sm:$0x1] %v3257_v56  ;;  %v13928_v7 = vor.u32 %v10136_v12, %v9717_v46  ;;  %v6200_v44 = vmax.f32 %v5960_v59, %v6152_v26  ;;  %v3492_v55 = vunpack.c.l.bf16 %v13763_v54  ;;  %v3538_v34 = vunpack.c.l.bf16 %v13904_v25 }
 0x345   : > { %v6198_v32 = vmax.f32 %v5958_v28, %v6150_v30  ;;  %v6199_v58 = vmax.f32 %v5959_v0, %v6151_v52  ;;  %8844 = vmatpush.bf16.msra.mxu1 %v10050_v61  ;;  %5489 = vst [vmem:[#allocation2 + $0x8c] sm:$0x1] %v5381_v42  ;;  %v10149_v10 = vld [vmem:[#allocation3 + $0x1a4] sm:$0xf]  ;;  %v3539_v21 = vunpack.c.h.bf16 %v13904_v25  ;;  %v3540_v16 = vunpack.c.l.bf16 %v3444_v1  ;;  %v15527_v28 = vld [vmem:[#allocation32_spill] sm:$0xff] }
 0x346   : > { %15524 = vst [vmem:[#allocation38_spill] sm:$0xff] %v13928_v7  ;;  %8449 = vmatmul.bf16.gmra.mxu0 %v13928_v7  ;;  %v6440_v37 = vmax.f32 %v6200_v44, %v6392_v63  ;;  %v15525_v57 = vunpack.c.l.bf16 %v13476_v35  ;;  %v3780_v22 = vunpack.c.l.bf16 %v13926_v15  ;;  %v4018_v42 = vunpack.c.l.bf16 %v3922_v9  ;;  %8597 = vmatmul.bf16.gmra.mxu2 %v15527_v28  ;;  %v13951_v28 = vld [vmem:[#allocation2 + $0xa8] sm:$0xff]  }
 0x347   : > { %v6438_v36 = vmax.f32 %v6198_v32, %v13920_v50  ;;  %v6439_v18 = vmax.f32 %v6199_v58, %v13924_v53  ;;  %v9775_v30 = vld [vmem:[#allocation3 + $0x1b0] sm:$0xf0] }
 0x348   : > { %v3586_v54 = vmax.f32 %v15525_v57, %v3538_v34  ;;  %v13941_v56 = vor.u32 %v10149_v10, %v9775_v30  ;;  %v6645_v46 = vrot.slane %v6440_v37, 1  ;;  %v6853_v12 = vrot.slane %v6440_v37, 2 }
 0x349   : > { %v6642_v52 = vrot.slane %v6438_v36, 1  ;;  %v6643_v26 = vrot.slane %v6439_v18, 1  ;;  %v6850_v0 = vrot.slane %v6438_v36, 2  ;;  %v6851_v59 = vrot.slane %v6439_v18, 2 }
 0x34a   : > { %15526 = vst [vmem:[#allocation23_spill] sm:$0xff] %v13941_v56  ;;  %v7058_v39 = vrot.slane %v6438_v36, 3  ;;  %8380 = vmatmul.bf16.gmra.mxu3 %v13941_v56  ;;  %v7059_v61 = vrot.slane %v6439_v18, 3  ;;  %v7061_v15 = vrot.slane %v6440_v37, 3  ;;  %v7266_v30 = vrot.slane %v6438_v36, 4 }
 0x34b   : > { %v6644_v25 = vsel %vm2320_vm3, %v6642_v52, %v6643_v26  ;;  %v6646_v63 = vsel %vm2320_vm3, %v6643_v26, %v6645_v46  ;;  %v6852_v44 = vsel %vm2529_vm4, %v6850_v0, %v6851_v59  ;;  %v6854_v1 = vsel %vm2529_vm4, %v6851_v59, %v6853_v12 }
 0x34c   : > { %v6736_v32 = vmax.f32 %v6438_v36, %v6644_v25  ;;  %v6737_v58 = vmax.f32 %v6439_v18, %v6646_v63  ;;  %v7060_v34 = vsel %vm2738_vm5, %v7058_v39, %v7059_v61  ;;  %v7062_v10 = vsel %vm2738_vm5, %v7059_v61, %v7061_v15  ;;  %v3924_v25 = vld [vmem:[#allocation2 + $0xa4] sm:$0x3]  ;;  %v4164_v61 = vld [vmem:[#allocation2 + $0xb0] sm:$0x3]  ;;  %v13959_v15 = vpop.f32.mrf.mxu2 }
 0x34d   : > { %v7267_v57 = vrot.slane %v6439_v18, 4  ;;  %v7269_v7 = vrot.slane %v6440_v37, 4  ;;  %v15528_v26 = vunpack.c.h.bf16 %v13476_v35  ;;  %v3588_v0 = vmax.f32 %v3492_v55, %v3540_v16 }
 0x34e   : > { %v6944_v60 = vmax.f32 %v6736_v32, %v6852_v44  ;;  %v6945_v52 = vmax.f32 %v6737_v58, %v6854_v1  ;;  %v3826_v59 = vmax.f32 %v3586_v54, %v13825_v2  ;;  %v4019_v12 = vunpack.c.h.bf16 %v3922_v9 }
 0x34f   : > { %v3587_v46 = vmax.f32 %v15528_v26, %v3539_v21  ;;  %v7268_v63 = vsel %vm2947_vm6, %v7266_v30, %v7267_v57  ;;  %v7270_v36 = vsel %vm2947_vm6, %v7267_v57, %v7269_v7  ;;  %v3828_v37 = vmax.f32 %v3588_v0, %v3780_v22  ;;  %v8405_v0 = vpop.f32.mrf.mxu0 }
 0x350   : > { %v7152_v39 = vmax.f32 %v6944_v60, %v7060_v34  ;;  %v7153_v56 = vmax.f32 %v6945_v52, %v7062_v10  ;;  %v4020_v32 = vunpack.c.l.bf16 %v3924_v25  ;;  %v4066_v35 = vmax.f32 %v3826_v59, %v4018_v42  ;;  %v15529_v34 = vld [vmem:[#allocation17_spill] sm:$0xff] }
 0x351   : > { %v3827_v18 = vmax.f32 %v3587_v46, %v13827_v11  ;;  %v15257_v21 = vunpack.c.l.bf16 %v13951_v28  ;;  %v15256_v16 = vunpack.c.h.bf16 %v13951_v28  ;;  %v13965_v60 = vadd.f32 %v13846_v47, %v13224_v19 }
 0x352   : > { %v7360_v58 = vmax.f32 %v7152_v39, %v7268_v63  ;;  %v7361_v44 = vmax.f32 %v7153_v56, %v7270_v36  ;;  %v4068_v7 = vmax.f32 %v3828_v37, %v4020_v32  ;;  %v4260_v9 = vunpack.c.l.bf16 %v4164_v61  ;;  %v13972_v56 = vpop.f32.mrf.mxu3 }
 0x353   : > { %v4067_v55 = vmax.f32 %v3827_v18, %v4019_v12  ;;  %v4306_v54 = vmax.f32 %v4066_v35, %v15257_v21  ;;  %v2391_v10 = vrot.slane %v15529_v34, 1  ;;  %v3447_v21 = vld [vmem:[#allocation2 + $0x98] sm:$0x3] }
 0x354   : > { %v7392_v1 = vpack.c.bf16 %v7360_v58, %v7360_v58  ;;  %v7393_v22 = vpack.c.bf16 %v7361_v44, %v7361_v44  ;;  %v4308_v30 = vmax.f32 %v4068_v7, %v4260_v9  ;;  %v15530_v7 = vld [vmem:[#allocation47_spill] sm:$0xff] }
 0x355   : > { %v4307_v42 = vmax.f32 %v4067_v55, %v15256_v16  ;;  %v4518_v57 = vrot.slane %v4306_v54, 1  ;;  %v4726_v52 = vrot.slane %v4306_v54, 2  ;;  %v4934_v26 = vrot.slane %v4306_v54, 3 }
 0x356   : > { %7424 = vst [vmem:[#allocation3 + $0xcc] sm:$0xf] %v7392_v1  ;;  %v5142_v63 = vrot.slane %v4306_v54, 4  ;;  %v4521_v59 = vrot.slane %v4308_v30, 1  ;;  %v4729_v12 = vrot.slane %v4308_v30, 2  ;;  %v4937_v39 = vrot.slane %v4308_v30, 3  ;;  %8602 = vmatmul.bf16.gmra.mxu2 %v15530_v7 }
 0x357   : > { %v4519_v47 = vrot.slane %v4307_v42, 1  ;;  %v4727_v46 = vrot.slane %v4307_v42, 2  ;;  %v4935_v25 = vrot.slane %v4307_v42, 3  ;;  %7425 = vst [vmem:[#allocation3 + $0xdc] sm:$0xf] %v7393_v22  ;;  %v5143_v36 = vrot.slane %v4307_v42, 4 }
 0x358   : > { %v5145_v32 = vrot.slane %v4308_v30, 4 }
 0x359   : > { %v4520_v18 = vsel %vm2320_vm3, %v4518_v57, %v4519_v47  ;;  %v4728_v61 = vsel %vm2529_vm4, %v4726_v52, %v4727_v46  ;;  %v4936_v37 = vsel %vm2738_vm5, %v4934_v26, %v4935_v25  ;;  %v4522_v35 = vsel %vm2320_vm3, %v4519_v47, %v4521_v59  ;;  %v13986_v26 = vpop.f32.mrf.mxu2 }
 0x35a   : > { %v4600_v58 = vmax.f32 %v4306_v54, %v4520_v18  ;;  %v4730_v44 = vsel %vm2529_vm4, %v4727_v46, %v4729_v12  ;;  %v4938_v55 = vsel %vm2738_vm5, %v4935_v25, %v4937_v39  ;;  %v4601_v9 = vmax.f32 %v4307_v42, %v4522_v35 }
 0x35b   : > { %v5144_v1 = vsel %vm2947_vm6, %v5142_v63, %v5143_v36  ;;  %v5146_v22 = vsel %vm2947_vm6, %v5143_v36, %v5145_v32  ;;  %v15531_v57 = vrot.slane %v12987_v17, 1  ;;  %v15532_v54 = vrot.slane %v13088_v48, 1 }
 0x35c   : > { %v4808_v30 = vmax.f32 %v4600_v58, %v4728_v61  ;;  %v2600_v42 = vrot.slane %v15529_v34, 2  ;;  %v4809_v63 = vmax.f32 %v4601_v9, %v4730_v44  ;;  %v2601_v12 = vrot.slane %v12987_v17, 2 }
 0x35d   : > { %v2393_v52 = vsel %vm2320_vm3, %v2391_v10, %v15531_v57  ;;  %v15533_v47 = vmov %v15531_v57  ;;  %v2809_v10 = vrot.slane %v15529_v34, 3  ;;  %v10122_v39 = vld [vmem:[#allocation3 + $0xcc] sm:$0xf]  ;;  %v2810_v18 = vrot.slane %v12987_v17, 3 }
 0x35e   : > { %v2395_v46 = vsel %vm2320_vm3, %v15533_v47, %v15532_v54  ;;  %v2461_v25 = vmax.f32 %v15529_v34, %v2393_v52  ;;  %v5016_v36 = vmax.f32 %v4808_v30, %v4936_v37  ;;  %v3018_v61 = vrot.slane %v15529_v34, 4  ;;  %v9671_v35 = vld [vmem:[#allocation3 + $0xd8] sm:$0xf0]  ;;  %v8346_v47 = vpop.f32.mrf.mxu3 }
 0x35f   : > { %v2462_v59 = vmax.f32 %v12987_v17, %v2395_v46  ;;  %v3019_v32 = vrot.slane %v12987_v17, 4  ;;  %v5017_v58 = vmax.f32 %v4809_v63, %v4938_v55  ;;  %v2602_v7 = vsel %vm2529_vm4, %v2600_v42, %v2601_v12  ;;  %v8407_v63 = vpop.f32.mrf.mxu0 }
 0x360   : > { %v15534_v44 = vrot.slane %v13088_v48, 2  ;;  %v3021_v57 = vrot.slane %v13088_v48, 4  ;;  %v14006_v52 = vor.u32 %v10122_v39, %v9671_v35  ;;  %v5224_v54 = vmax.f32 %v5016_v36, %v5144_v1  ;;  %v5529_v36 = vld [vmem:[#allocation2 + $0x54] sm:$0xff]  }
 0x361   : > { %v2670_v37 = vmax.f32 %v2461_v25, %v2602_v7  ;;  %v5225_v46 = vmax.f32 %v5017_v58, %v5146_v22  ;;  %v2811_v34 = vsel %vm2738_vm5, %v2809_v10, %v2810_v18  ;;  %v15536_v17 = vrot.slane %v13088_v48, 3  ;;  %v14015_v25 = vld [vmem:[#allocation2 + $0x60] sm:$0xff]  }
 0x362   : > { %v2604_v9 = vsel %vm2529_vm4, %v2601_v12, %v15534_v44  ;;  %15535 = vst [vmem:[#allocation32_spill] sm:$0xff] %v14006_v52  ;;  %v3020_v42 = vsel %vm2947_vm6, %v3018_v61, %v3019_v32  ;;  %8523 = vmatmul.bf16.gmra.mxu1 %v14006_v52  ;;  %v5256_v12 = vpack.c.bf16 %v5224_v54, %v5224_v54  ;;  %v5625_v54 = vunpack.c.l.bf16 %v5529_v36  ;;  %v3927_v52 = vld [vmem:[#allocation2 + $0xb0] sm:$0x3] }
 0x363   : > { %v2671_v30 = vmax.f32 %v2462_v59, %v2604_v9  ;;  %v2813_v55 = vsel %vm2738_vm5, %v2810_v18, %v15536_v17  ;;  %v2879_v44 = vmax.f32 %v2670_v37, %v2811_v34  ;;  %v3022_v1 = vsel %vm2947_vm6, %v3019_v32, %v3021_v57  ;;  %v5531_v18 = vld [vmem:[#allocation2 + $0x5c] sm:$0x3]  ;;  %v14036_v9 = vpop.f32.mrf.mxu2  ;;  %v14038_v37 = vld [vmem:[#allocation2 + $0x6c] sm:$0xff]   ;;  %v5819_v34 = vld [vmem:[#allocation2 + $0x74] sm:$0x3] }
 0x364   : > { %v14018_v22 = vadd.f32 %v8405_v0, %v13333_v43  ;;  %v14022_v48 = vadd.f32 %v13718_v27, %v13754_v29  ;;  %v5257_v59 = vpack.c.bf16 %v5225_v46, %v5225_v46  ;;  %v14025_v10 = vadd.f32 %v8346_v47, %v13892_v3  ;;  %5288 = vst [vmem:[#allocation3 + $0x148] sm:$0xf] %v5256_v12  ;;  %v5579_v43 = vld [vmem:[#allocation2 + $0x68] sm:$0x3]  ;;  %v6059_v17 = vld [vmem:[#allocation2 + $0x80] sm:$0x3] }
 0x365   : > { %v2880_v39 = vmax.f32 %v2671_v30, %v2813_v55  ;;  %v14029_v61 = vadd.f32 %v13902_v13, %v13224_v19  ;;  %v5382_v32 = vrot.slane %v5256_v12, 7  ;;  %v3088_v35 = vmax.f32 %v2879_v44, %v3020_v42  ;;  %v6297_v44 = vld [vmem:[#allocation2 + $0x84] sm:$0xff]  }
 0x366   : > { %15537 = vst [vmem:[#allocation17_spill] sm:$0xff] %v14025_v10  ;;  %v14032_v0 = vadd.f32 %v8407_v63, %v13767_v24  ;;  %v5384_v27 = vrot.slane %v5257_v59, 7  ;;  %v15259_v29 = vunpack.c.l.bf16 %v14015_v25  ;;  %v15258_v3 = vunpack.c.h.bf16 %v14015_v25 }
 0x367   : > { %v3089_v58 = vmax.f32 %v2880_v39, %v3022_v1  ;;  %5289 = vst [vmem:[#allocation3 + $0x158] sm:$0xf] %v5257_v59  ;;  %v5383_v7 = vrot.slane %v5382_v32, 4  ;;  %v3120_v57 = vpack.c.bf16 %v3088_v35, %v3088_v35  ;;  %v5626_v47 = vunpack.c.h.bf16 %v5529_v36 }
 0x368   : > { %5490 = vst [vmem:[#allocation2 + $0x90] sm:$0xe] %v5382_v32  ;;  %v5386_v30 = vrot.slane %v5384_v27, 4  ;;  %v5627_v46 = vunpack.c.l.bf16 %v5531_v18  ;;  %v5675_v24 = vunpack.c.l.bf16 %v5579_v43  ;;  %v5721_v12 = vmax.f32 %v5625_v54, %v15259_v29  ;;  %v6299_v18 = vld [vmem:[#allocation2 + $0x8c] sm:$0x3] }
 0x369   : > { %v3121_v13 = vpack.c.bf16 %v3089_v58, %v3089_v58  ;;  %v5385_v55 = vsel %vm11801_vm2, %v5383_v7, %v5384_v27  ;;  %3152 = vst [vmem:[#allocation3 + $0x1c4] sm:$0xf] %v3120_v57  ;;  %v3258_v42 = vrot.slane %v3120_v57, 7  ;;  %v5722_v39 = vmax.f32 %v5626_v47, %v15258_v3  ;;  %v15538_v27 = vld [vmem:[#allocation26_spill] sm:$0xff] }
 0x36a   : > { %v5723_v1 = vmax.f32 %v5627_v46, %v5675_v24  ;;  %v5913_v59 = vunpack.c.l.bf16 %v14038_v37  ;;  %v5914_v36 = vunpack.c.h.bf16 %v13906_v23  ;;  %v5915_v58 = vunpack.c.l.bf16 %v5819_v34  ;;  %8607 = vmatmul.bf16.gmra.mxu2 %v15538_v27  ;;  %5491 = vst [vmem:[#allocation2 + $0x94] sm:$0xf] %v5385_v55  ;;  %v3685_v34 = vld [vmem:[#allocation2 + $0x9c] sm:$0xff]  }
 0x36b   : > { %v3260_v63 = vrot.slane %v3121_v13, 7  ;;  %3153 = vst [vmem:[#allocation3 + $0x1d4] sm:$0xf] %v3121_v13  ;;  %v3259_v32 = vrot.slane %v3258_v42, 4  ;;  %v6155_v43 = vunpack.c.l.bf16 %v6059_v17  ;;  %v9733_v7 = vld [vmem:[#allocation3 + $0x148] sm:$0xf]  ;;  %v6393_v13 = vunpack.c.l.bf16 %v6297_v44 }
 0x36c   : > { %3358 = vst [vmem:[#allocation2 + $0xc0] sm:$0xe] %v3258_v42  ;;  %v5961_v57 = vmax.f32 %v5721_v12, %v5913_v59  ;;  %v5962_v54 = vmax.f32 %v5722_v39, %v5914_v36  ;;  %v6394_v16 = vunpack.c.h.bf16 %v6297_v44  ;;  %v5963_v23 = vmax.f32 %v5723_v1, %v5915_v58  ;;  %v14052_v17 = vld [vmem:[#allocation2 + $0x98] sm:$0x3]  ;;  %v3687_v39 = vld [vmem:[#allocation2 + $0xa4] sm:$0x3] }
 0x36d   : > { %v3262_v35 = vrot.slane %v3260_v63, 4  ;;  %v3261_v46 = vsel %vm11801_vm2, %v3259_v32, %v3260_v63  ;;  %v6395_v24 = vunpack.c.l.bf16 %v6299_v18  ;;  %v3493_v42 = vunpack.c.l.bf16 %v13877_v62  ;;  %5492 = vst [vmem:[#allocation2 + $0x98] sm:$0x1] %v5386_v30 }
 0x36e   : > { %v10140_v47 = vld [vmem:[#allocation3 + $0x154] sm:$0xf0]  ;;  %3359 = vst [vmem:[#allocation2 + $0xc4] sm:$0xf] %v3261_v46  ;;  %v6201_v12 = vmax.f32 %v5961_v57, %v13920_v50  ;;  %v6202_v44 = vmax.f32 %v5962_v54, %v13924_v53  ;;  %v3494_v55 = vunpack.c.h.bf16 %v13877_v62  ;;  %v6203_v59 = vmax.f32 %v5963_v23, %v6155_v43  ;;  %v14063_v54 = vpop.f32.mrf.mxu2 }
 0x36f   : > { %3360 = vst [vmem:[#allocation2 + $0xc8] sm:$0x1] %v3262_v35  ;;  %v14054_v27 = vor.u32 %v10140_v47, %v9733_v7  ;;  %v3495_v63 = vunpack.c.l.bf16 %v13916_v8  ;;  %v3543_v1 = vunpack.c.l.bf16 %v3447_v21  ;;  %v3589_v36 = vmax.f32 %v3493_v42, %v13825_v2 }
 0x370   : > { %v10153_v18 = vld [vmem:[#allocation3 + $0x1c4] sm:$0xf]  ;;  %v6441_v32 = vmax.f32 %v6201_v12, %v6393_v13  ;;  %v6442_v35 = vmax.f32 %v6202_v44, %v6394_v16  ;;  %v3590_v58 = vmax.f32 %v3494_v55, %v13827_v11  ;;  %v3781_v7 = vunpack.c.l.bf16 %v3685_v34 }
 0x371   : > { %15539 = vst [vmem:[#allocation47_spill] sm:$0xff] %v14054_v27  ;;  %8454 = vmatmul.bf16.gmra.mxu0 %v14054_v27  ;;  %v6443_v62 = vmax.f32 %v6203_v59, %v6395_v24  ;;  %v3591_v47 = vmax.f32 %v3495_v63, %v3543_v1  ;;  %v3782_v43 = vunpack.c.h.bf16 %v3685_v34  ;;  %v3783_v46 = vunpack.c.l.bf16 %v3687_v39  ;;  %v8410_v24 = vpop.f32.mrf.mxu0  ;;  %v10770_v63 = vld [vmem:[#allocation2 + $0xa8] sm:$0xff]   ;;  %v14072_v1 = vpop.f32.mrf.mxu3 }
 0x372   : > { %v9791_v57 = vld [vmem:[#allocation3 + $0x1d0] sm:$0xf0]  ;;  %v6647_v21 = vrot.slane %v6441_v32, 1  ;;  %v6648_v2 = vrot.slane %v6442_v35, 1  ;;  %v6855_v30 = vrot.slane %v6441_v32, 2  ;;  %v6856_v42 = vrot.slane %v6442_v35, 2 }
 0x373   : > { %v14065_v8 = vor.u32 %v10153_v18, %v9791_v57  ;;  %v6650_v23 = vrot.slane %v6443_v62, 1  ;;  %v6858_v3 = vrot.slane %v6443_v62, 2  ;;  %v7063_v13 = vrot.slane %v6441_v32, 3 }
 0x374   : > { %v6649_v11 = vsel %vm2320_vm3, %v6647_v21, %v6648_v2  ;;  %v7064_v16 = vrot.slane %v6442_v35, 3  ;;  %v7066_v12 = vrot.slane %v6443_v62, 3  ;;  %v7271_v44 = vrot.slane %v6441_v32, 4 }
 0x375   : > { %15540 = vst [vmem:[#allocation26_spill] sm:$0xff] %v14065_v8  ;;  %8385 = vmatmul.bf16.gmra.mxu3 %v14065_v8  ;;  %v6651_v34 = vsel %vm2320_vm3, %v6648_v2, %v6650_v23  ;;  %v6738_v55 = vmax.f32 %v6441_v32, %v6649_v11  ;;  %v6857_v39 = vsel %vm2529_vm4, %v6855_v30, %v6856_v42  ;;  %v7272_v21 = vrot.slane %v6442_v35, 4  ;;  %v4165_v2 = vld [vmem:[#allocation2 + $0xb4] sm:$0xff]  }
 0x376   : > { %v6859_v59 = vsel %vm2529_vm4, %v6856_v42, %v6858_v3  ;;  %v6739_v18 = vmax.f32 %v6442_v35, %v6651_v34  ;;  %v7065_v57 = vsel %vm2738_vm5, %v7063_v13, %v7064_v16  ;;  %v7067_v29 = vsel %vm2738_vm5, %v7064_v16, %v7066_v12  ;;  %v4167_v42 = vld [vmem:[#allocation2 + $0xbc] sm:$0x3] }
 0x377   : > { %v6946_v27 = vmax.f32 %v6738_v55, %v6857_v39  ;;  %v7274_v8 = vrot.slane %v6443_v62, 4  ;;  %v3829_v10 = vmax.f32 %v3589_v36, %v3781_v7  ;;  %v3830_v20 = vmax.f32 %v3590_v58, %v3782_v43  ;;  %v10183_v58 = vld [vmem:[#allocation9 + $0xb4] sm:$0xf]  ;;  %v9911_v7 = vld [vmem:[#allocation9 + $0xb8] sm:$0xf0]  ;;  %v14084_v55 = vpop.f32.mrf.mxu2 }
 0x378   : > { %v6947_v32 = vmax.f32 %v6739_v18, %v6859_v59  ;;  %v7273_v30 = vsel %vm2947_vm6, %v7271_v44, %v7272_v21  ;;  %v3831_v23 = vmax.f32 %v3591_v47, %v3783_v46  ;;  %v14077_v3 = vunpack.c.l.bf16 %v10770_v63 }
 0x379   : > { %v7154_v11 = vmax.f32 %v6946_v27, %v7065_v57  ;;  %v7275_v34 = vsel %vm2947_vm6, %v7272_v21, %v7274_v8  ;;  %v14080_v13 = vunpack.c.h.bf16 %v10770_v63  ;;  %v4023_v16 = vunpack.c.l.bf16 %v3927_v52  ;;  %v15541_v27 = vld [vmem:[#allocation24_spill] sm:$0xff] }
 0x37a   : > { %v7155_v35 = vmax.f32 %v6947_v32, %v7067_v29  ;;  %v4069_v12 = vmax.f32 %v3829_v10, %v14077_v3  ;;  %v4261_v62 = vunpack.c.l.bf16 %v4165_v2  ;;  %v4262_v36 = vunpack.c.h.bf16 %v4165_v2  ;;  %8612 = vmatmul.bf16.gmra.mxu2 %v15541_v27  ;;  %v10157_v32 = vld [vmem:[#allocation3 + $0x1e4] sm:$0xf]  ;;  %v10199_v27 = vld [vmem:[#allocation9 + $0x134] sm:$0xf] }
 0x37b   : > { %v7362_v43 = vmax.f32 %v7154_v11, %v7273_v30  ;;  %v4070_v44 = vmax.f32 %v3830_v20, %v14080_v13  ;;  %v4071_v47 = vmax.f32 %v3831_v23, %v4023_v16  ;;  %v4263_v46 = vunpack.c.l.bf16 %v4167_v42  ;;  %v9807_v30 = vld [vmem:[#allocation3 + $0x1f0] sm:$0xf0]  ;;  %v8351_v16 = vpop.f32.mrf.mxu3 }
 0x37c   : > { %v14089_v8 = vadd.f32 %v13932_v40, %v13224_v19  ;;  %v14092_v52 = vadd.f32 %v8410_v24, %v13428_v4  ;;  %v7363_v10 = vmax.f32 %v7155_v35, %v7275_v34  ;;  %v4309_v29 = vmax.f32 %v4069_v12, %v4261_v62  ;;  %v8412_v40 = vpop.f32.mrf.mxu0 }
 0x37d   : > { %v7394_v39 = vpack.c.bf16 %v7362_v43, %v7362_v43  ;;  %v4310_v59 = vmax.f32 %v4070_v44, %v4262_v36  ;;  %v4311_v63 = vmax.f32 %v4071_v47, %v4263_v46  ;;  %v9914_v18 = vor.u32 %v10183_v58, %v9911_v7  ;;  %v10181_v58 = vld [vmem:[#allocation9 + $0xa4] sm:$0xf]  ;;  %v9903_v7 = vld [vmem:[#allocation9 + $0xa8] sm:$0xf0]  ;;  %v8494_v46 = vpop.f32.mrf.mxu1 }
 0x37e   : > { %v14096_v20 = vadd.f32 %v13834_v38, %v13773_v51  ;;  %v7395_v57 = vpack.c.bf16 %v7363_v10, %v7363_v10  ;;  %v4523_v21 = vrot.slane %v4309_v29, 1  ;;  %v4731_v2 = vrot.slane %v4309_v29, 2  ;;  %v9975_v10 = vld [vmem:[#allocation9 + $0x138] sm:$0xf0] }
 0x37f   : > { %7426 = vst [vmem:[#allocation3 + $0xec] sm:$0xf] %v7394_v39  ;;  %v4524_v23 = vrot.slane %v4310_v59, 1  ;;  %v4526_v4 = vrot.slane %v4311_v63, 1  ;;  %v4732_v24 = vrot.slane %v4310_v59, 2  ;;  %v4734_v42 = vrot.slane %v4311_v63, 2  ;;  %8667 = vmatpush.bf16.msra.mxu3 %v9914_v18 }
 0x380   : > { %15542 = vst [vmem:[#allocation24_spill] sm:$0xff] %v14096_v20  ;;  %v14100_v11 = vadd.f32 %v13959_v15, %v13224_v19  ;;  %v4939_v34 = vrot.slane %v4309_v29, 3  ;;  %v4940_v51 = vrot.slane %v4310_v59, 3  ;;  %v4942_v38 = vrot.slane %v4311_v63, 3 }
 0x381   : > { %7427 = vst [vmem:[#allocation3 + $0xfc] sm:$0xf] %v7395_v57  ;;  %v4525_v35 = vsel %vm2320_vm3, %v4523_v21, %v4524_v23  ;;  %v4527_v12 = vsel %vm2320_vm3, %v4524_v23, %v4526_v4  ;;  %v5147_v62 = vrot.slane %v4309_v29, 4  ;;  %v5148_v36 = vrot.slane %v4310_v59, 4  ;;  %v10179_v23 = vld [vmem:[#allocation9 + $0x94] sm:$0xf] }
 0x382   : > { %v14105_v43 = vadd.f32 %v8412_v40, %v13800_v5  ;;  %v4602_v44 = vmax.f32 %v4309_v29, %v4525_v35  ;;  %v4603_v47 = vmax.f32 %v4310_v59, %v4527_v12  ;;  %v14107_v15 = vor.u32 %v10157_v32, %v9807_v30  ;;  %v9895_v4 = vld [vmem:[#allocation9 + $0x98] sm:$0xf0]  ;;  %v5534_v32 = vld [vmem:[#allocation2 + $0x68] sm:$0x3] }
 0x383   : > { %v4733_v39 = vsel %vm2529_vm4, %v4731_v2, %v4732_v24  ;;  %v4735_v18 = vsel %vm2529_vm4, %v4732_v24, %v4734_v42  ;;  %v5150_v57 = vrot.slane %v4311_v63, 4  ;;  %v14112_v21 = vadd.f32 %v8351_v16, %v13965_v60  ;;  %v14116_v30 = vld [vmem:[#allocation2 + $0x6c] sm:$0xff]   ;;  %v5582_v24 = vld [vmem:[#allocation2 + $0x74] sm:$0x3] }
 0x384   : > { %15543 = vst [vmem:[#allocation66_spill] sm:$0xff] %v14107_v15  ;;  %v4810_v20 = vmax.f32 %v4602_v44, %v4733_v39  ;;  %v4811_v5 = vmax.f32 %v4603_v47, %v4735_v18  ;;  %v4941_v29 = vsel %vm2738_vm5, %v4939_v34, %v4940_v51  ;;  %v9906_v59 = vor.u32 %v10181_v58, %v9903_v7  ;;  %v5822_v58 = vld [vmem:[#allocation2 + $0x80] sm:$0x3] }
 0x385   : > { %15544 = vst [vmem:[#allocation67_spill] sm:$0xff] %v14112_v21  ;;  %8390 = vmatmul.bf16.gmra.mxu3 %v14107_v15  ;;  %v4943_v2 = vsel %vm2738_vm5, %v4940_v51, %v4942_v38  ;;  %v5149_v40 = vsel %vm2947_vm6, %v5147_v62, %v5148_v36  ;;  %v14121_v63 = vadd.f32 %v8494_v46, %v14018_v22  ;;  %v5630_v51 = vunpack.c.l.bf16 %v5534_v32  ;;  %v6060_v62 = vld [vmem:[#allocation2 + $0x84] sm:$0xff]   ;;  %v10813_v32 = vld [vmem:[#allocation2 + $0x90] sm:$0xff]  }
 0x386   : > { %v9978_v60 = vor.u32 %v10199_v27, %v9975_v10  ;;  %v10126_v42 = vld [vmem:[#allocation3 + $0xec] sm:$0xf]  ;;  %v5018_v16 = vmax.f32 %v4810_v20, %v4941_v29  ;;  %v5019_v35 = vmax.f32 %v4811_v5, %v4943_v2  ;;  %v5151_v34 = vsel %vm2947_vm6, %v5148_v36, %v5150_v57  ;;  %8668 = vmatpush.bf16.msra.mxu3 %v9906_v59 }
 0x387   : > { %v9898_v12 = vor.u32 %v10179_v23, %v9895_v4  ;;  %v8930_v44 = vsub.f32 0.0, %v14121_v63  ;;  %v5676_v38 = vunpack.c.l.bf16 %v14116_v30  ;;  %v5677_v22 = vunpack.c.h.bf16 %v14038_v37  ;;  %v6062_v4 = vld [vmem:[#allocation2 + $0x8c] sm:$0x3] }
 0x388   : > { %v9687_v7 = vld [vmem:[#allocation3 + $0xf8] sm:$0xf0]  ;;  %8756 = vmatpush.bf16.msra.mxu0 %v9978_v60  ;;  %v5226_v46 = vmax.f32 %v5018_v16, %v5149_v40  ;;  %v5227_v20 = vmax.f32 %v5019_v35, %v5151_v34  ;;  %v5678_v27 = vunpack.c.l.bf16 %v5582_v24  ;;  %v15546_v36 = vunpack.c.l.bf16 %v14015_v25  ;;  %v6302_v24 = vld [vmem:[#allocation2 + $0x98] sm:$0x3] }
 0x389   : > { %v14127_v47 = vor.u32 %v10126_v42, %v9687_v7  ;;  %v8994_v10 = vmul.f32 1.442695, %v8930_v44  ;;  %v15547_v18 = vunpack.c.h.bf16 %v14015_v25  ;;  %v5918_v23 = vunpack.c.l.bf16 %v5822_v58  ;;  %v10215_v42 = vld [vmem:[#allocation9 + $0x1b4] sm:$0xf]  ;;  %v10039_v58 = vld [vmem:[#allocation9 + $0x1b8] sm:$0xf0] }
 0x38a   : > { %v5724_v39 = vmax.f32 %v15546_v36, %v5676_v38  ;;  %v5258_v5 = vpack.c.bf16 %v5226_v46, %v5226_v46  ;;  %v5259_v29 = vpack.c.bf16 %v5227_v20, %v5227_v20  ;;  %8669 = vmatpush.bf16.msra.mxu3 %v9898_v12  ;;  %v5726_v37 = vmax.f32 %v5630_v51, %v5678_v27  ;;  %v14136_v7 = vld [vmem:[#allocation2 + $0x9c] sm:$0xff]   ;;  %v14142_v20 = vld [vmem:[#allocation2 + $0xa4] sm:$0x3]  ;;  %v14144_v27 = vpop.f32.mrf.mxu2 }
 0x38b   : > { %15545 = vst [vmem:[#allocation68_spill] sm:$0xff] %v14127_v47  ;;  %v5725_v57 = vmax.f32 %v15547_v18, %v5677_v22  ;;  %8528 = vmatmul.bf16.gmra.mxu1 %v14127_v47  ;;  %v6156_v59 = vunpack.c.l.bf16 %v6060_v62  ;;  %11038 = vpow2.f32 %v8994_v10  ;;  %v6157_v60 = vunpack.c.h.bf16 %v6060_v62  ;;  %v3450_v18 = vld [vmem:[#allocation2 + $0xa4] sm:$0x3] }
 0x38c   : > { %v5964_v2 = vmax.f32 %v5724_v39, %v13920_v50  ;;  %5290 = vst [vmem:[#allocation3 + $0x168] sm:$0xf] %v5258_v5  ;;  %v5387_v25 = vrot.slane %v5258_v5, 7  ;;  %v5389_v16 = vrot.slane %v5259_v29, 7  ;;  %v5966_v35 = vmax.f32 %v5726_v37, %v5918_v23  ;;  %v3448_v50 = vld [vmem:[#allocation2 + $0x9c] sm:$0xff]  }
 0x38d   : > { %v5965_v40 = vmax.f32 %v5725_v57, %v13924_v53  ;;  %v6158_v34 = vunpack.c.l.bf16 %v6062_v4  ;;  %5291 = vst [vmem:[#allocation3 + $0x178] sm:$0xf] %v5259_v29  ;;  %v14138_v51 = vunpack.c.l.bf16 %v10813_v32  ;;  %v14140_v38 = vunpack.c.h.bf16 %v10813_v32 }
 0x38e   : > { %v6204_v12 = vmax.f32 %v5964_v2, %v6156_v59  ;;  %v5388_v53 = vrot.slane %v5387_v25, 4  ;;  %v5391_v22 = vrot.slane %v5389_v16, 4  ;;  %v6398_v46 = vunpack.c.l.bf16 %v6302_v24  ;;  %5493 = vst [vmem:[#allocation2 + $0x9c] sm:$0xe] %v5387_v25 }
 0x38f   : > { %v6205_v44 = vmax.f32 %v5965_v40, %v6157_v60  ;;  %v6206_v62 = vmax.f32 %v5966_v35, %v6158_v34  ;;  %v10042_v39 = vor.u32 %v10215_v42, %v10039_v58  ;;  %v3498_v4 = vunpack.c.l.bf16 %v14052_v17  ;;  %v14151_v40 = vpop.f32.mrf.mxu3 }
 0x390   : > { %v6444_v10 = vmax.f32 %v6204_v12, %v14138_v51  ;;  %v5390_v57 = vsel %vm11801_vm2, %v5388_v53, %v5389_v16  ;;  %5495 = vst [vmem:[#allocation2 + $0xa4] sm:$0x1] %v5391_v22  ;;  %v3544_v15 = vunpack.c.l.bf16 %v3448_v50 }
 0x391   : > { %v6445_v36 = vmax.f32 %v6205_v44, %v14140_v38  ;;  %v6446_v23 = vmax.f32 %v6206_v62, %v6398_v46  ;;  %v11039_v5 = vpop.eup %11038  ;;  %8845 = vmatpush.bf16.msra.mxu1 %v10042_v39  ;;  %5494 = vst [vmem:[#allocation2 + $0xa0] sm:$0xf] %v5390_v57  ;;  %v3690_v57 = vld [vmem:[#allocation2 + $0xb0] sm:$0x3] }
 0x392   : > { %v6652_v29 = vrot.slane %v6444_v10, 1  ;;  %v6860_v59 = vrot.slane %v6444_v10, 2  ;;  %v9122_v2 = vadd.f32 1.0, %v11039_v5  ;;  %v7068_v42 = vrot.slane %v6444_v10, 3 }
 0x393   : > { %v6653_v37 = vrot.slane %v6445_v36, 1  ;;  %v6861_v32 = vrot.slane %v6445_v36, 2  ;;  %v6655_v60 = vrot.slane %v6446_v23, 1  ;;  %v6863_v24 = vrot.slane %v6446_v23, 2  ;;  %v9749_v25 = vld [vmem:[#allocation3 + $0x168] sm:$0xf] }
 0x394   : > { %v7069_v17 = vrot.slane %v6445_v36, 3  ;;  %v7071_v34 = vrot.slane %v6446_v23, 3  ;;  %v10144_v58 = vld [vmem:[#allocation3 + $0x174] sm:$0xf0]  ;;  %11040 = vrcp.f32 %v9122_v2  ;;  %v7279_v47 = vrot.slane %v6446_v23, 4 }
 0x395   : > { %v6654_v16 = vsel %vm2320_vm3, %v6652_v29, %v6653_v37  ;;  %v6862_v35 = vsel %vm2529_vm4, %v6860_v59, %v6861_v32  ;;  %v6656_v12 = vsel %vm2320_vm3, %v6653_v37, %v6655_v60  ;;  %v6864_v53 = vsel %vm2529_vm4, %v6861_v32, %v6863_v24  ;;  %v3930_v32 = vld [vmem:[#allocation2 + $0xbc] sm:$0x3] }
 0x396   : > { %v6740_v44 = vmax.f32 %v6444_v10, %v6654_v16  ;;  %v14157_v22 = vor.u32 %v10144_v58, %v9749_v25  ;;  %v6741_v62 = vmax.f32 %v6445_v36, %v6656_v12  ;;  %v7070_v46 = vsel %vm2738_vm5, %v7068_v42, %v7069_v17  ;;  %v3928_v16 = vld [vmem:[#allocation2 + $0xb4] sm:$0xff]   ;;  %v10778_v12 = vld [vmem:[#allocation2 + $0xc0] sm:$0xff]  }
 0x397   : > { %v7072_v39 = vsel %vm2738_vm5, %v7069_v17, %v7071_v34  ;;  %v7276_v29 = vrot.slane %v6444_v10, 4  ;;  %v7277_v59 = vrot.slane %v6445_v36, 4  ;;  %v3545_v37 = vunpack.c.h.bf16 %v3448_v50  ;;  %v8496_v50 = vpop.f32.mrf.mxu1 }
 0x398   : > { %15548 = vst [vmem:[#allocation69_spill] sm:$0xff] %v14157_v22  ;;  %v6948_v5 = vmax.f32 %v6740_v44, %v6862_v35  ;;  %8459 = vmatmul.bf16.gmra.mxu0 %v14157_v22  ;;  %v6949_v2 = vmax.f32 %v6741_v62, %v6864_v53  ;;  %v3546_v60 = vunpack.c.l.bf16 %v3450_v18  ;;  %v3786_v58 = vunpack.c.l.bf16 %v3690_v57  ;;  %v14168_v44 = vpop.f32.mrf.mxu2  ;;  %v15551_v18 = vld [vmem:[#allocation25_spill] sm:$0xff] }
 0x399   : > { %v7278_v25 = vsel %vm2947_vm6, %v7276_v29, %v7277_v59  ;;  %v7280_v42 = vsel %vm2947_vm6, %v7277_v59, %v7279_v47  ;;  %v15549_v35 = vunpack.c.l.bf16 %v13697_v49  ;;  %v15550_v36 = vunpack.c.h.bf16 %v13697_v49  ;;  %8617 = vmatmul.bf16.gmra.mxu2 %v15551_v18  ;;  %v10177_v29 = vld [vmem:[#allocation9 + $0x84] sm:$0xf]  ;;  %v9887_v59 = vld [vmem:[#allocation9 + $0x88] sm:$0xf0] }
 0x39a   : > { %v7156_v24 = vmax.f32 %v6948_v5, %v7070_v46  ;;  %v7157_v17 = vmax.f32 %v6949_v2, %v7072_v39  ;;  %v3594_v34 = vmax.f32 %v3498_v4, %v3546_v60  ;;  %v11041_v53 = vpop.eup %11040  ;;  %v4024_v46 = vunpack.c.l.bf16 %v3928_v16  ;;  %v4170_v39 = vld [vmem:[#allocation2 + $0xc8] sm:$0x3]  ;;  %v8415_v2 = vpop.f32.mrf.mxu0 }
 0x39b   : > { %v3592_v10 = vmax.f32 %v15549_v35, %v3544_v15  ;;  %v3593_v23 = vmax.f32 %v15550_v36, %v3545_v37  ;;  %v4025_v47 = vunpack.c.h.bf16 %v3928_v16  ;;  %v4026_v57 = vunpack.c.l.bf16 %v3930_v32 }
 0x39c   : > { %v7364_v62 = vmax.f32 %v7156_v24, %v7278_v25  ;;  %v9250_v5 = vmul.f32 %v11041_v53, %v14121_v63  ;;  %v7365_v15 = vmax.f32 %v7157_v17, %v7280_v42  ;;  %v3834_v60 = vmax.f32 %v3594_v34, %v3786_v58  ;;  %v8356_v25 = vpop.f32.mrf.mxu3 }
 0x39d   : > { %v3832_v49 = vmax.f32 %v3592_v10, %v14077_v3  ;;  %v3833_v4 = vmax.f32 %v3593_v23, %v14080_v13  ;;  %v14174_v35 = vunpack.c.l.bf16 %v10778_v12  ;;  %v14176_v24 = vunpack.c.h.bf16 %v10778_v12 }
 0x39e   : > { %v7396_v37 = vpack.c.bf16 %v7364_v62, %v7364_v62  ;;  %9314 = vst [vmem:[%s14180_s7] sm:$0xff] %v9250_v5  ;;  %v7397_v63 = vpack.c.bf16 %v7365_v15, %v7365_v15  ;;  %v4266_v42 = vunpack.c.l.bf16 %v4170_v39  ;;  %v14185_v17 = vadd.f32 %v13986_v26, %v13224_v19 }
 0x39f   : > { %v4072_v16 = vmax.f32 %v3832_v49, %v4024_v46  ;;  %v4073_v32 = vmax.f32 %v3833_v4, %v4025_v47  ;;  %v4074_v58 = vmax.f32 %v3834_v60, %v4026_v57  ;;  %v9890_v10 = vor.u32 %v10177_v29, %v9887_v59  ;;  %v8499_v4 = vpop.f32.mrf.mxu1 }
 0x3a0   : > { %7428 = vst [vmem:[#allocation3 + $0x10c] sm:$0xf] %v7396_v37  ;;  %v14188_v36 = vadd.f32 %v8496_v50, %v14032_v0  ;;  %v14191_v23 = vadd.f32 %v8415_v2, %v13537_v45  ;;  %v14196_v18 = vadd.f32 %v8356_v25, %v14089_v8  ;;  %v14200_v26 = vadd.f32 %v13972_v56, %v13881_v6  ;;  %v14207_v50 = vld [vmem:[#allocation2 + $0x78] sm:$0xff]  }
 0x3a1   : > { %7429 = vst [vmem:[#allocation3 + $0x11c] sm:$0xf] %v7397_v63  ;;  %v4312_v34 = vmax.f32 %v4072_v16, %v14174_v35  ;;  %v4313_v12 = vmax.f32 %v4073_v32, %v14176_v24  ;;  %v14204_v53 = vadd.f32 %v14036_v9, %v13224_v19  ;;  %v4314_v0 = vmax.f32 %v4074_v58, %v4266_v42  ;;  %v15553_v9 = vld [vmem:[#allocation49_spill] sm:$0xff] }
 0x3a2   : > { %15552 = vst [vmem:[#allocation25_spill] sm:$0xff] %v14196_v18  ;;  %8670 = vmatpush.bf16.msra.mxu3 %v9890_v10  ;;  %v8932_v45 = vsub.f32 0.0, %v14188_v36  ;;  %v15265_v60 = vunpack.c.h.bf16 %v14207_v50  ;;  %v14218_v29 = vadd.f32 %v8499_v4, %v14092_v52 }
 0x3a3   : > { %v4528_v62 = vrot.slane %v4312_v34, 1  ;;  %v4529_v46 = vrot.slane %v4313_v12, 1  ;;  %v4736_v47 = vrot.slane %v4312_v34, 2  ;;  %v4737_v57 = vrot.slane %v4313_v12, 2 }
 0x3a4   : > { %v4531_v8 = vrot.slane %v4314_v0, 1  ;;  %v4739_v39 = vrot.slane %v4314_v0, 2  ;;  %v4944_v5 = vrot.slane %v4312_v34, 3  ;;  %v4945_v15 = vrot.slane %v4313_v12, 3 }
 0x3a5   : > { %v4530_v6 = vsel %vm2320_vm3, %v4528_v62, %v4529_v46  ;;  %v4947_v56 = vrot.slane %v4314_v0, 3  ;;  %v5152_v49 = vrot.slane %v4312_v34, 4  ;;  %8671 = vmatmul.bf16.vlgmr.msra.gmra.mxu3 %v15553_v9  ;;  %v4738_v37 = vsel %vm2529_vm4, %v4736_v47, %v4737_v57 }
 0x3a6   : > { %v4532_v59 = vsel %vm2320_vm3, %v4529_v46, %v4531_v8  ;;  %v4604_v2 = vmax.f32 %v4312_v34, %v4530_v6  ;;  %v4740_v16 = vsel %vm2529_vm4, %v4737_v57, %v4739_v39  ;;  %v5153_v32 = vrot.slane %v4313_v12, 4  ;;  %v8358_v46 = vpop.f32.mrf.mxu3  ;;  %v5535_v34 = vld [vmem:[#allocation2 + $0x6c] sm:$0xf]  ;;  %v5537_v57 = vld [vmem:[#allocation2 + $0x74] sm:$0x3] }
 0x3a7   : > { %v10130_v25 = vld [vmem:[#allocation3 + $0x10c] sm:$0xf]  ;;  %v4605_v63 = vmax.f32 %v4313_v12, %v4532_v59  ;;  %v5155_v42 = vrot.slane %v4314_v0, 4  ;;  %v4946_v62 = vsel %vm2738_vm5, %v4944_v5, %v4945_v15  ;;  %v8998_v9 = vmul.f32 1.442695, %v8932_v45  ;;  %v14224_v0 = vpop.f32.mrf.mxu0  ;;  %v5823_v45 = vld [vmem:[#allocation2 + $0x84] sm:$0xff]  }
 0x3a8   : > { %v9703_v58 = vld [vmem:[#allocation3 + $0x118] sm:$0xf0]  ;;  %v4812_v10 = vmax.f32 %v4604_v2, %v4738_v37  ;;  %v4948_v6 = vsel %vm2738_vm5, %v4945_v15, %v4947_v56  ;;  %v5154_v59 = vsel %vm2947_vm6, %v5152_v49, %v5153_v32  ;;  %v5585_v12 = vld [vmem:[#allocation2 + $0x80] sm:$0x3]  ;;  %v8934_v52 = vsub.f32 0.0, %v14218_v29 }
 0x3a9   : > { %v14220_v8 = vor.u32 %v10130_v25, %v9703_v58  ;;  %v4813_v47 = vmax.f32 %v4605_v63, %v4740_v16  ;;  %v5156_v5 = vsel %vm2947_vm6, %v5153_v32, %v5155_v42  ;;  %11042 = vpow2.f32 %v8998_v9  ;;  %v5825_v16 = vld [vmem:[#allocation2 + $0x8c] sm:$0x3]  ;;  %v6065_v58 = vld [vmem:[#allocation2 + $0x98] sm:$0x3] }
 0x3aa   : > { %v5020_v39 = vmax.f32 %v4812_v10, %v4946_v62  ;;  %v14230_v2 = vadd.f32 %v8358_v46, %v14100_v11  ;;  %v5631_v15 = vunpack.c.l.bf16 %v5535_v34  ;;  %v5632_v56 = vunpack.c.h.bf16 %v14116_v30 }
 0x3ab   : > { %15554 = vst [vmem:[#allocation49_spill] sm:$0xff] %v14220_v8  ;;  %8533 = vmatmul.bf16.gmra.mxu1 %v14220_v8  ;;  %v5021_v4 = vmax.f32 %v4813_v47, %v4948_v6  ;;  %v9002_v37 = vmul.f32 1.442695, %v8934_v52  ;;  %v5633_v25 = vunpack.c.l.bf16 %v5537_v57  ;;  %v5681_v63 = vunpack.c.l.bf16 %v5585_v12  ;;  %v6303_v47 = vld [vmem:[#allocation2 + $0x9c] sm:$0xff]   ;;  %v6305_v12 = vld [vmem:[#allocation2 + $0xa4] sm:$0x3] }
 0x3ac   : > { %15555 = vst [vmem:[#allocation70_spill] sm:$0xff] %v14230_v2  ;;  %v5228_v49 = vmax.f32 %v5020_v39, %v5154_v59  ;;  %v15556_v42 = vunpack.c.l.bf16 %v14207_v50  ;;  %v5728_v62 = vmax.f32 %v5632_v56, %v15265_v60  ;;  %v5919_v9 = vunpack.c.l.bf16 %v5823_v45  ;;  %v3691_v8 = vld [vmem:[#allocation2 + $0xb4] sm:$0xff]  }
 0x3ad   : > { %v5229_v32 = vmax.f32 %v5021_v4, %v5156_v5  ;;  %11044 = vpow2.f32 %v9002_v37  ;;  %v5729_v46 = vmax.f32 %v5633_v25, %v5681_v63  ;;  %v5920_v34 = vunpack.c.h.bf16 %v5823_v45 }
 0x3ae   : > { %v5727_v10 = vmax.f32 %v5631_v15, %v15556_v42  ;;  %v5260_v11 = vpack.c.bf16 %v5228_v49, %v5228_v49  ;;  %v5921_v6 = vunpack.c.l.bf16 %v5825_v16  ;;  %v6161_v57 = vunpack.c.l.bf16 %v6065_v58  ;;  %v14240_v58 = vpop.f32.mrf.mxu2 }
 0x3af   : > { %v5261_v30 = vpack.c.bf16 %v5229_v32, %v5229_v32  ;;  %v11043_v39 = vpop.eup %11042  ;;  %v5968_v52 = vmax.f32 %v5728_v62, %v5920_v34  ;;  %v6399_v4 = vunpack.c.l.bf16 %v6303_v47  ;;  %v6400_v15 = vunpack.c.h.bf16 %v6303_v47  ;;  %v14244_v47 = vpop.f32.mrf.mxu0  ;;  %v3453_v34 = vld [vmem:[#allocation2 + $0xb0] sm:$0x3] }
 0x3b0   : > { %v5967_v59 = vmax.f32 %v5727_v10, %v5919_v9  ;;  %5292 = vst [vmem:[#allocation3 + $0x188] sm:$0xf] %v5260_v11  ;;  %v5392_v5 = vrot.slane %v5260_v11, 7  ;;  %v9124_v56 = vadd.f32 1.0, %v11043_v39  ;;  %v5969_v60 = vmax.f32 %v5729_v46, %v5921_v6  ;;  %v14242_v9 = vld [vmem:[#allocation2 + $0xb0] sm:$0x3] }
 0x3b1   : > { %5293 = vst [vmem:[#allocation3 + $0x198] sm:$0xf] %v5261_v30  ;;  %v5394_v42 = vrot.slane %v5261_v30, 7  ;;  %v6208_v45 = vmax.f32 %v5968_v52, %v14140_v38  ;;  %v6401_v25 = vunpack.c.l.bf16 %v6305_v12  ;;  %v3499_v63 = vunpack.c.l.bf16 %v14136_v7 }
 0x3b2   : > { %v6207_v49 = vmax.f32 %v5967_v59, %v14138_v51  ;;  %v5393_v37 = vrot.slane %v5392_v5, 4  ;;  %5496 = vst [vmem:[#allocation2 + $0xa8] sm:$0xe] %v5392_v5  ;;  %11046 = vrcp.f32 %v9124_v56  ;;  %v6209_v32 = vmax.f32 %v5969_v60, %v6161_v57  ;;  %v15557_v60 = vld [vmem:[#allocation33_spill] sm:$0xff] }
 0x3b3   : > { %v5396_v16 = vrot.slane %v5394_v42, 4  ;;  %v11045_v62 = vpop.eup %11044  ;;  %v6448_v46 = vmax.f32 %v6208_v45, %v6400_v15  ;;  %v3500_v30 = vunpack.c.h.bf16 %v14136_v7  ;;  %v3501_v6 = vunpack.c.l.bf16 %v14142_v20 }
 0x3b4   : > { %v6447_v10 = vmax.f32 %v6207_v49, %v6399_v4  ;;  %v5395_v11 = vsel %vm11801_vm2, %v5393_v37, %v5394_v42  ;;  %v9126_v59 = vadd.f32 1.0, %v11045_v62  ;;  %v6449_v12 = vmax.f32 %v6209_v32, %v6401_v25 }
 0x3b5   : > { %5497 = vst [vmem:[#allocation2 + $0xac] sm:$0xf] %v5395_v11  ;;  %8676 = vmatmul.bf16.gmra.mxu3 %v15557_v60  ;;  %v6658_v57 = vrot.slane %v6448_v46, 1  ;;  %v6866_v52 = vrot.slane %v6448_v46, 2  ;;  %v7074_v56 = vrot.slane %v6448_v46, 3  ;;  %v7282_v18 = vrot.slane %v6448_v46, 4 }
 0x3b6   : > { %v6657_v39 = vrot.slane %v6447_v10, 1  ;;  %v6865_v5 = vrot.slane %v6447_v10, 2  ;;  %v7073_v4 = vrot.slane %v6447_v10, 3  ;;  %5498 = vst [vmem:[#allocation2 + $0xb0] sm:$0x1] %v5396_v16  ;;  %11048 = vrcp.f32 %v9126_v59 }
 0x3b7   : > { %v9765_v49 = vld [vmem:[#allocation3 + $0x188] sm:$0xf]  ;;  %v6660_v15 = vrot.slane %v6449_v12, 1  ;;  %v6868_v42 = vrot.slane %v6449_v12, 2  ;;  %v7076_v37 = vrot.slane %v6449_v12, 3  ;;  %v7281_v32 = vrot.slane %v6447_v10, 4 }
 0x3b8   : > { %v10148_v7 = vld [vmem:[#allocation3 + $0x194] sm:$0xf0]  ;;  %v6659_v20 = vsel %vm2320_vm3, %v6657_v39, %v6658_v57  ;;  %v6867_v45 = vsel %vm2529_vm4, %v6865_v5, %v6866_v52  ;;  %v7075_v25 = vsel %vm2738_vm5, %v7073_v4, %v7074_v56  ;;  %v11047_v62 = vpop.eup %11046  ;;  %v7284_v4 = vrot.slane %v6449_v12, 4 }
 0x3b9   : > { %v14254_v11 = vor.u32 %v10148_v7, %v9765_v49  ;;  %v6661_v60 = vsel %vm2320_vm3, %v6658_v57, %v6660_v15  ;;  %v6742_v16 = vmax.f32 %v6447_v10, %v6659_v20  ;;  %v6869_v59 = vsel %vm2529_vm4, %v6866_v52, %v6868_v42  ;;  %v3693_v7 = vld [vmem:[#allocation2 + $0xbc] sm:$0x3]  ;;  %v4171_v42 = vld [vmem:[#allocation2 + $0xcc] sm:$0xf] }
 0x3ba   : > { %v9252_v22 = vmul.f32 %v11047_v62, %v14188_v36  ;;  %v6743_v2 = vmax.f32 %v6448_v46, %v6661_v60  ;;  %v7077_v39 = vsel %vm2738_vm5, %v7074_v56, %v7076_v37  ;;  %v3549_v21 = vunpack.c.l.bf16 %v3453_v34  ;;  %v3933_v36 = vld [vmem:[#allocation2 + $0xc8] sm:$0x3]  ;;  %v14266_v34 = vpop.f32.mrf.mxu2  ;;  %8622 = vmatmul.bf16.gmra.mxu2 %v12998_v33 }
 0x3bb   : > { %15558 = vst [vmem:[#allocation33_spill] sm:$0xff] %v14254_v11  ;;  %8464 = vmatmul.bf16.gmra.mxu0 %v14254_v11  ;;  %v6950_v5 = vmax.f32 %v6742_v16, %v6867_v45  ;;  %v3595_v49 = vmax.f32 %v3499_v63, %v14077_v3  ;;  %v7283_v10 = vsel %vm2947_vm6, %v7281_v32, %v7282_v18  ;;  %v3787_v15 = vunpack.c.l.bf16 %v3691_v8  ;;  %v8501_v3 = vpop.f32.mrf.mxu1  ;;  %v8361_v45 = vpop.f32.mrf.mxu3 }
 0x3bc   : > { %9316 = vst [vmem:[%s14180_s7 + $0x10] sm:$0xff] %v9252_v22  ;;  %v6951_v57 = vmax.f32 %v6743_v2, %v6869_v59  ;;  %v3596_v52 = vmax.f32 %v3500_v30, %v14080_v13  ;;  %v11049_v20 = vpop.eup %11048  ;;  %v7285_v46 = vsel %vm2947_vm6, %v7282_v18, %v7284_v4  ;;  %v3597_v37 = vmax.f32 %v3501_v6, %v3549_v21  ;;  %v14269_v22 = vpop.f32.mrf.mxu0 }
 0x3bd   : > { %v7158_v56 = vmax.f32 %v6950_v5, %v7075_v25  ;;  %v3788_v12 = vunpack.c.h.bf16 %v3691_v8  ;;  %v9254_v2 = vmul.f32 %v11049_v20, %v14218_v29  ;;  %v3789_v63 = vunpack.c.l.bf16 %v3693_v7  ;;  %v15559_v7 = vld [vmem:[#allocation48_spill] sm:$0xff] }
 0x3be   : > { %v7159_v13 = vmax.f32 %v6951_v57, %v7077_v39  ;;  %v3835_v30 = vmax.f32 %v3595_v49, %v3787_v15  ;;  %v4029_v62 = vunpack.c.l.bf16 %v3933_v36  ;;  %v4267_v18 = vunpack.c.l.bf16 %v4171_v42  ;;  %v9967_v49 = vld [vmem:[#allocation9 + $0x128] sm:$0xf0]  ;;  %v15562_v36 = vld [vmem:[#allocation46_spill] sm:$0xff] }
 0x3bf   : > { %v7366_v32 = vmax.f32 %v7158_v56, %v7283_v10  ;;  %v3836_v25 = vmax.f32 %v3596_v52, %v3788_v12  ;;  %v14274_v21 = vadd.f32 %v14224_v0, %v13896_v14  ;;  %9318 = vst [vmem:[%s14180_s7 + $0x20] sm:$0xff] %v9254_v2  ;;  %v3837_v6 = vmax.f32 %v3597_v37, %v3789_v63  ;;  %v10197_v0 = vld [vmem:[#allocation9 + $0x124] sm:$0xf] }
 0x3c0   : > { %v7367_v8 = vmax.f32 %v7159_v13, %v7285_v46  ;;  %v4075_v33 = vmax.f32 %v3835_v30, %v14174_v35  ;;  %v14280_v29 = vadd.f32 %v14063_v54, %v13224_v19  ;;  %v14284_v59 = vadd.f32 %v8501_v3, %v14105_v43  ;;  %v15560_v54 = vld [vmem:[#allocation21_spill] sm:$0xff] }
 0x3c1   : > { %v7398_v60 = vpack.c.bf16 %v7366_v32, %v7366_v32  ;;  %v4076_v16 = vmax.f32 %v3836_v25, %v14176_v24  ;;  %v4077_v5 = vmax.f32 %v3837_v6, %v4029_v62  ;;  %v14287_v14 = vadd.f32 %v8361_v45, %v14185_v17  ;;  %v15564_v13 = vld [vmem:[#allocation29_spill] sm:$0xff] }
 0x3c2   : > { %v7399_v39 = vpack.c.bf16 %v7367_v8, %v7367_v8  ;;  %v4315_v4 = vmax.f32 %v4075_v33, %v4267_v18  ;;  %v14291_v57 = vadd.f32 %v14244_v47, %v15559_v7  ;;  %v15561_v10 = vunpack.c.l.bf16 %v15560_v54  ;;  %v5540_v47 = vld [vmem:[#allocation2 + $0x80] sm:$0x3] }
 0x3c3   : > { %7430 = vst [vmem:[#allocation3 + $0x12c] sm:$0xf] %v7398_v60  ;;  %v8936_v15 = vsub.f32 0.0, %v14284_v59  ;;  %v9970_v43 = vor.u32 %v10197_v0, %v9967_v49  ;;  %v15563_v42 = vunpack.c.l.bf16 %v15562_v36  ;;  %v8504_v6 = vpop.f32.mrf.mxu1  ;;  %v14304_v33 = vadd.f32 %v14072_v1, %v13900_v41  ;;  %v5586_v0 = vld [vmem:[#allocation2 + $0x84] sm:$0xff]  }
 0x3c4   : > { %v4316_v52 = vmax.f32 %v4076_v16, %v15561_v10  ;;  %7431 = vst [vmem:[#allocation3 + $0x13c] sm:$0xf] %v7399_v39  ;;  %v4533_v56 = vrot.slane %v4315_v4, 1  ;;  %v4741_v17 = vrot.slane %v4315_v4, 2  ;;  %v4949_v46 = vrot.slane %v4315_v4, 3  ;;  %v14306_v60 = vpop.f32.mrf.mxu0 }
 0x3c5   : > { %v4317_v20 = vmax.f32 %v4077_v5, %v15563_v42  ;;  %v5157_v2 = vrot.slane %v4315_v4, 4  ;;  %8757 = vmatpush.bf16.msra.mxu0 %v9970_v43  ;;  %8681 = vmatmul.bf16.gmra.mxu3 %v15564_v13  ;;  %v8363_v5 = vpop.f32.mrf.mxu3  ;;  %v5636_v49 = vunpack.c.l.bf16 %v5540_v47  ;;  %v9006_v43 = vmul.f32 1.442695, %v8936_v15 }
 0x3c6   : > { %v4534_v37 = vrot.slane %v4316_v52, 1  ;;  %v4742_v12 = vrot.slane %v4316_v52, 2  ;;  %v4950_v3 = vrot.slane %v4316_v52, 3  ;;  %v5158_v32 = vrot.slane %v4316_v52, 4 }
 0x3c7   : > { %v4536_v63 = vrot.slane %v4317_v20, 1  ;;  %v4744_v30 = vrot.slane %v4317_v20, 2  ;;  %v4952_v45 = vrot.slane %v4317_v20, 3  ;;  %v5160_v8 = vrot.slane %v4317_v20, 4 }
 0x3c8   : > { %v4535_v25 = vsel %vm2320_vm3, %v4533_v56, %v4534_v37  ;;  %v4743_v62 = vsel %vm2529_vm4, %v4741_v17, %v4742_v12  ;;  %v4951_v18 = vsel %vm2738_vm5, %v4949_v46, %v4950_v3  ;;  %v5159_v10 = vsel %vm2947_vm6, %v5157_v2, %v5158_v32  ;;  %v5588_v56 = vld [vmem:[#allocation2 + $0x8c] sm:$0x3] }
 0x3c9   : > { %v4537_v16 = vsel %vm2320_vm3, %v4534_v37, %v4536_v63  ;;  %v4606_v39 = vmax.f32 %v4315_v4, %v4535_v25  ;;  %v4745_v54 = vsel %vm2529_vm4, %v4742_v12, %v4744_v30  ;;  %v4953_v20 = vsel %vm2738_vm5, %v4950_v3, %v4952_v45  ;;  %v5828_v4 = vld [vmem:[#allocation2 + $0x98] sm:$0x3]  ;;  %v6066_v12 = vld [vmem:[#allocation2 + $0x9c] sm:$0xff]  }
 0x3ca   : > { %v4607_v7 = vmax.f32 %v4316_v52, %v4537_v16  ;;  %v10134_v36 = vld [vmem:[#allocation3 + $0x12c] sm:$0xf]  ;;  %v5161_v41 = vsel %vm2947_vm6, %v5158_v32, %v5160_v8  ;;  %v14314_v1 = vadd.f32 %v8504_v6, %v14191_v23  ;;  %11050 = vpow2.f32 %v9006_v43  ;;  %v6068_v32 = vld [vmem:[#allocation2 + $0xa4] sm:$0x3]  ;;  %v10814_v16 = vld [vmem:[#allocation2 + $0xa8] sm:$0xff]  }
 0x3cb   : > { %v4814_v42 = vmax.f32 %v4606_v39, %v4743_v62  ;;  %v9719_v17 = vld [vmem:[#allocation3 + $0x138] sm:$0xf0]  ;;  %v14317_v52 = vadd.f32 %v8363_v5, %v14204_v53  ;;  %v5682_v37 = vunpack.c.l.bf16 %v5586_v0  ;;  %v5683_v47 = vunpack.c.h.bf16 %v5586_v0 }
 0x3cc   : > { %v4815_v46 = vmax.f32 %v4607_v7, %v4745_v54  ;;  %v14319_v15 = vor.u32 %v10134_v36, %v9719_v17  ;;  %v8938_v3 = vsub.f32 0.0, %v14314_v1  ;;  %v5684_v63 = vunpack.c.l.bf16 %v5588_v56  ;;  %v6308_v36 = vld [vmem:[#allocation2 + $0xb0] sm:$0x3]  ;;  %v10031_v17 = vld [vmem:[#allocation9 + $0x1a8] sm:$0xf0] }
 0x3cd   : > { %v5022_v2 = vmax.f32 %v4814_v42, %v4951_v18  ;;  %v15566_v23 = vunpack.c.l.bf16 %v14207_v50  ;;  %v5924_v45 = vunpack.c.l.bf16 %v5828_v4  ;;  %v15567_v62 = vunpack.c.h.bf16 %v14207_v50  ;;  %v10213_v50 = vld [vmem:[#allocation9 + $0x1a4] sm:$0xf] }
 0x3ce   : > { %15565 = vst [vmem:[#allocation48_spill] sm:$0xff] %v14319_v15  ;;  %v5023_v13 = vmax.f32 %v4815_v46, %v4953_v20  ;;  %8538 = vmatmul.bf16.gmra.mxu1 %v14319_v15  ;;  %v9010_v53 = vmul.f32 1.442695, %v8938_v3  ;;  %v6162_v6 = vunpack.c.l.bf16 %v6066_v12  ;;  %v5732_v39 = vmax.f32 %v5636_v49, %v5684_v63  ;;  %v14331_v46 = vpop.f32.mrf.mxu0 }
 0x3cf   : > { %v5730_v30 = vmax.f32 %v15566_v23, %v5682_v37  ;;  %v5230_v25 = vmax.f32 %v5022_v2, %v5159_v10  ;;  %v5731_v8 = vmax.f32 %v15567_v62, %v5683_v47  ;;  %v6163_v0 = vunpack.c.h.bf16 %v6066_v12  ;;  %v14335_v12 = vld [vmem:[#allocation2 + $0xb4] sm:$0xff]  }
 0x3d0   : > { %v5231_v18 = vmax.f32 %v5023_v13, %v5161_v41  ;;  %11052 = vpow2.f32 %v9010_v53  ;;  %v6164_v43 = vunpack.c.l.bf16 %v6068_v32  ;;  %v11051_v42 = vpop.eup %11050  ;;  %v5972_v10 = vmax.f32 %v5732_v39, %v5924_v45  ;;  %v14338_v13 = vld [vmem:[#allocation2 + $0xb4] sm:$0xff]   ;;  %v14341_v45 = vld [vmem:[#allocation2 + $0xbc] sm:$0x3] }
 0x3d1   : > { %v5970_v5 = vmax.f32 %v5730_v30, %v14138_v51  ;;  %v5262_v7 = vpack.c.bf16 %v5230_v25, %v5230_v25  ;;  %v5971_v54 = vmax.f32 %v5731_v8, %v14140_v38  ;;  %v14329_v4 = vunpack.c.l.bf16 %v10814_v16  ;;  %v15568_v8 = vld [vmem:[#allocation28_spill] sm:$0xff] }
 0x3d2   : > { %v5263_v20 = vpack.c.bf16 %v5231_v18, %v5231_v18  ;;  %v9128_v51 = vadd.f32 1.0, %v11051_v42  ;;  %v14333_v37 = vunpack.c.h.bf16 %v10814_v16  ;;  %v6212_v2 = vmax.f32 %v5972_v10, %v6164_v43  ;;  %v14346_v18 = vpop.f32.mrf.mxu2 }
 0x3d3   : > { %v6210_v56 = vmax.f32 %v5970_v5, %v6162_v6  ;;  %5294 = vst [vmem:[#allocation3 + $0x1a8] sm:$0xf] %v5262_v7  ;;  %v5397_v49 = vrot.slane %v5262_v7, 7  ;;  %v6211_v41 = vmax.f32 %v5971_v54, %v6163_v0  ;;  %v6404_v3 = vunpack.c.l.bf16 %v6308_v36  ;;  %v3456_v7 = vld [vmem:[#allocation2 + $0xbc] sm:$0x3] }
 0x3d4   : > { %5295 = vst [vmem:[#allocation3 + $0x1b8] sm:$0xf] %v5263_v20  ;;  %v5399_v38 = vrot.slane %v5263_v20, 7  ;;  %11054 = vrcp.f32 %v9128_v51  ;;  %v10034_v30 = vor.u32 %v10213_v50, %v10031_v17  ;;  %v14350_v54 = vadd.f32 %v14084_v55, %v13224_v19 }
 0x3d5   : > { %v6450_v47 = vmax.f32 %v6210_v56, %v14329_v4  ;;  %v5398_v63 = vrot.slane %v5397_v49, 4  ;;  %v6451_v23 = vmax.f32 %v6211_v41, %v14333_v37  ;;  %5499 = vst [vmem:[#allocation2 + $0xb4] sm:$0xe] %v5397_v49  ;;  %v6452_v25 = vmax.f32 %v6212_v2, %v6404_v3  ;;  %8686 = vmatmul.bf16.gmra.mxu3 %v15568_v8 }
 0x3d6   : > { %v5401_v32 = vrot.slane %v5399_v38, 4  ;;  %v11053_v6 = vpop.eup %11052  ;;  %8846 = vmatpush.bf16.msra.mxu1 %v10034_v30 }
 0x3d7   : > { %v6662_v53 = vrot.slane %v6450_v47, 1  ;;  %v6870_v62 = vrot.slane %v6450_v47, 2  ;;  %v5400_v16 = vsel %vm11801_vm2, %v5398_v63, %v5399_v38  ;;  %v6663_v39 = vrot.slane %v6451_v23, 1 }
 0x3d8   : > { %v6871_v5 = vrot.slane %v6451_v23, 2  ;;  %v7078_v0 = vrot.slane %v6450_v47, 3  ;;  %v9130_v43 = vadd.f32 1.0, %v11053_v6  ;;  %v6665_v36 = vrot.slane %v6452_v25, 1  ;;  %5500 = vst [vmem:[#allocation2 + $0xb8] sm:$0xf] %v5400_v16  ;;  %v14361_v16 = vpop.f32.mrf.mxu0 }
 0x3d9   : > { %v7079_v42 = vrot.slane %v6451_v23, 3  ;;  %v6664_v20 = vsel %vm2320_vm3, %v6662_v53, %v6663_v39  ;;  %v6873_v56 = vrot.slane %v6452_v25, 2  ;;  %v7286_v50 = vrot.slane %v6450_v47, 4  ;;  %5501 = vst [vmem:[#allocation2 + $0xbc] sm:$0x1] %v5401_v32 }
 0x3da   : > { %v6872_v10 = vsel %vm2529_vm4, %v6870_v62, %v6871_v5  ;;  %v9781_v17 = vld [vmem:[#allocation3 + $0x1a8] sm:$0xf]  ;;  %11056 = vrcp.f32 %v9130_v43  ;;  %v6666_v49 = vsel %vm2320_vm3, %v6663_v39, %v6665_v36  ;;  %v6744_v51 = vmax.f32 %v6450_v47, %v6664_v20  ;;  %v11055_v38 = vpop.eup %11054  ;;  %v3696_v6 = vld [vmem:[#allocation2 + $0xc8] sm:$0x3]  ;;  %v3934_v36 = vld [vmem:[#allocation2 + $0xcc] sm:$0xf] }
 0x3db   : > { %v7081_v41 = vrot.slane %v6452_v25, 3  ;;  %v10152_v55 = vld [vmem:[#allocation3 + $0x1b4] sm:$0xf0]  ;;  %v6745_v2 = vmax.f32 %v6451_v23, %v6666_v49  ;;  %v6874_v3 = vsel %vm2529_vm4, %v6871_v5, %v6873_v56  ;;  %v7080_v63 = vsel %vm2738_vm5, %v7078_v0, %v7079_v42  ;;  %v14369_v56 = vld [vmem:[#allocation2 + $0xd8] sm:$0xff]  }
 0x3dc   : > { %v7287_v30 = vrot.slane %v6451_v23, 4  ;;  %v14357_v53 = vor.u32 %v10152_v55, %v9781_v17  ;;  %v9256_v62 = vmul.f32 %v11055_v38, %v14284_v59  ;;  %v6952_v32 = vmax.f32 %v6744_v51, %v6872_v10  ;;  %v4176_v38 = vld [vmem:[#allocation2 + $0xe0] sm:$0x3] }
 0x3dd   : > { %v7082_v8 = vsel %vm2738_vm5, %v7079_v42, %v7081_v41  ;;  %v6953_v47 = vmax.f32 %v6745_v2, %v6874_v3  ;;  %v7289_v43 = vrot.slane %v6452_v25, 4  ;;  %v3504_v23 = vunpack.c.l.bf16 %v14242_v9  ;;  %v14377_v3 = vpop.f32.mrf.mxu2 }
 0x3de   : > { %15569 = vst [vmem:[#allocation21_spill] sm:$0xff] %v14357_v53  ;;  %v7288_v39 = vsel %vm2947_vm6, %v7286_v50, %v7287_v30  ;;  %8469 = vmatmul.bf16.gmra.mxu0 %v14357_v53  ;;  %v7160_v5 = vmax.f32 %v6952_v32, %v7080_v63  ;;  %v3550_v0 = vunpack.c.l.bf16 %v14338_v13  ;;  %v3551_v20 = vunpack.c.h.bf16 %v14338_v13  ;;  %v8506_v63 = vpop.f32.mrf.mxu1 }
 0x3df   : > { %9320 = vst [vmem:[%s14180_s7 + $0x30] sm:$0xff] %v9256_v62  ;;  %v7161_v59 = vmax.f32 %v6953_v47, %v7082_v8  ;;  %v3552_v42 = vunpack.c.l.bf16 %v3456_v7  ;;  %v3792_v10 = vunpack.c.l.bf16 %v3696_v6  ;;  %v7290_v50 = vsel %vm2947_vm6, %v7287_v30, %v7289_v43  ;;  %v15572_v62 = vld [vmem:[#allocation19_spill] sm:$0xff]  ;;  %v8366_v47 = vpop.f32.mrf.mxu3 }
 0x3e0   : > { %v11057_v17 = vpop.eup %11056  ;;  %v7368_v25 = vmax.f32 %v7160_v5, %v7288_v39  ;;  %v15570_v49 = vunpack.c.l.bf16 %v13951_v28  ;;  %v4030_v41 = vunpack.c.l.bf16 %v3934_v36  ;;  %v15571_v2 = vunpack.c.h.bf16 %v13951_v28  ;;  %8627 = vmatmul.bf16.gmra.mxu2 %v15572_v62  ;;  %v14385_v36 = vld [vmem:[#allocation2 + $0xc0] sm:$0xff]  }
 0x3e1   : > { %v9258_v9 = vmul.f32 %v11057_v17, %v14314_v1  ;;  %v7369_v55 = vmax.f32 %v7161_v59, %v7290_v50  ;;  %v3600_v7 = vmax.f32 %v3504_v23, %v3552_v42  ;;  %v15269_v8 = vunpack.c.l.bf16 %v14369_v56  ;;  %v15574_v42 = vld [vmem:[#allocation56_spill] sm:$0xff] }
 0x3e2   : > { %v3598_v51 = vmax.f32 %v15570_v49, %v3550_v0  ;;  %v3599_v13 = vmax.f32 %v15571_v2, %v3551_v20  ;;  %v7400_v30 = vpack.c.bf16 %v7368_v25, %v7368_v25  ;;  %v15268_v6 = vunpack.c.h.bf16 %v14369_v56  ;;  %v5541_v49 = vld [vmem:[#allocation2 + $0x84] sm:$0xff]  }
 0x3e3   : > { %9322 = vst [vmem:[%s14180_s7 + $0x40] sm:$0xff] %v9258_v9  ;;  %v7401_v1 = vpack.c.bf16 %v7369_v55, %v7369_v55  ;;  %v3840_v28 = vmax.f32 %v3600_v7, %v3792_v10  ;;  %v4272_v43 = vunpack.c.l.bf16 %v4176_v38  ;;  %v14389_v5 = vadd.f32 %v14269_v22, %v14022_v48  ;;  %v15576_v10 = vld [vmem:[#allocation45_spill] sm:$0xff] }
 0x3e4   : > { %v3838_v32 = vmax.f32 %v3598_v51, %v14174_v35  ;;  %v3839_v39 = vmax.f32 %v3599_v13, %v14176_v24  ;;  %7432 = vst [vmem:[#allocation3 + $0x14c] sm:$0xf] %v7400_v30  ;;  %v14392_v35 = vadd.f32 %v8506_v63, %v14274_v21  ;;  %v14395_v0 = vadd.f32 %v8366_v47, %v14280_v29  ;;  %v15573_v24 = vld [vmem:[#allocation43_spill] sm:$0xff]  ;;  %v14409_v21 = vld [vmem:[#allocation2 + $0xb0] sm:$0x3] }
 0x3e5   : > { %v14399_v59 = vadd.f32 %v14144_v27, %v13224_v19  ;;  %v14403_v20 = vadd.f32 %v14306_v60, %v15573_v24  ;;  %7433 = vst [vmem:[#allocation3 + $0x15c] sm:$0xf] %v7401_v1  ;;  %v15575_v48 = vunpack.c.l.bf16 %v15574_v42  ;;  %v15577_v17 = vunpack.c.l.bf16 %v15576_v10  ;;  %v14414_v27 = vld [vmem:[#allocation2 + $0x90] sm:$0xff]   ;;  %v15578_v51 = vld [vmem:[#allocation35_spill] sm:$0xff] }
 0x3e6   : > { %v4078_v23 = vmax.f32 %v3838_v32, %v4030_v41  ;;  %v8940_v25 = vsub.f32 0.0, %v14392_v35  ;;  %8691 = vmatmul.bf16.gmra.mxu3 %v15578_v51  ;;  %v14419_v41 = vpop.f32.mrf.mxu0  ;;  %v8509_v10 = vpop.f32.mrf.mxu1 }
 0x3e7   : > { %v4079_v22 = vmax.f32 %v3839_v39, %v15575_v48  ;;  %v4080_v50 = vmax.f32 %v3840_v28, %v15577_v17  ;;  %v8368_v2 = vpop.f32.mrf.mxu3 }
 0x3e8   : > { %v4318_v29 = vmax.f32 %v4078_v23, %v15269_v8 }
 0x3e9   : > { %v4319_v38 = vmax.f32 %v4079_v22, %v15268_v6  ;;  %v4320_v9 = vmax.f32 %v4080_v50, %v4272_v43 }
 0x3ea   : > { %v4538_v13 = vrot.slane %v4318_v29, 1  ;;  %v4746_v7 = vrot.slane %v4318_v29, 2  ;;  %v4954_v63 = vrot.slane %v4318_v29, 3  ;;  %v5162_v23 = vrot.slane %v4318_v29, 4 }
 0x3eb   : > { %v4539_v30 = vrot.slane %v4319_v38, 1  ;;  %v4541_v32 = vrot.slane %v4320_v9, 1  ;;  %v4747_v47 = vrot.slane %v4319_v38, 2  ;;  %v4749_v1 = vrot.slane %v4320_v9, 2  ;;  %v10138_v42 = vld [vmem:[#allocation3 + $0x14c] sm:$0xf] }
 0x3ec   : > { %v4955_v39 = vrot.slane %v4319_v38, 3  ;;  %v4957_v28 = vrot.slane %v4320_v9, 3  ;;  %v5163_v24 = vrot.slane %v4319_v38, 4  ;;  %v5165_v22 = vrot.slane %v4320_v9, 4  ;;  %v9735_v50 = vld [vmem:[#allocation3 + $0x158] sm:$0xf0] }
 0x3ed   : > { %v4540_v43 = vsel %vm2320_vm3, %v4538_v13, %v4539_v30  ;;  %v4542_v48 = vsel %vm2320_vm3, %v4539_v30, %v4541_v32  ;;  %v4748_v8 = vsel %vm2529_vm4, %v4746_v7, %v4747_v47  ;;  %v4750_v60 = vsel %vm2529_vm4, %v4747_v47, %v4749_v1  ;;  %v5591_v7 = vld [vmem:[#allocation2 + $0x98] sm:$0x3] }
 0x3ee   : > { %v4608_v51 = vmax.f32 %v4318_v29, %v4540_v43  ;;  %v4609_v6 = vmax.f32 %v4319_v38, %v4542_v48  ;;  %v14431_v55 = vor.u32 %v10138_v42, %v9735_v50  ;;  %v4956_v62 = vsel %vm2738_vm5, %v4954_v63, %v4955_v39  ;;  %v5543_v38 = vld [vmem:[#allocation2 + $0x8c] sm:$0x3]  ;;  %v5829_v43 = vld [vmem:[#allocation2 + $0x9c] sm:$0xff]  }
 0x3ef   : > { %v4958_v13 = vsel %vm2738_vm5, %v4955_v39, %v4957_v28  ;;  %v9014_v30 = vmul.f32 1.442695, %v8940_v25  ;;  %v5164_v17 = vsel %vm2947_vm6, %v5162_v23, %v5163_v24  ;;  %v14437_v29 = vadd.f32 %v8509_v10, %v14291_v57  ;;  %v5831_v39 = vld [vmem:[#allocation2 + $0xa4] sm:$0x3]  ;;  %v14445_v57 = vpop.f32.mrf.mxu0 }
 0x3f0   : > { %15579 = vst [vmem:[#allocation46_spill] sm:$0xff] %v14431_v55  ;;  %v4816_v9 = vmax.f32 %v4608_v51, %v4748_v8  ;;  %v4817_v32 = vmax.f32 %v4609_v6, %v4750_v60  ;;  %8543 = vmatmul.bf16.gmra.mxu1 %v14431_v55  ;;  %v5166_v47 = vsel %vm2947_vm6, %v5163_v24, %v5165_v22  ;;  %v5637_v1 = vunpack.c.l.bf16 %v5541_v49  ;;  %v6309_v24 = vld [vmem:[#allocation2 + $0xb4] sm:$0xff]  }
 0x3f1   : > { %11058 = vpow2.f32 %v9014_v30  ;;  %v14442_v63 = vadd.f32 %v8368_v2, %v14350_v54  ;;  %v8942_v6 = vsub.f32 0.0, %v14437_v29  ;;  %v5638_v60 = vunpack.c.h.bf16 %v5541_v49 }
 0x3f2   : > { %v5024_v25 = vmax.f32 %v4816_v9, %v4956_v62  ;;  %v5025_v8 = vmax.f32 %v4817_v32, %v4958_v13  ;;  %v5639_v28 = vunpack.c.l.bf16 %v5543_v38  ;;  %v5687_v23 = vunpack.c.l.bf16 %v5591_v7  ;;  %v6311_v9 = vld [vmem:[#allocation2 + $0xbc] sm:$0x3] }
 0x3f3   : > { %v15580_v42 = vunpack.c.l.bf16 %v14414_v27  ;;  %v5925_v10 = vunpack.c.l.bf16 %v5829_v43  ;;  %v9018_v54 = vmul.f32 1.442695, %v8942_v6  ;;  %v15581_v2 = vunpack.c.h.bf16 %v14414_v27 }
 0x3f4   : > { %v5232_v22 = vmax.f32 %v5024_v25, %v5164_v17  ;;  %v5233_v50 = vmax.f32 %v5025_v8, %v5166_v47  ;;  %v5735_v51 = vmax.f32 %v5639_v28, %v5687_v23  ;;  %v5926_v13 = vunpack.c.h.bf16 %v5829_v43  ;;  %v14453_v43 = vpop.f32.mrf.mxu2 }
 0x3f5   : > { %v5733_v48 = vmax.f32 %v5637_v1, %v15580_v42  ;;  %v5734_v62 = vmax.f32 %v5638_v60, %v15581_v2  ;;  %v5927_v30 = vunpack.c.l.bf16 %v5831_v39  ;;  %11060 = vpow2.f32 %v9018_v54  ;;  %v15582_v60 = vld [vmem:[#allocation42_spill] sm:$0xff] }
 0x3f6   : > { %v5264_v32 = vpack.c.bf16 %v5232_v22, %v5232_v22  ;;  %v5265_v55 = vpack.c.bf16 %v5233_v50, %v5233_v50  ;;  %v6405_v38 = vunpack.c.l.bf16 %v6309_v24  ;;  %v6406_v17 = vunpack.c.h.bf16 %v6309_v24  ;;  %8696 = vmatmul.bf16.gmra.mxu3 %v15582_v60 }
 0x3f7   : > { %v5973_v49 = vmax.f32 %v5733_v48, %v5925_v10  ;;  %v11059_v7 = vpop.eup %11058  ;;  %v5974_v15 = vmax.f32 %v5734_v62, %v5926_v13  ;;  %v5975_v1 = vmax.f32 %v5735_v51, %v5927_v30  ;;  %v6407_v6 = vunpack.c.l.bf16 %v6311_v9  ;;  %v3459_v10 = vld [vmem:[#allocation2 + $0xc8] sm:$0x3]  ;;  %v14462_v9 = vpop.f32.mrf.mxu0 }
 0x3f8   : > { %5296 = vst [vmem:[#allocation3 + $0x1c8] sm:$0xf] %v5264_v32  ;;  %v5402_v47 = vrot.slane %v5264_v32, 7  ;;  %v5404_v25 = vrot.slane %v5265_v55, 7  ;;  %v9132_v8 = vadd.f32 1.0, %v11059_v7  ;;  %v15583_v28 = vunpack.c.l.bf16 %v14409_v21 }
 0x3f9   : > { %v6213_v42 = vmax.f32 %v5973_v49, %v14329_v4  ;;  %5297 = vst [vmem:[#allocation3 + $0x1d8] sm:$0xf] %v5265_v55  ;;  %v6214_v39 = vmax.f32 %v5974_v15, %v14333_v37  ;;  %v3506_v22 = vunpack.c.h.bf16 %v14335_v12  ;;  %v3507_v54 = vunpack.c.l.bf16 %v14341_v45 }
 0x3fa   : > { %v6215_v23 = vmax.f32 %v5975_v1, %v15583_v28  ;;  %v5403_v24 = vrot.slane %v5402_v47, 4  ;;  %v5406_v50 = vrot.slane %v5404_v25, 4  ;;  %11062 = vrcp.f32 %v9132_v8  ;;  %5502 = vst [vmem:[#allocation2 + $0xc0] sm:$0xe] %v5402_v47 }
 0x3fb   : > { %v6453_v48 = vmax.f32 %v6213_v42, %v6405_v38  ;;  %v6454_v2 = vmax.f32 %v6214_v39, %v6406_v17  ;;  %v11061_v13 = vpop.eup %11060  ;;  %v3555_v49 = vunpack.c.l.bf16 %v3459_v10 }
 0x3fc   : > { %v6455_v62 = vmax.f32 %v6215_v23, %v6407_v6  ;;  %v5405_v15 = vsel %vm11801_vm2, %v5403_v24, %v5404_v25  ;;  %5504 = vst [vmem:[#allocation2 + $0xc8] sm:$0x1] %v5406_v50  ;;  %v9134_v32 = vadd.f32 1.0, %v11061_v13  ;;  %v3697_v13 = vld [vmem:[#allocation2 + $0xcc] sm:$0xf] }
 0x3fd   : > { %v6667_v55 = vrot.slane %v6453_v48, 1  ;;  %v6875_v51 = vrot.slane %v6453_v48, 2  ;;  %v7083_v21 = vrot.slane %v6453_v48, 3  ;;  %v7291_v30 = vrot.slane %v6453_v48, 4  ;;  %5503 = vst [vmem:[#allocation2 + $0xc4] sm:$0xf] %v5405_v15 }
 0x3fe   : > { %v6668_v38 = vrot.slane %v6454_v2, 1  ;;  %v6670_v7 = vrot.slane %v6455_v62, 1  ;;  %v6876_v1 = vrot.slane %v6454_v2, 2  ;;  %v6878_v45 = vrot.slane %v6455_v62, 2  ;;  %v3939_v15 = vld [vmem:[#allocation2 + $0xe0] sm:$0x3] }
 0x3ff   : > { %v7084_v42 = vrot.slane %v6454_v2, 3  ;;  %v7086_v17 = vrot.slane %v6455_v62, 3  ;;  %v7292_v47 = vrot.slane %v6454_v2, 4  ;;  %v9797_v8 = vld [vmem:[#allocation3 + $0x1c8] sm:$0xf]  ;;  %11064 = vrcp.f32 %v9134_v32 }
 0x400   : > { %v6669_v6 = vsel %vm2320_vm3, %v6667_v55, %v6668_v38  ;;  %v6671_v25 = vsel %vm2320_vm3, %v6668_v38, %v6670_v7  ;;  %v6877_v60 = vsel %vm2529_vm4, %v6875_v51, %v6876_v1  ;;  %v11063_v39 = vpop.eup %11062  ;;  %v10156_v28 = vld [vmem:[#allocation3 + $0x1d4] sm:$0xf0]  ;;  %v6879_v24 = vsel %vm2529_vm4, %v6876_v1, %v6878_v45 }
 0x401   : > { %v6746_v23 = vmax.f32 %v6453_v48, %v6669_v6  ;;  %v6747_v10 = vmax.f32 %v6454_v2, %v6671_v25  ;;  %v7085_v50 = vsel %vm2738_vm5, %v7083_v21, %v7084_v42  ;;  %v14469_v53 = vor.u32 %v10156_v28, %v9797_v8  ;;  %v4177_v51 = vld [vmem:[#allocation2 + $0xe4] sm:$0xff]   ;;  %v8511_v25 = vpop.f32.mrf.mxu1 }
 0x402   : > { %v9260_v32 = vmul.f32 %v11063_v39, %v14392_v35  ;;  %v7087_v55 = vsel %vm2738_vm5, %v7084_v42, %v7086_v17  ;;  %v7293_v38 = vsel %vm2947_vm6, %v7291_v30, %v7292_v47  ;;  %v7294_v48 = vrot.slane %v6455_v62, 4  ;;  %v4179_v17 = vld [vmem:[#allocation2 + $0xec] sm:$0x3]  ;;  %v14482_v30 = vpop.f32.mrf.mxu2 }
 0x403   : > { %15584 = vst [vmem:[#allocation29_spill] sm:$0xff] %v14469_v53  ;;  %v6954_v7 = vmax.f32 %v6746_v23, %v6877_v60  ;;  %v6955_v11 = vmax.f32 %v6747_v10, %v6879_v24  ;;  %v15585_v2 = vunpack.c.l.bf16 %v14385_v36  ;;  %v15586_v1 = vunpack.c.l.bf16 %v14335_v12  ;;  %8474 = vmatmul.bf16.gmra.mxu0 %v14469_v53  ;;  %v15588_v60 = vld [vmem:[#allocation50_spill] sm:$0xff]  ;;  %v15589_v24 = vld [vmem:[#allocation16_spill] sm:$0xff] }
 0x404   : > { %9324 = vst [vmem:[%s14180_s7 + $0x50] sm:$0xff] %v9260_v32  ;;  %v15587_v21 = vunpack.c.h.bf16 %v14385_v36  ;;  %v3603_v35 = vmax.f32 %v3507_v54, %v3555_v49  ;;  %v3793_v6 = vunpack.c.l.bf16 %v3697_v13  ;;  %v4035_v42 = vunpack.c.l.bf16 %v3939_v15  ;;  %8632 = vmatmul.bf16.gmra.mxu2 %v15588_v60  ;;  %v8371_v15 = vpop.f32.mrf.mxu3 }
 0x405   : > { %v3601_v45 = vmax.f32 %v15586_v1, %v15585_v2  ;;  %v7162_v62 = vmax.f32 %v6954_v7, %v7085_v50  ;;  %v7163_v39 = vmax.f32 %v6955_v11, %v7087_v55  ;;  %v7295_v12 = vsel %vm2947_vm6, %v7292_v47, %v7294_v48  ;;  %v11065_v23 = vpop.eup %11064  ;;  %v14495_v47 = vpop.f32.mrf.mxu0 }
 0x406   : > { %v3602_v8 = vmax.f32 %v3506_v22, %v15587_v21  ;;  %v4273_v28 = vunpack.c.l.bf16 %v4177_v51  ;;  %v15590_v32 = vunpack.c.l.bf16 %v15589_v24  ;;  %v15591_v22 = vld [vmem:[#allocation22_spill] sm:$0xff]  ;;  %v4274_v13 = vunpack.c.h.bf16 %v4177_v51  ;;  %v10195_v51 = vld [vmem:[#allocation9 + $0x114] sm:$0xf] }
 0x407   : > { %v3841_v10 = vmax.f32 %v3601_v45, %v3793_v6  ;;  %v15592_v54 = vunpack.c.l.bf16 %v15591_v22  ;;  %v9262_v2 = vmul.f32 %v11065_v23, %v14437_v29  ;;  %v7370_v1 = vmax.f32 %v7162_v62, %v7293_v38 }
 0x408   : > { %v3842_v36 = vmax.f32 %v3602_v8, %v15590_v32  ;;  %v7371_v21 = vmax.f32 %v7163_v39, %v7295_v12  ;;  %v4275_v50 = vunpack.c.l.bf16 %v4179_v17  ;;  %v14493_v11 = vadd.f32 %v14151_v40, %v14029_v61  ;;  %v9951_v39 = vld [vmem:[#allocation9 + $0x108] sm:$0xf0]  ;;  %v15596_v12 = vld [vmem:[#allocation24_spill] sm:$0xff] }
 0x409   : > { %v3843_v49 = vmax.f32 %v3603_v35, %v15592_v54  ;;  %v15593_v55 = vunpack.c.l.bf16 %v14369_v56  ;;  %v15594_v48 = vunpack.c.h.bf16 %v14369_v56  ;;  %v9959_v35 = vld [vmem:[#allocation9 + $0x118] sm:$0xf0]  ;;  %v8285_v29 = vadd.f32 %v14168_v44, %v13224_v19  ;;  %9326 = vst [vmem:[%s14180_s7 + $0x60] sm:$0xff] %v9262_v2  ;;  %v10193_v56 = vld [vmem:[#allocation9 + $0x104] sm:$0xf] }
 0x40a   : > { %v7402_v38 = vpack.c.bf16 %v7370_v1, %v7370_v1  ;;  %v7403_v6 = vpack.c.bf16 %v7371_v21, %v7371_v21  ;;  %v14505_v61 = vadd.f32 %v8511_v25, %v14389_v5  ;;  %v14508_v62 = vadd.f32 %v8371_v15, %v14399_v59  ;;  %v14516_v59 = vpop.f32.mrf.mxu2 }
 0x40b   : > { %v4081_v7 = vmax.f32 %v3841_v10, %v15593_v55  ;;  %v4082_v45 = vmax.f32 %v3842_v36, %v15594_v48  ;;  %v4083_v8 = vmax.f32 %v3843_v49, %v4035_v42  ;;  %v15595_v42 = vld [vmem:[#allocation53_spill] sm:$0xff]  ;;  %v14513_v23 = vadd.f32 %v14331_v46, %v15596_v12  ;;  %v5546_v48 = vld [vmem:[#allocation2 + $0x98] sm:$0x3] }
 0x40c   : > { %8701 = vmatmul.bf16.gmra.mxu3 %v15595_v42  ;;  %7434 = vst [vmem:[#allocation3 + $0x16c] sm:$0xf] %v7402_v38  ;;  %v8944_v44 = vsub.f32 0.0, %v14505_v61  ;;  %v9962_v10 = vor.u32 %v10195_v51, %v9959_v35  ;;  %v9954_v5 = vor.u32 %v10193_v56, %v9951_v39  ;;  %v8373_v38 = vpop.f32.mrf.mxu3  ;;  %v5592_v42 = vld [vmem:[#allocation2 + $0x9c] sm:$0xff]  }
 0x40d   : > { %v4321_v40 = vmax.f32 %v4081_v7, %v4273_v28  ;;  %v4322_v17 = vmax.f32 %v4082_v45, %v4274_v13  ;;  %v4323_v60 = vmax.f32 %v4083_v8, %v4275_v50  ;;  %7435 = vst [vmem:[#allocation3 + $0x17c] sm:$0xf] %v7403_v6  ;;  %v8514_v13 = vpop.f32.mrf.mxu1  ;;  %v14526_v6 = vadd.f32 %v14240_v58, %v13224_v19 }
 0x40e   : > { %8758 = vmatpush.bf16.msra.mxu0 %v9962_v10 }
 0x40f   : > { %v4543_v25 = vrot.slane %v4321_v40, 1  ;;  %v4544_v28 = vrot.slane %v4322_v17, 1  ;;  %v4546_v24 = vrot.slane %v4323_v60, 1  ;;  %v4751_v32 = vrot.slane %v4321_v40, 2 }
 0x410   : > { %v4752_v36 = vrot.slane %v4322_v17, 2  ;;  %v4754_v22 = vrot.slane %v4323_v60, 2  ;;  %v4959_v54 = vrot.slane %v4321_v40, 3  ;;  %v4960_v49 = vrot.slane %v4322_v17, 3 }
 0x411   : > { %v4545_v46 = vsel %vm2320_vm3, %v4543_v25, %v4544_v28  ;;  %v4547_v15 = vsel %vm2320_vm3, %v4544_v28, %v4546_v24  ;;  %v4962_v2 = vrot.slane %v4323_v60, 3  ;;  %v5167_v1 = vrot.slane %v4321_v40, 4  ;;  %v14530_v28 = vpop.f32.mrf.mxu0 }
 0x412   : > { %v4610_v21 = vmax.f32 %v4321_v40, %v4545_v46  ;;  %v4611_v50 = vmax.f32 %v4322_v17, %v4547_v15  ;;  %v4753_v55 = vsel %vm2529_vm4, %v4751_v32, %v4752_v36  ;;  %v4755_v7 = vsel %vm2529_vm4, %v4752_v36, %v4754_v22  ;;  %8759 = vmatpush.bf16.msra.mxu0 %v9954_v5  ;;  %v5834_v32 = vld [vmem:[#allocation2 + $0xb0] sm:$0x3]  ;;  %v6072_v5 = vld [vmem:[#allocation2 + $0xb4] sm:$0xff]  }
 0x413   : > { %v4961_v45 = vsel %vm2738_vm5, %v4959_v54, %v4960_v49  ;;  %v4963_v8 = vsel %vm2738_vm5, %v4960_v49, %v4962_v2  ;;  %v5168_v51 = vrot.slane %v4322_v17, 4  ;;  %v5170_v35 = vrot.slane %v4323_v60, 4  ;;  %v10142_v12 = vld [vmem:[#allocation3 + $0x16c] sm:$0xf]  ;;  %v5594_v60 = vld [vmem:[#allocation2 + $0xa4] sm:$0x3] }
 0x414   : > { %v4818_v56 = vmax.f32 %v4610_v21, %v4753_v55  ;;  %v4819_v39 = vmax.f32 %v4611_v50, %v4755_v7  ;;  %v9022_v40 = vmul.f32 1.442695, %v8944_v44  ;;  %v14533_v17 = vadd.f32 %v8514_v13, %v14403_v20  ;;  %v9751_v58 = vld [vmem:[#allocation3 + $0x178] sm:$0xf0]  ;;  %v6074_v21 = vld [vmem:[#allocation2 + $0xbc] sm:$0x3] }
 0x415   : > { %v5169_v10 = vsel %vm2947_vm6, %v5167_v1, %v5168_v51  ;;  %v5171_v25 = vsel %vm2947_vm6, %v5168_v51, %v5170_v35  ;;  %v5642_v24 = vunpack.c.l.bf16 %v5546_v48  ;;  %v14535_v44 = vadd.f32 %v8373_v38, %v8285_v29  ;;  %v14545_v51 = vpop.f32.mrf.mxu2  ;;  %v15600_v35 = vld [vmem:[#allocation54_spill] sm:$0xff] }
 0x416   : > { %v5026_v36 = vmax.f32 %v4818_v56, %v4961_v45  ;;  %v5027_v22 = vmax.f32 %v4819_v39, %v4963_v8  ;;  %11066 = vpow2.f32 %v9022_v40  ;;  %v14537_v54 = vor.u32 %v10142_v12, %v9751_v58  ;;  %v10815_v8 = vld [vmem:[#allocation2 + $0xc0] sm:$0xff]   ;;  %8637 = vmatmul.bf16.gmra.mxu2 %v15600_v35 }
 0x417   : > { %v8946_v49 = vsub.f32 0.0, %v14533_v17  ;;  %v5688_v46 = vunpack.c.l.bf16 %v5592_v42  ;;  %v5689_v15 = vunpack.c.h.bf16 %v5592_v42  ;;  %v5690_v20 = vunpack.c.l.bf16 %v5594_v60  ;;  %v8516_v42 = vpop.f32.mrf.mxu1  ;;  %v6314_v60 = vld [vmem:[#allocation2 + $0xc8] sm:$0x3] }
 0x418   : > { %15597 = vst [vmem:[#allocation28_spill] sm:$0xff] %v14537_v54  ;;  %v5234_v2 = vmax.f32 %v5026_v36, %v5169_v10  ;;  %v5235_v1 = vmax.f32 %v5027_v22, %v5171_v25  ;;  %v5930_v13 = vunpack.c.l.bf16 %v5834_v32  ;;  %8548 = vmatmul.bf16.gmra.mxu1 %v14537_v54  ;;  %v15598_v55 = vunpack.c.l.bf16 %v14414_v27 }
 0x419   : > { %v9026_v50 = vmul.f32 1.442695, %v8946_v49  ;;  %v15599_v29 = vunpack.c.h.bf16 %v14414_v27  ;;  %v6168_v45 = vunpack.c.l.bf16 %v6072_v5  ;;  %v5738_v39 = vmax.f32 %v5642_v24, %v5690_v20  ;;  %v10211_v27 = vld [vmem:[#allocation9 + $0x194] sm:$0xf] }
 0x41a   : > { %v5736_v7 = vmax.f32 %v15598_v55, %v5688_v46  ;;  %v5266_v38 = vpack.c.bf16 %v5234_v2, %v5234_v2  ;;  %v5267_v56 = vpack.c.bf16 %v5235_v1, %v5235_v1  ;;  %v6169_v40 = vunpack.c.h.bf16 %v6072_v5  ;;  %v10023_v46 = vld [vmem:[#allocation9 + $0x198] sm:$0xf0]  ;;  %v8376_v1 = vpop.f32.mrf.mxu3  ;;  %v15601_v20 = vld [vmem:[#allocation52_spill] sm:$0xff] }
 0x41b   : > { %v5737_v48 = vmax.f32 %v15599_v29, %v5689_v15  ;;  %11068 = vpow2.f32 %v9026_v50  ;;  %v6170_v25 = vunpack.c.l.bf16 %v6074_v21  ;;  %v5978_v22 = vmax.f32 %v5738_v39, %v5930_v13  ;;  %v14555_v29 = vpop.f32.mrf.mxu0 }
 0x41c   : > { %v5976_v12 = vmax.f32 %v5736_v7, %v14329_v4  ;;  %v11067_v32 = vpop.eup %11066  ;;  %5298 = vst [vmem:[#allocation3 + $0x1e8] sm:$0xf] %v5266_v38  ;;  %v5407_v58 = vrot.slane %v5266_v38, 7  ;;  %v5409_v36 = vrot.slane %v5267_v56, 7  ;;  %v14550_v49 = vunpack.c.l.bf16 %v10815_v8  ;;  %8706 = vmatmul.bf16.gmra.mxu3 %v15601_v20 }
 0x41d   : > { %v5977_v10 = vmax.f32 %v5737_v48, %v14333_v37  ;;  %5299 = vst [vmem:[#allocation3 + $0x1f8] sm:$0xf] %v5267_v56  ;;  %v9136_v24 = vadd.f32 1.0, %v11067_v32  ;;  %v14552_v2 = vunpack.c.h.bf16 %v10815_v8  ;;  %v6218_v55 = vmax.f32 %v5978_v22, %v6170_v25 }
 0x41e   : > { %v6216_v5 = vmax.f32 %v5976_v12, %v6168_v45  ;;  %v5408_v21 = vrot.slane %v5407_v58, 4  ;;  %v5411_v50 = vrot.slane %v5409_v36, 4  ;;  %5505 = vst [vmem:[#allocation2 + $0xcc] sm:$0xe] %v5407_v58  ;;  %v6410_v7 = vunpack.c.l.bf16 %v6314_v60  ;;  %v15602_v45 = vld [vmem:[#allocation15_spill] sm:$0xff] }
 0x41f   : > { %v6217_v15 = vmax.f32 %v5977_v10, %v6169_v40  ;;  %11070 = vrcp.f32 %v9136_v24  ;;  %v10026_v35 = vor.u32 %v10211_v27, %v10023_v46  ;;  %v8431_v8 = vadd.f32 %v14361_v16, %v15602_v45 }
 0x420   : > { %v6456_v13 = vmax.f32 %v6216_v5, %v14550_v49  ;;  %v8290_v38 = vadd.f32 %v14266_v34, %v13224_v19  ;;  %v5410_v56 = vsel %vm11801_vm2, %v5408_v21, %v5409_v36  ;;  %5507 = vst [vmem:[#allocation2 + $0xd4] sm:$0x1] %v5411_v50  ;;  %v6458_v39 = vmax.f32 %v6218_v55, %v6410_v7  ;;  %v14574_v21 = vpop.f32.mrf.mxu2 }
 0x421   : > { %v6457_v48 = vmax.f32 %v6217_v15, %v14552_v2  ;;  %v11069_v40 = vpop.eup %11068  ;;  %5506 = vst [vmem:[#allocation2 + $0xd0] sm:$0xf] %v5410_v56  ;;  %8847 = vmatpush.bf16.msra.mxu1 %v10026_v35  ;;  %v14567_v27 = vadd.f32 %v14419_v41, %v14200_v26  ;;  %v14571_v46 = vadd.f32 %v8516_v42, %v14513_v23  ;;  %v8519_v26 = vpop.f32.mrf.mxu1 }
 0x422   : > { %v6672_v12 = vrot.slane %v6456_v13, 1  ;;  %v6880_v25 = vrot.slane %v6456_v13, 2  ;;  %v9138_v16 = vadd.f32 1.0, %v11069_v40  ;;  %v6675_v32 = vrot.slane %v6458_v39, 1  ;;  %v8378_v23 = vpop.f32.mrf.mxu3 }
 0x423   : > { %v6673_v10 = vrot.slane %v6457_v48, 1  ;;  %v6881_v60 = vrot.slane %v6457_v48, 2  ;;  %v6883_v58 = vrot.slane %v6458_v39, 2  ;;  %v9813_v34 = vld [vmem:[#allocation3 + $0x1e8] sm:$0xf]  ;;  %v7088_v36 = vrot.slane %v6456_v13, 3 }
 0x424   : > { %v7089_v22 = vrot.slane %v6457_v48, 3  ;;  %v10160_v24 = vld [vmem:[#allocation3 + $0x1f4] sm:$0xf0]  ;;  %11072 = vrcp.f32 %v9138_v16  ;;  %v7091_v20 = vrot.slane %v6458_v39, 3  ;;  %v7296_v56 = vrot.slane %v6456_v13, 4 }
 0x425   : > { %v6674_v31 = vsel %vm2320_vm3, %v6672_v12, %v6673_v10  ;;  %v6676_v5 = vsel %vm2320_vm3, %v6673_v10, %v6675_v32  ;;  %v11071_v41 = vpop.eup %11070  ;;  %v14576_v50 = vor.u32 %v10160_v24, %v9813_v34  ;;  %v6882_v7 = vsel %vm2529_vm4, %v6880_v25, %v6881_v60  ;;  %v5549_v24 = vld [vmem:[#allocation2 + $0xa4] sm:$0x3] }
 0x426   : > { %v6748_v15 = vmax.f32 %v6456_v13, %v6674_v31  ;;  %v6749_v55 = vmax.f32 %v6457_v48, %v6676_v5  ;;  %v6884_v35 = vsel %vm2529_vm4, %v6881_v60, %v6883_v58  ;;  %v9264_v42 = vmul.f32 %v11071_v41, %v14505_v61  ;;  %v14594_v31 = vpop.f32.mrf.mxu0 }
 0x427   : > { %15603 = vst [vmem:[#allocation19_spill] sm:$0xff] %v14576_v50  ;;  %v7297_v40 = vrot.slane %v6457_v48, 4  ;;  %8479 = vmatmul.bf16.gmra.mxu0 %v14576_v50  ;;  %v7090_v10 = vsel %vm2738_vm5, %v7088_v36, %v7089_v22  ;;  %v7299_v16 = vrot.slane %v6458_v39, 4  ;;  %v8948_v32 = vsub.f32 0.0, %v14571_v46  ;;  %v5547_v36 = vld [vmem:[#allocation2 + $0x9c] sm:$0xff]  }
 0x428   : > { %v6956_v45 = vmax.f32 %v6748_v15, %v6882_v7  ;;  %v6957_v12 = vmax.f32 %v6749_v55, %v6884_v35  ;;  %v14586_v34 = vadd.f32 %v14346_v18, %v13224_v19  ;;  %9328 = vst [vmem:[%s14180_s7 + $0x70] sm:$0xff] %v9264_v42  ;;  %v7092_v25 = vsel %vm2738_vm5, %v7089_v22, %v7091_v20  ;;  %v15604_v18 = vld [vmem:[#allocation17_spill] sm:$0xff]  ;;  %v5597_v20 = vld [vmem:[#allocation2 + $0xb0] sm:$0x3] }
 0x429   : > { %v14591_v61 = vadd.f32 %v8376_v1, %v14526_v6  ;;  %v7298_v48 = vsel %vm2947_vm6, %v7296_v56, %v7297_v40  ;;  %v9030_v58 = vmul.f32 1.442695, %v8948_v32  ;;  %v14596_v39 = vadd.f32 %v8519_v26, %v8431_v8  ;;  %v5835_v26 = vld [vmem:[#allocation2 + $0xb4] sm:$0xff]  }
 0x42a   : > { %v7164_v60 = vmax.f32 %v6956_v45, %v7090_v10  ;;  %v7165_v13 = vmax.f32 %v6957_v12, %v7092_v25  ;;  %v11073_v5 = vpop.eup %11072  ;;  %v14600_v15 = vadd.f32 %v14445_v57, %v15604_v18  ;;  %v7300_v22 = vsel %vm2947_vm6, %v7297_v40, %v7299_v16  ;;  %v5837_v57 = vld [vmem:[#allocation2 + $0xbc] sm:$0x3]  ;;  %v6077_v12 = vld [vmem:[#allocation2 + $0xc8] sm:$0x3] }
 0x42b   : > { %v14603_v1 = vadd.f32 %v8378_v23, %v8290_v38  ;;  %v9266_v41 = vmul.f32 %v11073_v5, %v14533_v17  ;;  %11074 = vpow2.f32 %v9030_v58  ;;  %v8950_v8 = vsub.f32 0.0, %v14596_v39  ;;  %v15605_v17 = vld [vmem:[#allocation59_spill] sm:$0xff]  ;;  %v8381_v5 = vpop.f32.mrf.mxu3 }
 0x42c   : > { %v7372_v6 = vmax.f32 %v7164_v60, %v7298_v48  ;;  %v7373_v55 = vmax.f32 %v7165_v13, %v7300_v22  ;;  %v5643_v35 = vunpack.c.l.bf16 %v5547_v36  ;;  %v5644_v42 = vunpack.c.h.bf16 %v5547_v36  ;;  %8711 = vmatmul.bf16.gmra.mxu3 %v15605_v17  ;;  %v6315_v60 = vld [vmem:[#allocation2 + $0xcc] sm:$0xff]   ;;  %v14615_v13 = vpop.f32.mrf.mxu2  ;;  %v8521_v48 = vpop.f32.mrf.mxu1 }
 0x42d   : > { %v5645_v45 = vunpack.c.l.bf16 %v5549_v24  ;;  %v14609_v56 = vadd.f32 %v14377_v3, %v13224_v19  ;;  %9330 = vst [vmem:[%s14180_s7 + $0x80] sm:$0xff] %v9266_v41  ;;  %v9034_v23 = vmul.f32 1.442695, %v8950_v8  ;;  %v5693_v40 = vunpack.c.l.bf16 %v5597_v20  ;;  %v15606_v3 = vld [vmem:[#allocation57_spill] sm:$0xff] }
 0x42e   : > { %v7404_v7 = vpack.c.bf16 %v7372_v6, %v7372_v6  ;;  %v7405_v38 = vpack.c.bf16 %v7373_v55, %v7373_v55  ;;  %v5739_v10 = vmax.f32 %v5643_v35, %v14329_v4  ;;  %v5740_v16 = vmax.f32 %v5644_v42, %v14333_v37  ;;  %8642 = vmatmul.bf16.gmra.mxu2 %v15606_v3  ;;  %v6317_v6 = vld [vmem:[#allocation2 + $0xd4] sm:$0x3]  ;;  %v14636_v42 = vld [vmem:[#allocation2 + $0xb0] sm:$0x3] }
 0x42f   : > { %v5931_v32 = vunpack.c.l.bf16 %v5835_v26  ;;  %v5932_v25 = vunpack.c.h.bf16 %v5835_v26  ;;  %v14620_v58 = vadd.f32 %v14462_v9, %v14304_v33  ;;  %11076 = vpow2.f32 %v9034_v23  ;;  %v14629_v9 = vld [vmem:[#allocation2 + $0xa8] sm:$0xff]  }
 0x430   : > { %7436 = vst [vmem:[#allocation3 + $0x18c] sm:$0xf] %v7404_v7  ;;  %v5741_v36 = vmax.f32 %v5645_v45, %v5693_v40  ;;  %v5933_v24 = vunpack.c.l.bf16 %v5837_v57  ;;  %v14624_v4 = vadd.f32 %v14453_v43, %v13224_v19  ;;  %v6173_v22 = vunpack.c.l.bf16 %v6077_v12  ;;  %v15607_v45 = vld [vmem:[#allocation67_spill] sm:$0xff] }
 0x431   : > { %7437 = vst [vmem:[#allocation3 + $0x19c] sm:$0xf] %v7405_v38  ;;  %v5979_v37 = vmax.f32 %v5739_v10, %v5931_v32  ;;  %v5980_v18 = vmax.f32 %v5740_v16, %v5932_v25  ;;  %v11075_v20 = vpop.eup %11074  ;;  %v6411_v55 = vunpack.c.l.bf16 %v6315_v60  ;;  %v6412_v8 = vunpack.c.h.bf16 %v6315_v60  ;;  %v14642_v38 = vpop.f32.mrf.mxu0 }
 0x432   : > { %v5981_v41 = vmax.f32 %v5741_v36, %v5933_v24  ;;  %v14627_v33 = vadd.f32 %v8521_v48, %v14567_v27  ;;  %v9140_v26 = vadd.f32 1.0, %v11075_v20  ;;  %v14634_v43 = vadd.f32 %v8381_v5, %v14586_v34  ;;  %v5598_v48 = vld [vmem:[#allocation2 + $0xb4] sm:$0xff]  }
 0x433   : > { %v6219_v7 = vmax.f32 %v5979_v37, %v14550_v49  ;;  %v6220_v35 = vmax.f32 %v5980_v18, %v14552_v2  ;;  %v14640_v57 = vadd.f32 %v14495_v47, %v15607_v45  ;;  %v6413_v23 = vunpack.c.l.bf16 %v6317_v6 }
 0x434   : > { %v6221_v27 = vmax.f32 %v5981_v41, %v6173_v22  ;;  %v8952_v40 = vsub.f32 0.0, %v14627_v33  ;;  %11078 = vrcp.f32 %v9140_v26  ;;  %v10576_v10 = vunpack.c.l.bf16 %v14629_v9  ;;  %v15609_v22 = vld [vmem:[#allocation34_spill] sm:$0xff] }
 0x435   : > { %v6459_v12 = vmax.f32 %v6219_v7, %v6411_v55  ;;  %v6460_v17 = vmax.f32 %v6220_v35, %v6412_v8  ;;  %v11077_v16 = vpop.eup %11076  ;;  %v10577_v60 = vunpack.c.h.bf16 %v14629_v9  ;;  %v5648_v47 = vunpack.c.l.bf16 %v14636_v42  ;;  %v14651_v55 = vpop.f32.mrf.mxu2 }
 0x436   : > { %v6461_v32 = vmax.f32 %v6221_v27, %v6413_v23  ;;  %v9038_v25 = vmul.f32 1.442695, %v8952_v40  ;;  %v9142_v36 = vadd.f32 1.0, %v11077_v16  ;;  %v8524_v8 = vpop.f32.mrf.mxu1  ;;  %v5694_v27 = vunpack.c.l.bf16 %v5598_v48 }
 0x437   : > { %v10146_v34 = vld [vmem:[#allocation3 + $0x18c] sm:$0xf]  ;;  %v6677_v24 = vrot.slane %v6459_v12, 1  ;;  %v6678_v5 = vrot.slane %v6460_v17, 1  ;;  %v6885_v37 = vrot.slane %v6459_v12, 2  ;;  %8760 = vmatmul.bf16.vlgmr.msra.gmra.mxu0 %v15609_v22  ;;  %v6886_v20 = vrot.slane %v6460_v17, 2 }
 0x438   : > { %v9767_v3 = vld [vmem:[#allocation3 + $0x198] sm:$0xf0]  ;;  %v6680_v6 = vrot.slane %v6461_v32, 1  ;;  %v6888_v41 = vrot.slane %v6461_v32, 2  ;;  %11080 = vrcp.f32 %v9142_v36  ;;  %v7093_v26 = vrot.slane %v6459_v12, 3  ;;  %v8383_v36 = vpop.f32.mrf.mxu3 }
 0x439   : > { %v14648_v18 = vor.u32 %v10146_v34, %v9767_v3  ;;  %v6679_v9 = vsel %vm2320_vm3, %v6677_v24, %v6678_v5  ;;  %v7094_v7 = vrot.slane %v6460_v17, 3  ;;  %v6887_v45 = vsel %vm2529_vm4, %v6885_v37, %v6886_v20 }
 0x43a   : > { %v6681_v35 = vsel %vm2320_vm3, %v6678_v5, %v6680_v6  ;;  %v6750_v42 = vmax.f32 %v6459_v12, %v6679_v9  ;;  %v11079_v23 = vpop.eup %11078  ;;  %v6889_v16 = vsel %vm2529_vm4, %v6886_v20, %v6888_v41  ;;  %v7096_v34 = vrot.slane %v6461_v32, 3  ;;  %v14663_v41 = vpop.f32.mrf.mxu0 }
 0x43b   : > { %15608 = vst [vmem:[#allocation43_spill] sm:$0xff] %v14648_v18  ;;  %8553 = vmatmul.bf16.gmra.mxu1 %v14648_v18  ;;  %v6751_v40 = vmax.f32 %v6460_v17, %v6681_v35  ;;  %v7301_v3 = vrot.slane %v6459_v12, 4  ;;  %v9268_v24 = vmul.f32 %v11079_v23, %v14571_v46  ;;  %v7302_v54 = vrot.slane %v6460_v17, 4  ;;  %v5600_v18 = vld [vmem:[#allocation2 + $0xbc] sm:$0x3] }
 0x43c   : > { %v6958_v22 = vmax.f32 %v6750_v42, %v6887_v45  ;;  %v7304_v50 = vrot.slane %v6461_v32, 4  ;;  %v7095_v5 = vsel %vm2738_vm5, %v7093_v26, %v7094_v7  ;;  %11082 = vpow2.f32 %v9038_v25  ;;  %v5840_v46 = vld [vmem:[#allocation2 + $0xc8] sm:$0x3]  ;;  %v6078_v26 = vld [vmem:[#allocation2 + $0xcc] sm:$0xff]  }
 0x43d   : > { %v6959_v53 = vmax.f32 %v6751_v40, %v6889_v16  ;;  %v5695_v37 = vunpack.c.h.bf16 %v5598_v48  ;;  %9332 = vst [vmem:[%s14180_s7 + $0x90] sm:$0xff] %v9268_v24  ;;  %v7097_v6 = vsel %vm2738_vm5, %v7094_v7, %v7096_v34  ;;  %v7303_v20 = vsel %vm2947_vm6, %v7301_v3, %v7302_v54  ;;  %v15610_v7 = vld [vmem:[#allocation61_spill] sm:$0xff]  ;;  %v14677_v3 = vld [vmem:[#allocation2 + $0xd8] sm:$0xff]   ;;  %v14679_v24 = vpop.f32.mrf.mxu2 }
 0x43e   : > { %v7166_v9 = vmax.f32 %v6958_v22, %v7095_v5  ;;  %v14666_v12 = vadd.f32 %v8524_v8, %v14600_v15  ;;  %v11081_v17 = vpop.eup %11080  ;;  %v7305_v35 = vsel %vm2947_vm6, %v7302_v54, %v7304_v50  ;;  %v14670_v25 = vadd.f32 %v8383_v36, %v14609_v56  ;;  %8716 = vmatmul.bf16.gmra.mxu3 %v15610_v7  ;;  %v6320_v36 = vld [vmem:[#allocation2 + $0xe0] sm:$0x3]  ;;  %v15611_v22 = vld [vmem:[#allocation18_spill] sm:$0xff] }
 0x43f   : > { %v7167_v32 = vmax.f32 %v6959_v53, %v7097_v6  ;;  %v5696_v48 = vunpack.c.l.bf16 %v5600_v18  ;;  %v9270_v42 = vmul.f32 %v11081_v17, %v14596_v39  ;;  %v5742_v15 = vmax.f32 %v10576_v10, %v5694_v27  ;;  %v6080_v53 = vld [vmem:[#allocation2 + $0xd4] sm:$0x3]  ;;  %v8526_v39 = vpop.f32.mrf.mxu1  ;;  %8647 = vmatmul.bf16.gmra.mxu2 %v15611_v22  ;;  %v10015_v6 = vld [vmem:[#allocation9 + $0x188] sm:$0xf0] }
 0x440   : > { %v7374_v45 = vmax.f32 %v7166_v9, %v7303_v20  ;;  %v8954_v23 = vsub.f32 0.0, %v14666_v12  ;;  %v5743_v40 = vmax.f32 %v10577_v60, %v5695_v37  ;;  %v5936_v34 = vunpack.c.l.bf16 %v5840_v46  ;;  %v10209_v37 = vld [vmem:[#allocation9 + $0x184] sm:$0xf]  ;;  %v8386_v7 = vpop.f32.mrf.mxu3 }
 0x441   : > { %v7375_v8 = vmax.f32 %v7167_v32, %v7305_v35  ;;  %v5744_v16 = vmax.f32 %v5648_v47, %v5696_v48  ;;  %9334 = vst [vmem:[%s14180_s7 + $0xa0] sm:$0xff] %v9270_v42  ;;  %v5982_v56 = vmax.f32 %v5742_v15, %v14550_v49  ;;  %v6174_v18 = vunpack.c.l.bf16 %v6078_v26 }
 0x442   : > { %v7406_v54 = vpack.c.bf16 %v7374_v45, %v7374_v45  ;;  %v9042_v50 = vmul.f32 1.442695, %v8954_v23  ;;  %v11083_v10 = vpop.eup %11082  ;;  %v5983_v60 = vmax.f32 %v5743_v40, %v14552_v2  ;;  %v6175_v5 = vunpack.c.h.bf16 %v6078_v26 }
 0x443   : > { %v7407_v27 = vpack.c.bf16 %v7375_v8, %v7375_v8  ;;  %v5984_v47 = vmax.f32 %v5744_v16, %v5936_v34  ;;  %v9144_v9 = vadd.f32 1.0, %v11083_v10  ;;  %v6176_v20 = vunpack.c.l.bf16 %v6080_v53  ;;  %v14699_v16 = vld [vmem:[#allocation2 + $0xb4] sm:$0xff]   ;;  %v14702_v34 = vpop.f32.mrf.mxu0 }
 0x444   : > { %7438 = vst [vmem:[#allocation3 + $0x1ac] sm:$0xf] %v7406_v54  ;;  %11084 = vpow2.f32 %v9042_v50  ;;  %v6222_v46 = vmax.f32 %v5982_v56, %v6174_v18  ;;  %v6223_v17 = vmax.f32 %v5983_v60, %v6175_v5  ;;  %v15279_v32 = vunpack.c.l.bf16 %v14677_v3 }
 0x445   : > { %7439 = vst [vmem:[#allocation3 + $0x1bc] sm:$0xf] %v7407_v27  ;;  %v15278_v35 = vunpack.c.h.bf16 %v14677_v3  ;;  %v6416_v48 = vunpack.c.l.bf16 %v6320_v36  ;;  %v8300_v42 = vadd.f32 %v14482_v30, %v13224_v19  ;;  %11086 = vrcp.f32 %v9144_v9  ;;  %v15612_v30 = vld [vmem:[#allocation40_spill] sm:$0xff] }
 0x446   : > { %v6224_v26 = vmax.f32 %v5984_v47, %v6176_v20  ;;  %v10018_v45 = vor.u32 %v10209_v37, %v10015_v6  ;;  %v14689_v23 = vadd.f32 %v14530_v28, %v14493_v11  ;;  %v14693_v15 = vadd.f32 %v14516_v59, %v13224_v19  ;;  %v14713_v37 = vpop.f32.mrf.mxu2 }
 0x447   : > { %v6462_v8 = vmax.f32 %v6222_v46, %v15279_v32  ;;  %v6463_v40 = vmax.f32 %v6223_v17, %v15278_v35  ;;  %8765 = vmatmul.bf16.gmra.mxu0 %v15612_v30  ;;  %v14705_v11 = vadd.f32 %v8526_v39, %v14620_v58  ;;  %v14708_v59 = vadd.f32 %v8386_v7, %v14624_v4  ;;  %v8529_v4 = vpop.f32.mrf.mxu1  ;;  %v5555_v32 = vld [vmem:[#allocation2 + $0xbc] sm:$0x3] }
 0x448   : > { %v6464_v53 = vmax.f32 %v6224_v26, %v6416_v48  ;;  %8848 = vmatpush.bf16.msra.mxu1 %v10018_v45  ;;  %v5649_v10 = vunpack.c.l.bf16 %v14699_v16  ;;  %v5650_v27 = vunpack.c.h.bf16 %v14699_v16  ;;  %v8388_v16 = vpop.f32.mrf.mxu3 }
 0x449   : > { %v6682_v28 = vrot.slane %v6462_v8, 1  ;;  %v6683_v54 = vrot.slane %v6463_v40, 1  ;;  %v6890_v50 = vrot.slane %v6462_v8, 2  ;;  %v6891_v56 = vrot.slane %v6463_v40, 2 }
 0x44a   : > { %v11085_v18 = vpop.eup %11084  ;;  %v6685_v36 = vrot.slane %v6464_v53, 1  ;;  %v6893_v22 = vrot.slane %v6464_v53, 2  ;;  %v7098_v58 = vrot.slane %v6462_v8, 3  ;;  %v7099_v39 = vrot.slane %v6463_v40, 3 }
 0x44b   : > { %v10150_v60 = vld [vmem:[#allocation3 + $0x1ac] sm:$0xf]  ;;  %v9146_v47 = vadd.f32 1.0, %v11085_v18  ;;  %v6684_v5 = vsel %vm2320_vm3, %v6682_v28, %v6683_v54  ;;  %v11087_v6 = vpop.eup %11086  ;;  %v6892_v17 = vsel %vm2529_vm4, %v6890_v50, %v6891_v56  ;;  %v7101_v48 = vrot.slane %v6464_v53, 3 }
 0x44c   : > { %v9783_v9 = vld [vmem:[#allocation3 + $0x1b8] sm:$0xf0]  ;;  %v6686_v20 = vsel %vm2320_vm3, %v6683_v54, %v6685_v36  ;;  %v6752_v46 = vmax.f32 %v6462_v8, %v6684_v5  ;;  %v9272_v26 = vmul.f32 %v11087_v6, %v14627_v33  ;;  %v6894_v30 = vsel %vm2529_vm4, %v6891_v56, %v6893_v22  ;;  %v5603_v5 = vld [vmem:[#allocation2 + $0xc8] sm:$0x3]  ;;  %v15613_v33 = vld [vmem:[#allocation64_spill] sm:$0xff] }
 0x44d   : > { %v14717_v7 = vor.u32 %v10150_v60, %v9783_v9  ;;  %11088 = vrcp.f32 %v9146_v47  ;;  %v6753_v45 = vmax.f32 %v6463_v40, %v6686_v20  ;;  %v7306_v18 = vrot.slane %v6462_v8, 4 }
 0x44e   : > { %v6960_v28 = vmax.f32 %v6752_v46, %v6892_v17  ;;  %v7307_v35 = vrot.slane %v6463_v40, 4  ;;  %9336 = vst [vmem:[%s14180_s7 + $0xb0] sm:$0xff] %v9272_v26  ;;  %v7100_v50 = vsel %vm2738_vm5, %v7098_v58, %v7099_v39  ;;  %v7309_v36 = vrot.slane %v6464_v53, 4  ;;  %8721 = vmatmul.bf16.gmra.mxu3 %v15613_v33  ;;  %v14734_v58 = vpop.f32.mrf.mxu0  ;;  %v14740_v33 = vpop.f32.mrf.mxu2 }
 0x44f   : > { %8558 = vmatmul.bf16.gmra.mxu1 %v14717_v7  ;;  %v6961_v54 = vmax.f32 %v6753_v45, %v6894_v30  ;;  %v8956_v60 = vsub.f32 0.0, %v14705_v11  ;;  %v7102_v47 = vsel %vm2738_vm5, %v7099_v39, %v7101_v48  ;;  %v14729_v8 = vadd.f32 %v8529_v4, %v14640_v57  ;;  %v5841_v39 = vld [vmem:[#allocation2 + $0xcc] sm:$0xff]   ;;  %v5843_v48 = vld [vmem:[#allocation2 + $0xd4] sm:$0x3]  ;;  %v6083_v4 = vld [vmem:[#allocation2 + $0xe0] sm:$0x3] }
 0x450   : > { %v7168_v6 = vmax.f32 %v6960_v28, %v7100_v50  ;;  %v7308_v56 = vsel %vm2947_vm6, %v7306_v18, %v7307_v35  ;;  %v7310_v22 = vsel %vm2947_vm6, %v7307_v35, %v7309_v36  ;;  %v14732_v20 = vadd.f32 %v8388_v16, %v8300_v42  ;;  %v6321_v42 = vld [vmem:[#allocation2 + $0xe4] sm:$0xff]   ;;  %v6323_v50 = vld [vmem:[#allocation2 + $0xec] sm:$0x3] }
 0x451   : > { %v7169_v40 = vmax.f32 %v6961_v54, %v7102_v47  ;;  %v9046_v9 = vmul.f32 1.442695, %v8956_v60  ;;  %v8958_v46 = vsub.f32 0.0, %v14729_v8  ;;  %v5651_v17 = vunpack.c.l.bf16 %v5555_v32  ;;  %v8531_v47 = vpop.f32.mrf.mxu1 }
 0x452   : > { %v7376_v53 = vmax.f32 %v7168_v6, %v7308_v56  ;;  %v5699_v26 = vunpack.c.l.bf16 %v5603_v5  ;;  %v5745_v57 = vmax.f32 %v5649_v10, %v14550_v49  ;;  %v5746_v35 = vmax.f32 %v5650_v27, %v14552_v2  ;;  %v15614_v6 = vld [vmem:[#allocation62_spill] sm:$0xff]  ;;  %v8391_v27 = vpop.f32.mrf.mxu3 }
 0x453   : > { %v11089_v45 = vpop.eup %11088  ;;  %v7377_v30 = vmax.f32 %v7169_v40, %v7310_v22  ;;  %11090 = vpow2.f32 %v9046_v9  ;;  %v9050_v18 = vmul.f32 1.442695, %v8958_v46  ;;  %v5937_v36 = vunpack.c.l.bf16 %v5841_v39  ;;  %8652 = vmatmul.bf16.gmra.mxu2 %v15614_v6  ;;  %v15615_v9 = vld [vmem:[#allocation51_spill] sm:$0xff] }
 0x454   : > { %v9274_v16 = vmul.f32 %v11089_v45, %v14666_v12  ;;  %v7408_v28 = vpack.c.bf16 %v7376_v53, %v7376_v53  ;;  %v5747_v54 = vmax.f32 %v5651_v17, %v5699_v26  ;;  %v5938_v60 = vunpack.c.h.bf16 %v5841_v39 }
 0x455   : > { %v7409_v32 = vpack.c.bf16 %v7377_v30, %v7377_v30  ;;  %v5939_v5 = vunpack.c.l.bf16 %v5843_v48  ;;  %11092 = vpow2.f32 %v9050_v18  ;;  %v6179_v49 = vunpack.c.l.bf16 %v6083_v4  ;;  %v15618_v4 = vld [vmem:[#allocation25_spill] sm:$0xff] }
 0x456   : > { %9338 = vst [vmem:[%s14180_s7 + $0xc0] sm:$0xff] %v9274_v16  ;;  %v6417_v2 = vunpack.c.l.bf16 %v6321_v42  ;;  %v6418_v10 = vunpack.c.h.bf16 %v6321_v42  ;;  %v5985_v12 = vmax.f32 %v5745_v57, %v5937_v36  ;;  %v5986_v56 = vmax.f32 %v5746_v35, %v5938_v60  ;;  %v14764_v6 = vpop.f32.mrf.mxu2 }
 0x457   : > { %7440 = vst [vmem:[#allocation3 + $0x1cc] sm:$0xf] %v7408_v28  ;;  %v5987_v40 = vmax.f32 %v5747_v54, %v5939_v5  ;;  %v6419_v22 = vunpack.c.l.bf16 %v6323_v50  ;;  %8770 = vmatmul.bf16.gmra.mxu0 %v15615_v9  ;;  %v14746_v53 = vadd.f32 %v8531_v47, %v14689_v23  ;;  %v15616_v17 = vunpack.c.l.bf16 %v14677_v3  ;;  %v15619_v50 = vld [vmem:[#allocation70_spill] sm:$0xff]  ;;  %v11297_v9 = vld [vmem:[%s15144_s4] sm:$0x3] }
 0x458   : > { %7441 = vst [vmem:[#allocation3 + $0x1dc] sm:$0xf] %v7409_v32  ;;  %v15617_v39 = vunpack.c.h.bf16 %v14677_v3  ;;  %v14753_v30 = vadd.f32 %v8391_v27, %v14693_v15  ;;  %v8446_v42 = vadd.f32 %v14555_v29, %v15618_v4  ;;  %v8305_v54 = vadd.f32 %v14545_v51, %v13224_v19  ;;  %v14762_v32 = vpop.f32.mrf.mxu0 }
 0x459   : > { %v11091_v46 = vpop.eup %11090  ;;  %v6225_v26 = vmax.f32 %v5985_v12, %v15616_v17  ;;  %v6227_v45 = vmax.f32 %v5987_v40, %v6179_v49  ;;  %v8960_v35 = vsub.f32 0.0, %v14746_v53  ;;  %v8448_v3 = vadd.f32 %v14594_v31, %v15619_v50  ;;  %v8534_v29 = vpop.f32.mrf.mxu1 }
 0x45a   : > { %v6226_v48 = vmax.f32 %v5986_v56, %v15617_v39  ;;  %v9148_v57 = vadd.f32 1.0, %v11091_v46  ;;  %v8393_v19 = vpop.f32.mrf.mxu3  ;;  %v14772_v46 = vperm.slane %v11297_v9, 1 }
 0x45b   : > { %v6465_v16 = vmax.f32 %v6225_v26, %v6417_v2  ;;  %v6467_v28 = vmax.f32 %v6227_v45, %v6419_v22  ;;  %v11093_v18 = vpop.eup %11092  ;;  %v9054_v15 = vmul.f32 1.442695, %v8960_v35  ;;  %v15620_v22 = vld [vmem:[#allocation27_spill] sm:$0xff] }
 0x45c   : > { %v6466_v23 = vmax.f32 %v6226_v48, %v6418_v10  ;;  %11094 = vrcp.f32 %v9148_v57  ;;  %v9150_v36 = vadd.f32 1.0, %v11093_v18 }
 0x45d   : > { %v6687_v60 = vrot.slane %v6465_v16, 1  ;;  %v6690_v47 = vrot.slane %v6467_v28, 1  ;;  %v6895_v2 = vrot.slane %v6465_v16, 2  ;;  %v6898_v27 = vrot.slane %v6467_v28, 2 }
 0x45e   : > { %v6688_v5 = vrot.slane %v6466_v23, 1  ;;  %v10154_v49 = vld [vmem:[#allocation3 + $0x1cc] sm:$0xf]  ;;  %v6896_v10 = vrot.slane %v6466_v23, 2  ;;  %v7103_v12 = vrot.slane %v6465_v16, 3  ;;  %11096 = vrcp.f32 %v9150_v36  ;;  %8726 = vmatmul.bf16.gmra.mxu3 %v15620_v22 }
 0x45f   : > { %v9799_v51 = vld [vmem:[#allocation3 + $0x1d8] sm:$0xf0]  ;;  %v7104_v40 = vrot.slane %v6466_v23, 3  ;;  %v7106_v57 = vrot.slane %v6467_v28, 3  ;;  %v7311_v35 = vrot.slane %v6465_v16, 4  ;;  %v7312_v36 = vrot.slane %v6466_v23, 4 }
 0x460   : > { %v6689_v31 = vsel %vm2320_vm3, %v6687_v60, %v6688_v5  ;;  %v6691_v56 = vsel %vm2320_vm3, %v6688_v5, %v6690_v47  ;;  %v14774_v17 = vor.u32 %v10154_v49, %v9799_v51  ;;  %v6897_v48 = vsel %vm2529_vm4, %v6895_v2, %v6896_v10  ;;  %v14795_v22 = vpop.f32.mrf.mxu0 }
 0x461   : > { %v6754_v26 = vmax.f32 %v6465_v16, %v6689_v31  ;;  %v6755_v39 = vmax.f32 %v6466_v23, %v6691_v56  ;;  %v6899_v45 = vsel %vm2529_vm4, %v6896_v10, %v6898_v27  ;;  %v7314_v60 = vrot.slane %v6467_v28, 4  ;;  %v8536_v31 = vpop.f32.mrf.mxu1 }
 0x462   : > { %v11095_v4 = vpop.eup %11094  ;;  %8563 = vmatmul.bf16.gmra.mxu1 %v14774_v17  ;;  %v7105_v47 = vsel %vm2738_vm5, %v7103_v12, %v7104_v40  ;;  %v7107_v49 = vsel %vm2738_vm5, %v7104_v40, %v7106_v57  ;;  %11098 = vpow2.f32 %v9054_v15  ;;  %v8584_v2 = vadd.f32 %v14574_v21, %v14772_v46  ;;  %v14791_v12 = vpop.f32.mrf.mxu2  ;;  %v15621_v15 = vld [vmem:[#allocation39_spill] sm:$0xff] }
 0x463   : > { %v6962_v18 = vmax.f32 %v6754_v26, %v6897_v48  ;;  %v6963_v50 = vmax.f32 %v6755_v39, %v6899_v45  ;;  %v9276_v5 = vmul.f32 %v11095_v4, %v14705_v11  ;;  %v7313_v27 = vsel %vm2947_vm6, %v7311_v35, %v7312_v36  ;;  %8657 = vmatmul.bf16.gmra.mxu2 %v15621_v15  ;;  %v8672_v9 = vpop.f32.mrf.mxu3 }
 0x464   : > { %v11097_v51 = vpop.eup %11096  ;;  %v7315_v23 = vsel %vm2947_vm6, %v7312_v36, %v7314_v60  ;;  %v14787_v28 = vadd.f32 %v8534_v29, %v8446_v42  ;;  %v14789_v11 = vadd.f32 %v8393_v19, %v8305_v54  ;;  %v8537_v39 = vadd.f32 %v8536_v31, %v8448_v3  ;;  %v15622_v29 = vld [vmem:[#allocation55_spill] sm:$0xff] }
 0x465   : > { %v7170_v10 = vmax.f32 %v6962_v18, %v7105_v47  ;;  %v7171_v16 = vmax.f32 %v6963_v50, %v7107_v49  ;;  %9340 = vst [vmem:[%s14180_s7 + $0xd0] sm:$0xff] %v9276_v5  ;;  %v9278_v21 = vmul.f32 %v11097_v51, %v14729_v8  ;;  %v14798_v48 = vadd.f32 %v8672_v9, %v8584_v2  ;;  %v15623_v5 = vld [vmem:[#allocation14_spill] sm:$0xff] }
 0x466   : > { %v8962_v26 = vsub.f32 0.0, %v14787_v28  ;;  %v8964_v57 = vsub.f32 0.0, %v8537_v39  ;;  %v8451_v4 = vadd.f32 %v14642_v38, %v14287_v14  ;;  %v8586_v3 = vadd.f32 %v14615_v13, %v14772_v46 }
 0x467   : > { %v7378_v56 = vmax.f32 %v7170_v10, %v7313_v27  ;;  %v7379_v40 = vmax.f32 %v7171_v16, %v7315_v23  ;;  %9342 = vst [vmem:[%s14180_s7 + $0xe0] sm:$0xff] %v9278_v21  ;;  %8775 = vmatmul.bf16.gmra.mxu0 %v15622_v29  ;;  %v8453_v31 = vadd.f32 %v14663_v41, %v14317_v52 }
 0x468   : > { %v11099_v19 = vpop.eup %11098  ;;  %v9058_v45 = vmul.f32 1.442695, %v8962_v26  ;;  %v9062_v35 = vmul.f32 1.442695, %v8964_v57  ;;  %v14809_v47 = vpop.f32.mrf.mxu0  ;;  %v8589_v21 = vadd.f32 %v14651_v55, %v14772_v46 }
 0x469   : > { %v7410_v42 = vpack.c.bf16 %v7378_v56, %v7378_v56  ;;  %v7411_v54 = vpack.c.bf16 %v7379_v40, %v7379_v40  ;;  %v9152_v8 = vadd.f32 1.0, %v11099_v19  ;;  %v8539_v18 = vpop.f32.mrf.mxu1 }
 0x46a   : > { %11100 = vpow2.f32 %v9058_v45  ;;  %v8540_v50 = vadd.f32 %v8539_v18, %v8451_v4  ;;  %v8456_v45 = vadd.f32 %v14702_v34, %v14395_v0 }
 0x46b   : > { %7442 = vst [vmem:[#allocation3 + $0x1ec] sm:$0xf] %v7410_v42  ;;  %11102 = vrcp.f32 %v9152_v8  ;;  %v8674_v36 = vpop.f32.mrf.mxu3  ;;  %v8591_v8 = vadd.f32 %v14679_v24, %v14772_v46  ;;  %v8458_v24 = vadd.f32 %v14734_v58, %v14442_v63 }
 0x46c   : > { %7443 = vst [vmem:[#allocation3 + $0x1fc] sm:$0xf] %v7411_v54  ;;  %11104 = vpow2.f32 %v9062_v35  ;;  %v14806_v60 = vadd.f32 %v8674_v36, %v8586_v3  ;;  %v8966_v49 = vsub.f32 0.0, %v8540_v50 }
 0x46e   : > { %8731 = vmatmul.bf16.gmra.mxu3 %v15623_v5  ;;  %v9066_v27 = vmul.f32 1.442695, %v8966_v49  ;;  %v15625_v5 = vld [vmem:[#allocation23_spill] sm:$0xff] }
 0x470   : > { %v11101_v2 = vpop.eup %11100  ;;  %v14823_v41 = vpop.f32.mrf.mxu0 }
 0x471   : > { %v11103_v16 = vpop.eup %11102  ;;  %v9154_v38 = vadd.f32 1.0, %v11101_v2  ;;  %v8541_v56 = vpop.f32.mrf.mxu1 }
 0x472   : > { %v10158_v10 = vld [vmem:[#allocation3 + $0x1ec] sm:$0xf]  ;;  %v11105_v51 = vpop.eup %11104  ;;  %v9280_v23 = vmul.f32 %v11103_v16, %v14746_v53  ;;  %v8542_v40 = vadd.f32 %v8541_v56, %v8453_v31  ;;  %v15624_v53 = vld [vmem:[#allocation58_spill] sm:$0xff]  ;;  %v15626_v16 = vld [vmem:[#allocation37_spill] sm:$0xff] }
 0x473   : > { %v9815_v14 = vld [vmem:[#allocation3 + $0x1f8] sm:$0xf0]  ;;  %11106 = vrcp.f32 %v9154_v38  ;;  %v9156_v15 = vadd.f32 1.0, %v11105_v51  ;;  %v8677_v9 = vpop.f32.mrf.mxu3  ;;  %v15627_v31 = vld [vmem:[#allocation60_spill] sm:$0xff] }
 0x474   : > { %v14811_v13 = vor.u32 %v10158_v10, %v9815_v14  ;;  %9344 = vst [vmem:[%s14180_s7 + $0xf0] sm:$0xff] %v9280_v23  ;;  %11108 = vpow2.f32 %v9066_v27  ;;  %v14820_v26 = vadd.f32 %v8677_v9, %v8589_v21  ;;  %v8968_v42 = vsub.f32 0.0, %v8542_v40 }
 0x475   : > { %11110 = vrcp.f32 %v9156_v15 }
 0x476   : > { %8568 = vmatmul.bf16.gmra.mxu1 %v14811_v13  ;;  %v9070_v54 = vmul.f32 1.442695, %v8968_v42  ;;  %v15628_v42 = vld [vmem:[#allocation26_spill] sm:$0xff] }
 0x477   : > { %8780 = vmatmul.bf16.gmra.mxu0 %v15624_v53 }
 0x478   : > { %11112 = vpow2.f32 %v9070_v54  ;;  %v14835_v10 = vpop.f32.mrf.mxu0 }
 0x479   : > { %v11107_v52 = vpop.eup %11106  ;;  %v8544_v4 = vpop.f32.mrf.mxu1 }
 0x47a   : > { %v11109_v55 = vpop.eup %11108  ;;  %v9282_v29 = vmul.f32 %v11107_v52, %v14787_v28  ;;  %v8545_v3 = vadd.f32 %v8544_v4, %v8456_v45 }
 0x47b   : > { %v11111_v19 = vpop.eup %11110  ;;  %v9158_v57 = vadd.f32 1.0, %v11109_v55  ;;  %v8679_v18 = vpop.f32.mrf.mxu3 }
 0x47c   : > { %9346 = vst [vmem:[%s14180_s7 + $0x100] sm:$0xff] %v9282_v29  ;;  %v9284_v35 = vmul.f32 %v11111_v19, %v8537_v39  ;;  %v14832_v36 = vadd.f32 %v8679_v18, %v8591_v8  ;;  %v8970_v28 = vsub.f32 0.0, %v8545_v3  ;;  %v8594_v39 = vadd.f32 %v14713_v37, %v14772_v46  ;;  %v15629_v19 = vld [vmem:[#allocation41_spill] sm:$0xff] }
 0x47d   : > { %11114 = vrcp.f32 %v9158_v57  ;;  %v8599_v57 = vadd.f32 %v14764_v6, %v14772_v46 }
 0x47e   : > { %9348 = vst [vmem:[%s14180_s7 + $0x110] sm:$0xff] %v9284_v35  ;;  %8736 = vmatmul.bf16.gmra.mxu3 %v15625_v5  ;;  %v11113_v49 = vpop.eup %11112  ;;  %v9074_v0 = vmul.f32 1.442695, %v8970_v28  ;;  %v15630_v35 = vld [vmem:[#allocation63_spill] sm:$0xff] }
 0x47f   : > { %v9160_v34 = vadd.f32 1.0, %v11113_v49 }
 0x480   : > { %11116 = vpow2.f32 %v9074_v0  ;;  %v14847_v9 = vpop.f32.mrf.mxu0 }
 0x481   : > { %11118 = vrcp.f32 %v9160_v34  ;;  %v8546_v38 = vpop.f32.mrf.mxu1 }
 0x482   : > { %v8547_v51 = vadd.f32 %v8546_v38, %v8458_v24  ;;  %v15632_v38 = vld [vmem:[#allocation65_spill] sm:$0xff] }
 0x483   : > { %v11115_v2 = vpop.eup %11114  ;;  %v8682_v27 = vpop.f32.mrf.mxu3 }
 0x484   : > { %v9286_v14 = vmul.f32 %v11115_v2, %v8540_v50  ;;  %v14843_v23 = vadd.f32 %v8682_v27, %v8594_v39  ;;  %v8972_v15 = vsub.f32 0.0, %v8547_v51  ;;  %v8596_v50 = vadd.f32 %v14740_v33, %v14772_v46 }
 0x486   : > { %8849 = vmatmul.bf16.vlgmr.msra.gmra.mxu1 %v15626_v16  ;;  %9350 = vst [vmem:[%s14180_s7 + $0x120] sm:$0xff] %v9286_v14  ;;  %v11117_v21 = vpop.eup %11116  ;;  %v9078_v58 = vmul.f32 1.442695, %v8972_v15  ;;  %v15631_v16 = vld [vmem:[#allocation44_spill] sm:$0xff]  ;;  %v8601_v15 = vadd.f32 %v14791_v12, %v14772_v46 }
 0x487   : > { %8785 = vmatmul.bf16.gmra.mxu0 %v15627_v31  ;;  %v11119_v56 = vpop.eup %11118  ;;  %v9162_v63 = vadd.f32 1.0, %v11117_v21  ;;  %v15635_v12 = vld [vmem:[#allocation20_spill] sm:$0xff] }
 0x488   : > { %v9288_v37 = vmul.f32 %v11119_v56, %v8542_v40  ;;  %v8461_v40 = vadd.f32 %v14762_v32, %v14508_v62  ;;  %v14860_v8 = vpop.f32.mrf.mxu0  ;;  %v8463_v62 = vadd.f32 %v14795_v22, %v14535_v44  ;;  %v15633_v56 = vld [vmem:[#allocation66_spill] sm:$0xff] }
 0x489   : > { %11120 = vrcp.f32 %v9162_v63 }
 0x48a   : > { %9352 = vst [vmem:[%s14180_s7 + $0x130] sm:$0xff] %v9288_v37  ;;  %11122 = vpow2.f32 %v9078_v58  ;;  %v15634_v37 = vld [vmem:[#allocation36_spill] sm:$0xff] }
 0x48b   : > { %v8684_v53 = vpop.f32.mrf.mxu3 }
 0x48c   : > { %v14852_v52 = vadd.f32 %v8684_v53, %v8596_v50  ;;  %v8466_v50 = vadd.f32 %v14809_v47, %v14591_v61 }
 0x48e   : > { %8741 = vmatmul.bf16.gmra.mxu3 %v15628_v42 }
 0x48f   : > { %v11121_v54 = vpop.eup %11120 }
 0x490   : > { %v11123_v55 = vpop.eup %11122  ;;  %v9290_v29 = vmul.f32 %v11121_v54, %v8545_v3  ;;  %v14868_v34 = vpop.f32.mrf.mxu0 }
 0x491   : > { %v9164_v45 = vadd.f32 1.0, %v11123_v55 }
 0x492   : > { %9354 = vst [vmem:[%s14180_s7 + $0x140] sm:$0xff] %v9290_v29 }
 0x493   : > { %11124 = vrcp.f32 %v9164_v45  ;;  %v8687_v18 = vpop.f32.mrf.mxu3  ;;  %v8468_v45 = vadd.f32 %v14823_v41, %v14603_v1  ;;  %v8471_v1 = vadd.f32 %v14835_v10, %v14634_v43  ;;  %v15638_v43 = vld [vmem:[#allocation30_spill] sm:$0xff] }
 0x494   : > { %v14863_v3 = vadd.f32 %v8687_v18, %v8599_v57  ;;  %v15636_v18 = vld [vmem:[#allocation31_spill] sm:$0xff] }
 0x495   : > { %v8549_v33 = vpop.f32.mrf.mxu1 }
 0x496   : > { %8854 = vmatmul.bf16.gmra.mxu1 %v15629_v19  ;;  %v8550_v4 = vadd.f32 %v8549_v33, %v8461_v40 }
 0x497   : > { %8790 = vmatmul.bf16.gmra.mxu0 %v15630_v35 }
 0x498   : > { %v8974_v5 = vsub.f32 0.0, %v8550_v4 }
 0x499   : > { %v11125_v49 = vpop.eup %11124 }
 0x49a   : > { %v9082_v28 = vmul.f32 1.442695, %v8974_v5  ;;  %v9292_v32 = vmul.f32 %v11125_v49, %v8547_v51  ;;  %v15637_v5 = vld [vmem:[#allocation38_spill] sm:$0xff] }
 0x49b   : > { %v8689_v21 = vpop.f32.mrf.mxu3 }
 0x49c   : > { %11126 = vpow2.f32 %v9082_v28  ;;  %9356 = vst [vmem:[%s14180_s7 + $0x150] sm:$0xff] %v9292_v32  ;;  %v14878_v63 = vadd.f32 %v8689_v21, %v8601_v15 }
 0x49d   : > { %v8551_v0 = vpop.f32.mrf.mxu1 }
 0x49e   : > { %v8552_v6 = vadd.f32 %v8551_v0, %v8463_v62  ;;  %8746 = vmatmul.bf16.gmra.mxu3 %v15633_v56 }
 0x4a0   : > { %v8976_v2 = vsub.f32 0.0, %v8552_v6 }
 0x4a2   : > { %v11127_v24 = vpop.eup %11126  ;;  %v9086_v39 = vmul.f32 1.442695, %v8976_v2 }
 0x4a3   : > { %v9166_v14 = vadd.f32 1.0, %v11127_v24 }
 0x4a4   : > { %11128 = vpow2.f32 %v9086_v39  ;;  %v14872_v44 = vpop.f32.mrf.mxu0  ;;  %v8473_v39 = vadd.f32 %v14847_v9, %v14670_v25  ;;  %v8476_v25 = vadd.f32 %v14860_v8, %v14708_v59 }
 0x4a5   : > { %11130 = vrcp.f32 %v9166_v14 }
 0x4a6   : > { %8859 = vmatmul.bf16.gmra.mxu1 %v15631_v16 }
 0x4a7   : > { %8795 = vmatmul.bf16.gmra.mxu0 %v15632_v38 }
 0x4aa   : > { %v11129_v27 = vpop.eup %11128 }
 0x4ab   : > { %v11131_v22 = vpop.eup %11130  ;;  %v9168_v51 = vadd.f32 1.0, %v11129_v27 }
 0x4ac   : > { %v9294_v31 = vmul.f32 %v11131_v22, %v8550_v4  ;;  %v14883_v42 = vpop.f32.mrf.mxu0 }
 0x4ad   : > { %11132 = vrcp.f32 %v9168_v51  ;;  %v15639_v51 = vld [vmem:[#allocation47_spill] sm:$0xff] }
 0x4ae   : > { %9358 = vst [vmem:[%s14180_s7 + $0x160] sm:$0xff] %v9294_v31 }
 0x4b3   : > { %v11133_v58 = vpop.eup %11132 }
 0x4b4   : > { %v9296_v53 = vmul.f32 %v11133_v58, %v8552_v6  ;;  %v14889_v57 = vpop.f32.mrf.mxu0 }
 0x4b6   : > { %8864 = vmatmul.bf16.gmra.mxu1 %v15634_v37  ;;  %9360 = vst [vmem:[%s14180_s7 + $0x170] sm:$0xff] %v9296_v53 }
 0x4b7   : > { %8800 = vmatmul.bf16.gmra.mxu0 %v15635_v12 }
 0x4b8   : > { %v8554_v54 = vpop.f32.mrf.mxu1 }
 0x4b9   : > { %v8555_v55 = vadd.f32 %v8554_v54, %v8466_v50 }
 0x4bb   : > { %v8978_v29 = vsub.f32 0.0, %v8555_v55 }
 0x4bc   : > { %v14893_v28 = vpop.f32.mrf.mxu0 }
 0x4bd   : > { %v9090_v19 = vmul.f32 1.442695, %v8978_v29  ;;  %v15640_v29 = vld [vmem:[#allocation32_spill] sm:$0xff] }
 0x4bf   : > { %11134 = vpow2.f32 %v9090_v19  ;;  %v8478_v19 = vadd.f32 %v14868_v34, %v14732_v20  ;;  %v8481_v20 = vadd.f32 %v14872_v44, %v14753_v30  ;;  %v8483_v30 = vadd.f32 %v14883_v42, %v14789_v11 }
 0x4c0   : > { %v8556_v40 = vpop.f32.mrf.mxu1 }
 0x4c1   : > { %v8557_v33 = vadd.f32 %v8556_v40, %v8468_v45  ;;  %v15641_v40 = vld [vmem:[#allocation69_spill] sm:$0xff] }
 0x4c3   : > { %v8980_v35 = vsub.f32 0.0, %v8557_v33 }
 0x4c4   : > { %v14900_v16 = vpop.f32.mrf.mxu0 }
 0x4c5   : > { %v11135_v61 = vpop.eup %11134  ;;  %v9094_v47 = vmul.f32 1.442695, %v8980_v35 }
 0x4c6   : > { %v9170_v4 = vadd.f32 1.0, %v11135_v61  ;;  %8869 = vmatmul.bf16.gmra.mxu1 %v15636_v18 }
 0x4c7   : > { %11136 = vpow2.f32 %v9094_v47  ;;  %8805 = vmatmul.bf16.gmra.mxu0 %v15637_v5 }
 0x4c8   : > { %11138 = vrcp.f32 %v9170_v4 }
 0x4cc   : > { %v8559_v49 = vpop.f32.mrf.mxu1  ;;  %v14907_v9 = vpop.f32.mrf.mxu0 }
 0x4cd   : > { %v11137_v41 = vpop.eup %11136  ;;  %v8560_v0 = vadd.f32 %v8559_v49, %v8471_v1 }
 0x4ce   : > { %v11139_v62 = vpop.eup %11138  ;;  %v9172_v32 = vadd.f32 1.0, %v11137_v41 }
 0x4cf   : > { %v9298_v6 = vmul.f32 %v11139_v62, %v8555_v55  ;;  %v8982_v2 = vsub.f32 0.0, %v8560_v0 }
 0x4d0   : > { %11140 = vrcp.f32 %v9172_v32 }
 0x4d1   : > { %9362 = vst [vmem:[%s14180_s7 + $0x180] sm:$0xff] %v9298_v6  ;;  %v9098_v24 = vmul.f32 1.442695, %v8982_v2 }
 0x4d3   : > { %11142 = vpow2.f32 %v9098_v24  ;;  %v15643_v24 = vld [vmem:[#allocation33_spill] sm:$0xff] }
 0x4d4   : > { %v8561_v14 = vpop.f32.mrf.mxu1  ;;  %v14913_v8 = vpop.f32.mrf.mxu0 }
 0x4d5   : > { %v8562_v10 = vadd.f32 %v8561_v14, %v8473_v39 }
 0x4d6   : > { %v11141_v38 = vpop.eup %11140  ;;  %8874 = vmatmul.bf16.gmra.mxu1 %v15638_v43 }
 0x4d7   : > { %v9300_v27 = vmul.f32 %v11141_v38, %v8557_v33  ;;  %v8984_v22 = vsub.f32 0.0, %v8562_v10  ;;  %8810 = vmatmul.bf16.gmra.mxu0 %v15639_v51 }
 0x4d9   : > { %9364 = vst [vmem:[%s14180_s7 + $0x190] sm:$0xff] %v9300_v27  ;;  %v11143_v31 = vpop.eup %11142  ;;  %v9102_v15 = vmul.f32 1.442695, %v8984_v22 }
 0x4da   : > { %v9174_v21 = vadd.f32 1.0, %v11143_v31  ;;  %v8762_v31 = vadd.f32 %v14889_v57, %v14798_v48 }
 0x4db   : > { %11144 = vpow2.f32 %v9102_v15 }
 0x4dc   : > { %11146 = vrcp.f32 %v9174_v21  ;;  %v14919_v34 = vpop.f32.mrf.mxu0  ;;  %v15644_v21 = vld [vmem:[#allocation49_spill] sm:$0xff] }
 0x4df   : > { %v8564_v56 = vpop.f32.mrf.mxu1 }
 0x4e0   : > { %v8565_v58 = vadd.f32 %v8564_v56, %v8476_v25 }
 0x4e1   : > { %v11145_v37 = vpop.eup %11144 }
 0x4e2   : > { %v11147_v50 = vpop.eup %11146  ;;  %v9176_v53 = vadd.f32 1.0, %v11145_v37  ;;  %v8986_v54 = vsub.f32 0.0, %v8565_v58 }
 0x4e3   : > { %v9302_v55 = vmul.f32 %v11147_v50, %v8560_v0  ;;  %v15642_v0 = vld [vmem:[#allocation68_spill] sm:$0xff] }
 0x4e4   : > { %11148 = vrcp.f32 %v9176_v53  ;;  %v9106_v12 = vmul.f32 1.442695, %v8986_v54  ;;  %v14926_v14 = vpop.f32.mrf.mxu0  ;;  %v15645_v53 = vld [vmem:[#allocation21_spill] sm:$0xff]  ;;  %v8764_v54 = vadd.f32 %v14893_v28, %v14806_v60  ;;  %v8767_v60 = vadd.f32 %v14900_v16, %v14820_v26 }
 0x4e5   : > { %9366 = vst [vmem:[%s14180_s7 + $0x1a0] sm:$0xff] %v9302_v55  ;;  %v8769_v26 = vadd.f32 %v14907_v9, %v14832_v36 }
 0x4e6   : > { %8879 = vmatmul.bf16.gmra.mxu1 %v15640_v29  ;;  %11150 = vpow2.f32 %v9106_v12  ;;  %v14938_v12 = vpop.f32.mrf.mxu2 }
 0x4e7   : > { %v8566_v59 = vpop.f32.mrf.mxu1  ;;  %8815 = vmatmul.bf16.gmra.mxu0 %v15641_v40 }
 0x4e8   : > { %v8567_v45 = vadd.f32 %v8566_v59, %v8478_v19  ;;  %v14940_v19 = vpop.f32.mrf.mxu3 }
 0x4ea   : > { %v11149_v33 = vpop.eup %11148  ;;  %v8988_v35 = vsub.f32 0.0, %v8567_v45 }
 0x4eb   : > { %v9304_v61 = vmul.f32 %v11149_v33, %v8562_v10 }
 0x4ec   : > { %v11151_v47 = vpop.eup %11150  ;;  %v9110_v4 = vmul.f32 1.442695, %v8988_v35  ;;  %v14932_v25 = vpop.f32.mrf.mxu0 }
 0x4ed   : > { %9368 = vst [vmem:[%s14180_s7 + $0x1b0] sm:$0xff] %v9304_v61  ;;  %v9178_v18 = vadd.f32 1.0, %v11151_v47 }
 0x4ee   : > { %11152 = vpow2.f32 %v9110_v4 }
 0x4ef   : > { %11154 = vrcp.f32 %v9178_v18  ;;  %v15646_v18 = vld [vmem:[#allocation48_spill] sm:$0xff] }
 0x4f3   : > { %v8569_v5 = vpop.f32.mrf.mxu1 }
 0x4f4   : > { %v8570_v1 = vadd.f32 %v8569_v5, %v8481_v20  ;;  %v11153_v41 = vpop.eup %11152  ;;  %v14942_v35 = vpop.f32.mrf.mxu0 }
 0x4f5   : > { %v11155_v49 = vpop.eup %11154  ;;  %v9180_v62 = vadd.f32 1.0, %v11153_v41  ;;  %v14948_v20 = vpop.f32.mrf.mxu2 }
 0x4f6   : > { %v8990_v32 = vsub.f32 0.0, %v8570_v1  ;;  %8884 = vmatmul.bf16.gmra.mxu1 %v15642_v0  ;;  %v9306_v6 = vmul.f32 %v11155_v49, %v8565_v58  ;;  %v14950_v49 = vpop.f32.mrf.mxu3 }
 0x4f7   : > { %11156 = vrcp.f32 %v9180_v62  ;;  %8820 = vmatmul.bf16.gmra.mxu0 %v15643_v24 }
 0x4f8   : > { %v9114_v2 = vmul.f32 1.442695, %v8990_v32  ;;  %9370 = vst [vmem:[%s14180_s7 + $0x1c0] sm:$0xff] %v9306_v6  ;;  %v15647_v32 = vld [vmem:[#allocation29_spill] sm:$0xff] }
 0x4fa   : > { %11158 = vpow2.f32 %v9114_v2 }
 0x4fb   : > { %v8571_v44 = vpop.f32.mrf.mxu1 }
 0x4fc   : > { %v8572_v39 = vadd.f32 %v8571_v44, %v8483_v30  ;;  %v14955_v0 = vpop.f32.mrf.mxu0 }
 0x4fd   : > { %v11157_v38 = vpop.eup %11156 }
 0x4fe   : > { %v8992_v43 = vsub.f32 0.0, %v8572_v39  ;;  %v9308_v10 = vmul.f32 %v11157_v38, %v8567_v45  ;;  %v14958_v38 = vpop.f32.mrf.mxu2  ;;  %v14962_v9 = vpop.f32.mrf.mxu3 }
 0x500   : > { %v11159_v27 = vpop.eup %11158  ;;  %v9118_v22 = vmul.f32 1.442695, %v8992_v43  ;;  %9372 = vst [vmem:[%s14180_s7 + $0x1d0] sm:$0xff] %v9308_v10  ;;  %v8772_v10 = vadd.f32 %v14913_v8, %v14843_v23  ;;  %v8774_v23 = vadd.f32 %v14919_v34, %v14852_v52  ;;  %v8777_v52 = vadd.f32 %v14926_v14, %v14863_v3 }
 0x501   : > { %v9182_v51 = vadd.f32 1.0, %v11159_v27  ;;  %v8779_v14 = vadd.f32 %v14932_v25, %v14878_v63 }
 0x502   : > { %11160 = vpow2.f32 %v9118_v22 }
 0x503   : > { %11162 = vrcp.f32 %v9182_v51  ;;  %v8850_v15 = vpop.f32.mrf.mxu1 }
 0x504   : > { %v8851_v11 = vadd.f32 %v8850_v15, %v8762_v31  ;;  %v14965_v51 = vpop.f32.mrf.mxu0  ;;  %v15648_v15 = vld [vmem:[#allocation46_spill] sm:$0xff] }
 0x506   : > { %v8931_v42 = vsub.f32 0.0, %v8851_v11  ;;  %8889 = vmatmul.bf16.gmra.mxu1 %v15644_v21 }
 0x507   : > { %8825 = vmatmul.bf16.gmra.mxu0 %v15645_v53 }
 0x508   : > { %v11161_v56 = vpop.eup %11160  ;;  %v8996_v58 = vmul.f32 1.442695, %v8931_v42 }
 0x509   : > { %v11163_v37 = vpop.eup %11162  ;;  %v9184_v50 = vadd.f32 1.0, %v11161_v56 }
 0x50a   : > { %v9310_v48 = vmul.f32 %v11163_v37, %v8570_v1  ;;  %11164 = vpow2.f32 %v8996_v58  ;;  %v15649_v58 = vld [vmem:[#allocation19_spill] sm:$0xff]  ;;  %v14971_v37 = vpop.f32.mrf.mxu2 }
 0x50b   : > { %11166 = vrcp.f32 %v9184_v50  ;;  %v8852_v57 = vpop.f32.mrf.mxu1 }
 0x50c   : > { %9374 = vst [vmem:[%s14180_s7 + $0x1e0] sm:$0xff] %v9310_v48  ;;  %v8853_v55 = vadd.f32 %v8852_v57, %v8764_v54  ;;  %v14974_v54 = vpop.f32.mrf.mxu3  ;;  %v14976_v57 = vpop.f32.mrf.mxu0 }
 0x50e   : > { %v8933_v29 = vsub.f32 0.0, %v8853_v55 }
 0x510   : > { %v11165_v59 = vpop.eup %11164  ;;  %v9000_v45 = vmul.f32 1.442695, %v8933_v29 }
 0x511   : > { %v11167_v40 = vpop.eup %11166  ;;  %v9123_v33 = vadd.f32 1.0, %v11165_v59 }
 0x512   : > { %v9312_v28 = vmul.f32 %v11167_v40, %v8572_v39  ;;  %11168 = vpow2.f32 %v9000_v45 }
 0x513   : > { %11170 = vrcp.f32 %v9123_v33  ;;  %v8855_v61 = vpop.f32.mrf.mxu1 }
 0x514   : > { %9376 = vst [vmem:[%s14180_s7 + $0x1f0] sm:$0xff] %v9312_v28  ;;  %v8856_v47 = vadd.f32 %v8855_v61, %v8767_v60  ;;  %v14981_v60 = vpop.f32.mrf.mxu2  ;;  %v15650_v61 = vld [vmem:[#allocation28_spill] sm:$0xff] }
 0x516   : > { %v8935_v4 = vsub.f32 0.0, %v8856_v47  ;;  %8894 = vmatmul.bf16.gmra.mxu1 %v15646_v18 }
 0x517   : > { %8830 = vmatmul.bf16.gmra.mxu0 %v15647_v32 }
 0x518   : > { %v11169_v5 = vpop.eup %11168  ;;  %v9004_v1 = vmul.f32 1.442695, %v8935_v4 }
 0x519   : > { %v11171_v41 = vpop.eup %11170  ;;  %v9125_v62 = vadd.f32 1.0, %v11169_v5 }
 0x51a   : > { %v9251_v16 = vmul.f32 %v11171_v41, %v8851_v11  ;;  %11172 = vpow2.f32 %v9004_v1  ;;  %v14986_v1 = vpop.f32.mrf.mxu0 }
 0x51b   : > { %11174 = vrcp.f32 %v9125_v62  ;;  %v8857_v6 = vpop.f32.mrf.mxu1 }
 0x51c   : > { %9315 = vst [vmem:[%s14180_s7 + $0x8] sm:$0xff] %v9251_v16  ;;  %v8858_v2 = vadd.f32 %v8857_v6, %v8769_v26  ;;  %v8604_v26 = vadd.f32 %v14938_v12, %v14772_v46  ;;  %v14993_v6 = vpop.f32.mrf.mxu2 }
 0x51e   : > { %v8937_v24 = vsub.f32 0.0, %v8858_v2 }
 0x520   : > { %v11173_v30 = vpop.eup %11172  ;;  %v9008_v44 = vmul.f32 1.442695, %v8937_v24  ;;  %v8693_v24 = vadd.f32 %v14940_v19, %v8604_v26 }
 0x521   : > { %v11175_v39 = vpop.eup %11174  ;;  %v9127_v43 = vadd.f32 1.0, %v11173_v30 }
 0x522   : > { %v9253_v36 = vmul.f32 %v11175_v39, %v8853_v55  ;;  %11176 = vpow2.f32 %v9008_v44  ;;  %v8782_v25 = vadd.f32 %v14942_v35, %v8693_v24 }
 0x523   : > { %11178 = vrcp.f32 %v9127_v43  ;;  %v8860_v27 = vpop.f32.mrf.mxu1 }
 0x524   : > { %9317 = vst [vmem:[%s14180_s7 + $0x18] sm:$0xff] %v9253_v36  ;;  %v8861_v22 = vadd.f32 %v8860_v27, %v8772_v10  ;;  %v14999_v10 = vpop.f32.mrf.mxu0  ;;  %v8606_v27 = vadd.f32 %v14948_v20, %v14772_v46 }
 0x526   : > { %v8939_v31 = vsub.f32 0.0, %v8861_v22  ;;  %8899 = vmatmul.bf16.gmra.mxu1 %v15648_v15  ;;  %v8695_v15 = vadd.f32 %v14950_v49, %v8606_v27  ;;  %v8609_v49 = vadd.f32 %v14958_v38, %v14772_v46  ;;  %v8611_v38 = vadd.f32 %v14971_v37, %v14772_v46 }
 0x527   : > { %8835 = vmatmul.bf16.gmra.mxu0 %v15649_v58 }
 0x528   : > { %v11177_v11 = vpop.eup %11176  ;;  %v9012_v42 = vmul.f32 1.442695, %v8939_v31 }
 0x529   : > { %v11179_v21 = vpop.eup %11178  ;;  %v9129_v56 = vadd.f32 1.0, %v11177_v11 }
 0x52a   : > { %v9255_v8 = vmul.f32 %v11179_v21, %v8856_v47  ;;  %11180 = vpow2.f32 %v9012_v42  ;;  %v14984_v47 = vpop.f32.mrf.mxu3  ;;  %v15006_v42 = vpop.f32.mrf.mxu2 }
 0x52b   : > { %11182 = vrcp.f32 %v9129_v56  ;;  %v8862_v50 = vpop.f32.mrf.mxu1  ;;  %v8784_v56 = vadd.f32 %v14955_v0, %v8695_v15 }
 0x52c   : > { %9319 = vst [vmem:[%s14180_s7 + $0x28] sm:$0xff] %v9255_v8  ;;  %v8863_v53 = vadd.f32 %v8862_v50, %v8774_v23  ;;  %v15012_v50 = vpop.f32.mrf.mxu0 }
 0x52e   : > { %v8941_v48 = vsub.f32 0.0, %v8863_v53 }
 0x530   : > { %v11181_v55 = vpop.eup %11180  ;;  %v9016_v29 = vmul.f32 1.442695, %v8941_v48 }
 0x531   : > { %v11183_v59 = vpop.eup %11182  ;;  %v9131_v45 = vadd.f32 1.0, %v11181_v55  ;;  %v8698_v55 = vadd.f32 %v14962_v9, %v8609_v49 }
 0x532   : > { %v9257_v34 = vmul.f32 %v11183_v59, %v8858_v2  ;;  %11184 = vpow2.f32 %v9016_v29  ;;  %v14996_v39 = vpop.f32.mrf.mxu3 }
 0x533   : > { %11186 = vrcp.f32 %v9131_v45  ;;  %v8865_v40 = vpop.f32.mrf.mxu1  ;;  %v8787_v45 = vadd.f32 %v14965_v51, %v8698_v55 }
 0x534   : > { %9321 = vst [vmem:[%s14180_s7 + $0x38] sm:$0xff] %v9257_v34  ;;  %v8866_v33 = vadd.f32 %v8865_v40, %v8777_v52  ;;  %v15018_v34 = vpop.f32.mrf.mxu2 }
 0x536   : > { %v8943_v28 = vsub.f32 0.0, %v8866_v33  ;;  %8904 = vmatmul.bf16.gmra.mxu1 %v15650_v61  ;;  %v15026_v61 = vpop.f32.mrf.mxu0 }
 0x538   : > { %v11185_v4 = vpop.eup %11184  ;;  %v9020_v18 = vmul.f32 1.442695, %v8943_v28 }
 0x539   : > { %v11187_v5 = vpop.eup %11186  ;;  %v9133_v3 = vadd.f32 1.0, %v11185_v4  ;;  %v8700_v4 = vadd.f32 %v14974_v54, %v8611_v38 }
 0x53a   : > { %v9259_v41 = vmul.f32 %v11187_v5, %v8861_v22  ;;  %11188 = vpow2.f32 %v9020_v18  ;;  %v15651_v22 = vld [vmem:[#allocation43_spill] sm:$0xff]  ;;  %v15009_v23 = vpop.f32.mrf.mxu3 }
 0x53b   : > { %11190 = vrcp.f32 %v9133_v3  ;;  %v8867_v62 = vpop.f32.mrf.mxu1 }
 0x53c   : > { %9323 = vst [vmem:[%s14180_s7 + $0x48] sm:$0xff] %v9259_v41  ;;  %v8868_v32 = vadd.f32 %v8867_v62, %v8779_v14  ;;  %v8789_v14 = vadd.f32 %v14976_v57, %v8700_v4  ;;  %v15031_v37 = vpop.f32.mrf.mxu2 }
 0x53e   : > { %v8945_v16 = vsub.f32 0.0, %v8868_v32 }
 0x540   : > { %v11189_v2 = vpop.eup %11188  ;;  %v9024_v30 = vmul.f32 1.442695, %v8945_v16 }
 0x541   : > { %v11191_v44 = vpop.eup %11190  ;;  %v9135_v63 = vadd.f32 1.0, %v11189_v2 }
 0x542   : > { %v9261_v43 = vmul.f32 %v11191_v44, %v8863_v53  ;;  %11192 = vpow2.f32 %v9024_v30  ;;  %v15021_v28 = vpop.f32.mrf.mxu3  ;;  %v15038_v30 = vpop.f32.mrf.mxu0 }
 0x543   : > { %11194 = vrcp.f32 %v9135_v63  ;;  %v8870_v36 = vpop.f32.mrf.mxu1 }
 0x544   : > { %9325 = vst [vmem:[%s14180_s7 + $0x58] sm:$0xff] %v9261_v43  ;;  %v8871_v12 = vadd.f32 %v8870_v36, %v8782_v25 }
 0x546   : > { %v8947_v19 = vsub.f32 0.0, %v8871_v12  ;;  %8909 = vmatmul.bf16.gmra.mxu1 %v15651_v22 }
 0x548   : > { %v11193_v31 = vpop.eup %11192  ;;  %v9028_v11 = vmul.f32 1.442695, %v8947_v19 }
 0x549   : > { %v11195_v35 = vpop.eup %11194  ;;  %v9137_v21 = vadd.f32 1.0, %v11193_v31 }
 0x54a   : > { %v9263_v58 = vmul.f32 %v11195_v35, %v8866_v33  ;;  %11196 = vpow2.f32 %v9028_v11  ;;  %v15035_v16 = vpop.f32.mrf.mxu3 }
 0x54b   : > { %11198 = vrcp.f32 %v9137_v21  ;;  %v8872_v8 = vpop.f32.mrf.mxu1  ;;  %v15051_v21 = vpop.f32.mrf.mxu0 }
 0x54c   : > { %9327 = vst [vmem:[%s14180_s7 + $0x68] sm:$0xff] %v9263_v58  ;;  %v8873_v20 = vadd.f32 %v8872_v8, %v8784_v56  ;;  %v8619_v56 = vadd.f32 %v15006_v42, %v14772_v46  ;;  %v8621_v42 = vadd.f32 %v15018_v34, %v14772_v46 }
 0x54e   : > { %v8949_v53 = vsub.f32 0.0, %v8873_v20  ;;  %v8708_v8 = vadd.f32 %v15009_v23, %v8619_v56 }
 0x550   : > { %v11197_v48 = vpop.eup %11196  ;;  %v9032_v29 = vmul.f32 1.442695, %v8949_v53 }
 0x551   : > { %v11199_v0 = vpop.eup %11198  ;;  %v9139_v59 = vadd.f32 1.0, %v11197_v48  ;;  %v8797_v48 = vadd.f32 %v15012_v50, %v8708_v8 }
 0x552   : > { %v9265_v52 = vmul.f32 %v11199_v0, %v8868_v32  ;;  %11200 = vpow2.f32 %v9032_v29  ;;  %v15048_v31 = vpop.f32.mrf.mxu3 }
 0x553   : > { %11202 = vrcp.f32 %v9139_v59  ;;  %v8875_v40 = vpop.f32.mrf.mxu1 }
 0x554   : > { %9329 = vst [vmem:[%s14180_s7 + $0x78] sm:$0xff] %v9265_v52  ;;  %v8876_v33 = vadd.f32 %v8875_v40, %v8787_v45  ;;  %v8806_v45 = vpop.f32.mrf.mxu0  ;;  %v8710_v40 = vadd.f32 %v15021_v28, %v8621_v42 }
 0x556   : > { %v8951_v9 = vsub.f32 0.0, %v8876_v33  ;;  %8914 = vmatmul.bf16.gmra.mxu1 %v14717_v7  ;;  %v8614_v7 = vadd.f32 %v14981_v60, %v14772_v46  ;;  %v8616_v60 = vadd.f32 %v14993_v6, %v14772_v46 }
 0x558   : > { %v11201_v51 = vpop.eup %11200  ;;  %v9036_v18 = vmul.f32 1.442695, %v8951_v9  ;;  %v8703_v2 = vadd.f32 %v14984_v47, %v8614_v7  ;;  %v15045_v47 = vpop.f32.mrf.mxu2  ;;  %v8705_v19 = vadd.f32 %v14996_v39, %v8616_v60  ;;  %v8799_v9 = vadd.f32 %v15026_v61, %v8710_v40 }
 0x559   : > { %v11203_v5 = vpop.eup %11202  ;;  %v9141_v3 = vadd.f32 1.0, %v11201_v51 }
 0x55a   : > { %v9267_v41 = vmul.f32 %v11203_v5, %v8871_v12  ;;  %11204 = vpow2.f32 %v9036_v18  ;;  %v8792_v63 = vadd.f32 %v14986_v1, %v8703_v2  ;;  %v8794_v11 = vadd.f32 %v14999_v10, %v8705_v19  ;;  %v8717_v29 = vpop.f32.mrf.mxu3 }
 0x55b   : > { %11206 = vrcp.f32 %v9141_v3  ;;  %v8877_v62 = vpop.f32.mrf.mxu1 }
 0x55c   : > { %9331 = vst [vmem:[%s14180_s7 + $0x88] sm:$0xff] %v9267_v41  ;;  %v8878_v32 = vadd.f32 %v8877_v62, %v8789_v14  ;;  %v8808_v14 = vpop.f32.mrf.mxu0 }
 0x55e   : > { %v8953_v26 = vsub.f32 0.0, %v8878_v32 }
 0x560   : > { %v11205_v54 = vpop.eup %11204  ;;  %v9040_v24 = vmul.f32 1.442695, %v8953_v26  ;;  %v8628_v53 = vpop.f32.mrf.mxu2 }
 0x561   : > { %v11207_v57 = vpop.eup %11206  ;;  %v9143_v44 = vadd.f32 1.0, %v11205_v54 }
 0x562   : > { %v9269_v25 = vmul.f32 %v11207_v57, %v8873_v20  ;;  %11208 = vpow2.f32 %v9040_v24  ;;  %v8719_v34 = vpop.f32.mrf.mxu3 }
 0x563   : > { %11210 = vrcp.f32 %v9143_v44  ;;  %v8880_v43 = vpop.f32.mrf.mxu1 }
 0x564   : > { %9333 = vst [vmem:[%s14180_s7 + $0x98] sm:$0xff] %v9269_v25  ;;  %v8881_v36 = vadd.f32 %v8880_v43, %v8792_v63 }
 0x566   : > { %v8955_v12 = vsub.f32 0.0, %v8881_v36  ;;  %8919 = vmatmul.bf16.gmra.mxu1 %v14774_v17 }
 0x568   : > { %v11209_v27 = vpop.eup %11208  ;;  %v9044_v22 = vmul.f32 1.442695, %v8955_v12  ;;  %v8630_v4 = vpop.f32.mrf.mxu2 }
 0x569   : > { %v11211_v1 = vpop.eup %11210  ;;  %v9145_v15 = vadd.f32 1.0, %v11209_v27 }
 0x56a   : > { %v9271_v35 = vmul.f32 %v11211_v1, %v8876_v33  ;;  %11212 = vpow2.f32 %v9044_v22  ;;  %v8722_v44 = vpop.f32.mrf.mxu3 }
 0x56b   : > { %11214 = vrcp.f32 %v9145_v15  ;;  %v8882_v6 = vpop.f32.mrf.mxu1 }
 0x56c   : > { %9335 = vst [vmem:[%s14180_s7 + $0xa8] sm:$0xff] %v9271_v35  ;;  %v8883_v17 = vadd.f32 %v8882_v6, %v8794_v11 }
 0x56e   : > { %v8957_v39 = vsub.f32 0.0, %v8883_v17 }
 0x570   : > { %v11213_v58 = vpop.eup %11212  ;;  %v9048_v20 = vmul.f32 1.442695, %v8957_v39  ;;  %v8633_v24 = vpop.f32.mrf.mxu2 }
 0x571   : > { %v11215_v49 = vpop.eup %11214  ;;  %v9147_v10 = vadd.f32 1.0, %v11213_v58 }
 0x572   : > { %v9273_v55 = vmul.f32 %v11215_v49, %v8878_v32  ;;  %11216 = vpow2.f32 %v9048_v20  ;;  %v8724_v6 = vpop.f32.mrf.mxu3  ;;  %v8631_v20 = vadd.f32 %v8630_v4, %v14772_v46 }
 0x573   : > { %11218 = vrcp.f32 %v9147_v10  ;;  %v8885_v0 = vpop.f32.mrf.mxu1 }
 0x574   : > { %9337 = vst [vmem:[%s14180_s7 + $0xb8] sm:$0xff] %v9273_v55  ;;  %v8886_v59 = vadd.f32 %v8885_v0, %v8797_v48  ;;  %v8720_v10 = vadd.f32 %v8719_v34, %v8631_v20 }
 0x576   : > { %v8959_v52 = vsub.f32 0.0, %v8886_v59  ;;  %8924 = vmatmul.bf16.gmra.mxu1 %v14811_v13  ;;  %v8624_v13 = vadd.f32 %v15031_v37, %v14772_v46  ;;  %v8626_v37 = vadd.f32 %v15045_v47, %v14772_v46  ;;  %v8629_v47 = vadd.f32 %v8628_v53, %v14772_v46 }
 0x578   : > { %v11217_v23 = vpop.eup %11216  ;;  %v9052_v33 = vmul.f32 1.442695, %v8959_v52  ;;  %v8713_v41 = vadd.f32 %v15035_v16, %v8624_v13  ;;  %v8715_v16 = vadd.f32 %v15048_v31, %v8626_v37  ;;  %v8635_v1 = vpop.f32.mrf.mxu2  ;;  %v8718_v11 = vadd.f32 %v8717_v29, %v8629_v47 }
 0x579   : > { %v11219_v50 = vpop.eup %11218  ;;  %v9149_v38 = vadd.f32 1.0, %v11217_v23 }
 0x57a   : > { %v9275_v51 = vmul.f32 %v11219_v50, %v8881_v36  ;;  %11220 = vpow2.f32 %v9052_v33  ;;  %v8802_v7 = vadd.f32 %v15038_v30, %v8713_v41  ;;  %v8811_v36 = vpop.f32.mrf.mxu0  ;;  %v8804_v60 = vadd.f32 %v15051_v21, %v8715_v16 }
 0x57b   : > { %11222 = vrcp.f32 %v9149_v38  ;;  %v8887_v18 = vpop.f32.mrf.mxu1  ;;  %v8807_v56 = vadd.f32 %v8806_v45, %v8718_v11  ;;  %v8727_v45 = vpop.f32.mrf.mxu3  ;;  %v8634_v33 = vadd.f32 %v8633_v24, %v14772_v46  ;;  %v8636_v41 = vadd.f32 %v8635_v1, %v14772_v46 }
 0x57c   : > { %9339 = vst [vmem:[%s14180_s7 + $0xc8] sm:$0xff] %v9275_v51  ;;  %v8888_v5 = vadd.f32 %v8887_v18, %v8799_v9 }
 0x57d   : > { %v8723_v9 = vadd.f32 %v8722_v44, %v8634_v33 }
 0x57e   : > { %v8961_v3 = vsub.f32 0.0, %v8888_v5 }
 0x580   : > { %v11221_v28 = vpop.eup %11220  ;;  %v9056_v62 = vmul.f32 1.442695, %v8961_v3  ;;  %v8638_v29 = vpop.f32.mrf.mxu2 }
 0x581   : > { %v11223_v32 = vpop.eup %11222  ;;  %v9151_v61 = vadd.f32 1.0, %v11221_v28  ;;  %v8639_v16 = vadd.f32 %v8638_v29, %v14772_v46 }
 0x582   : > { %v9277_v26 = vmul.f32 %v11223_v32, %v8883_v17  ;;  %11224 = vpow2.f32 %v9056_v62  ;;  %v8813_v21 = vpop.f32.mrf.mxu0 }
 0x583   : > { %11226 = vrcp.f32 %v9151_v61  ;;  %v8890_v54 = vpop.f32.mrf.mxu1  ;;  %v8729_v28 = vpop.f32.mrf.mxu3 }
 0x584   : > { %9341 = vst [vmem:[%s14180_s7 + $0xd8] sm:$0xff] %v9277_v26  ;;  %v8891_v2 = vadd.f32 %v8890_v54, %v8802_v7  ;;  %v8725_v7 = vadd.f32 %v8724_v6, %v8636_v41 }
 0x586   : > { %v8963_v57 = vsub.f32 0.0, %v8891_v2  ;;  %v8814_v24 = vadd.f32 %v8813_v21, %v8725_v7 }
 0x588   : > { %v11225_v63 = vpop.eup %11224  ;;  %v9060_v25 = vmul.f32 1.442695, %v8963_v57  ;;  %v8640_v13 = vpop.f32.mrf.mxu2 }
 0x589   : > { %v11227_v43 = vpop.eup %11226  ;;  %v9153_v30 = vadd.f32 1.0, %v11225_v63  ;;  %v8641_v11 = vadd.f32 %v8640_v13, %v14772_v46 }
 0x58a   : > { %v9279_v12 = vmul.f32 %v11227_v43, %v8886_v59  ;;  %11228 = vpow2.f32 %v9060_v25  ;;  %v8809_v59 = vadd.f32 %v8808_v14, %v8720_v10  ;;  %v8816_v40 = vpop.f32.mrf.mxu0 }
 0x58b   : > { %11230 = vrcp.f32 %v9153_v30  ;;  %v8892_v27 = vpop.f32.mrf.mxu1  ;;  %v8732_v43 = vpop.f32.mrf.mxu3  ;;  %v8728_v30 = vadd.f32 %v8727_v45, %v8639_v16 }
 0x58c   : > { %9343 = vst [vmem:[%s14180_s7 + $0xe8] sm:$0xff] %v9279_v12  ;;  %v8893_v19 = vadd.f32 %v8892_v27, %v8804_v60 }
 0x58d   : > { %v8817_v47 = vadd.f32 %v8816_v40, %v8728_v30 }
 0x58e   : > { %v8965_v22 = vsub.f32 0.0, %v8893_v19 }
 0x590   : > { %v11229_v15 = vpop.eup %11228  ;;  %v9064_v31 = vmul.f32 1.442695, %v8965_v22  ;;  %v8643_v63 = vpop.f32.mrf.mxu2 }
 0x591   : > { %v11231_v35 = vpop.eup %11230  ;;  %v9155_v17 = vadd.f32 1.0, %v11229_v15 }
 0x592   : > { %v9281_v39 = vmul.f32 %v11231_v35, %v8888_v5  ;;  %11232 = vpow2.f32 %v9064_v31  ;;  %v8812_v5 = vadd.f32 %v8811_v36, %v8723_v9  ;;  %v8818_v32 = vpop.f32.mrf.mxu0 }
 0x593   : > { %11234 = vrcp.f32 %v9155_v17  ;;  %v8895_v58 = vpop.f32.mrf.mxu1  ;;  %v8730_v17 = vadd.f32 %v8729_v28, %v8641_v11  ;;  %v8734_v21 = vpop.f32.mrf.mxu3 }
 0x594   : > { %9345 = vst [vmem:[%s14180_s7 + $0xf8] sm:$0xff] %v9281_v39  ;;  %v8896_v8 = vadd.f32 %v8895_v58, %v8807_v56 }
 0x596   : > { %v8967_v49 = vsub.f32 0.0, %v8896_v8 }
 0x598   : > { %v11233_v53 = vpop.eup %11232  ;;  %v9068_v48 = vmul.f32 1.442695, %v8967_v49  ;;  %v8645_v35 = vpop.f32.mrf.mxu2 }
 0x599   : > { %v11235_v55 = vpop.eup %11234  ;;  %v9157_v0 = vadd.f32 1.0, %v11233_v53 }
 0x59a   : > { %v9283_v42 = vmul.f32 %v11235_v55, %v8891_v2  ;;  %11236 = vpow2.f32 %v9068_v48  ;;  %v8821_v27 = vpop.f32.mrf.mxu0  ;;  %v8644_v48 = vadd.f32 %v8643_v63, %v14772_v46 }
 0x59b   : > { %11238 = vrcp.f32 %v9157_v0  ;;  %v8897_v52 = vpop.f32.mrf.mxu1  ;;  %v8737_v33 = vpop.f32.mrf.mxu3 }
 0x59c   : > { %9347 = vst [vmem:[%s14180_s7 + $0x108] sm:$0xff] %v9283_v42  ;;  %v8898_v23 = vadd.f32 %v8897_v52, %v8809_v59  ;;  %v8733_v0 = vadd.f32 %v8732_v43, %v8644_v48 }
 0x59e   : > { %v8969_v50 = vsub.f32 0.0, %v8898_v23 }
 0x5a0   : > { %v11237_v38 = vpop.eup %11236  ;;  %v9072_v51 = vmul.f32 1.442695, %v8969_v50  ;;  %v8648_v45 = vpop.f32.mrf.mxu2 }
 0x5a1   : > { %v11239_v4 = vpop.eup %11238  ;;  %v9159_v18 = vadd.f32 1.0, %v11237_v38  ;;  %v8649_v7 = vadd.f32 %v8648_v45, %v14772_v46 }
 0x5a2   : > { %v9285_v34 = vmul.f32 %v11239_v4, %v8893_v19  ;;  %11240 = vpow2.f32 %v9072_v51  ;;  %v8823_v49 = vpop.f32.mrf.mxu0  ;;  %v8646_v51 = vadd.f32 %v8645_v35, %v14772_v46 }
 0x5a3   : > { %11242 = vrcp.f32 %v9159_v18  ;;  %v8900_v3 = vpop.f32.mrf.mxu1 }
 0x5a4   : > { %9349 = vst [vmem:[%s14180_s7 + $0x118] sm:$0xff] %v9285_v34  ;;  %v8901_v14 = vadd.f32 %v8900_v3, %v8812_v5  ;;  %v8735_v5 = vadd.f32 %v8734_v21, %v8646_v51 }
 0x5a6   : > { %v8971_v62 = vsub.f32 0.0, %v8901_v14 }
 0x5a8   : > { %v11241_v61 = vpop.eup %11240  ;;  %v9076_v26 = vmul.f32 1.442695, %v8971_v62  ;;  %v8650_v41 = vpop.f32.mrf.mxu2 }
 0x5a9   : > { %v11243_v54 = vpop.eup %11242  ;;  %v9161_v2 = vadd.f32 1.0, %v11241_v61  ;;  %v8739_v61 = vpop.f32.mrf.mxu3  ;;  %v8651_v30 = vadd.f32 %v8650_v41, %v14772_v46 }
 0x5aa   : > { %v9287_v37 = vmul.f32 %v11243_v54, %v8896_v8  ;;  %11244 = vpow2.f32 %v9076_v26  ;;  %v8819_v8 = vadd.f32 %v8818_v32, %v8730_v17  ;;  %v8826_v9 = vpop.f32.mrf.mxu0 }
 0x5ab   : > { %11246 = vrcp.f32 %v9161_v2  ;;  %v8902_v57 = vpop.f32.mrf.mxu1 }
 0x5ac   : > { %9351 = vst [vmem:[%s14180_s7 + $0x128] sm:$0xff] %v9287_v37  ;;  %v8903_v44 = vadd.f32 %v8902_v57, %v8814_v24  ;;  %v8738_v24 = vadd.f32 %v8737_v33, %v8649_v7 }
 0x5ae   : > { %v8973_v25 = vsub.f32 0.0, %v8903_v44  ;;  %v8827_v63 = vadd.f32 %v8826_v9, %v8738_v24 }
 0x5b0   : > { %v11245_v36 = vpop.eup %11244  ;;  %v9080_v60 = vmul.f32 1.442695, %v8973_v25 }
 0x5b1   : > { %v11247_v12 = vpop.eup %11246  ;;  %v9163_v19 = vadd.f32 1.0, %v11245_v36  ;;  %v8653_v36 = vpop.f32.mrf.mxu2 }
 0x5b2   : > { %v9289_v22 = vmul.f32 %v11247_v12, %v8898_v23  ;;  %11248 = vpow2.f32 %v9080_v60  ;;  %v8822_v23 = vadd.f32 %v8821_v27, %v8733_v0  ;;  %v8828_v54 = vpop.f32.mrf.mxu0  ;;  %v8742_v12 = vpop.f32.mrf.mxu3  ;;  %v8654_v17 = vadd.f32 %v8653_v36, %v14772_v46 }
 0x5b3   : > { %11250 = vrcp.f32 %v9163_v19  ;;  %v8905_v1 = vpop.f32.mrf.mxu1  ;;  %v8740_v19 = vadd.f32 %v8739_v61, %v8651_v30 }
 0x5b4   : > { %9353 = vst [vmem:[%s14180_s7 + $0x138] sm:$0xff] %v9289_v22  ;;  %v8906_v15 = vadd.f32 %v8905_v1, %v8817_v47 }
 0x5b5   : > { %v8829_v11 = vadd.f32 %v8828_v54, %v8740_v19 }
 0x5b6   : > { %v8975_v31 = vsub.f32 0.0, %v8906_v15 }
 0x5b8   : > { %v11249_v6 = vpop.eup %11248  ;;  %v9084_v56 = vmul.f32 1.442695, %v8975_v31 }
 0x5b9   : > { %v11251_v39 = vpop.eup %11250  ;;  %v9165_v58 = vadd.f32 1.0, %v11249_v6 }
 0x5ba   : > { %v9291_v20 = vmul.f32 %v11251_v39, %v8901_v14  ;;  %11252 = vpow2.f32 %v9084_v56  ;;  %v8824_v14 = vadd.f32 %v8823_v49, %v8735_v5  ;;  %v8831_v1 = vpop.f32.mrf.mxu0  ;;  %v8655_v39 = vpop.f32.mrf.mxu2 }
 0x5bb   : > { %11254 = vrcp.f32 %v9165_v58  ;;  %v8907_v53 = vpop.f32.mrf.mxu1  ;;  %v8743_v58 = vadd.f32 %v8742_v12, %v8654_v17  ;;  %v8744_v49 = vpop.f32.mrf.mxu3 }
 0x5bc   : > { %9355 = vst [vmem:[%s14180_s7 + $0x148] sm:$0xff] %v9291_v20  ;;  %v8908_v10 = vadd.f32 %v8907_v53, %v8819_v8 }
 0x5be   : > { %v8977_v55 = vsub.f32 0.0, %v8908_v10 }
 0x5c0   : > { %v11253_v29 = vpop.eup %11252  ;;  %v9088_v59 = vmul.f32 1.442695, %v8977_v55 }
 0x5c1   : > { %v11255_v42 = vpop.eup %11254  ;;  %v9167_v52 = vadd.f32 1.0, %v11253_v29 }
 0x5c2   : > { %v9293_v40 = vmul.f32 %v11255_v42, %v8903_v44  ;;  %11256 = vpow2.f32 %v9088_v59  ;;  %v8833_v55 = vpop.f32.mrf.mxu0  ;;  %v8656_v59 = vadd.f32 %v8655_v39, %v14772_v46  ;;  %v8658_v33 = vpop.f32.mrf.mxu2 }
 0x5c3   : > { %11258 = vrcp.f32 %v9167_v52  ;;  %v8910_v50 = vpop.f32.mrf.mxu1  ;;  %v8747_v51 = vpop.f32.mrf.mxu3 }
 0x5c4   : > { %9357 = vst [vmem:[%s14180_s7 + $0x158] sm:$0xff] %v9293_v40  ;;  %v8911_v38 = vadd.f32 %v8910_v50, %v8822_v23  ;;  %v8745_v52 = vadd.f32 %v8744_v49, %v8656_v59 }
 0x5c6   : > { %v8979_v4 = vsub.f32 0.0, %v8911_v38 }
 0x5c8   : > { %v11257_v18 = vpop.eup %11256  ;;  %v9092_v34 = vmul.f32 1.442695, %v8979_v4 }
 0x5c9   : > { %v11259_v13 = vpop.eup %11258  ;;  %v9169_v3 = vadd.f32 1.0, %v11257_v18 }
 0x5ca   : > { %v9295_v28 = vmul.f32 %v11259_v13, %v8906_v15  ;;  %11260 = vpow2.f32 %v9092_v34  ;;  %v8836_v5 = vpop.f32.mrf.mxu0  ;;  %v8659_v34 = vadd.f32 %v8658_v33, %v14772_v46  ;;  %v8660_v7 = vpop.f32.mrf.mxu2 }
 0x5cb   : > { %11262 = vrcp.f32 %v9169_v3  ;;  %v8912_v62 = vpop.f32.mrf.mxu1  ;;  %v8661_v24 = vadd.f32 %v8660_v7, %v14772_v46 }
 0x5cc   : > { %9359 = vst [vmem:[%s14180_s7 + $0x168] sm:$0xff] %v9295_v28  ;;  %v8913_v32 = vadd.f32 %v8912_v62, %v8824_v14  ;;  %v8748_v14 = vadd.f32 %v8747_v51, %v8659_v34 }
 0x5ce   : > { %v8981_v26 = vsub.f32 0.0, %v8913_v32 }
 0x5d0   : > { %v11261_v2 = vpop.eup %11260  ;;  %v9096_v37 = vmul.f32 1.442695, %v8981_v26 }
 0x5d1   : > { %v11263_v57 = vpop.eup %11262  ;;  %v9171_v44 = vadd.f32 1.0, %v11261_v2  ;;  %v8749_v2 = vpop.f32.mrf.mxu3 }
 0x5d2   : > { %v9297_v16 = vmul.f32 %v11263_v57, %v8908_v10  ;;  %11264 = vpow2.f32 %v9096_v37  ;;  %v8832_v10 = vadd.f32 %v8831_v1, %v8743_v58  ;;  %v8838_v57 = vpop.f32.mrf.mxu0 }
 0x5d3   : > { %11266 = vrcp.f32 %v9171_v44  ;;  %v8915_v25 = vpop.f32.mrf.mxu1 }
 0x5d4   : > { %9361 = vst [vmem:[%s14180_s7 + $0x178] sm:$0xff] %v9297_v16  ;;  %v8916_v43 = vadd.f32 %v8915_v25, %v8827_v63  ;;  %v8750_v63 = vadd.f32 %v8749_v2, %v8661_v24 }
 0x5d6   : > { %v8983_v60 = vsub.f32 0.0, %v8916_v43  ;;  %v8839_v36 = vadd.f32 %v8838_v57, %v8750_v63 }
 0x5d8   : > { %v11265_v27 = vpop.eup %11264  ;;  %v9100_v47 = vmul.f32 1.442695, %v8983_v60 }
 0x5d9   : > { %v11267_v22 = vpop.eup %11266  ;;  %v9173_v15 = vadd.f32 1.0, %v11265_v27 }
 0x5da   : > { %v9299_v31 = vmul.f32 %v11267_v22, %v8911_v38  ;;  %11268 = vpow2.f32 %v9100_v47  ;;  %v8834_v38 = vadd.f32 %v8833_v55, %v8745_v52 }
 0x5db   : > { %11270 = vrcp.f32 %v9173_v15  ;;  %v8917_v35 = vpop.f32.mrf.mxu1 }
 0x5dc   : > { %9363 = vst [vmem:[%s14180_s7 + $0x188] sm:$0xff] %v9299_v31  ;;  %v8918_v6 = vadd.f32 %v8917_v35, %v8829_v11 }
 0x5de   : > { %v8985_v56 = vsub.f32 0.0, %v8918_v6 }
 0x5e0   : > { %v11269_v21 = vpop.eup %11268  ;;  %v9104_v8 = vmul.f32 1.442695, %v8985_v56 }
 0x5e1   : > { %v11271_v20 = vpop.eup %11270  ;;  %v9175_v53 = vadd.f32 1.0, %v11269_v21 }
 0x5e2   : > { %v9301_v48 = vmul.f32 %v11271_v20, %v8913_v32  ;;  %11272 = vpow2.f32 %v9104_v8  ;;  %v8837_v32 = vadd.f32 %v8836_v5, %v8748_v14 }
 0x5e3   : > { %11274 = vrcp.f32 %v9175_v53  ;;  %v8920_v29 = vpop.f32.mrf.mxu1 }
 0x5e4   : > { %9365 = vst [vmem:[%s14180_s7 + $0x198] sm:$0xff] %v9301_v48  ;;  %v8921_v0 = vadd.f32 %v8920_v29, %v8832_v10 }
 0x5e6   : > { %v8987_v42 = vsub.f32 0.0, %v8921_v0 }
 0x5e8   : > { %v11273_v45 = vpop.eup %11272  ;;  %v9108_v23 = vmul.f32 1.442695, %v8987_v42 }
 0x5e9   : > { %v11275_v40 = vpop.eup %11274  ;;  %v9177_v50 = vadd.f32 1.0, %v11273_v45 }
 0x5ea   : > { %v9303_v9 = vmul.f32 %v11275_v40, %v8916_v43  ;;  %11276 = vpow2.f32 %v9108_v23 }
 0x5eb   : > { %11278 = vrcp.f32 %v9177_v50  ;;  %v8922_v4 = vpop.f32.mrf.mxu1 }
 0x5ec   : > { %9367 = vst [vmem:[%s14180_s7 + $0x1a8] sm:$0xff] %v9303_v9  ;;  %v8923_v18 = vadd.f32 %v8922_v4, %v8834_v38 }
 0x5ee   : > { %v8989_v13 = vsub.f32 0.0, %v8923_v18 }
 0x5f0   : > { %v11277_v3 = vpop.eup %11276  ;;  %v9112_v28 = vmul.f32 1.442695, %v8989_v13 }
 0x5f1   : > { %v11279_v41 = vpop.eup %11278  ;;  %v9179_v62 = vadd.f32 1.0, %v11277_v3 }
 0x5f2   : > { %v9305_v61 = vmul.f32 %v11279_v41, %v8918_v6  ;;  %11280 = vpow2.f32 %v9112_v28 }
 0x5f3   : > { %11282 = vrcp.f32 %v9179_v62  ;;  %v8925_v26 = vpop.f32.mrf.mxu1 }
 0x5f4   : > { %9369 = vst [vmem:[%s14180_s7 + $0x1b8] sm:$0xff] %v9305_v61  ;;  %v8926_v54 = vadd.f32 %v8925_v26, %v8837_v32 }
 0x5f6   : > { %v8991_v37 = vsub.f32 0.0, %v8926_v54 }
 0x5f8   : > { %v11281_v44 = vpop.eup %11280  ;;  %v9116_v16 = vmul.f32 1.442695, %v8991_v37 }
 0x5f9   : > { %v11283_v25 = vpop.eup %11282  ;;  %v9181_v43 = vadd.f32 1.0, %v11281_v44 }
 0x5fa   : > { %v9307_v30 = vmul.f32 %v11283_v25, %v8921_v0  ;;  %11284 = vpow2.f32 %v9116_v16 }
 0x5fb   : > { %11286 = vrcp.f32 %v9181_v43  ;;  %v8927_v60 = vpop.f32.mrf.mxu1 }
 0x5fc   : > { %9371 = vst [vmem:[%s14180_s7 + $0x1c8] sm:$0xff] %v9307_v30  ;;  %v8928_v12 = vadd.f32 %v8927_v60, %v8839_v36 }
 0x5fe   : > { %v8993_v27 = vsub.f32 0.0, %v8928_v12 }
 0x600   : > { %v11285_v19 = vpop.eup %11284  ;;  %v9120_v46 = vmul.f32 1.442695, %v8993_v27 }
 0x601   : > { %v11287_v47 = vpop.eup %11286  ;;  %v9183_v22 = vadd.f32 1.0, %v11285_v19 }
 0x602   : > { %v9309_v1 = vmul.f32 %v11287_v47, %v8923_v18  ;;  %11288 = vpow2.f32 %v9120_v46 }
 0x603   : > { %11290 = vrcp.f32 %v9183_v22 }
 0x604   : > { %9373 = vst [vmem:[%s14180_s7 + $0x1d8] sm:$0xff] %v9309_v1 }
 0x608   : > { %v11289_v15 = vpop.eup %11288 }
 0x609   : > { %v11291_v11 = vpop.eup %11290  ;;  %v9185_v31 = vadd.f32 1.0, %v11289_v15 }
 0x60a   : > { %v9311_v35 = vmul.f32 %v11291_v11, %v8926_v54 }
 0x60b   : > { %11292 = vrcp.f32 %v9185_v31 }
 0x60c   : > { %9375 = vst [vmem:[%s14180_s7 + $0x1e8] sm:$0xff] %v9311_v35 }
 0x611   : > { %v11293_v6 = vpop.eup %11292 }
 0x612   : > { %v9313_v17 = vmul.f32 %v11293_v6, %v8928_v12 }
 0x614   : > { %9377 = vst [vmem:[%s14180_s7 + $0x1f8] sm:$0xff] %v9313_v17 }
 0x615   : > { %11415 = shalt.err (!%p11412_p10)
}
 0x616   : > { %s11469_s10 = smov 256   ;;  %s11470_s7 = smov 16  }
 0x617   : > { %10843 = dma.vmem_to_hbm [thread:$0]  (%p11570_p5), %s9392_s24, 8192, %s9394_s29, %s9379_s11, %s11469_s10, %s11469_s10, %s11470_s7  }
 0x618 PF: > { %s9408_s28 = sand.u32 1, %s11446_s18   ;;  %p15652_p12 = scmp.ge.s32.totalorder %s11458_s21, 2 }
 0x619   : > { %s9409_s9 = scalar_lea.sflag [#allocation6], %s9408_s28 }
 0x61a   : > { %p10857_p13 = pnand %p15652_p12, %p11536_p6 }
 0x61c   : > { %p10858_p0 = pneg %p10857_p13 }
 0x61e   : > { %11441 = dma.done.wait (%p10858_p0), %s9409_s9, 8192  }
 0x61f   : > { %11443 = vsyncadd (%p10858_p0), %s9409_s9, 4294959104  ;;  %p19_p3 = scmp.ge.s32.totalorder %s11557_s16, 4   ;;  %s15653_s18 = smov %s11450_s19 }
 0x620   : > { %s15654_s19 = smov %s11454_s20  ;;  %s15655_s20 = smov %s11566_s26 }
 0x621   : > { %s15656_s21 = smov %s11557_s16  ;;  %21 = sbr.rel (!%p19_p3) target bundleno = 6 (0x6), region = 97 }
 0x626   :  { %9415 = vsyncpa [#allocation5], 1 }
 0x627   :  { %9417 = vsyncpa [#allocation5 + $0x1], 1 }
 0x628   :  { %9418 = vsyncpa [#allocation8], 1 }
 0x629   :  { %9419 = vsyncpa [#allocation6], 1 }
 0x62a   :  { %9421 = vsyncpa [#allocation6 + $0x1], 1 }

</bundles_post_ra>
